<compile_context>
chip_gen: v5e
topology: v5e:2x2
jax: 0.10.0
libtpu: 0.0.40
codegen_flags: <defaults>
</compile_context>

<pallas_src>
import functools

import numpy as np

import jax
import jax.numpy as jnp
from jax.experimental import pallas as pl
from jax.experimental.pallas import tpu as pltpu


# ----------------------------------------------------------------------------
# Fused forward kernel: one grid step == one image
# ----------------------------------------------------------------------------
def _hnet_kernel(x_ref, t1_ref, b1_ref, t2_ref, b2_ref, wf_ref, bf_ref, o_ref,
                 *, num_classes):
    x = x_ref[0]                                             # (32, 96) bf16

    # conv1 (5x5, 3 -> 16) as 5 banded MXU matmuls over the (W*Cin) lane axis.
    acc1 = jnp.dot(x[0:28, :], t1_ref[0], preferred_element_type=jnp.float32)
    for i in range(1, 5):
        acc1 = acc1 + jnp.dot(x[i:i + 28, :], t1_ref[i],
                              preferred_element_type=jnp.float32)
    y1 = jnp.maximum(acc1 + b1_ref[...], 0.0).astype(jnp.bfloat16)   # (28, 448)

    # conv2 (3x3, 16 -> 32)
    acc2 = jnp.dot(y1[0:26, :], t2_ref[0], preferred_element_type=jnp.float32)
    for i in range(1, 3):
        acc2 = acc2 + jnp.dot(y1[i:i + 26, :], t2_ref[i],
                              preferred_element_type=jnp.float32)
    y2 = jnp.maximum(acc2 + b2_ref[...], 0.0)                        # (26, 832) f32

    # dropout(p=0.5): identity in inference mode.
    # TODO(synk): training-mode dropout would mask y2 with
    # pltpu.prng_seed / pltpu.prng_random_bits and scale by 1/(1-p).

    # fc1: y2 (26, 832) already is the channels-last flatten of the feature
    # map, so contract it per class on the VPU/XLU (FLOPs are negligible) --
    # this avoids any (676, 32) -> (1, 21632) relayout.
    cols = []
    for c in range(num_classes):
        wc = wf_ref[c].astype(jnp.float32)                           # (26, 832)
        cols.append(jnp.sum(y2 * wc, axis=1, keepdims=True))         # (26, 1)
    s = jnp.concatenate(cols, axis=1)                                # (26, nc)
    logits = jnp.sum(s, axis=0, keepdims=True) + bf_ref[...]         # (1, nc)
    o_ref[0] = logits


def hnet_forward(params, x_nchw, *, num_classes):
    n = x_nchw.shape[0]
    # NCHW -> (N, H, W*C) row layout, bf16.  Only XLA glue in the whole forward.
    xr = jnp.transpose(x_nchw, (0, 2, 3, 1)).reshape(n, 32, 32 * 3)
    xr = xr.astype(jnp.bfloat16)

    out = pl.pallas_call(
        functools.partial(_hnet_kernel, num_classes=num_classes),
        out_shape=jax.ShapeDtypeStruct((n, 1, num_classes), jnp.float32),
        grid_spec=pltpu.PrefetchScalarGridSpec(
            num_scalar_prefetch=0,
            grid=(n,),
            in_specs=[
                pl.BlockSpec((1, 32, 96), lambda b: (b, 0, 0)),            # x
                pl.BlockSpec((5, 96, 448), lambda b: (0, 0, 0)),           # t1
                pl.BlockSpec((1, 448), lambda b: (0, 0)),                  # b1
                pl.BlockSpec((3, 448, 832), lambda b: (0, 0, 0)),          # t2
                pl.BlockSpec((1, 832), lambda b: (0, 0)),                  # b2
                pl.BlockSpec((num_classes, 26, 832), lambda b: (0, 0, 0)),  # wf
                pl.BlockSpec((1, num_classes), lambda b: (0, 0)),          # bf
            ],
            out_specs=pl.BlockSpec((1, 1, num_classes), lambda b: (b, 0, 0)),
        ),
        compiler_params=pltpu.CompilerParams(
            dimension_semantics=("parallel",),
            vmem_limit_bytes=32 * 1024 * 1024,
        ),
    )(xr, params["t1"], params["b1"], params["t2"], params["b2"],
      params["wf"], params["bf"])
    return out[:, 0, :]


# ----------------------------------------------------------------------------
# Parameter prep (host-side, numpy): banded conv weights + fc1 re-layout
# ----------------------------------------------------------------------------
def _toeplitz_bands(w_oihw, w_in):
    """w: (Cout, Cin, KH, KW) -> (KH, W_in*Cin, OW*Cout) banded matrices with
    T[i, (ow+j)*Cin + ci, ow*Cout + co] = w[co, ci, i, j]."""
    cout, cin, kh, kw = w_oihw.shape
    ow_n = w_in - kw + 1
    t = np.zeros((kh, w_in * cin, ow_n * cout), np.float32)
    for i in range(kh):
        for j in range(kw):
            blk = w_oihw[:, :, i, j].T                      # (Cin, Cout)
            for ow in range(ow_n):
                r0 = (ow + j) * cin
                c0 = ow * cout
                t[i, r0:r0 + cin, c0:c0 + cout] = blk
    return t


def prepare_params(raw, num_classes):
    c1 = np.asarray(raw["conv1_w"], np.float32)             # (16, 3, 5, 5)
    c2 = np.asarray(raw["conv2_w"], np.float32)             # (32, 16, 3, 3)
    fw = np.asarray(raw["fc1_w"], np.float32)               # (nc, 21632)

    t1 = _toeplitz_bands(c1, 32)                            # (5, 96, 448)
    t2 = _toeplitz_bands(c2, 28)                            # (3, 448, 832)
    b1 = np.tile(np.asarray(raw["conv1_b"], np.float32), 28)[None, :]   # (1, 448)
    b2 = np.tile(np.asarray(raw["conv2_b"], np.float32), 26)[None, :]   # (1, 832)

    # fc1 columns are torch NCHW-flat (co*676 + oh*26 + ow); regroup them to
    # the kernel's (oh, ow*32 + co) activation layout.
    wf = (fw.reshape(num_classes, 32, 26, 26)
            .transpose(0, 2, 3, 1)
            .reshape(num_classes, 26, 26 * 32))             # (nc, 26, 832)
    bf = np.asarray(raw["fc1_b"], np.float32)[None, :]      # (1, nc)

    return {
        "t1": jnp.asarray(t1, jnp.bfloat16),
        "b1": jnp.asarray(b1, jnp.float32),
        "t2": jnp.asarray(t2, jnp.bfloat16),
        "b2": jnp.asarray(b2, jnp.float32),
        "wf": jnp.asarray(wf, jnp.bfloat16),
        "bf": jnp.asarray(bf, jnp.float32),
    }


# ----------------------------------------------------------------------------
# Deterministic parameter init (PyTorch-style uniform(-1/sqrt(fan_in), +))
# ----------------------------------------------------------------------------
def init_params(key, num_classes):
    ks = jax.random.split(key, 6)

    def u(k, shape, fan_in):
        bound = fan_in ** -0.5
        return jax.random.uniform(k, shape, jnp.float32, -bound, bound)

    return {
        "conv1_w": u(ks[0], (16, 3, 5, 5), 3 * 5 * 5),
        "conv1_b": u(ks[1], (16,), 3 * 5 * 5),
        "conv2_w": u(ks[2], (32, 16, 3, 3), 16 * 3 * 3),
        "conv2_b": u(ks[3], (32,), 16 * 3 * 3),
        "fc1_w": u(ks[4], (num_classes, 26 * 26 * 32), 26 * 26 * 32),
        "fc1_b": u(ks[5], (num_classes,), 26 * 26 * 32),
    }


# ----------------------------------------------------------------------------
# Pure-JAX f32 reference (torch layout) for the correctness check
# ----------------------------------------------------------------------------
def reference_forward(raw, x):
    y = jax.lax.conv_general_dilated(
        x, raw["conv1_w"], (1, 1), "VALID",
        dimension_numbers=("NCHW", "OIHW", "NCHW"))
    y = jnp.maximum(y + raw["conv1_b"][None, :, None, None], 0.0)
    y = jax.lax.conv_general_dilated(
        y, raw["conv2_w"], (1, 1), "VALID",
        dimension_numbers=("NCHW", "OIHW", "NCHW"))
    y = jnp.maximum(y + raw["conv2_b"][None, :, None, None], 0.0)
    y = y.reshape(y.shape[0], -1)
    return y @ raw["fc1_w"].T + raw["fc1_b"]


if __name__ == "__main__":
    num_classes = 10
    key = jax.random.PRNGKey(0)
    kp, kx = jax.random.split(key)
    raw = init_params(kp, num_classes)
    params = prepare_params(raw, num_classes)

    # Input must be 32x32 so that 26*26*32 matches fc1 after the two VALID convs.
    x = jax.random.normal(kx, (2, 3, 32, 32), jnp.float32)

    fwd = jax.jit(functools.partial(hnet_forward, num_classes=num_classes))
    out = jax.block_until_ready(fwd(params, x))
    ref = jax.block_until_ready(reference_forward(raw, x))

    assert out.shape == (2, num_classes), out.shape
    # bf16 MXU operands / bf16 fc1 weights (f32 accumulation) vs f32 reference.
    max_err = float(jnp.max(jnp.abs(out - ref)))
    assert jnp.allclose(out, ref, rtol=5e-2, atol=5e-2), max_err

    print("KERNEL_OK")
</pallas_src>

<mosaic_0001>
module attributes {stable_mosaic.version = 11 : i64} {
  func.func @_hnet_kernel(%arg0: i32, %arg1: memref<1x32x96xbf16, #tpu.memory_space<vmem>>, %arg2: memref<5x96x448xbf16, #tpu.memory_space<vmem>>, %arg3: memref<1x448xf32, #tpu.memory_space<vmem>>, %arg4: memref<3x448x832xbf16, #tpu.memory_space<vmem>>, %arg5: memref<1x832xf32, #tpu.memory_space<vmem>>, %arg6: memref<10x26x832xbf16, #tpu.memory_space<vmem>>, %arg7: memref<1x10xf32, #tpu.memory_space<vmem>>, %arg8: memref<1x1x10xf32, #tpu.memory_space<vmem>>) attributes {dimension_semantics = [#tpu.dimension_semantics<parallel>], iteration_bounds = array<i64: 2>, scalar_prefetch = 0 : i64, scratch_operands = 0 : i64, tpu.core_type = #tpu.core_type<tc>, window_params = [{transform_indices = @transform_0, window_bounds = array<i64: 1, 32, 96>}, {pipeline_mode = #tpu.pipeline_mode<synchronous>, transform_indices = @transform_1, window_bounds = array<i64: 5, 96, 448>}, {pipeline_mode = #tpu.pipeline_mode<synchronous>, transform_indices = @transform_2, window_bounds = array<i64: 1, 448>}, {pipeline_mode = #tpu.pipeline_mode<synchronous>, transform_indices = @transform_3, window_bounds = array<i64: 3, 448, 832>}, {pipeline_mode = #tpu.pipeline_mode<synchronous>, transform_indices = @transform_4, window_bounds = array<i64: 1, 832>}, {pipeline_mode = #tpu.pipeline_mode<synchronous>, transform_indices = @transform_5, window_bounds = array<i64: 10, 26, 832>}, {pipeline_mode = #tpu.pipeline_mode<synchronous>, transform_indices = @transform_6, window_bounds = array<i64: 1, 10>}, {transform_indices = @transform_7, window_bounds = array<i64: 1, 1, 10>}]} {
    %c0 = arith.constant 0 : index
    %c0_0 = arith.constant 0 : index
    %c0_1 = arith.constant 0 : index
    %0 = vector.load %arg1[%c0, %c0_0, %c0_1] : memref<1x32x96xbf16, #tpu.memory_space<vmem>>, vector<1x32x96xbf16>
    %1 = vector.shape_cast %0 : vector<1x32x96xbf16> to vector<32x96xbf16>
    %2 = vector.extract_strided_slice %1 {offsets = [0, 0], sizes = [28, 96], strides = [1, 1]} : vector<32x96xbf16> to vector<28x96xbf16>
    %c0_2 = arith.constant 0 : index
    %c0_3 = arith.constant 0 : index
    %c0_4 = arith.constant 0 : index
    %3 = vector.load %arg2[%c0_2, %c0_3, %c0_4] : memref<5x96x448xbf16, #tpu.memory_space<vmem>>, vector<1x96x448xbf16>
    %4 = vector.shape_cast %3 : vector<1x96x448xbf16> to vector<96x448xbf16>
    %cst = arith.constant dense<0.000000e+00> : vector<28x448xf32>
    %5 = tpu.matmul %2, %4, %cst {dimension_numbers = #tpu.dot_dimension_numbers<[1], [0], [0], [1], [0, 0, 1, 1], [], []>} : vector<28x96xbf16>, vector<96x448xbf16>, vector<28x448xf32> -> vector<28x448xf32>
    %6 = vector.extract_strided_slice %1 {offsets = [1, 0], sizes = [28, 96], strides = [1, 1]} : vector<32x96xbf16> to vector<28x96xbf16>
    %c1 = arith.constant 1 : index
    %c0_5 = arith.constant 0 : index
    %c0_6 = arith.constant 0 : index
    %7 = vector.load %arg2[%c1, %c0_5, %c0_6] : memref<5x96x448xbf16, #tpu.memory_space<vmem>>, vector<1x96x448xbf16>
    %8 = vector.shape_cast %7 : vector<1x96x448xbf16> to vector<96x448xbf16>
    %cst_7 = arith.constant dense<0.000000e+00> : vector<28x448xf32>
    %9 = tpu.matmul %6, %8, %cst_7 {dimension_numbers = #tpu.dot_dimension_numbers<[1], [0], [0], [1], [0, 0, 1, 1], [], []>} : vector<28x96xbf16>, vector<96x448xbf16>, vector<28x448xf32> -> vector<28x448xf32>
    %10 = arith.addf %5, %9 : vector<28x448xf32>
    %11 = vector.extract_strided_slice %1 {offsets = [2, 0], sizes = [28, 96], strides = [1, 1]} : vector<32x96xbf16> to vector<28x96xbf16>
    %c2 = arith.constant 2 : index
    %c0_8 = arith.constant 0 : index
    %c0_9 = arith.constant 0 : index
    %12 = vector.load %arg2[%c2, %c0_8, %c0_9] : memref<5x96x448xbf16, #tpu.memory_space<vmem>>, vector<1x96x448xbf16>
    %13 = vector.shape_cast %12 : vector<1x96x448xbf16> to vector<96x448xbf16>
    %cst_10 = arith.constant dense<0.000000e+00> : vector<28x448xf32>
    %14 = tpu.matmul %11, %13, %cst_10 {dimension_numbers = #tpu.dot_dimension_numbers<[1], [0], [0], [1], [0, 0, 1, 1], [], []>} : vector<28x96xbf16>, vector<96x448xbf16>, vector<28x448xf32> -> vector<28x448xf32>
    %15 = arith.addf %10, %14 : vector<28x448xf32>
    %16 = vector.extract_strided_slice %1 {offsets = [3, 0], sizes = [28, 96], strides = [1, 1]} : vector<32x96xbf16> to vector<28x96xbf16>
    %c3 = arith.constant 3 : index
    %c0_11 = arith.constant 0 : index
    %c0_12 = arith.constant 0 : index
    %17 = vector.load %arg2[%c3, %c0_11, %c0_12] : memref<5x96x448xbf16, #tpu.memory_space<vmem>>, vector<1x96x448xbf16>
    %18 = vector.shape_cast %17 : vector<1x96x448xbf16> to vector<96x448xbf16>
    %cst_13 = arith.constant dense<0.000000e+00> : vector<28x448xf32>
    %19 = tpu.matmul %16, %18, %cst_13 {dimension_numbers = #tpu.dot_dimension_numbers<[1], [0], [0], [1], [0, 0, 1, 1], [], []>} : vector<28x96xbf16>, vector<96x448xbf16>, vector<28x448xf32> -> vector<28x448xf32>
    %20 = arith.addf %15, %19 : vector<28x448xf32>
    %21 = vector.extract_strided_slice %1 {offsets = [4, 0], sizes = [28, 96], strides = [1, 1]} : vector<32x96xbf16> to vector<28x96xbf16>
    %c4 = arith.constant 4 : index
    %c0_14 = arith.constant 0 : index
    %c0_15 = arith.constant 0 : index
    %22 = vector.load %arg2[%c4, %c0_14, %c0_15] : memref<5x96x448xbf16, #tpu.memory_space<vmem>>, vector<1x96x448xbf16>
    %23 = vector.shape_cast %22 : vector<1x96x448xbf16> to vector<96x448xbf16>
    %cst_16 = arith.constant dense<0.000000e+00> : vector<28x448xf32>
    %24 = tpu.matmul %21, %23, %cst_16 {dimension_numbers = #tpu.dot_dimension_numbers<[1], [0], [0], [1], [0, 0, 1, 1], [], []>} : vector<28x96xbf16>, vector<96x448xbf16>, vector<28x448xf32> -> vector<28x448xf32>
    %25 = arith.addf %20, %24 : vector<28x448xf32>
    %c0_17 = arith.constant 0 : index
    %c0_18 = arith.constant 0 : index
    %26 = vector.load %arg3[%c0_17, %c0_18] : memref<1x448xf32, #tpu.memory_space<vmem>>, vector<1x448xf32>
    %27 = vector.broadcast %26 : vector<1x448xf32> to vector<28x448xf32>
    %28 = arith.addf %25, %27 : vector<28x448xf32>
    %cst_19 = arith.constant 0.000000e+00 : f32
    %29 = vector.broadcast %cst_19 : f32 to vector<28x448xf32>
    %30 = arith.maximumf %28, %29 : vector<28x448xf32>
    %31 = arith.truncf %30 : vector<28x448xf32> to vector<28x448xbf16>
    %32 = vector.extract_strided_slice %31 {offsets = [0, 0], sizes = [26, 448], strides = [1, 1]} : vector<28x448xbf16> to vector<26x448xbf16>
    %c0_20 = arith.constant 0 : index
    %c0_21 = arith.constant 0 : index
    %c0_22 = arith.constant 0 : index
    %33 = vector.load %arg4[%c0_20, %c0_21, %c0_22] : memref<3x448x832xbf16, #tpu.memory_space<vmem>>, vector<1x448x832xbf16>
    %34 = vector.shape_cast %33 : vector<1x448x832xbf16> to vector<448x832xbf16>
    %cst_23 = arith.constant dense<0.000000e+00> : vector<26x832xf32>
    %35 = tpu.matmul %32, %34, %cst_23 {dimension_numbers = #tpu.dot_dimension_numbers<[1], [0], [0], [1], [0, 0, 1, 1], [], []>} : vector<26x448xbf16>, vector<448x832xbf16>, vector<26x832xf32> -> vector<26x832xf32>
    %36 = vector.extract_strided_slice %31 {offsets = [1, 0], sizes = [26, 448], strides = [1, 1]} : vector<28x448xbf16> to vector<26x448xbf16>
    %c1_24 = arith.constant 1 : index
    %c0_25 = arith.constant 0 : index
    %c0_26 = arith.constant 0 : index
    %37 = vector.load %arg4[%c1_24, %c0_25, %c0_26] : memref<3x448x832xbf16, #tpu.memory_space<vmem>>, vector<1x448x832xbf16>
    %38 = vector.shape_cast %37 : vector<1x448x832xbf16> to vector<448x832xbf16>
    %cst_27 = arith.constant dense<0.000000e+00> : vector<26x832xf32>
    %39 = tpu.matmul %36, %38, %cst_27 {dimension_numbers = #tpu.dot_dimension_numbers<[1], [0], [0], [1], [0, 0, 1, 1], [], []>} : vector<26x448xbf16>, vector<448x832xbf16>, vector<26x832xf32> -> vector<26x832xf32>
    %40 = arith.addf %35, %39 : vector<26x832xf32>
    %41 = vector.extract_strided_slice %31 {offsets = [2, 0], sizes = [26, 448], strides = [1, 1]} : vector<28x448xbf16> to vector<26x448xbf16>
    %c2_28 = arith.constant 2 : index
    %c0_29 = arith.constant 0 : index
    %c0_30 = arith.constant 0 : index
    %42 = vector.load %arg4[%c2_28, %c0_29, %c0_30] : memref<3x448x832xbf16, #tpu.memory_space<vmem>>, vector<1x448x832xbf16>
    %43 = vector.shape_cast %42 : vector<1x448x832xbf16> to vector<448x832xbf16>
    %cst_31 = arith.constant dense<0.000000e+00> : vector<26x832xf32>
    %44 = tpu.matmul %41, %43, %cst_31 {dimension_numbers = #tpu.dot_dimension_numbers<[1], [0], [0], [1], [0, 0, 1, 1], [], []>} : vector<26x448xbf16>, vector<448x832xbf16>, vector<26x832xf32> -> vector<26x832xf32>
    %45 = arith.addf %40, %44 : vector<26x832xf32>
    %c0_32 = arith.constant 0 : index
    %c0_33 = arith.constant 0 : index
    %46 = vector.load %arg5[%c0_32, %c0_33] : memref<1x832xf32, #tpu.memory_space<vmem>>, vector<1x832xf32>
    %47 = vector.broadcast %46 : vector<1x832xf32> to vector<26x832xf32>
    %48 = arith.addf %45, %47 : vector<26x832xf32>
    %cst_34 = arith.constant 0.000000e+00 : f32
    %49 = vector.broadcast %cst_34 : f32 to vector<26x832xf32>
    %50 = arith.maximumf %48, %49 : vector<26x832xf32>
    %c0_35 = arith.constant 0 : index
    %c0_36 = arith.constant 0 : index
    %c0_37 = arith.constant 0 : index
    %51 = vector.load %arg6[%c0_35, %c0_36, %c0_37] : memref<10x26x832xbf16, #tpu.memory_space<vmem>>, vector<1x26x832xbf16>
    %52 = vector.shape_cast %51 : vector<1x26x832xbf16> to vector<26x832xbf16>
    %53 = arith.extf %52 : vector<26x832xbf16> to vector<26x832xf32>
    %54 = arith.mulf %50, %53 : vector<26x832xf32>
    %cst_38 = arith.constant dense<0.000000e+00> : vector<26xf32>
    %55 = vector.multi_reduction <add>, %54, %cst_38 [1] : vector<26x832xf32> to vector<26xf32>
    %56 = vector.shape_cast %55 : vector<26xf32> to vector<26x1xf32>
    %c1_39 = arith.constant 1 : index
    %c0_40 = arith.constant 0 : index
    %c0_41 = arith.constant 0 : index
    %57 = vector.load %arg6[%c1_39, %c0_40, %c0_41] : memref<10x26x832xbf16, #tpu.memory_space<vmem>>, vector<1x26x832xbf16>
    %58 = vector.shape_cast %57 : vector<1x26x832xbf16> to vector<26x832xbf16>
    %59 = arith.extf %58 : vector<26x832xbf16> to vector<26x832xf32>
    %60 = arith.mulf %50, %59 : vector<26x832xf32>
    %cst_42 = arith.constant dense<0.000000e+00> : vector<26xf32>
    %61 = vector.multi_reduction <add>, %60, %cst_42 [1] : vector<26x832xf32> to vector<26xf32>
    %62 = vector.shape_cast %61 : vector<26xf32> to vector<26x1xf32>
    %c2_43 = arith.constant 2 : index
    %c0_44 = arith.constant 0 : index
    %c0_45 = arith.constant 0 : index
    %63 = vector.load %arg6[%c2_43, %c0_44, %c0_45] : memref<10x26x832xbf16, #tpu.memory_space<vmem>>, vector<1x26x832xbf16>
    %64 = vector.shape_cast %63 : vector<1x26x832xbf16> to vector<26x832xbf16>
    %65 = arith.extf %64 : vector<26x832xbf16> to vector<26x832xf32>
    %66 = arith.mulf %50, %65 : vector<26x832xf32>
    %cst_46 = arith.constant dense<0.000000e+00> : vector<26xf32>
    %67 = vector.multi_reduction <add>, %66, %cst_46 [1] : vector<26x832xf32> to vector<26xf32>
    %68 = vector.shape_cast %67 : vector<26xf32> to vector<26x1xf32>
    %c3_47 = arith.constant 3 : index
    %c0_48 = arith.constant 0 : index
    %c0_49 = arith.constant 0 : index
    %69 = vector.load %arg6[%c3_47, %c0_48, %c0_49] : memref<10x26x832xbf16, #tpu.memory_space<vmem>>, vector<1x26x832xbf16>
    %70 = vector.shape_cast %69 : vector<1x26x832xbf16> to vector<26x832xbf16>
    %71 = arith.extf %70 : vector<26x832xbf16> to vector<26x832xf32>
    %72 = arith.mulf %50, %71 : vector<26x832xf32>
    %cst_50 = arith.constant dense<0.000000e+00> : vector<26xf32>
    %73 = vector.multi_reduction <add>, %72, %cst_50 [1] : vector<26x832xf32> to vector<26xf32>
    %74 = vector.shape_cast %73 : vector<26xf32> to vector<26x1xf32>
    %c4_51 = arith.constant 4 : index
    %c0_52 = arith.constant 0 : index
    %c0_53 = arith.constant 0 : index
    %75 = vector.load %arg6[%c4_51, %c0_52, %c0_53] : memref<10x26x832xbf16, #tpu.memory_space<vmem>>, vector<1x26x832xbf16>
    %76 = vector.shape_cast %75 : vector<1x26x832xbf16> to vector<26x832xbf16>
    %77 = arith.extf %76 : vector<26x832xbf16> to vector<26x832xf32>
    %78 = arith.mulf %50, %77 : vector<26x832xf32>
    %cst_54 = arith.constant dense<0.000000e+00> : vector<26xf32>
    %79 = vector.multi_reduction <add>, %78, %cst_54 [1] : vector<26x832xf32> to vector<26xf32>
    %80 = vector.shape_cast %79 : vector<26xf32> to vector<26x1xf32>
    %c5 = arith.constant 5 : index
    %c0_55 = arith.constant 0 : index
    %c0_56 = arith.constant 0 : index
    %81 = vector.load %arg6[%c5, %c0_55, %c0_56] : memref<10x26x832xbf16, #tpu.memory_space<vmem>>, vector<1x26x832xbf16>
    %82 = vector.shape_cast %81 : vector<1x26x832xbf16> to vector<26x832xbf16>
    %83 = arith.extf %82 : vector<26x832xbf16> to vector<26x832xf32>
    %84 = arith.mulf %50, %83 : vector<26x832xf32>
    %cst_57 = arith.constant dense<0.000000e+00> : vector<26xf32>
    %85 = vector.multi_reduction <add>, %84, %cst_57 [1] : vector<26x832xf32> to vector<26xf32>
    %86 = vector.shape_cast %85 : vector<26xf32> to vector<26x1xf32>
    %c6 = arith.constant 6 : index
    %c0_58 = arith.constant 0 : index
    %c0_59 = arith.constant 0 : index
    %87 = vector.load %arg6[%c6, %c0_58, %c0_59] : memref<10x26x832xbf16, #tpu.memory_space<vmem>>, vector<1x26x832xbf16>
    %88 = vector.shape_cast %87 : vector<1x26x832xbf16> to vector<26x832xbf16>
    %89 = arith.extf %88 : vector<26x832xbf16> to vector<26x832xf32>
    %90 = arith.mulf %50, %89 : vector<26x832xf32>
    %cst_60 = arith.constant dense<0.000000e+00> : vector<26xf32>
    %91 = vector.multi_reduction <add>, %90, %cst_60 [1] : vector<26x832xf32> to vector<26xf32>
    %92 = vector.shape_cast %91 : vector<26xf32> to vector<26x1xf32>
    %c7 = arith.constant 7 : index
    %c0_61 = arith.constant 0 : index
    %c0_62 = arith.constant 0 : index
    %93 = vector.load %arg6[%c7, %c0_61, %c0_62] : memref<10x26x832xbf16, #tpu.memory_space<vmem>>, vector<1x26x832xbf16>
    %94 = vector.shape_cast %93 : vector<1x26x832xbf16> to vector<26x832xbf16>
    %95 = arith.extf %94 : vector<26x832xbf16> to vector<26x832xf32>
    %96 = arith.mulf %50, %95 : vector<26x832xf32>
    %cst_63 = arith.constant dense<0.000000e+00> : vector<26xf32>
    %97 = vector.multi_reduction <add>, %96, %cst_63 [1] : vector<26x832xf32> to vector<26xf32>
    %98 = vector.shape_cast %97 : vector<26xf32> to vector<26x1xf32>
    %c8 = arith.constant 8 : index
    %c0_64 = arith.constant 0 : index
    %c0_65 = arith.constant 0 : index
    %99 = vector.load %arg6[%c8, %c0_64, %c0_65] : memref<10x26x832xbf16, #tpu.memory_space<vmem>>, vector<1x26x832xbf16>
    %100 = vector.shape_cast %99 : vector<1x26x832xbf16> to vector<26x832xbf16>
    %101 = arith.extf %100 : vector<26x832xbf16> to vector<26x832xf32>
    %102 = arith.mulf %50, %101 : vector<26x832xf32>
    %cst_66 = arith.constant dense<0.000000e+00> : vector<26xf32>
    %103 = vector.multi_reduction <add>, %102, %cst_66 [1] : vector<26x832xf32> to vector<26xf32>
    %104 = vector.shape_cast %103 : vector<26xf32> to vector<26x1xf32>
    %c9 = arith.constant 9 : index
    %c0_67 = arith.constant 0 : index
    %c0_68 = arith.constant 0 : index
    %105 = vector.load %arg6[%c9, %c0_67, %c0_68] : memref<10x26x832xbf16, #tpu.memory_space<vmem>>, vector<1x26x832xbf16>
    %106 = vector.shape_cast %105 : vector<1x26x832xbf16> to vector<26x832xbf16>
    %107 = arith.extf %106 : vector<26x832xbf16> to vector<26x832xf32>
    %108 = arith.mulf %50, %107 : vector<26x832xf32>
    %cst_69 = arith.constant dense<0.000000e+00> : vector<26xf32>
    %109 = vector.multi_reduction <add>, %108, %cst_69 [1] : vector<26x832xf32> to vector<26xf32>
    %110 = vector.shape_cast %109 : vector<26xf32> to vector<26x1xf32>
    %111 = tpu.concatenate %56, %62, %68, %74, %80, %86, %92, %98, %104, %110 in 1 : vector<26x1xf32>, vector<26x1xf32>, vector<26x1xf32>, vector<26x1xf32>, vector<26x1xf32>, vector<26x1xf32>, vector<26x1xf32>, vector<26x1xf32>, vector<26x1xf32>, vector<26x1xf32> -> vector<26x10xf32>
    %cst_70 = arith.constant dense<0.000000e+00> : vector<10xf32>
    %112 = vector.multi_reduction <add>, %111, %cst_70 [0] : vector<26x10xf32> to vector<10xf32>
    %113 = vector.shape_cast %112 : vector<10xf32> to vector<1x10xf32>
    %c0_71 = arith.constant 0 : index
    %c0_72 = arith.constant 0 : index
    %114 = vector.load %arg7[%c0_71, %c0_72] : memref<1x10xf32, #tpu.memory_space<vmem>>, vector<1x10xf32>
    %115 = arith.addf %113, %114 : vector<1x10xf32>
    %c0_73 = arith.constant 0 : index
    %c0_74 = arith.constant 0 : index
    %c0_75 = arith.constant 0 : index
    %116 = vector.load %arg8[%c0_73, %c0_74, %c0_75] : memref<1x1x10xf32, #tpu.memory_space<vmem>>, vector<1x1x10xf32>
    %117 = vector.shape_cast %116 : vector<1x1x10xf32> to vector<1x10xf32>
    %118 = vector.shape_cast %115 : vector<1x10xf32> to vector<1x1x10xf32>
    tpu.vector_store %arg8[%c0_73, %c0_74, %c0_75], %118 {strides = array<i32>} : memref<1x1x10xf32, #tpu.memory_space<vmem>>, vector<1x1x10xf32>,
    return
  }
  func.func @transform_0(%arg0: i32) -> (i32, i32, i32) {
    %c0_i32 = arith.constant 0 : i32
    %c0_i32_0 = arith.constant 0 : i32
    %c0_i32_1 = arith.constant 0 : i32
    return %arg0, %c0_i32, %c0_i32_0 : i32, i32, i32
  }
  func.func @transform_1(%arg0: i32) -> (i32, i32, i32) {
    %c0_i32 = arith.constant 0 : i32
    %c0_i32_0 = arith.constant 0 : i32
    %c0_i32_1 = arith.constant 0 : i32
    %c0_i32_2 = arith.constant 0 : i32
    return %c0_i32, %c0_i32_0, %c0_i32_1 : i32, i32, i32
  }
  func.func @transform_2(%arg0: i32) -> (i32, i32) {
    %c0_i32 = arith.constant 0 : i32
    %c0_i32_0 = arith.constant 0 : i32
    %c0_i32_1 = arith.constant 0 : i32
    return %c0_i32, %c0_i32_0 : i32, i32
  }
  func.func @transform_3(%arg0: i32) -> (i32, i32, i32) {
    %c0_i32 = arith.constant 0 : i32
    %c0_i32_0 = arith.constant 0 : i32
    %c0_i32_1 = arith.constant 0 : i32
    %c0_i32_2 = arith.constant 0 : i32
    return %c0_i32, %c0_i32_0, %c0_i32_1 : i32, i32, i32
  }
  func.func @transform_4(%arg0: i32) -> (i32, i32) {
    %c0_i32 = arith.constant 0 : i32
    %c0_i32_0 = arith.constant 0 : i32
    %c0_i32_1 = arith.constant 0 : i32
    return %c0_i32, %c0_i32_0 : i32, i32
  }
  func.func @transform_5(%arg0: i32) -> (i32, i32, i32) {
    %c0_i32 = arith.constant 0 : i32
    %c0_i32_0 = arith.constant 0 : i32
    %c0_i32_1 = arith.constant 0 : i32
    %c0_i32_2 = arith.constant 0 : i32
    return %c0_i32, %c0_i32_0, %c0_i32_1 : i32, i32, i32
  }
  func.func @transform_6(%arg0: i32) -> (i32, i32) {
    %c0_i32 = arith.constant 0 : i32
    %c0_i32_0 = arith.constant 0 : i32
    %c0_i32_1 = arith.constant 0 : i32
    return %c0_i32, %c0_i32_0 : i32, i32
  }
  func.func @transform_7(%arg0: i32) -> (i32, i32, i32) {
    %c0_i32 = arith.constant 0 : i32
    %c0_i32_0 = arith.constant 0 : i32
    %c0_i32_1 = arith.constant 0 : i32
    return %arg0, %c0_i32, %c0_i32_0 : i32, i32, i32
  }
}

</mosaic_0001>

<bundles_post_ra>
// kernel: hnet_forward.1
= control target key start
LH: loop header
LB: loop body
LE: loop exit
PB: predicated region body
PF: predicated region fallthrough
CT: control target
= control target key end

     0   :  { %s15183_s0 = inlined_call_operand.vmem [shape: bf16[2,32,96], index: 0, kind: input, shape index: {}]   ;;  %s15184_s1 = inlined_call_operand.hbm [shape: bf16[5,96,448], index: 1, kind: input, shape index: {}]   ;;  %s15185_s2 = inlined_call_operand.hbm [shape: f32[1,448], index: 2, kind: input, shape index: {}]   ;;  %s15186_s3 = inlined_call_operand.hbm [shape: bf16[3,448,832], index: 3, kind: input, shape index: {}]   ;;  %s15187_s4 = inlined_call_operand.hbm [shape: f32[1,832], index: 4, kind: input, shape index: {}]   ;;  %s15188_s5 = inlined_call_operand.hbm [shape: bf16[10,26,832], index: 5, kind: input, shape index: {}]   ;;  %s15189_s6 = inlined_call_operand.hbm [shape: f32[1,10], index: 6, kind: input, shape index: {}]   ;;  %s15190_s7 = inlined_call_operand.hbm [shape: f32[2,1,10], index: 7, kind: output, shape index: {}]  }
   0x1   :  { %15277 = sst [smem:[#allocation78_spill]] %s15184_s1 }
   0x2   :  { %15278 = sst [smem:[#allocation79_spill]] %s15185_s2 }
   0x3   :  { %15279 = sst [smem:[#allocation80_spill]] %s15186_s3 }
   0x4   :  { %15280 = sst [smem:[#allocation81_spill]] %s15187_s4 }
   0x5   :  { %12 = vsyncpa [#allocation3], 0 }
   0x6   :  { %13 = vsyncpa [#allocation6], 0 }
   0x7   :  { %14 = vsyncpa [#allocation9], 0 }
   0x8   :  { %15 = vsyncpa [#allocation12], 0 }
   0x9   :  { %16 = vsyncpa [#allocation4], 0 }
   0xa   :  { %18 = vsyncpa [#allocation4 + $0x1], 0  ;;  %s12593_s24 = smov 0   ;;  %s12595_s25 = smov 0  }
   0xb   :  { %s12597_s26 = smov 0   ;;  %s12599_s27 = smov 0  }
   0xc LB: > { %s12614_s28 = sadd.s32 4294967295, %s12541_s27   ;;  %s8524_s29 = sadd.s32 4294967294, %s12541_s27   ;;  %s12541_s27 = sphi %s12599_s27, %s15623_s27   ;;  %s12537_s26 = sphi %s12597_s26, %s15622_s26   ;;  %s12533_s25 = sphi %s12595_s25, %s15621_s25   ;;  %s12529_s24 = sphi %s12593_s24, %s15620_s24  }
   0xd   : > { %s12618_s30 = sadd.s32 1, %s12541_s27   ;;  %s183_s8 = sadd.s32 1, %s12537_s26 }
   0xe   : > { %s180_s9 = ssub.s32 %s12541_s27, %s12618_s30  ;;  %p193_p0 = scmp.ne.s32.totalorder %s12537_s26, %s12533_s25 }
   0xf   : > { %p181_p1 = scmp.eq.s32.totalorder %s180_s9, 0  ;;  %p194_p2 = scmp.eq.s32.totalorder %s12614_s28, 1 }
  0x10   : > { %p199_p3 = scmp.ne.s32.totalorder %s12533_s25, %s12529_s24  ;;  %p200_p4 = scmp.eq.s32.totalorder %s8524_s29, 1 }
  0x11   : > { %s12629_s10 = scalar_select %p181_p1, %s12537_s26, %s183_s8  }
  0x12   : > { %p12631_p5 = por %p194_p2, %p193_p0  ;;  %p12635_p6 = por %p200_p4, %p199_p3 }
  0x13   : > { %p8525_p7 = scmp.ge.s32.totalorder %s12541_s27, 1  ;;  %p207_p8 = scmp.lt.s32.totalorder %s12541_s27, 3 }
  0x14   : > { %p12226_p9 = scmp.eq.s32.totalorder %s12614_s28, 0  ;;  %s15284_s2 = sld [smem:[#allocation79_spill]] }
  0x15   : > { %p12642_p10 = pnand %p8525_p7, %p207_p8  ;;  %s12543_s17 = smov [#allocation5]  }
  0x16   : > { %s235_s18 = sshll.u32 %s12543_s17, 4  ;;  %s15285_s4 = sld [smem:[#allocation81_spill]]  ;;  %s236_s18 = int_to_ptr.vmem [resolvable:$true] %s235_s18 }
  0x17   : > { %p12203_p11 = pneg %p12642_p10  ;;  %s15287_s1 = sld [smem:[#allocation78_spill]] }
  0x18   : > { %s12544_s9 = smov [#allocation8]   ;;  %s12545_s15 = smov [#allocation2]  }
  0x19   : > { %p12656_p12 = pnand %p12226_p9, %p12203_p11  ;;  %s261_s14 = sshll.u32 %s12544_s9, 4  ;;  %s262_s14 = int_to_ptr.vmem [resolvable:$true] %s261_s14 }
  0x1a   : > { %s233_s16 = sshll.u32 %s15284_s2, 4  ;;  %s220_s17 = sshll.u32 %s12545_s15, 4  ;;  %s234_s16 = int_to_ptr.hbm [resolvable:$true] %s233_s16  ;;  %s221_s17 = int_to_ptr.vmem [resolvable:$true] %s220_s17 }
  0x1b   : > { %12209 = dma.hbm_to_vmem [thread:$0]  (!%p12656_p12), %s234_s16, 64, %s236_s18, [#allocation6]  }
  0x1c   : > { %s259_s21 = sshll.u32 %s15285_s4, 4  ;;  %s15288_s3 = sld [smem:[#allocation80_spill]]  ;;  %s260_s21 = int_to_ptr.hbm [resolvable:$true] %s259_s21 }
  0x1d   : > { %s218_s8 = sshll.u32 %s15287_s1, 4  ;;  %s12546_s4 = smov 256   ;;  %s219_s8 = int_to_ptr.hbm [resolvable:$true] %s218_s8 }
  0x1e   : > { %12215 = dma.hbm_to_vmem [thread:$0]  (!%p12656_p12), %s260_s21, 112, %s262_s14, [#allocation9]  }
  0x1f   : > { %s12547_s23 = smov 16   ;;  %s12548_s29 = smov [#allocation7]  }
  0x20   : > { %12206 = dma.hbm_to_vmem [thread:$0]  (!%p12656_p12), %s219_s8, 15360, %s221_s17, [#allocation3], %s12546_s4, %s12546_s4, %s12547_s23  }
  0x21   : > { %s246_s16 = sshll.u32 %s12548_s29, 4  ;;  %s12549_s18 = smov 448   ;;  %s247_s16 = int_to_ptr.vmem [resolvable:$true] %s246_s16 }
  0x22   : > { %s244_s2 = sshll.u32 %s15288_s3, 4  ;;  %s12550_s9 = smov 28   ;;  %s245_s2 = int_to_ptr.hbm [resolvable:$true] %s244_s2 }
  0x23   : > { %12212 = dma.hbm_to_vmem [thread:$0]  (!%p12656_p12), %s245_s2, 75264, %s247_s16, [#allocation6], %s12549_s18, %s12549_s18, %s12550_s9  }
  0x24   : > { %s270_s15 = sshll.u32 %s15188_s5, 4  ;;  %s12551_s19 = smov [#allocation10]   ;;  %s271_s15 = int_to_ptr.hbm [resolvable:$true] %s270_s15 }
  0x25   : > { %s272_s20 = sshll.u32 %s12551_s19, 4  ;;  %s285_s4 = sshll.u32 %s15189_s6, 4  ;;  %s273_s20 = int_to_ptr.vmem [resolvable:$true] %s272_s20  ;;  %s286_s4 = int_to_ptr.hbm [resolvable:$true] %s285_s4 }
  0x26   : > { %12218 = dma.hbm_to_vmem [thread:$0]  (!%p12656_p12), %s271_s15, 17920, %s273_s20, [#allocation9], %s12549_s18, %s12549_s18, %s12550_s9  }
  0x27   : > { %s12552_s8 = smov [#allocation11]   ;;  %308 = sbr.rel (%p12642_p10) target bundleno = 1420 (0x58c), region = 48 }
  0x28   : > { %s287_s17 = sshll.u32 %s12552_s8, 4  ;;  %s288_s17 = int_to_ptr.vmem [resolvable:$true] %s287_s17 }
  0x29   : > { %12221 = dma.hbm_to_vmem [thread:$0]  (!%p12656_p12), %s286_s4, 16, %s288_s17, [#allocation12]  }
  0x2c   : > { %12508 = dma.done.wait (%p12226_p9), [#allocation3], 15360  }
  0x2d   : > { %12510 = vsyncadd (%p12226_p9), [#allocation3], 4294951936 }
  0x2e   : > { %12512 = dma.done.wait (%p12226_p9), [#allocation6], 75328  }
  0x2f   : > { %12514 = vsyncadd (%p12226_p9), [#allocation6], 4294891968 }
  0x30   : > { %12516 = dma.done.wait (%p12226_p9), [#allocation9], 18032  }
  0x31   : > { %12518 = vsyncadd (%p12226_p9), [#allocation9], 4294949264 }
  0x32   : > { %12520 = dma.done.wait (%p12226_p9), [#allocation12], 16  }
  0x33   : > { %12522 = vsyncadd (%p12226_p9), [#allocation12], 4294967280  ;;  %p365_p13 = scmp.lt.s32.totalorder %s12614_s28, 1  ;;  %v8632_v0 = vld [vmem:[#allocation2 + $0x160] sm:$0xf]  ;;  %vm570_vm1 = vcmask 785408   ;;  %s8405_s18 = scalar_lea.hbm %s15190_s7, %s12614_s28 }
  0x34   : > { %v11515_v1 = vld [vmem:[#allocation2 + $0x16c] sm:$0xf0]  ;;  %v11513_v2 = vld [vmem:[#allocation2 + $0x164] sm:$0xf]  ;;  %v8634_v4 = vld [vmem:[#allocation2 + $0x170] sm:$0xf0] }
  0x35   : > { %s12704_s1 = scalar_select %p365_p13, %s12614_s28, 1  ;;  %v8633_v3 = vor.u32 %v11515_v1, %v8632_v0  ;;  %v8640_v5 = vld [vmem:[#allocation2 + $0x168] sm:$0xf]  ;;  %v11516_v6 = vld [vmem:[#allocation2 + $0x174] sm:$0xf0]  ;;  %v8637_v7 = vor.u32 %v11513_v2, %v8634_v4  ;;  %vm878_vm2 = vcmask 1046528  }
  0x36   : > { %v8641_v8 = vor.u32 %v11516_v6, %v8640_v5  ;;  %v11514_v9 = vld [vmem:[#allocation2 + $0x16c] sm:$0xf]  ;;  %v8642_v10 = vld [vmem:[#allocation2 + $0x178] sm:$0xf0]  ;;  %v8616_v11 = vld [vmem:[#allocation2 + $0x140] sm:$0xf] }
  0x37   : > { %579 = vmatpush.bf16.msra.mxu0 %v8633_v3  ;;  %v8645_v12 = vor.u32 %v11514_v9, %v8642_v10  ;;  %v11511_v13 = vld [vmem:[#allocation2 + $0x14c] sm:$0xf0]  ;;  %v11509_v14 = vld [vmem:[#allocation2 + $0x144] sm:$0xf]  ;;  %v8618_v15 = vld [vmem:[#allocation2 + $0x150] sm:$0xf0]  ;;  %598 = vmatpush.bf16.msra.mxu1 %v8637_v7 }
  0x38   : > { %617 = vmatpush.bf16.msra.mxu2 %v8641_v8  ;;  %v8617_v16 = vor.u32 %v11511_v13, %v8616_v11  ;;  %v8621_v17 = vor.u32 %v11509_v14, %v8618_v15  ;;  %v8624_v18 = vld [vmem:[#allocation2 + $0x148] sm:$0xf]  ;;  %v11512_v19 = vld [vmem:[#allocation2 + $0x154] sm:$0xf0]  ;;  %v11510_v20 = vld [vmem:[#allocation2 + $0x14c] sm:$0xf] }
  0x39   : > { %636 = vmatpush.bf16.msra.mxu3 %v8645_v12  ;;  %v8625_v21 = vor.u32 %v11512_v19, %v8624_v18  ;;  %v8626_v22 = vld [vmem:[#allocation2 + $0x158] sm:$0xf0]  ;;  %v8600_v23 = vld [vmem:[#allocation2 + $0x120] sm:$0xf]  ;;  %v11507_v24 = vld [vmem:[#allocation2 + $0x12c] sm:$0xf0] }
  0x3a   : > { %v8629_v25 = vor.u32 %v11510_v20, %v8626_v22  ;;  %v11505_v26 = vld [vmem:[#allocation2 + $0x124] sm:$0xf]  ;;  %v8602_v27 = vld [vmem:[#allocation2 + $0x130] sm:$0xf0]  ;;  %v8608_v28 = vld [vmem:[#allocation2 + $0x128] sm:$0xf]  ;;  %v8601_v29 = vor.u32 %v11507_v24, %v8600_v23 }
  0x3b   : > { %580 = vmatpush.bf16.msra.mxu0 %v8617_v16  ;;  %v11508_v30 = vld [vmem:[#allocation2 + $0x134] sm:$0xf0]  ;;  %v11506_v31 = vld [vmem:[#allocation2 + $0x12c] sm:$0xf]  ;;  %v8610_v32 = vld [vmem:[#allocation2 + $0x138] sm:$0xf0]  ;;  %599 = vmatpush.bf16.msra.mxu1 %v8621_v17  ;;  %v8605_v33 = vor.u32 %v11505_v26, %v8602_v27 }
  0x3c   : > { %618 = vmatpush.bf16.msra.mxu2 %v8625_v21  ;;  %v8609_v34 = vor.u32 %v11508_v30, %v8608_v28  ;;  %v8584_v35 = vld [vmem:[#allocation2 + $0x100] sm:$0xf]  ;;  %v11503_v36 = vld [vmem:[#allocation2 + $0x10c] sm:$0xf0]  ;;  %v11501_v37 = vld [vmem:[#allocation2 + $0x104] sm:$0xf]  ;;  %v8613_v38 = vor.u32 %v11506_v31, %v8610_v32 }
  0x3d   : > { %637 = vmatpush.bf16.msra.mxu3 %v8629_v25  ;;  %v8586_v39 = vld [vmem:[#allocation2 + $0x110] sm:$0xf0]  ;;  %v8592_v40 = vld [vmem:[#allocation2 + $0x108] sm:$0xf]  ;;  %v11504_v41 = vld [vmem:[#allocation2 + $0x114] sm:$0xf0]  ;;  %v8585_v44 = vor.u32 %v11503_v36, %v8584_v35 }
  0x3e   : > { %v11502_v42 = vld [vmem:[#allocation2 + $0x10c] sm:$0xf]  ;;  %v8594_v43 = vld [vmem:[#allocation2 + $0x118] sm:$0xf0]  ;;  %s11466_s2 = sshll.u32 %s12704_s1, 4  ;;  %v8589_v46 = vor.u32 %v11501_v37, %v8586_v39  ;;  %v8593_v47 = vor.u32 %v11504_v41, %v8592_v40  ;;  %vm1376_vm4 = vcmask 1045504  }
  0x3f   : > { %581 = vmatpush.bf16.msra.mxu0 %v8601_v29  ;;  %v8568_v45 = vld [vmem:[#allocation2 + $0xe0] sm:$0xf]  ;;  %600 = vmatpush.bf16.msra.mxu1 %v8605_v33  ;;  %v11499_v48 = vld [vmem:[#allocation2 + $0xec] sm:$0xf0]  ;;  %v11497_v49 = vld [vmem:[#allocation2 + $0xe4] sm:$0xf]  ;;  %v8597_v51 = vor.u32 %v11502_v42, %v8594_v43  ;;  %s369_s22 = scalar_lea.vmem %s15183_s0, %s11466_s2 }
  0x40   : > { %619 = vmatpush.bf16.msra.mxu2 %v8609_v34  ;;  %v8570_v50 = vld [vmem:[#allocation2 + $0xf0] sm:$0xf0]  ;;  %v8576_v52 = vld [vmem:[#allocation2 + $0xe8] sm:$0xf]  ;;  %v11500_v53 = vld [vmem:[#allocation2 + $0xf4] sm:$0xf0]  ;;  %v8569_v58 = vor.u32 %v11499_v48, %v8568_v45 }
  0x41   : > { %638 = vmatpush.bf16.msra.mxu3 %v8613_v38  ;;  %v11498_v54 = vld [vmem:[#allocation2 + $0xec] sm:$0xf]  ;;  %v8578_v55 = vld [vmem:[#allocation2 + $0xf8] sm:$0xf0]  ;;  %v8552_v56 = vld [vmem:[#allocation2 + $0xc0] sm:$0xf]  ;;  %v8573_v62 = vor.u32 %v11497_v49, %v8570_v50  ;;  %v8577_v63 = vor.u32 %v11500_v53, %v8576_v52 }
  0x42   : > { %v11495_v57 = vld [vmem:[#allocation2 + $0xcc] sm:$0xf0]  ;;  %v11493_v59 = vld [vmem:[#allocation2 + $0xc4] sm:$0xf]  ;;  %v8554_v60 = vld [vmem:[#allocation2 + $0xd0] sm:$0xf0]  ;;  %v8581_v3 = vor.u32 %v11498_v54, %v8578_v55 }
  0x43   : > { %582 = vmatpush.bf16.msra.mxu0 %v8585_v44  ;;  %v8560_v61 = vld [vmem:[#allocation2 + $0xc8] sm:$0xf]  ;;  %601 = vmatpush.bf16.msra.mxu1 %v8589_v46  ;;  %v11496_v0 = vld [vmem:[#allocation2 + $0xd4] sm:$0xf0]  ;;  %v12710_v1 = vld [vmem:[%s369_s22] sm:$0xff]  ;;  %v8553_v11 = vor.u32 %v11495_v57, %v8552_v56  ;;  %v8557_v14 = vor.u32 %v11493_v59, %v8554_v60  ;;  %vm3203_vm5 = vcmask 523264  }
  0x44   : > { %620 = vmatpush.bf16.msra.mxu2 %v8593_v47  ;;  %v12712_v2 = vld [vmem:[%s369_s22 + $0x8] sm:$0xff]  ;;  %v8562_v5 = vld [vmem:[#allocation2 + $0xd8] sm:$0xf0]  ;;  %v436_v7 = vshrl.u32 %v12710_v1, 16  ;;  %v438_v8 = vshll.u32 %v12710_v1, 16  ;;  %v8561_v15 = vor.u32 %v11496_v0, %v8560_v61  ;;  %vm7280_vm6 = vcmask 1041408  }
  0x45   : > { %639 = vmatpush.bf16.msra.mxu3 %v8597_v51  ;;  %v11494_v4 = vld [vmem:[#allocation2 + $0xcc] sm:$0xf]  ;;  %v8744_v6 = vld [vmem:[#allocation2 + $0xa8] sm:$0xf]  ;;  %v443_v9 = vshll.u32 %v12712_v2, 16  ;;  %v447_v34 = vshrl.u32 %v12712_v2, 16 }
  0x46   : > { %v11492_v10 = vld [vmem:[#allocation2 + $0xb4] sm:$0xf0]  ;;  %vm434_vm0 = vsmask.f32 7424  ;;  %v11490_v12 = vld [vmem:[#allocation2 + $0xac] sm:$0xf]  ;;  %v8565_v18 = vor.u32 %v11494_v4, %v8562_v5 }
  0x47   : > { %583 = vmatpush.bf16.msra.mxu0 %v8569_v58  ;;  %v8746_v13 = vld [vmem:[#allocation2 + $0xb8] sm:$0xf0]  ;;  %602 = vmatpush.bf16.msra.mxu1 %v8573_v62  ;;  %v440_v16 = vrot.slane %v438_v8, 1  ;;  %v12719_v17 = vrot.slane %v443_v9, 1  ;;  %v8745_v19 = vor.u32 %v11492_v10, %v8744_v6  ;;  %v8728_v20 = vld [vmem:[#allocation2 + $0x88] sm:$0xf] }
  0x48   : > { %621 = vmatpush.bf16.msra.mxu2 %v8577_v63  ;;  %v8736_v21 = vld [vmem:[#allocation2 + $0xa0] sm:$0xf]  ;;  %v11491_v22 = vld [vmem:[#allocation2 + $0xac] sm:$0xf0]  ;;  %v8749_v24 = vor.u32 %v11490_v12, %v8746_v13  ;;  %v11488_v25 = vld [vmem:[#allocation2 + $0x94] sm:$0xf0] }
  0x49   : > { %640 = vmatpush.bf16.msra.mxu3 %v8581_v3  ;;  %v441_v23 = vor.u32 %v440_v16, %v436_v7  ;;  %v11489_v26 = vld [vmem:[#allocation2 + $0xa4] sm:$0xf]  ;;  %v8738_v27 = vld [vmem:[#allocation2 + $0xb0] sm:$0xf0]  ;;  %v11486_v28 = vld [vmem:[#allocation2 + $0x8c] sm:$0xf]  ;;  %v8737_v32 = vor.u32 %v11491_v22, %v8736_v21  ;;  %v8729_v35 = vor.u32 %v11488_v25, %v8728_v20 }
  0x4a   : > { %v8730_v29 = vld [vmem:[#allocation2 + $0x98] sm:$0xf0]  ;;  %v1130_v31 = vrot.slane %v443_v9, 2  ;;  %v8712_v33 = vld [vmem:[#allocation2 + $0x68] sm:$0xf]  ;;  %v8741_v36 = vor.u32 %v11489_v26, %v8738_v27  ;;  %v1129_v43 = vrot.slane %v447_v34, 1 }
  0x4b   : > { %584 = vmatpush.bf16.msra.mxu0 %v8553_v11  ;;  %603 = vmatpush.bf16.msra.mxu1 %v8557_v14  ;;  %v446_v30 = vsel %vm434_vm0, %v441_v23, %v12719_v17  ;;  %v11484_v37 = vld [vmem:[#allocation2 + $0x74] sm:$0xf0]  ;;  %v8720_v38 = vld [vmem:[#allocation2 + $0x80] sm:$0xf]  ;;  %v11487_v39 = vld [vmem:[#allocation2 + $0x8c] sm:$0xf0]  ;;  %v8733_v40 = vor.u32 %v11486_v28, %v8730_v29 }
  0x4c   : > { %622 = vmatpush.bf16.msra.mxu2 %v8561_v15  ;;  %v11485_v41 = vld [vmem:[#allocation2 + $0x84] sm:$0xf]  ;;  %v8722_v42 = vld [vmem:[#allocation2 + $0x90] sm:$0xf0]  ;;  %v11482_v44 = vld [vmem:[#allocation2 + $0x6c] sm:$0xf]  ;;  %v8721_v46 = vor.u32 %v11487_v39, %v8720_v38  ;;  %v12730_v47 = vor.u32 %v1130_v31, %v1129_v43  ;;  %v8713_v48 = vor.u32 %v11484_v37, %v8712_v33 }
  0x4d   : > { %641 = vmatpush.bf16.msra.mxu3 %v8565_v18  ;;  %v8714_v45 = vld [vmem:[#allocation2 + $0x78] sm:$0xf0]  ;;  %v8725_v49 = vor.u32 %v11485_v41, %v8722_v42  ;;  %v8696_v50 = vld [vmem:[#allocation2 + $0x48] sm:$0xf]  ;;  %v8704_v51 = vld [vmem:[#allocation2 + $0x60] sm:$0xf] }
  0x4e   : > { %8646 = vmatmul.msk.bf16.vlgmr.msra.gmra.mxu0 %vm570_vm1, %v446_v30  ;;  %8648 = vmatmul.msk.bf16.vlgmr.msra.gmra.mxu1 %vm570_vm1, %v446_v30  ;;  %v11483_v52 = vld [vmem:[#allocation2 + $0x6c] sm:$0xf0]  ;;  %v8717_v53 = vor.u32 %v11482_v44, %v8714_v45  ;;  %v11480_v54 = vld [vmem:[#allocation2 + $0x54] sm:$0xf0]  ;;  %v11481_v55 = vld [vmem:[#allocation2 + $0x64] sm:$0xf] }
  0x4f   : > { %8650 = vmatmul.msk.bf16.vlgmr.msra.gmra.mxu2 %vm570_vm1, %v446_v30  ;;  %779 = vmatpush.bf16.msrb.mxu0 %v8737_v32  ;;  %v8706_v56 = vld [vmem:[#allocation2 + $0x70] sm:$0xf0]  ;;  %v11478_v57 = vld [vmem:[#allocation2 + $0x4c] sm:$0xf]  ;;  %v8698_v58 = vld [vmem:[#allocation2 + $0x58] sm:$0xf0]  ;;  %v8705_v59 = vor.u32 %v11483_v52, %v8704_v51  ;;  %v8697_v60 = vor.u32 %v11480_v54, %v8696_v50 }
  0x50   : > { %817 = vmatpush.bf16.msrb.mxu2 %v8745_v19  ;;  %8652 = vmatmul.msk.bf16.vlgmr.msra.gmra.mxu3 %vm570_vm1, %v446_v30  ;;  %v8709_v61 = vor.u32 %v11481_v55, %v8706_v56  ;;  %v8688_v62 = vld [vmem:[#allocation2 + $0x40] sm:$0xf]  ;;  %v11479_v63 = vld [vmem:[#allocation2 + $0x4c] sm:$0xf0]  ;;  %v11477_v0 = vld [vmem:[#allocation2 + $0x44] sm:$0xf]  ;;  %v8701_v3 = vor.u32 %v11478_v57, %v8698_v58  ;;  %v449_v19 = vor.u32 %v447_v34, %v12719_v17 }
  0x51   : > { %836 = vmatpush.bf16.msrb.mxu3 %v8749_v24  ;;  %798 = vmatpush.bf16.msrb.mxu1 %v8741_v36  ;;  %v8690_v4 = vld [vmem:[#allocation2 + $0x50] sm:$0xf0]  ;;  %v8680_v5 = vld [vmem:[#allocation2 + $0x28] sm:$0xf]  ;;  %v11476_v6 = vld [vmem:[#allocation2 + $0x34] sm:$0xf0]  ;;  %v8689_v11 = vor.u32 %v11479_v63, %v8688_v62 }
  0x52   : > { %v11474_v9 = vld [vmem:[#allocation2 + $0x2c] sm:$0xf]  ;;  %v8682_v10 = vld [vmem:[#allocation2 + $0x38] sm:$0xf0]  ;;  %v8672_v12 = vld [vmem:[#allocation2 + $0x20] sm:$0xf]  ;;  %v8693_v13 = vor.u32 %v11477_v0, %v8690_v4  ;;  %v8681_v14 = vor.u32 %v11476_v6, %v8680_v5 }
  0x53   : > { %780 = vmatpush.bf16.msrb.mxu0 %v8721_v46  ;;  %v11475_v15 = vld [vmem:[#allocation2 + $0x2c] sm:$0xf0]  ;;  %v11473_v16 = vld [vmem:[#allocation2 + $0x24] sm:$0xf]  ;;  %v8674_v18 = vld [vmem:[#allocation2 + $0x30] sm:$0xf0]  ;;  %v8685_v20 = vor.u32 %v11474_v9, %v8682_v10 }
  0x54   : > { %818 = vmatpush.bf16.msrb.mxu2 %v8729_v35  ;;  %v8664_v21 = vld [vmem:[#allocation2 + $0x8] sm:$0xf]  ;;  %v11472_v22 = vld [vmem:[#allocation2 + $0x14] sm:$0xf0]  ;;  %v11470_v23 = vld [vmem:[#allocation2 + $0xc] sm:$0xf]  ;;  %v8673_v27 = vor.u32 %v11475_v15, %v8672_v12  ;;  %v8677_v31 = vor.u32 %v11473_v16, %v8674_v18 }
  0x55   : > { %837 = vmatpush.bf16.msrb.mxu3 %v8733_v40  ;;  %799 = vmatpush.bf16.msrb.mxu1 %v8725_v49  ;;  %v8666_v24 = vld [vmem:[#allocation2 + $0x18] sm:$0xf0]  ;;  %v8848_v25 = vld [vmem:[#allocation2 + $0x228] sm:$0xf]  ;;  %v11540_v26 = vld [vmem:[#allocation2 + $0x234] sm:$0xf0]  ;;  %v8665_v32 = vor.u32 %v11472_v22, %v8664_v21 }
  0x56   : > { %v8656_v28 = vld [vmem:[#allocation2] sm:$0xf]  ;;  %v11538_v29 = vld [vmem:[#allocation2 + $0x22c] sm:$0xf]  ;;  %v8850_v30 = vld [vmem:[#allocation2 + $0x238] sm:$0xf0]  ;;  %v8669_v34 = vor.u32 %v11470_v23, %v8666_v24  ;;  %v8849_v36 = vor.u32 %v11540_v26, %v8848_v25 }
  0x57   : > { %781 = vmatpush.bf16.msrb.mxu0 %v8705_v59  ;;  %v11471_v33 = vld [vmem:[#allocation2 + $0xc] sm:$0xf0]  ;;  %v11469_v35 = vld [vmem:[#allocation2 + $0x4] sm:$0xf]  ;;  %v8658_v17 = vld [vmem:[#allocation2 + $0x10] sm:$0xf0]  ;;  %v8853_v40 = vor.u32 %v11538_v29, %v8850_v30 }
  0x58   : > { %819 = vmatpush.bf16.msrb.mxu2 %v8713_v48  ;;  %v8832_v37 = vld [vmem:[#allocation2 + $0x208] sm:$0xf]  ;;  %v8840_v38 = vld [vmem:[#allocation2 + $0x220] sm:$0xf]  ;;  %v11539_v39 = vld [vmem:[#allocation2 + $0x22c] sm:$0xf0]  ;;  %v8657_v44 = vor.u32 %v11471_v33, %v8656_v28  ;;  %v8661_v48 = vor.u32 %v11469_v35, %v8658_v17 }
  0x59   : > { %838 = vmatpush.bf16.msrb.mxu3 %v8717_v53  ;;  %800 = vmatpush.bf16.msrb.mxu1 %v8709_v61  ;;  %v11536_v41 = vld [vmem:[#allocation2 + $0x214] sm:$0xf0]  ;;  %v11537_v42 = vld [vmem:[#allocation2 + $0x224] sm:$0xf]  ;;  %v8842_v43 = vld [vmem:[#allocation2 + $0x230] sm:$0xf0]  ;;  %v8841_v49 = vor.u32 %v11539_v39, %v8840_v38 }
  0x5a   : > { %v11534_v45 = vld [vmem:[#allocation2 + $0x20c] sm:$0xf]  ;;  %v8834_v46 = vld [vmem:[#allocation2 + $0x218] sm:$0xf0]  ;;  %v8833_v50 = vor.u32 %v11536_v41, %v8832_v37  ;;  %v8845_v51 = vor.u32 %v11537_v42, %v8842_v43  ;;  %v8816_v52 = vld [vmem:[#allocation2 + $0x1e8] sm:$0xf] }
  0x5b   : > { %782 = vmatpush.bf16.msrb.mxu0 %v8689_v11  ;;  %v8824_v53 = vld [vmem:[#allocation2 + $0x200] sm:$0xf]  ;;  %v11535_v54 = vld [vmem:[#allocation2 + $0x20c] sm:$0xf0]  ;;  %v8837_v55 = vor.u32 %v11534_v45, %v8834_v46  ;;  %v11532_v56 = vld [vmem:[#allocation2 + $0x1f4] sm:$0xf0] }
  0x5c   : > { %820 = vmatpush.bf16.msrb.mxu2 %v8697_v60  ;;  %v11533_v57 = vld [vmem:[#allocation2 + $0x204] sm:$0xf]  ;;  %v8826_v58 = vld [vmem:[#allocation2 + $0x210] sm:$0xf0]  ;;  %v11530_v59 = vld [vmem:[#allocation2 + $0x1ec] sm:$0xf]  ;;  %v8825_v61 = vor.u32 %v11535_v54, %v8824_v53  ;;  %v8817_v62 = vor.u32 %v11532_v56, %v8816_v52 }
  0x5d   : > { %839 = vmatpush.bf16.msrb.mxu3 %v8701_v3  ;;  %801 = vmatpush.bf16.msrb.mxu1 %v8693_v13  ;;  %v8818_v60 = vld [vmem:[#allocation2 + $0x1f8] sm:$0xf0]  ;;  %v8829_v63 = vor.u32 %v11533_v57, %v8826_v58  ;;  %v8808_v0 = vld [vmem:[#allocation2 + $0x1e0] sm:$0xf]  ;;  %v11531_v3 = vld [vmem:[#allocation2 + $0x1ec] sm:$0xf0] }
  0x5e   : > { %8647 = vmatmul.msk.bf16.gmra.mxu0 %vm570_vm1, %v449_v19  ;;  %8649 = vmatmul.msk.bf16.gmra.mxu1 %vm570_vm1, %v449_v19  ;;  %v8821_v4 = vor.u32 %v11530_v59, %v8818_v60  ;;  %v8800_v5 = vld [vmem:[#allocation2 + $0x1c8] sm:$0xf]  ;;  %v11528_v6 = vld [vmem:[#allocation2 + $0x1d4] sm:$0xf0]  ;;  %v11526_v9 = vld [vmem:[#allocation2 + $0x1cc] sm:$0xf]  ;;  %v8809_v10 = vor.u32 %v11531_v3, %v8808_v0 }
  0x5f   : > { %8651 = vmatmul.msk.bf16.gmra.mxu2 %vm570_vm1, %v449_v19  ;;  %783 = vmatpush.bf16.msrb.mxu0 %v8673_v27  ;;  %v11529_v11 = vld [vmem:[#allocation2 + $0x1e4] sm:$0xf]  ;;  %v8810_v12 = vld [vmem:[#allocation2 + $0x1f0] sm:$0xf0]  ;;  %v8801_v13 = vor.u32 %v11528_v6, %v8800_v5  ;;  %v8792_v15 = vld [vmem:[#allocation2 + $0x1c0] sm:$0xf] }
  0x60   : > { %821 = vmatpush.bf16.msrb.mxu2 %v8681_v14  ;;  %8653 = vmatmul.msk.bf16.gmra.mxu3 %vm570_vm1, %v449_v19  ;;  %v8802_v14 = vld [vmem:[#allocation2 + $0x1d8] sm:$0xf0]  ;;  %v11527_v16 = vld [vmem:[#allocation2 + $0x1cc] sm:$0xf0]  ;;  %v8784_v18 = vld [vmem:[#allocation2 + $0x1a8] sm:$0xf] }
  0x61   : > { %840 = vmatpush.bf16.msrb.mxu3 %v8685_v20  ;;  %802 = vmatpush.bf16.msrb.mxu1 %v8677_v31  ;;  %v11524_v19 = vld [vmem:[#allocation2 + $0x1b4] sm:$0xf0]  ;;  %v8813_v20 = vor.u32 %v11529_v11, %v8810_v12  ;;  %v8805_v21 = vor.u32 %v11526_v9, %v8802_v14  ;;  %v8793_v22 = vor.u32 %v11527_v16, %v8792_v15  ;;  %v11525_v23 = vld [vmem:[#allocation2 + $0x1c4] sm:$0xf]  ;;  %v8794_v24 = vld [vmem:[#allocation2 + $0x1d0] sm:$0xf0] }
  0x62   : > { %v11522_v25 = vld [vmem:[#allocation2 + $0x1ac] sm:$0xf]  ;;  %v8785_v26 = vor.u32 %v11524_v19, %v8784_v18  ;;  %v8786_v27 = vld [vmem:[#allocation2 + $0x1b8] sm:$0xf0]  ;;  %v8776_v28 = vld [vmem:[#allocation2 + $0x1a0] sm:$0xf] }
  0x63   : > { %784 = vmatpush.bf16.msrb.mxu0 %v8657_v44  ;;  %v11523_v29 = vld [vmem:[#allocation2 + $0x1ac] sm:$0xf0]  ;;  %v8768_v30 = vld [vmem:[#allocation2 + $0x188] sm:$0xf]  ;;  %v11520_v31 = vld [vmem:[#allocation2 + $0x194] sm:$0xf0] }
  0x64   : > { %822 = vmatpush.bf16.msrb.mxu2 %v8665_v32  ;;  %v8797_v32 = vor.u32 %v11525_v23, %v8794_v24  ;;  %v11521_v33 = vld [vmem:[#allocation2 + $0x1a4] sm:$0xf]  ;;  %v8952_v35 = vld [vmem:[#allocation2 + $0x2e8] sm:$0xf]  ;;  %v11564_v17 = vld [vmem:[#allocation2 + $0x2f4] sm:$0xf0] }
  0x65   : > { %841 = vmatpush.bf16.msrb.mxu3 %v8669_v34  ;;  %803 = vmatpush.bf16.msrb.mxu1 %v8661_v48  ;;  %v8789_v34 = vor.u32 %v11522_v25, %v8786_v27  ;;  %v8778_v37 = vld [vmem:[#allocation2 + $0x1b0] sm:$0xf0]  ;;  %v11518_v38 = vld [vmem:[#allocation2 + $0x18c] sm:$0xf]  ;;  %v8770_v39 = vld [vmem:[#allocation2 + $0x198] sm:$0xf0]  ;;  %v8953_v44 = vor.u32 %v11564_v17, %v8952_v35 }
  0x66   : > { %v8760_v41 = vld [vmem:[#allocation2 + $0x180] sm:$0xf]  ;;  %v11519_v42 = vld [vmem:[#allocation2 + $0x18c] sm:$0xf0]  ;;  %v11562_v43 = vld [vmem:[#allocation2 + $0x2ec] sm:$0xf]  ;;  %v8773_v52 = vor.u32 %v11518_v38, %v8770_v39 }
  0x67   : > { %1010 = vmatpush.bf16.msra.mxu0 %v8841_v49  ;;  %v8954_v45 = vld [vmem:[#allocation2 + $0x2f8] sm:$0xf0]  ;;  %v8944_v46 = vld [vmem:[#allocation2 + $0x2e0] sm:$0xf]  ;;  %v11563_v48 = vld [vmem:[#allocation2 + $0x2ec] sm:$0xf0]  ;;  %v8781_v49 = vor.u32 %v11521_v33, %v8778_v37  ;;  %v8761_v53 = vor.u32 %v11519_v42, %v8760_v41 }
  0x68   : > { %1048 = vmatpush.bf16.msra.mxu2 %v8849_v36  ;;  %v8777_v36 = vor.u32 %v11523_v29, %v8776_v28  ;;  %v11517_v54 = vld [vmem:[#allocation2 + $0x184] sm:$0xf]  ;;  %v8957_v56 = vor.u32 %v11562_v43, %v8954_v45  ;;  %v8945_v57 = vor.u32 %v11563_v48, %v8944_v46  ;;  %v8946_v59 = vld [vmem:[#allocation2 + $0x2f0] sm:$0xf0]  ;;  %v8920_v3 = vld [vmem:[#allocation2 + $0x2a8] sm:$0xf] }
  0x69   : > { %1067 = vmatpush.bf16.msra.mxu3 %v8853_v40  ;;  %1029 = vmatpush.bf16.msra.mxu1 %v8845_v51  ;;  %v8769_v40 = vor.u32 %v11520_v31, %v8768_v30  ;;  %v11560_v51 = vld [vmem:[#allocation2 + $0x2d4] sm:$0xf0]  ;;  %v11561_v58 = vld [vmem:[#allocation2 + $0x2e4] sm:$0xf]  ;;  %v8928_v5 = vld [vmem:[#allocation2 + $0x2c0] sm:$0xf] }
  0x6a   : > { %v8949_v0 = vor.u32 %v11561_v58, %v8946_v59  ;;  %v11559_v9 = vld [vmem:[#allocation2 + $0x2cc] sm:$0xf0]  ;;  %v8930_v11 = vld [vmem:[#allocation2 + $0x2d0] sm:$0xf0]  ;;  %v11554_v12 = vld [vmem:[#allocation2 + $0x2ac] sm:$0xf] }
  0x6b   : > { %1011 = vmatpush.bf16.msra.mxu0 %v8825_v61  ;;  %v11558_v61 = vld [vmem:[#allocation2 + $0x2cc] sm:$0xf]  ;;  %v8929_v15 = vor.u32 %v11559_v9, %v8928_v5  ;;  %v8912_v19 = vld [vmem:[#allocation2 + $0x2a0] sm:$0xf]  ;;  %v8904_v23 = vld [vmem:[#allocation2 + $0x288] sm:$0xf] }
  0x6c   : > { %1049 = vmatpush.bf16.msra.mxu2 %v8833_v50  ;;  %v8936_v50 = vld [vmem:[#allocation2 + $0x2c8] sm:$0xf]  ;;  %v11552_v24 = vld [vmem:[#allocation2 + $0x294] sm:$0xf0]  ;;  %v11550_v25 = vld [vmem:[#allocation2 + $0x28c] sm:$0xf] }
  0x6d   : > { %1068 = vmatpush.bf16.msra.mxu3 %v8837_v55  ;;  %1030 = vmatpush.bf16.msra.mxu1 %v8829_v63  ;;  %v8762_v55 = vld [vmem:[#allocation2 + $0x190] sm:$0xf0]  ;;  %v8937_v60 = vor.u32 %v11560_v51, %v8936_v50  ;;  %v8906_v27 = vld [vmem:[#allocation2 + $0x298] sm:$0xf0]  ;;  %v8896_v30 = vld [vmem:[#allocation2 + $0x280] sm:$0xf] }
  0x6e   : > { %8750 = vmatmul.msk.bf16.vlgmr.msrb.gmra.mxu0 %vm570_vm1, %v12710_v1  ;;  %8752 = vmatmul.msk.bf16.vlgmr.msrb.gmra.mxu1 %vm570_vm1, %v12710_v1  ;;  %v8765_v63 = vor.u32 %v11517_v54, %v8762_v55  ;;  %v11551_v31 = vld [vmem:[#allocation2 + $0x28c] sm:$0xf0]  ;;  %v11549_v33 = vld [vmem:[#allocation2 + $0x284] sm:$0xf]  ;;  %v8898_v35 = vld [vmem:[#allocation2 + $0x290] sm:$0xf0] }
  0x6f   : > { %1012 = vmatpush.bf16.msra.mxu0 %v8809_v10  ;;  %8754 = vmatmul.msk.bf16.vlgmr.msrb.gmra.mxu2 %vm570_vm1, %v12710_v1  ;;  %v11557_v10 = vld [vmem:[#allocation2 + $0x2c4] sm:$0xf]  ;;  %v8888_v17 = vld [vmem:[#allocation2 + $0x268] sm:$0xf]  ;;  %v8890_v37 = vld [vmem:[#allocation2 + $0x278] sm:$0xf0]  ;;  %v8901_v41 = vor.u32 %v11549_v33, %v8898_v35 }
  0x70   : > { %1050 = vmatpush.bf16.msra.mxu2 %v8817_v62  ;;  %8756 = vmatmul.msk.bf16.vlgmr.msrb.gmra.mxu3 %vm570_vm1, %v12710_v1  ;;  %v8938_v62 = vld [vmem:[#allocation2 + $0x2d8] sm:$0xf0]  ;;  %v8933_v16 = vor.u32 %v11557_v10, %v8930_v11  ;;  %v1126_v38 = vrot.slane %v436_v7, 1  ;;  %v8880_v42 = vld [vmem:[#allocation2 + $0x260] sm:$0xf]  ;;  %v879_v50 = vrot.slane %v12710_v1, 1 }
  0x71   : > { %1069 = vmatpush.bf16.msra.mxu3 %v8821_v4  ;;  %1031 = vmatpush.bf16.msra.mxu1 %v8813_v20  ;;  %v11556_v4 = vld [vmem:[#allocation2 + $0x2b4] sm:$0xf0]  ;;  %v8941_v6 = vor.u32 %v11558_v61, %v8938_v62  ;;  %v11555_v20 = vld [vmem:[#allocation2 + $0x2ac] sm:$0xf0]  ;;  %v8872_v43 = vld [vmem:[#allocation2 + $0x248] sm:$0xf] }
  0x72   : > { %v8921_v14 = vor.u32 %v11556_v4, %v8920_v3  ;;  %v8913_v28 = vor.u32 %v11555_v20, %v8912_v19  ;;  %v11547_v46 = vld [vmem:[#allocation2 + $0x26c] sm:$0xf0]  ;;  %v11545_v48 = vld [vmem:[#allocation2 + $0x264] sm:$0xf]  ;;  %v12757_v51 = vrot.slane %v12712_v2, 1  ;;  %v1127_v54 = vrot.slane %v438_v8, 2 }
  0x73   : > { %1013 = vmatpush.bf16.msra.mxu0 %v8793_v22  ;;  %v8914_v22 = vld [vmem:[#allocation2 + $0x2b0] sm:$0xf0]  ;;  %v11542_v7 = vld [vmem:[#allocation2 + $0x24c] sm:$0xf]  ;;  %v8881_v55 = vor.u32 %v11547_v46, %v8880_v42  ;;  %vm1125_vm3 = vsmask.f32 6400 }
  0x74   : > { %1051 = vmatpush.bf16.msra.mxu2 %v8801_v13  ;;  %v8922_v13 = vld [vmem:[#allocation2 + $0x2b8] sm:$0xf0]  ;;  %v11543_v59 = vld [vmem:[#allocation2 + $0x24c] sm:$0xf0]  ;;  %v8866_v61 = vld [vmem:[#allocation2 + $0x250] sm:$0xf0]  ;;  %v1128_v62 = vor.u32 %v1127_v54, %v1126_v38 }
  0x75   : > { %1070 = vmatpush.bf16.msra.mxu3 %v8805_v21  ;;  %1032 = vmatpush.bf16.msra.mxu1 %v8797_v32  ;;  %v8925_v18 = vor.u32 %v11554_v12, %v8922_v13  ;;  %v11553_v21 = vld [vmem:[#allocation2 + $0x2a4] sm:$0xf]  ;;  %v8909_v32 = vor.u32 %v11550_v25, %v8906_v27  ;;  %v9056_v4 = vld [vmem:[#allocation2 + $0x3a8] sm:$0xf]  ;;  %v11588_v5 = vld [vmem:[#allocation2 + $0x3b4] sm:$0xf0] }
  0x76   : > { %v8917_v29 = vor.u32 %v11553_v21, %v8914_v22  ;;  %v9057_v9 = vor.u32 %v11588_v5, %v9056_v4  ;;  %v9058_v10 = vld [vmem:[#allocation2 + $0x3b8] sm:$0xf0]  ;;  %v9040_v11 = vld [vmem:[#allocation2 + $0x388] sm:$0xf]  ;;  %v11584_v12 = vld [vmem:[#allocation2 + $0x394] sm:$0xf0] }
  0x77   : > { %1014 = vmatpush.bf16.msra.mxu0 %v8777_v36  ;;  %v11546_v36 = vld [vmem:[#allocation2 + $0x26c] sm:$0xf]  ;;  %v11587_v19 = vld [vmem:[#allocation2 + $0x3ac] sm:$0xf0]  ;;  %v11585_v20 = vld [vmem:[#allocation2 + $0x3a4] sm:$0xf] }
  0x78   : > { %1052 = vmatpush.bf16.msra.mxu2 %v8785_v26  ;;  %v8905_v26 = vor.u32 %v11552_v24, %v8904_v23  ;;  %v8893_v45 = vor.u32 %v11546_v36, %v8890_v37  ;;  %v9050_v21 = vld [vmem:[#allocation2 + $0x3b0] sm:$0xf0]  ;;  %v9024_v25 = vld [vmem:[#allocation2 + $0x368] sm:$0xf]  ;;  %v11578_v27 = vld [vmem:[#allocation2 + $0x36c] sm:$0xf] }
  0x79   : > { %1071 = vmatpush.bf16.msra.mxu3 %v8789_v34  ;;  %1033 = vmatpush.bf16.msra.mxu1 %v8781_v49  ;;  %v11548_v34 = vld [vmem:[#allocation2 + $0x274] sm:$0xf0]  ;;  %v8882_v49 = vld [vmem:[#allocation2 + $0x270] sm:$0xf0]  ;;  %v9053_v24 = vor.u32 %v11585_v20, %v9050_v21  ;;  %v9016_v36 = vld [vmem:[#allocation2 + $0x360] sm:$0xf] }
  0x7a   : > { %v8889_v39 = vor.u32 %v11548_v34, %v8888_v17  ;;  %v9034_v33 = vld [vmem:[#allocation2 + $0x390] sm:$0xf0]  ;;  %v11579_v37 = vld [vmem:[#allocation2 + $0x36c] sm:$0xf0]  ;;  %v11577_v38 = vld [vmem:[#allocation2 + $0x364] sm:$0xf] }
  0x7b   : > { %1015 = vmatpush.bf16.msra.mxu0 %v8761_v53  ;;  %v11576_v42 = vld [vmem:[#allocation2 + $0x354] sm:$0xf0]  ;;  %v9010_v46 = vld [vmem:[#allocation2 + $0x358] sm:$0xf0]  ;;  %v8992_v54 = vld [vmem:[#allocation2 + $0x328] sm:$0xf] }
  0x7c   : > { %1053 = vmatpush.bf16.msra.mxu2 %v8769_v40  ;;  %v8897_v40 = vor.u32 %v11551_v31, %v8896_v30  ;;  %v11583_v30 = vld [vmem:[#allocation2 + $0x38c] sm:$0xf0]  ;;  %v11568_v4 = vld [vmem:[#allocation2 + $0x314] sm:$0xf0]  ;;  %v1378_v20 = vrot.slane %v12712_v2, 2  ;;  %vm7292_vm7 = vcmask 517120  }
  0x7d   : > { %1072 = vmatpush.bf16.msra.mxu3 %v8773_v52  ;;  %1034 = vmatpush.bf16.msra.mxu1 %v8765_v63  ;;  %v8874_v52 = vld [vmem:[#allocation2 + $0x258] sm:$0xf0]  ;;  %v881_v63 = vsel %vm878_vm2, %v879_v50, %v12757_v51  ;;  %vm8332_vm8 = vcmask 7168   ;;  %vm8337_vm9 = vcmask 15360   ;;  %vm8342_vm10 = vcmask 23552   ;;  %s363_s23 = sand.u32 1, %s12533_s25  }
  0x7e   : > { %8751 = vmatmul.msk.bf16.gmra.mxu0 %vm570_vm1, %v12712_v2  ;;  %8753 = vmatmul.msk.bf16.gmra.mxu1 %vm570_vm1, %v12712_v2  ;;  %v8877_v58 = vor.u32 %v11542_v7, %v8874_v52  ;;  %v11573_v52 = vld [vmem:[#allocation2 + $0x344] sm:$0xf]  ;;  %vm8347_vm11 = vcmask 31744   ;;  %vm8352_vm12 = vcmask 39936   ;;  %vm8357_vm13 = vcmask 48128   ;;  %s364_s9 = scalar_lea.vmem [#allocation13], %s363_s23 }
  0x7f   : > { %1261 = vmatpush.bf16.msrb.mxu0 %v8945_v57  ;;  %8755 = vmatmul.msk.bf16.gmra.mxu2 %vm570_vm1, %v12712_v2  ;;  %v8864_v57 = vld [vmem:[#allocation2 + $0x240] sm:$0xf]  ;;  %vm8362_vm14 = vcmask 56320   ;;  %vm8367_vm15 = vcmask 64512   ;;  %s8407_s21 = sshll.u32 %s364_s9, 4  ;;  %s8409_s14 = sshll.u32 %s8405_s18, 4  ;;  %s8408_s21 = int_to_ptr.vmem [resolvable:$true] %s8407_s21  ;;  %s8410_s14 = int_to_ptr.hbm [resolvable:$true] %s8409_s14 }
  0x80   : > { %1299 = vmatpush.bf16.msrb.mxu2 %v8953_v44  ;;  %8757 = vmatmul.msk.bf16.gmra.mxu3 %vm570_vm1, %v12712_v2  ;;  %v11544_v44 = vld [vmem:[#allocation2 + $0x254] sm:$0xf0]  ;;  %v8865_v8 = vor.u32 %v11543_v59, %v8864_v57  ;;  %v11570_v57 = vld [vmem:[#allocation2 + $0x32c] sm:$0xf]  ;;  %s8397_s15 = scalar_lea.sflag [#allocation4], %s363_s23  ;;  %s12477_s19 = sshra.s32 %s8410_s14, 4  ;;  %s12478_s19 = int_to_ptr.hbm [resolvable:$true] %s12477_s19 }
  0x81   : > { %1318 = vmatpush.bf16.msrb.mxu3 %v8957_v56  ;;  %1280 = vmatpush.bf16.msrb.mxu1 %v8949_v0  ;;  %v8873_v53 = vor.u32 %v11544_v44, %v8872_v43  ;;  %v8885_v56 = vor.u32 %v11545_v48, %v8882_v49  ;;  %v12764_v0 = vsel %vm1125_vm3, %v1128_v62, %v12730_v47  ;;  %v11574_v43 = vld [vmem:[#allocation2 + $0x34c] sm:$0xf]  ;;  %v9000_v48 = vld [vmem:[#allocation2 + $0x340] sm:$0xf]  ;;  %v11575_v49 = vld [vmem:[#allocation2 + $0x34c] sm:$0xf0]  ;;  %p12484_p3 = scmp.lt.s32.totalorder %s12478_s19, %s15190_s7 }
  0x82   : > { %v9013_v50 = vor.u32 %v11574_v43, %v9010_v46  ;;  %v9001_v7 = vor.u32 %v11575_v49, %v9000_v48  ;;  %v11569_v62 = vld [vmem:[#allocation2 + $0x324] sm:$0xf]  ;;  %vm8394_vm3 = vcmask 73728   ;;  %s12479_s20 = scalar_lea.hbm %s12478_s19, 1  ;;  %s12483_s8 = scalar_lea.hbm %s15190_s7, 2 }
  0x83   : > { %1262 = vmatpush.bf16.msrb.mxu0 %v8929_v15  ;;  %v9042_v15 = vld [vmem:[#allocation2 + $0x398] sm:$0xf0]  ;;  %p12480_p0 = scmp.ne.s32.totalorder %s12478_s19, %s12479_s20  ;;  %p12485_p4 = scmp.lt.s32.totalorder %s12483_s8, %s12479_s20 }
  0x84   : > { %1300 = vmatpush.bf16.msrb.mxu2 %v8937_v60  ;;  %v11541_v60 = vld [vmem:[#allocation2 + $0x244] sm:$0xf] }
  0x85   : > { %1319 = vmatpush.bf16.msrb.mxu3 %v8941_v6  ;;  %1281 = vmatpush.bf16.msrb.mxu1 %v8933_v16  ;;  %v8869_v3 = vor.u32 %v11541_v60, %v8866_v61  ;;  %v11586_v6 = vld [vmem:[#allocation2 + $0x3ac] sm:$0xf]  ;;  %v9048_v16 = vld [vmem:[#allocation2 + $0x3a0] sm:$0xf]  ;;  %v11571_v61 = vld [vmem:[#allocation2 + $0x32c] sm:$0xf0]  ;;  %p12481_p1 = pnand %p12480_p0, %p12631_p5  ;;  %p12486_p7 = por %p12485_p4, %p12484_p3 }
  0x86   : > { %v9061_v13 = vor.u32 %v11586_v6, %v9058_v10  ;;  %v9049_v23 = vor.u32 %v11587_v19, %v9048_v16  ;;  %v8984_v60 = vld [vmem:[#allocation2 + $0x320] sm:$0xf]  ;;  %v11566_v6 = vld [vmem:[#allocation2 + $0x30c] sm:$0xf]  ;;  %v8970_v16 = vld [vmem:[#allocation2 + $0x310] sm:$0xf0] }
  0x87   : > { %1263 = vmatpush.bf16.msrb.mxu0 %v8913_v28  ;;  %v9026_v28 = vld [vmem:[#allocation2 + $0x378] sm:$0xf0]  ;;  %v1377_v19 = vrot.slane %v12710_v1, 2  ;;  %p12482_p2 = pneg %p12481_p1 }
  0x88   : > { %1301 = vmatpush.bf16.msrb.mxu2 %v8921_v14  ;;  %v11582_v14 = vld [vmem:[#allocation2 + $0x38c] sm:$0xf]  ;;  %v9029_v34 = vor.u32 %v11578_v27, %v9026_v28 }
  0x89   : > { %1320 = vmatpush.bf16.msrb.mxu3 %v8925_v18  ;;  %1282 = vmatpush.bf16.msrb.mxu1 %v8917_v29  ;;  %v9041_v18 = vor.u32 %v11584_v12, %v9040_v11  ;;  %v9045_v22 = vor.u32 %v11582_v14, %v9042_v15  ;;  %v9032_v29 = vld [vmem:[#allocation2 + $0x380] sm:$0xf]  ;;  %v11565_v14 = vld [vmem:[#allocation2 + $0x304] sm:$0xf]  ;;  %p12487_p8 = pnand %p12486_p7, %p12482_p2 }
  0x8a   : > { %v9033_v31 = vor.u32 %v11583_v30, %v9032_v29  ;;  %v8968_v12 = vld [vmem:[#allocation2 + $0x300] sm:$0xf] }
  0x8b   : > { %1264 = vmatpush.bf16.msrb.mxu0 %v8897_v40  ;;  %v9018_v40 = vld [vmem:[#allocation2 + $0x370] sm:$0xf0] }
  0x8c   : > { %1302 = vmatpush.bf16.msrb.mxu2 %v8905_v26  ;;  %v11580_v26 = vld [vmem:[#allocation2 + $0x374] sm:$0xf0]  ;;  %v9021_v44 = vor.u32 %v11577_v38, %v9018_v40 }
  0x8d   : > { %1321 = vmatpush.bf16.msrb.mxu3 %v8909_v32  ;;  %1283 = vmatpush.bf16.msrb.mxu1 %v8901_v41  ;;  %v11581_v32 = vld [vmem:[#allocation2 + $0x384] sm:$0xf]  ;;  %v9025_v35 = vor.u32 %v11580_v26, %v9024_v25  ;;  %v9008_v41 = vld [vmem:[#allocation2 + $0x348] sm:$0xf] }
  0x8e   : > { %8854 = vmatmul.msk.bf16.vlgmr.msra.gmra.mxu0 %vm570_vm1, %v881_v63  ;;  %8856 = vmatmul.msk.bf16.vlgmr.msra.gmra.mxu1 %vm570_vm1, %v881_v63  ;;  %v9037_v17 = vor.u32 %v11581_v32, %v9034_v33 }
  0x8f   : > { %1265 = vmatpush.bf16.msrb.mxu0 %v8881_v55  ;;  %8858 = vmatmul.msk.bf16.vlgmr.msra.gmra.mxu2 %vm570_vm1, %v881_v63 }
  0x90   : > { %1303 = vmatpush.bf16.msrb.mxu2 %v8889_v39  ;;  %8860 = vmatmul.msk.bf16.vlgmr.msra.gmra.mxu3 %vm570_vm1, %v881_v63  ;;  %v9017_v39 = vor.u32 %v11579_v37, %v9016_v36  ;;  %v8985_v63 = vor.u32 %v11571_v61, %v8984_v60 }
  0x91   : > { %1322 = vmatpush.bf16.msrb.mxu3 %v8893_v45  ;;  %1284 = vmatpush.bf16.msrb.mxu1 %v8885_v56  ;;  %v9009_v45 = vor.u32 %v11576_v42, %v9008_v41  ;;  %v11572_v56 = vld [vmem:[#allocation2 + $0x334] sm:$0xf0] }
  0x93   : > { %1266 = vmatpush.bf16.msrb.mxu0 %v8865_v8  ;;  %v8986_v8 = vld [vmem:[#allocation2 + $0x330] sm:$0xf0] }
  0x94   : > { %1304 = vmatpush.bf16.msrb.mxu2 %v8873_v53  ;;  %v9002_v53 = vld [vmem:[#allocation2 + $0x350] sm:$0xf0]  ;;  %v8989_v5 = vor.u32 %v11569_v62, %v8986_v8 }
  0x95   : > { %1323 = vmatpush.bf16.msrb.mxu3 %v8877_v58  ;;  %1285 = vmatpush.bf16.msrb.mxu1 %v8869_v3  ;;  %v9005_v55 = vor.u32 %v11573_v52, %v9002_v53  ;;  %v8993_v58 = vor.u32 %v11572_v56, %v8992_v54  ;;  %v8976_v3 = vld [vmem:[#allocation2 + $0x308] sm:$0xf] }
  0x96   : > { %v8977_v10 = vor.u32 %v11568_v4, %v8976_v3 }
  0x97   : > { %1508 = vmatpush.bf16.msra.mxu0 %v9049_v23 }
  0x98   : > { %1546 = vmatpush.bf16.msra.mxu2 %v9057_v9  ;;  %v8978_v9 = vld [vmem:[#allocation2 + $0x318] sm:$0xf0] }
  0x99   : > { %1565 = vmatpush.bf16.msra.mxu3 %v9061_v13  ;;  %1527 = vmatpush.bf16.msra.mxu1 %v9053_v24  ;;  %v8981_v11 = vor.u32 %v11566_v6, %v8978_v9  ;;  %v11567_v13 = vld [vmem:[#allocation2 + $0x30c] sm:$0xf0] }
  0x9a   : > { %v8969_v15 = vor.u32 %v11567_v13, %v8968_v12 }
  0x9b   : > { %1509 = vmatpush.bf16.msra.mxu0 %v9033_v31 }
  0x9c   : > { %1547 = vmatpush.bf16.msra.mxu2 %v9041_v18  ;;  %v8973_v18 = vor.u32 %v11565_v14, %v8970_v16 }
  0x9d   : > { %1566 = vmatpush.bf16.msra.mxu3 %v9045_v22  ;;  %1528 = vmatpush.bf16.msra.mxu1 %v9037_v17  ;;  %v1379_v22 = vsel %vm1376_vm4, %v1377_v19, %v1378_v20 }
  0x9e   : > { %8855 = vmatmul.msk.bf16.gmra.mxu0 %vm570_vm1, %v12757_v51  ;;  %8857 = vmatmul.msk.bf16.gmra.mxu1 %vm570_vm1, %v12757_v51 }
  0x9f   : > { %8859 = vmatmul.msk.bf16.gmra.mxu2 %vm570_vm1, %v12757_v51  ;;  %1510 = vmatpush.bf16.msra.mxu0 %v9017_v39 }
  0xa0   : > { %1548 = vmatpush.bf16.msra.mxu2 %v9025_v35  ;;  %8861 = vmatmul.msk.bf16.gmra.mxu3 %vm570_vm1, %v12757_v51  ;;  %v8994_v51 = vld [vmem:[#allocation2 + $0x338] sm:$0xf0] }
  0xa1   : > { %1567 = vmatpush.bf16.msra.mxu3 %v9029_v34  ;;  %1529 = vmatpush.bf16.msra.mxu1 %v9021_v44  ;;  %v8997_v59 = vor.u32 %v11570_v57, %v8994_v51 }
  0xa3   : > { %1511 = vmatpush.bf16.msra.mxu0 %v9001_v7 }
  0xa4   : > { %1549 = vmatpush.bf16.msra.mxu2 %v9009_v45 }
  0xa5   : > { %1568 = vmatpush.bf16.msra.mxu3 %v9013_v50  ;;  %1530 = vmatpush.bf16.msra.mxu1 %v9005_v55 }
  0xa7   : > { %1512 = vmatpush.bf16.msra.mxu0 %v8985_v63 }
  0xa8   : > { %1550 = vmatpush.bf16.msra.mxu2 %v8993_v58 }
  0xa9   : > { %1569 = vmatpush.bf16.msra.mxu3 %v8997_v59  ;;  %1531 = vmatpush.bf16.msra.mxu1 %v8989_v5 }
  0xab   : > { %1513 = vmatpush.bf16.msra.mxu0 %v8969_v15 }
  0xac   : > { %1551 = vmatpush.bf16.msra.mxu2 %v8977_v10 }
  0xad   : > { %1570 = vmatpush.bf16.msra.mxu3 %v8981_v11  ;;  %1532 = vmatpush.bf16.msra.mxu1 %v8973_v18 }
  0xae   : > { %8958 = vmatmul.msk.bf16.vlgmr.msrb.gmra.mxu0 %vm570_vm1, %v12764_v0  ;;  %8960 = vmatmul.msk.bf16.vlgmr.msrb.gmra.mxu1 %vm570_vm1, %v12764_v0 }
  0xaf   : > { %8962 = vmatmul.msk.bf16.vlgmr.msrb.gmra.mxu2 %vm570_vm1, %v12764_v0 }
  0xb0   : > { %8964 = vmatmul.msk.bf16.vlgmr.msrb.gmra.mxu3 %vm570_vm1, %v12764_v0 }
  0xbe   : > { %8959 = vmatmul.msk.bf16.gmra.mxu0 %vm570_vm1, %v12730_v47  ;;  %8961 = vmatmul.msk.bf16.gmra.mxu1 %vm570_vm1, %v12730_v47 }
  0xbf   : > { %8963 = vmatmul.msk.bf16.gmra.mxu2 %vm570_vm1, %v12730_v47 }
  0xc0   : > { %8965 = vmatmul.msk.bf16.gmra.mxu3 %vm570_vm1, %v12730_v47 }
  0xcb   : > { %v586_v21 = vpop.f32.mrf.mxu0  ;;  %v605_v0 = vpop.f32.mrf.mxu1 }
  0xce   : > { %9062 = vmatmul.msk.bf16.vlgmr.msra.gmra.mxu0 %vm570_vm1, %v1379_v22  ;;  %9064 = vmatmul.msk.bf16.vlgmr.msra.gmra.mxu1 %vm570_vm1, %v1379_v22 }
  0xcf   : > { %9066 = vmatmul.msk.bf16.vlgmr.msra.gmra.mxu2 %vm570_vm1, %v1379_v22 }
  0xd0   : > { %9068 = vmatmul.msk.bf16.vlgmr.msra.gmra.mxu3 %vm570_vm1, %v1379_v22 }
  0xd2   : > { %v624_v23 = vpop.f32.mrf.mxu2 }
  0xd3   : > { %v643_v24 = vpop.f32.mrf.mxu3  ;;  %v12800_v25 = vpop.f32.mrf.mxu0 }
  0xd4   : > { %v12802_v47 = vpop.f32.mrf.mxu1 }
  0xda   : > { %v12804_v1 = vpop.f32.mrf.mxu2 }
  0xdb   : > { %v12806_v2 = vpop.f32.mrf.mxu3  ;;  %v591_v26 = vpop.f32.mrf.mxu0 }
  0xdc   : > { %v610_v27 = vpop.f32.mrf.mxu1 }
  0xde   : > { %9063 = vmatmul.msk.bf16.gmra.mxu0 %vm570_vm1, %v1378_v20  ;;  %9065 = vmatmul.msk.bf16.gmra.mxu1 %vm570_vm1, %v1378_v20 }
  0xdf   : > { %9067 = vmatmul.msk.bf16.gmra.mxu2 %vm570_vm1, %v1378_v20 }
  0xe0   : > { %9069 = vmatmul.msk.bf16.gmra.mxu3 %vm570_vm1, %v1378_v20  ;;  %vm8377_vm1 = vcmask 80896  }
  0xe2   : > { %v629_v28 = vpop.f32.mrf.mxu2 }
  0xe3   : > { %v648_v29 = vpop.f32.mrf.mxu3  ;;  %v12812_v30 = vpop.f32.mrf.mxu0 }
  0xe4   : > { %v12814_v31 = vpop.f32.mrf.mxu1 }
  0xea   : > { %v12816_v32 = vpop.f32.mrf.mxu2 }
  0xeb   : > { %v12818_v33 = vpop.f32.mrf.mxu3  ;;  %v786_v35 = vpop.f32.mrf.mxu0 }
  0xec   : > { %v787_v17 = vadd.f32 %v786_v35, %v586_v21  ;;  %v805_v34 = vpop.f32.mrf.mxu1  ;;  %v9492_v35 = vld [vmem:[#allocation7 + $0x968] sm:$0xf] }
  0xed   : > { %v806_v36 = vadd.f32 %v805_v34, %v605_v0  ;;  %v11893_v34 = vld [vmem:[#allocation7 + $0x980] sm:$0xf0] }
  0xf2   : > { %v824_v37 = vpop.f32.mrf.mxu2 }
  0xf3   : > { %v825_v38 = vadd.f32 %v824_v37, %v624_v23  ;;  %v843_v39 = vpop.f32.mrf.mxu3  ;;  %v12820_v40 = vpop.f32.mrf.mxu0  ;;  %v9240_v37 = vld [vmem:[#allocation7 + $0x770] sm:$0xf] }
  0xf4   : > { %v844_v41 = vadd.f32 %v843_v39, %v643_v24  ;;  %v12822_v42 = vpop.f32.mrf.mxu1  ;;  %v9464_v39 = vld [vmem:[#allocation7 + $0x930] sm:$0xf] }
  0xfa   : > { %v12824_v43 = vpop.f32.mrf.mxu2 }
  0xfb   : > { %v12826_v44 = vpop.f32.mrf.mxu3  ;;  %v791_v45 = vpop.f32.mrf.mxu0 }
  0xfc   : > { %v792_v46 = vadd.f32 %v791_v45, %v591_v26  ;;  %v810_v48 = vpop.f32.mrf.mxu1 }
  0xfd   : > { %v811_v49 = vadd.f32 %v810_v48, %v610_v27 }
 0x102   : > { %v829_v50 = vpop.f32.mrf.mxu2 }
 0x103   : > { %v830_v7 = vadd.f32 %v829_v50, %v629_v28  ;;  %v848_v52 = vpop.f32.mrf.mxu3  ;;  %v12828_v53 = vpop.f32.mrf.mxu0  ;;  %v9268_v28 = vld [vmem:[#allocation7 + $0x7a8] sm:$0xf] }
 0x104   : > { %v849_v54 = vadd.f32 %v848_v52, %v648_v29  ;;  %v12830_v55 = vpop.f32.mrf.mxu1  ;;  %v11837_v29 = vld [vmem:[#allocation7 + $0x7c0] sm:$0xf0] }
 0x105   : > { %v11949_v52 = vld [vmem:[#allocation7 + $0xb40] sm:$0xf0] }
 0x10a   : > { %v12832_v56 = vpop.f32.mrf.mxu2 }
 0x10b   : > { %v12834_v57 = vpop.f32.mrf.mxu3  ;;  %v1017_v51 = vpop.f32.mrf.mxu0 }
 0x10c   : > { %v12836_v58 = vadd.f32 %v1017_v51, %v787_v17  ;;  %v1036_v59 = vpop.f32.mrf.mxu1  ;;  %v9269_v17 = vor.u32 %v11837_v29, %v9268_v28  ;;  %v11942_v28 = vld [vmem:[#allocation7 + $0xb08] sm:$0xf0] }
 0x10d   : > { %v12838_v60 = vadd.f32 %v1036_v59, %v806_v36  ;;  %v9493_v36 = vor.u32 %v11893_v34, %v9492_v35  ;;  %v9212_v59 = vld [vmem:[#allocation7 + $0x738] sm:$0xf]  ;;  %v9184_v35 = vld [vmem:[#allocation7 + $0x700] sm:$0xf] }
 0x10e   : > { %3210 = vmatpush.bf16.msrb.mxu0 %v9269_v17  ;;  %v11816_v17 = vld [vmem:[#allocation7 + $0x718] sm:$0xf0]  ;;  %v9408_v34 = vld [vmem:[#allocation7 + $0x8c0] sm:$0xf] }
 0x10f   : > { %3229 = vmatpush.bf16.msrb.mxu1 %v9493_v36 }
 0x112   : > { %v1055_v61 = vpop.f32.mrf.mxu2 }
 0x113   : > { %v12840_v62 = vadd.f32 %v1055_v61, %v825_v38  ;;  %v1074_v63 = vpop.f32.mrf.mxu3  ;;  %v12842_v8 = vpop.f32.mrf.mxu0  ;;  %v11830_v38 = vld [vmem:[#allocation7 + $0x788] sm:$0xf0]  ;;  %v11823_v61 = vld [vmem:[#allocation7 + $0x750] sm:$0xf0] }
 0x114   : > { %v12844_v3 = vadd.f32 %v1074_v63, %v844_v41  ;;  %v12846_v4 = vpop.f32.mrf.mxu1  ;;  %v9241_v45 = vor.u32 %v11830_v38, %v9240_v37  ;;  %v9436_v63 = vld [vmem:[#allocation7 + $0x8f8] sm:$0xf]  ;;  %v9185_v37 = vor.u32 %v11816_v17, %v9184_v35  ;;  %v11872_v38 = vld [vmem:[#allocation7 + $0x8d8] sm:$0xf0]  ;;  %v9632_v17 = vld [vmem:[#allocation7 + $0xa80] sm:$0xf] }
 0x116   : > { %3211 = vmatpush.bf16.msrb.mxu0 %v9241_v45 }
 0x11a   : > { %v12848_v5 = vpop.f32.mrf.mxu2 }
 0x11b   : > { %v12850_v6 = vpop.f32.mrf.mxu3  ;;  %v1022_v9 = vpop.f32.mrf.mxu0 }
 0x11c   : > { %v12852_v10 = vadd.f32 %v1022_v9, %v792_v46  ;;  %v1041_v11 = vpop.f32.mrf.mxu1  ;;  %v11886_v46 = vld [vmem:[#allocation7 + $0x948] sm:$0xf0]  ;;  %v9213_v9 = vor.u32 %v11823_v61, %v9212_v59  ;;  %v9156_v59 = vld [vmem:[#allocation7 + $0x6c8] sm:$0xf]  ;;  %v11809_v61 = vld [vmem:[#allocation7 + $0x6e0] sm:$0xf0] }
 0x11d   : > { %v12854_v12 = vadd.f32 %v1041_v11, %v811_v49  ;;  %v9465_v50 = vor.u32 %v11886_v46, %v9464_v39  ;;  %v11879_v11 = vld [vmem:[#allocation7 + $0x910] sm:$0xf0]  ;;  %v9409_v46 = vor.u32 %v11872_v38, %v9408_v34  ;;  %v11928_v34 = vld [vmem:[#allocation7 + $0xa98] sm:$0xf0] }
 0x11e   : > { %3212 = vmatpush.bf16.msrb.mxu0 %v9213_v9  ;;  %v9828_v9 = vld [vmem:[#allocation7 + $0xc08] sm:$0xf]  ;;  %v9633_v38 = vor.u32 %v11928_v34, %v9632_v17 }
 0x11f   : > { %3230 = vmatpush.bf16.msrb.mxu1 %v9465_v50  ;;  %v9660_v50 = vld [vmem:[#allocation7 + $0xab8] sm:$0xf] }
 0x122   : > { %v1060_v13 = vpop.f32.mrf.mxu2  ;;  %3213 = vmatpush.bf16.msrb.mxu0 %v9185_v37  ;;  %v9128_v37 = vld [vmem:[#allocation7 + $0x690] sm:$0xf] }
 0x123   : > { %v12856_v14 = vadd.f32 %v1060_v13, %v830_v7  ;;  %v1079_v15 = vpop.f32.mrf.mxu3  ;;  %v12858_v16 = vpop.f32.mrf.mxu0  ;;  %v9716_v7 = vld [vmem:[#allocation7 + $0xb28] sm:$0xf]  ;;  %v9437_v13 = vor.u32 %v11879_v11, %v9436_v63  ;;  %v11977_v11 = vld [vmem:[#allocation7 + $0xc20] sm:$0xf0] }
 0x124   : > { %v12860_v18 = vadd.f32 %v1079_v15, %v849_v54  ;;  %v12862_v19 = vpop.f32.mrf.mxu1  ;;  %v9717_v51 = vor.u32 %v11949_v52, %v9716_v7  ;;  %v9688_v15 = vld [vmem:[#allocation7 + $0xaf0] sm:$0xf]  ;;  %v11935_v7 = vld [vmem:[#allocation7 + $0xad0] sm:$0xf0]  ;;  %v9380_v63 = vld [vmem:[#allocation7 + $0x888] sm:$0xf] }
 0x125   : > { %v9689_v29 = vor.u32 %v11942_v28, %v9688_v15  ;;  %3231 = vmatpush.bf16.msrb.mxu1 %v9437_v13  ;;  %v9157_v13 = vor.u32 %v11809_v61, %v9156_v59  ;;  %v11865_v15 = vld [vmem:[#allocation7 + $0x8a0] sm:$0xf0]  ;;  %v12896_v28 = vld [vmem:[#allocation5] sm:$0xf]  ;;  %v11858_v61 = vld [vmem:[#allocation7 + $0x868] sm:$0xf0] }
 0x126   : > { %3248 = vmatpush.bf16.msrb.mxu2 %v9717_v51  ;;  %v9661_v51 = vor.u32 %v11935_v7, %v9660_v50  ;;  %v9381_v35 = vor.u32 %v11865_v15, %v9380_v63  ;;  %v9352_v50 = vld [vmem:[#allocation7 + $0x850] sm:$0xf] }
 0x127   : > { %3214 = vmatpush.bf16.msrb.mxu0 %v9157_v13  ;;  %v12910_v13 = vperm.slane %v12896_v28, 1  ;;  %v9353_v15 = vor.u32 %v11858_v61, %v9352_v50  ;;  %v9100_v50 = vld [vmem:[#allocation7 + $0x658] sm:$0xf] }
 0x129   : > { %3232 = vmatpush.bf16.msrb.mxu1 %v9409_v46  ;;  %v11802_v46 = vld [vmem:[#allocation7 + $0x6a8] sm:$0xf0] }
 0x12a   : > { %v12864_v20 = vpop.f32.mrf.mxu2  ;;  %3249 = vmatpush.bf16.msrb.mxu2 %v9689_v29  ;;  %v9829_v29 = vor.u32 %v11977_v11, %v9828_v9  ;;  %v9129_v59 = vor.u32 %v11802_v46, %v9128_v37  ;;  %v794_v37 = vadd.f32 %v12828_v53, %v12812_v30  ;;  %v9800_v53 = vld [vmem:[#allocation7 + $0xbd0] sm:$0xf] }
 0x12b   : > { %v12866_v21 = vpop.f32.mrf.mxu3  ;;  %v12868_v22 = vpop.f32.mrf.mxu0 }
 0x12c   : > { %v12870_v0 = vpop.f32.mrf.mxu1  ;;  %3271 = vmatpush.bf16.msrb.mxu3 %v9829_v29  ;;  %v1335_v7 = vadd.f32 %v12868_v22, %v12836_v58  ;;  %v9604_v29 = vld [vmem:[#allocation7 + $0xa48] sm:$0xf]  ;;  %v11921_v58 = vld [vmem:[#allocation7 + $0xa60] sm:$0xf0]  ;;  %v789_v22 = vadd.f32 %v12820_v40, %v12800_v25  ;;  %3215 = vmatpush.bf16.msrb.mxu0 %v9129_v59  ;;  %v11795_v25 = vld [vmem:[#allocation7 + $0x670] sm:$0xf0] }
 0x12d   : > { %3233 = vmatpush.bf16.msrb.mxu1 %v9381_v35  ;;  %v1336_v63 = vadd.f32 %v12870_v0, %v12838_v60  ;;  %v808_v35 = vadd.f32 %v12822_v42, %v12802_v47  ;;  %v827_v60 = vadd.f32 %v12824_v43, %v12804_v1  ;;  %v846_v0 = vadd.f32 %v12826_v44, %v12806_v2  ;;  %v9324_v40 = vld [vmem:[#allocation7 + $0x818] sm:$0xf]  ;;  %v11851_v43 = vld [vmem:[#allocation7 + $0x830] sm:$0xf0]  ;;  %v11970_v59 = vld [vmem:[#allocation7 + $0xbe8] sm:$0xf0] }
 0x12e   : > { %3250 = vmatpush.bf16.msrb.mxu2 %v9661_v51  ;;  %v12903_v51 = vperm.slane %v12896_v28, 0  ;;  %v813_v47 = vadd.f32 %v12830_v55, %v12814_v31  ;;  %v832_v42 = vadd.f32 %v12832_v56, %v12816_v32  ;;  %v9101_v1 = vor.u32 %v11795_v25, %v9100_v50  ;;  %v9772_v25 = vld [vmem:[#allocation7 + $0xb98] sm:$0xf] }
 0x12f   : > { %v851_v2 = vadd.f32 %v12834_v57, %v12818_v33  ;;  %v1088_v30 = vadd.f32 %v12842_v8, %v789_v22  ;;  %v9325_v61 = vor.u32 %v11851_v43, %v9324_v40  ;;  %v1089_v31 = vadd.f32 %v12846_v4, %v808_v35  ;;  %v11963_v40 = vld [vmem:[#allocation7 + $0xbb0] sm:$0xf0] }
 0x130   : > { %v1090_v32 = vadd.f32 %v12848_v5, %v827_v60  ;;  %v9801_v56 = vor.u32 %v11970_v59, %v9800_v53  ;;  %3216 = vmatpush.bf16.msrb.mxu0 %v9101_v1  ;;  %v12936_v57 = vperm.slane %v12896_v28, 2  ;;  %v12942_v35 = vperm.slane %v12896_v28, 3 }
 0x131   : > { %3234 = vmatpush.bf16.msrb.mxu1 %v9353_v15  ;;  %v9773_v43 = vor.u32 %v11963_v40, %v9772_v25 }
 0x132   : > { %v12872_v23 = vpop.f32.mrf.mxu2  ;;  %3251 = vmatpush.bf16.msrb.mxu2 %v9633_v38  ;;  %v9605_v38 = vor.u32 %v11921_v58, %v9604_v29  ;;  %v9072_v29 = vld [vmem:[#allocation7 + $0x620] sm:$0xf]  ;;  %v11788_v58 = vld [vmem:[#allocation7 + $0x638] sm:$0xf0]  ;;  %3272 = vmatpush.bf16.msrb.mxu3 %v9801_v56  ;;  %v11834_v56 = vld [vmem:[#allocation7 + $0x7ac] sm:$0xf] }
 0x133   : > { %v12874_v24 = vpop.f32.mrf.mxu3  ;;  %v12876_v26 = vpop.f32.mrf.mxu0  ;;  %v1337_v15 = vadd.f32 %v12872_v23, %v12840_v62  ;;  %v9296_v62 = vld [vmem:[#allocation7 + $0x7e0] sm:$0xf]  ;;  %v11844_v23 = vld [vmem:[#allocation7 + $0x7f8] sm:$0xf0] }
 0x134   : > { %v12878_v27 = vpop.f32.mrf.mxu1  ;;  %v1338_v4 = vadd.f32 %v12874_v24, %v12844_v3  ;;  %v1339_v5 = vadd.f32 %v12876_v26, %v1088_v30  ;;  %v9297_v3 = vor.u32 %v11844_v23, %v9296_v62  ;;  %v9548_v24 = vld [vmem:[#allocation7 + $0x9d8] sm:$0xf]  ;;  %v1091_v26 = vadd.f32 %v12850_v6, %v846_v0  ;;  %v11907_v30 = vld [vmem:[#allocation7 + $0x9f0] sm:$0xf0] }
 0x135   : > { %3235 = vmatpush.bf16.msrb.mxu1 %v9325_v61  ;;  %v12954_v61 = vadd.f32 %v12864_v20, %v832_v42 }
 0x136   : > { %3252 = vmatpush.bf16.msrb.mxu2 %v9605_v38  ;;  %3273 = vmatpush.bf16.msrb.mxu3 %v9773_v43 }
 0x139   : > { %3236 = vmatpush.bf16.msrb.mxu1 %v9297_v3 }
 0x13a   : > { %v12880_v41 = vpop.f32.mrf.mxu2 }
 0x13b   : > { %v12882_v48 = vpop.f32.mrf.mxu3  ;;  %v12884_v49 = vpop.f32.mrf.mxu0  ;;  %v1341_v20 = vadd.f32 %v12880_v41, %v1090_v32 }
 0x13c   : > { %v12886_v54 = vpop.f32.mrf.mxu1 }
 0x13d   : > { %v1344_v62 = vadd.f32 %v12886_v54, %v12854_v12 }
 0x142   : > { %v12888_v36 = vpop.f32.mrf.mxu2 }
 0x143   : > { %v12890_v39 = vpop.f32.mrf.mxu3  ;;  %v12892_v45 = vpop.f32.mrf.mxu0  ;;  %v1345_v3 = vadd.f32 %v12888_v36, %v12856_v14  ;;  %v9830_v36 = vld [vmem:[#allocation7 + $0xc24] sm:$0xf0] }
 0x144   : > { %v12894_v52 = vpop.f32.mrf.mxu1  ;;  %v1346_v12 = vadd.f32 %v12890_v39, %v12860_v18  ;;  %v11820_v39 = vld [vmem:[#allocation7 + $0x73c] sm:$0xf] }
 0x145   : > { %15289 = vst [vmem:[#allocation19_spill] sm:$0xff] %v12894_v52 }
 0x14a   : > { %v12900_v52 = vpop.f32.mrf.mxu2 }
 0x14b   : > { %v12907_v9 = vpop.f32.mrf.mxu3  ;;  %v1515_v11 = vpop.f32.mrf.mxu0 }
 0x14c   : > { %v1582_v17 = vadd.f32 %v1515_v11, %v1335_v7  ;;  %v1534_v34 = vpop.f32.mrf.mxu1  ;;  %v11914_v11 = vld [vmem:[#allocation7 + $0xa28] sm:$0xf0] }
 0x14d   : > { %v1583_v46 = vadd.f32 %v1534_v34, %v1336_v63  ;;  %v9576_v63 = vld [vmem:[#allocation7 + $0xa10] sm:$0xf]  ;;  %v1340_v34 = vadd.f32 %v12878_v27, %v1089_v31  ;;  %v1096_v27 = vadd.f32 %v12858_v16, %v794_v37  ;;  %v9744_v31 = vld [vmem:[#allocation7 + $0xb60] sm:$0xf]  ;;  %v12959_v16 = vadd.f32 %v12866_v21, %v851_v2 }
 0x14e   : > { %v1608_v7 = vadd.f32 %v12903_v51, %v1582_v17  ;;  %v9577_v8 = vor.u32 %v11914_v11, %v9576_v63  ;;  %v9073_v17 = vor.u32 %v11788_v58, %v9072_v29  ;;  %v9549_v63 = vor.u32 %v11907_v30, %v9548_v24  ;;  %v9270_v11 = vld [vmem:[#allocation7 + $0x7c4] sm:$0xf0]  ;;  %v9520_v58 = vld [vmem:[#allocation7 + $0x9a0] sm:$0xf]  ;;  %v11946_v30 = vld [vmem:[#allocation7 + $0xb2c] sm:$0xf] }
 0x14f   : > { %v1609_v44 = vadd.f32 %v12910_v13, %v1583_v46  ;;  %v9494_v29 = vld [vmem:[#allocation7 + $0x984] sm:$0xf0]  ;;  %v1343_v21 = vadd.f32 %v12884_v49, %v12852_v10 }
 0x150   : > { %v1624_v55 = vmax.f32 %v1608_v7, 0.0  ;;  %3253 = vmatpush.bf16.msrb.mxu2 %v9577_v8  ;;  %3217 = vmatpush.bf16.msrb.mxu0 %v9073_v17  ;;  %v9273_v8 = vor.u32 %v11834_v56, %v9270_v11  ;;  %v11827_v17 = vld [vmem:[#allocation7 + $0x774] sm:$0xf] }
 0x151   : > { %v1625_v33 = vmax.f32 %v1609_v44, 0.0  ;;  %v12950_v44 = vadd.f32 %v12862_v19, %v813_v47 }
 0x152   : > { %v1553_v22 = vpop.f32.mrf.mxu2 }
 0x153   : > { %v12945_v38 = vpack.c.bf16 %v1625_v33, %v1624_v55  ;;  %v1584_v60 = vadd.f32 %v1553_v22, %v1337_v15  ;;  %v1572_v46 = vpop.f32.mrf.mxu3  ;;  %v1517_v50 = vpop.f32.mrf.mxu0  ;;  %v11956_v55 = vld [vmem:[#allocation7 + $0xb78] sm:$0xf0]  ;;  %v11890_v15 = vld [vmem:[#allocation7 + $0x96c] sm:$0xf] }
 0x154   : > { %v1585_v28 = vadd.f32 %v1572_v46, %v1338_v4  ;;  %v1586_v7 = vadd.f32 %v1517_v50, %v1339_v5  ;;  %v1536_v1 = vpop.f32.mrf.mxu1  ;;  %v9745_v47 = vor.u32 %v11956_v55, %v9744_v31  ;;  %3254 = vmatpush.bf16.msrb.mxu2 %v9549_v63  ;;  %v1342_v4 = vadd.f32 %v12882_v48, %v1091_v26  ;;  %v11900_v22 = vld [vmem:[#allocation7 + $0x9b8] sm:$0xf0]  ;;  %v9466_v46 = vld [vmem:[#allocation7 + $0x94c] sm:$0xf0] }
 0x155   : > { %v1610_v53 = vadd.f32 %v12936_v57, %v1584_v60  ;;  %v1587_v59 = vadd.f32 %v1536_v1, %v1340_v34  ;;  %v9497_v5 = vor.u32 %v11890_v15, %v9494_v29  ;;  %3286 = vmatpush.bf16.msra.mxu0 %v9273_v8  ;;  %v9521_v32 = vor.u32 %v11900_v22, %v9520_v58  ;;  %v9242_v34 = vld [vmem:[#allocation7 + $0x78c] sm:$0xf0]  ;;  %v11883_v60 = vld [vmem:[#allocation7 + $0x934] sm:$0xf]  ;;  %v9438_v15 = vld [vmem:[#allocation7 + $0x914] sm:$0xf0] }
 0x156   : > { %v1611_v6 = vadd.f32 %v12942_v35, %v1585_v28  ;;  %v1612_v0 = vadd.f32 %v12903_v51, %v1586_v7  ;;  %3274 = vmatpush.bf16.msrb.mxu3 %v9745_v47  ;;  %v9245_v49 = vor.u32 %v11827_v17, %v9242_v34  ;;  %v9469_v40 = vor.u32 %v11883_v60, %v9466_v46  ;;  %v9690_v58 = vld [vmem:[#allocation7 + $0xb0c] sm:$0xf0]  ;;  %v11813_v22 = vld [vmem:[#allocation7 + $0x704] sm:$0xf]  ;;  %v9186_v17 = vld [vmem:[#allocation7 + $0x71c] sm:$0xf0] }
 0x157   : > { %v1626_v19 = vmax.f32 %v1610_v53, 0.0  ;;  %v1613_v37 = vadd.f32 %v12910_v13, %v1587_v59  ;;  %3305 = vmatpush.bf16.msra.mxu1 %v9497_v5  ;;  %v9718_v53 = vld [vmem:[#allocation7 + $0xb44] sm:$0xf0]  ;;  %v11974_v59 = vld [vmem:[#allocation7 + $0xc0c] sm:$0xf]  ;;  %v2105_v63 = vunpack.c.l.b16 %v12945_v38  ;;  %v2106_v31 = vunpack.c.h.b16 %v12945_v38 }
 0x158   : > { %v1627_v42 = vmax.f32 %v1611_v6, 0.0  ;;  %v1628_v33 = vmax.f32 %v1612_v0, 0.0  ;;  %3255 = vmatpush.bf16.msrb.mxu2 %v9521_v32  ;;  %v1347_v6 = vadd.f32 %v12892_v45, %v1096_v27  ;;  %v9721_v18 = vor.u32 %v11946_v30, %v9718_v53 }
 0x159   : > { %v1629_v2 = vmax.f32 %v1613_v37, 0.0  ;;  %3287 = vmatpush.bf16.msra.mxu0 %v9245_v49  ;;  %v11876_v37 = vld [vmem:[#allocation7 + $0x8fc] sm:$0xf]  ;;  %v9833_v27 = vor.u32 %v11974_v59, %v9830_v36  ;;  %v9189_v60 = vor.u32 %v11813_v22, %v9186_v17  ;;  %v11967_v36 = vld [vmem:[#allocation7 + $0xbd4] sm:$0xf] }
 0x15a   : > { %v12968_v23 = vpack.c.bf16 %v1627_v42, %v1626_v19  ;;  %v1555_v41 = vpop.f32.mrf.mxu2  ;;  %v9214_v19 = vld [vmem:[#allocation7 + $0x754] sm:$0xf0]  ;;  %v15290_v42 = vld [vmem:[#allocation19_spill] sm:$0xff] }
 0x15b   : > { %v1642_v48 = vpack.c.bf16 %v1629_v2, %v1628_v33  ;;  %v1588_v50 = vadd.f32 %v1555_v41, %v1341_v20  ;;  %v1574_v25 = vpop.f32.mrf.mxu3  ;;  %v1520_v10 = vpop.f32.mrf.mxu0  ;;  %3306 = vmatpush.bf16.msra.mxu1 %v9469_v40  ;;  %v9217_v11 = vor.u32 %v11820_v39, %v9214_v19  ;;  %v11939_v20 = vld [vmem:[#allocation7 + $0xaf4] sm:$0xf]  ;;  %v1348_v33 = vadd.f32 %v15290_v42, %v12950_v44  ;;  %v9802_v39 = vld [vmem:[#allocation7 + $0xbec] sm:$0xf0]  ;;  %v11925_v42 = vld [vmem:[#allocation7 + $0xa84] sm:$0xf] }
 0x15c   : > { %v1589_v54 = vadd.f32 %v1574_v25, %v1342_v4  ;;  %v1590_v24 = vadd.f32 %v1520_v10, %v1343_v21  ;;  %v1539_v26 = vpop.f32.mrf.mxu1  ;;  %3324 = vmatpush.bf16.msra.mxu2 %v9721_v18  ;;  %3347 = vmatpush.bf16.msra.mxu3 %v9833_v27  ;;  %v9441_v2 = vor.u32 %v11876_v37, %v9438_v15 }
 0x15d   : > { %v2109_v28 = vunpack.c.l.b16 %v1642_v48  ;;  %v2110_v7 = vunpack.c.h.b16 %v1642_v48  ;;  %v1614_v1 = vadd.f32 %v12936_v57, %v1588_v50  ;;  %v1591_v43 = vadd.f32 %v1539_v26, %v1344_v62  ;;  %3288 = vmatpush.bf16.msra.mxu0 %v9217_v11 }
 0x15e   : > { %v1615_v0 = vadd.f32 %v12942_v35, %v1589_v54  ;;  %v1616_v14 = vadd.f32 %v12903_v51, %v1590_v24  ;;  %v9693_v5 = vor.u32 %v11939_v20, %v9690_v58  ;;  %v2107_v62 = vunpack.c.l.b16 %v12968_v23  ;;  %v9382_v20 = vld [vmem:[#allocation7 + $0x8a4] sm:$0xf0] }
 0x15f   : > { %v1630_v55 = vmax.f32 %v1614_v1, 0.0  ;;  %v1617_v56 = vadd.f32 %v12910_v13, %v1591_v43  ;;  %v12983_v8 = vpack.c.b16 %v2109_v28, %v2105_v63  ;;  %v12985_v29 = vpack.c.b16 %v2110_v7, %v2106_v31  ;;  %3307 = vmatpush.bf16.msra.mxu1 %v9441_v2  ;;  %v9410_v1 = vld [vmem:[#allocation7 + $0x8dc] sm:$0xf0]  ;;  %v11799_v2 = vld [vmem:[#allocation7 + $0x694] sm:$0xf] }
 0x160   : > { %v1631_v47 = vmax.f32 %v1615_v0, 0.0  ;;  %v1632_v45 = vmax.f32 %v1616_v14, 0.0  ;;  %3325 = vmatpush.bf16.msra.mxu2 %v9693_v5  ;;  %v2108_v26 = vunpack.c.h.b16 %v12968_v23  ;;  %v1349_v43 = vadd.f32 %v12900_v52, %v12954_v61  ;;  %v9662_v0 = vld [vmem:[#allocation7 + $0xad4] sm:$0xf0]  ;;  %v9130_v5 = vld [vmem:[#allocation7 + $0x6ac] sm:$0xf0] }
 0x161   : > { %v1633_v38 = vmax.f32 %v1617_v56, 0.0  ;;  %v2132_v54 = vshll.u32 %v12983_v8, 16  ;;  %v2144_v24 = vshll.u32 %v12985_v29, 16  ;;  %3289 = vmatpush.bf16.msra.mxu0 %v9189_v60  ;;  %v2130_v59 = vshrl.u32 %v12983_v8, 16  ;;  %v11960_v60 = vld [vmem:[#allocation7 + $0xb9c] sm:$0xf] }
 0x162   : > { %v1643_v4 = vpack.c.bf16 %v1631_v47, %v1630_v55  ;;  %v1558_v21 = vpop.f32.mrf.mxu2  ;;  %v1350_v23 = vadd.f32 %v12907_v9, %v12959_v16  ;;  %v2142_v52 = vshrl.u32 %v12985_v29, 16  ;;  %v11806_v55 = vld [vmem:[#allocation7 + $0x6cc] sm:$0xf]  ;;  %v9158_v9 = vld [vmem:[#allocation7 + $0x6e4] sm:$0xf0]  ;;  %v9805_v15 = vor.u32 %v11967_v36, %v9802_v39 }
 0x163   : > { %v12988_v41 = vpack.c.bf16 %v1633_v38, %v1632_v45  ;;  %v1592_v32 = vadd.f32 %v1558_v21, %v1345_v3  ;;  %v1577_v44 = vpop.f32.mrf.mxu3  ;;  %v1522_v34 = vpop.f32.mrf.mxu0  ;;  %v2134_v31 = vrot.slane %v2132_v54, 1  ;;  %v2146_v61 = vrot.slane %v2144_v24, 1  ;;  %v11862_v16 = vld [vmem:[#allocation7 + $0x88c] sm:$0xf] }
 0x164   : > { %v2111_v46 = vunpack.c.l.b16 %v1643_v4  ;;  %v2112_v48 = vunpack.c.h.b16 %v1643_v4  ;;  %v1593_v50 = vadd.f32 %v1577_v44, %v1346_v12  ;;  %v1594_v25 = vadd.f32 %v1522_v34, %v1347_v6  ;;  %v1541_v10 = vpop.f32.mrf.mxu1  ;;  %v11869_v12 = vld [vmem:[#allocation7 + $0x8c4] sm:$0xf]  ;;  %v11932_v6 = vld [vmem:[#allocation7 + $0xabc] sm:$0xf]  ;;  %3348 = vmatpush.bf16.msra.mxu3 %v9805_v15  ;;  %v11855_v44 = vld [vmem:[#allocation7 + $0x854] sm:$0xf] }
 0x165   : > { %v1618_v49 = vadd.f32 %v12936_v57, %v1592_v32  ;;  %v1595_v40 = vadd.f32 %v1541_v10, %v1348_v33  ;;  %v9413_v37 = vor.u32 %v11869_v12, %v9410_v1  ;;  %v9665_v47 = vor.u32 %v11932_v6, %v9662_v0  ;;  %v9634_v33 = vld [vmem:[#allocation7 + $0xa9c] sm:$0xf0]  ;;  %v9354_v34 = vld [vmem:[#allocation7 + $0x86c] sm:$0xf0]  ;;  %v11918_v10 = vld [vmem:[#allocation7 + $0xa4c] sm:$0xf] }
 0x166   : > { %v12994_v3 = vpack.c.b16 %v2111_v46, %v2107_v62  ;;  %v1619_v28 = vadd.f32 %v12942_v35, %v1593_v50  ;;  %v1620_v7 = vadd.f32 %v12903_v51, %v1594_v25  ;;  %v13004_v14 = vpack.c.b16 %v2112_v48, %v2108_v26  ;;  %v9102_v1 = vld [vmem:[#allocation7 + $0x674] sm:$0xf0]  ;;  %v11848_v0 = vld [vmem:[#allocation7 + $0x81c] sm:$0xf]  ;;  %v11841_v15 = vld [vmem:[#allocation7 + $0x7e4] sm:$0xf] }
 0x167   : > { %v1634_v30 = vmax.f32 %v1618_v49, 0.0  ;;  %v1621_v53 = vadd.f32 %v12910_v13, %v1595_v40  ;;  %v2113_v38 = vunpack.c.l.b16 %v12988_v41  ;;  %3308 = vmatpush.bf16.msra.mxu1 %v9413_v37  ;;  %3326 = vmatpush.bf16.msra.mxu2 %v9665_v47  ;;  %v2114_v22 = vunpack.c.h.b16 %v12988_v41  ;;  %v9606_v49 = vld [vmem:[#allocation7 + $0xa64] sm:$0xf0]  ;;  %v9774_v40 = vld [vmem:[#allocation7 + $0xbb4] sm:$0xf0] }
 0x168   : > { %v1635_v18 = vmax.f32 %v1619_v28, 0.0  ;;  %v1636_v51 = vmax.f32 %v1620_v7, 0.0  ;;  %v2154_v19 = vshrl.u32 %v12994_v3, 16  ;;  %v2156_v4 = vshll.u32 %v12994_v3, 16 }
 0x169   : > { %v1637_v63 = vmax.f32 %v1621_v53, 0.0  ;;  %v2168_v21 = vshll.u32 %v13004_v14, 16  ;;  %v9161_v48 = vor.u32 %v11806_v55, %v9158_v9  ;;  %v9385_v50 = vor.u32 %v11862_v16, %v9382_v20  ;;  %v9578_v55 = vld [vmem:[#allocation7 + $0xa2c] sm:$0xf0]  ;;  %v9298_v20 = vld [vmem:[#allocation7 + $0x7fc] sm:$0xf0] }
 0x16a   : > { %v13007_v13 = vpack.c.bf16 %v1635_v18, %v1634_v30  ;;  %v1560_v56 = vpop.f32.mrf.mxu2  ;;  %v9637_v25 = vor.u32 %v11925_v42, %v9634_v33  ;;  %v2166_v26 = vshrl.u32 %v13004_v14, 16  ;;  %v9133_v28 = vor.u32 %v11799_v2, %v9130_v5  ;;  %v9276_v5 = vld [vmem:[#allocation7 + $0x7b0] sm:$0xf] }
 0x16b   : > { %v1646_v45 = vpack.c.bf16 %v1637_v63, %v1636_v51  ;;  %v1596_v27 = vadd.f32 %v1560_v56, %v1349_v43  ;;  %v1579_v11 = vpop.f32.mrf.mxu3  ;;  %3290 = vmatpush.bf16.msra.mxu0 %v9161_v48  ;;  %3309 = vmatpush.bf16.msra.mxu1 %v9385_v50  ;;  %v9357_v7 = vor.u32 %v11855_v44, %v9354_v34  ;;  %v2158_v36 = vrot.slane %v2156_v4, 1  ;;  %v11911_v63 = vld [vmem:[#allocation7 + $0xa14] sm:$0xf]  ;;  %v9746_v4 = vld [vmem:[#allocation7 + $0xb7c] sm:$0xf0] }
 0x16c   : > { %v1597_v58 = vadd.f32 %v1579_v11, %v1350_v23  ;;  %v9777_v12 = vor.u32 %v11960_v60, %v9774_v40  ;;  %v2135_v43 = vor.u32 %v2134_v31, %v2130_v59  ;;  %3327 = vmatpush.bf16.msra.mxu2 %v9637_v25  ;;  %v9609_v6 = vor.u32 %v11918_v10, %v9606_v49  ;;  %v9326_v23 = vld [vmem:[#allocation7 + $0x834] sm:$0xf0]  ;;  %v9074_v11 = vld [vmem:[#allocation7 + $0x63c] sm:$0xf0]  ;;  %v9500_v44 = vld [vmem:[#allocation7 + $0x970] sm:$0xf] }
 0x16d   : > { %v2117_v17 = vunpack.c.l.b16 %v1646_v45  ;;  %v2118_v62 = vunpack.c.h.b16 %v1646_v45  ;;  %v1622_v32 = vadd.f32 %v12936_v57, %v1596_v27  ;;  %v2147_v51 = vor.u32 %v2146_v61, %v2142_v52  ;;  %v11785_v52 = vld [vmem:[#allocation7 + $0x624] sm:$0xf]  ;;  %v11894_v34 = vld [vmem:[#allocation7 + $0x988] sm:$0xf0] }
 0x16e   : > { %v1623_v46 = vadd.f32 %v12942_v35, %v1597_v58  ;;  %v11792_v35 = vld [vmem:[#allocation7 + $0x65c] sm:$0xf]  ;;  %v2170_v39 = vrot.slane %v2168_v21, 1  ;;  %3349 = vmatpush.bf16.msra.mxu3 %v9777_v12  ;;  %v2115_v56 = vunpack.c.l.b16 %v13007_v13  ;;  %v2116_v37 = vunpack.c.h.b16 %v13007_v13  ;;  %v11953_v58 = vld [vmem:[#allocation7 + $0xb64] sm:$0xf] }
 0x16f   : > { %v13016_v54 = vpack.c.b16 %v2117_v17, %v2113_v38  ;;  %v13018_v24 = vpack.c.b16 %v2118_v62, %v2114_v22  ;;  %v1638_v41 = vmax.f32 %v1622_v32, 0.0  ;;  %3291 = vmatpush.bf16.msra.mxu0 %v9133_v28  ;;  %3310 = vmatpush.bf16.msra.mxu1 %v9357_v7  ;;  %v9105_v16 = vor.u32 %v11792_v35, %v9102_v1  ;;  %v11904_v38 = vld [vmem:[#allocation7 + $0x9dc] sm:$0xf]  ;;  %v9550_v21 = vld [vmem:[#allocation7 + $0x9f4] sm:$0xf0] }
 0x170   : > { %v1639_v57 = vmax.f32 %v1623_v46, 0.0  ;;  %v9329_v45 = vor.u32 %v11848_v0, %v9326_v23  ;;  %3328 = vmatpush.bf16.msra.mxu2 %v9609_v6  ;;  %v9581_v13 = vor.u32 %v11911_v63, %v9578_v55  ;;  %v9749_v2 = vor.u32 %v11953_v58, %v9746_v4  ;;  %v11838_v22 = vld [vmem:[#allocation7 + $0x7c8] sm:$0xf0]  ;;  %v9248_v28 = vld [vmem:[#allocation7 + $0x778] sm:$0xf] }
 0x171   : > { %v2137_v30 = vshll.u32 %v13016_v54, 16  ;;  %v2149_v53 = vshll.u32 %v13018_v24, 16  ;;  %v9077_v32 = vor.u32 %v11785_v52, %v9074_v11  ;;  %v2159_v60 = vor.u32 %v2158_v36, %v2154_v19  ;;  %v9472_v12 = vld [vmem:[#allocation7 + $0x938] sm:$0xf]  ;;  %v11887_v35 = vld [vmem:[#allocation7 + $0x950] sm:$0xf0] }
 0x172   : > { %v1647_v18 = vpack.c.bf16 %v1639_v57, %v1638_v41  ;;  %v2171_v46 = vor.u32 %v2170_v39, %v2166_v26  ;;  %3350 = vmatpush.bf16.msra.mxu3 %v9749_v2  ;;  %v9301_v25 = vor.u32 %v11841_v15, %v9298_v20  ;;  %v9553_v10 = vor.u32 %v11904_v38, %v9550_v21  ;;  %v11897_v41 = vld [vmem:[#allocation7 + $0x9a4] sm:$0xf]  ;;  %v9522_v57 = vld [vmem:[#allocation7 + $0x9bc] sm:$0xf0]  ;;  %v11831_v26 = vld [vmem:[#allocation7 + $0x790] sm:$0xf0] }
 0x173   : > { %v13027_v59 = vrot.slane %v2137_v30, 1  ;;  %v13029_v31 = vrot.slane %v2149_v53, 1  ;;  %3292 = vmatpush.bf16.msra.mxu0 %v9105_v16  ;;  %3311 = vmatpush.bf16.msra.mxu1 %v9329_v45  ;;  %v9277_v49 = vor.u32 %v11838_v22, %v9276_v5  ;;  %v9501_v40 = vor.u32 %v11894_v34, %v9500_v44  ;;  %v9724_v1 = vld [vmem:[#allocation7 + $0xb30] sm:$0xf]  ;;  %v11978_v6 = vld [vmem:[#allocation7 + $0xc28] sm:$0xf0] }
 0x174   : > { %v2119_v47 = vunpack.c.l.b16 %v1647_v18  ;;  %v2120_v9 = vunpack.c.h.b16 %v1647_v18  ;;  %3329 = vmatpush.bf16.msra.mxu2 %v9581_v13  ;;  %v9836_v30 = vld [vmem:[#allocation7 + $0xc10] sm:$0xf]  ;;  %v9525_v53 = vor.u32 %v11897_v41, %v9522_v57  ;;  %v9249_v0 = vor.u32 %v11831_v26, %v9248_v28  ;;  %v11824_v39 = vld [vmem:[#allocation7 + $0x758] sm:$0xf0]  ;;  %v9444_v63 = vld [vmem:[#allocation7 + $0x900] sm:$0xf] }
 0x175   : > { %v13033_v61 = vsel %vm434_vm0, %v2135_v43, %v13027_v59  ;;  %v13037_v27 = vsel %vm434_vm0, %v2147_v51, %v13029_v31  ;;  %v11950_v43 = vld [vmem:[#allocation7 + $0xb48] sm:$0xf0]  ;;  %v9473_v23 = vor.u32 %v11887_v35, %v9472_v12  ;;  %v9837_v18 = vor.u32 %v11978_v6, %v9836_v30  ;;  %v9220_v51 = vld [vmem:[#allocation7 + $0x740] sm:$0xf]  ;;  %v11880_v55 = vld [vmem:[#allocation7 + $0x918] sm:$0xf0] }
 0x176   : > { %v13039_v42 = vpack.c.b16 %v2119_v47, %v2115_v56  ;;  %v13041_v33 = vpack.c.b16 %v2120_v9, %v2116_v37  ;;  %3218 = vmatmul.bf16.vlgmr.msrb.gmra.mxu0 %v13033_v61  ;;  %3237 = vmatmul.bf16.vlgmr.msrb.gmra.mxu1 %v13037_v27  ;;  %v9725_v36 = vor.u32 %v11950_v43, %v9724_v1  ;;  %v9696_v56 = vld [vmem:[#allocation7 + $0xaf8] sm:$0xf]  ;;  %v11943_v37 = vld [vmem:[#allocation7 + $0xb10] sm:$0xf0]  ;;  %v2177_v47 = vshrl.u32 %v13016_v54, 16 }
 0x177   : > { %3293 = vmatpush.bf16.msra.mxu0 %v9077_v32  ;;  %3312 = vmatpush.bf16.msra.mxu1 %v9301_v25  ;;  %v2180_v9 = vshrl.u32 %v13018_v24, 16  ;;  %v9221_v16 = vor.u32 %v11824_v39, %v9220_v51  ;;  %v9445_v45 = vor.u32 %v11880_v55, %v9444_v63  ;;  %v9192_v52 = vld [vmem:[#allocation7 + $0x708] sm:$0xf]  ;;  %v9697_v15 = vor.u32 %v11943_v37, %v9696_v56  ;;  %v11817_v20 = vld [vmem:[#allocation7 + $0x720] sm:$0xf0] }
 0x178   : > { %v2161_v17 = vshll.u32 %v13039_v42, 16  ;;  %v2173_v62 = vshll.u32 %v13041_v33, 16  ;;  %3330 = vmatpush.bf16.msra.mxu2 %v9553_v10  ;;  %v13067_v13 = vor.u32 %v2177_v47, %v13027_v59  ;;  %v9416_v38 = vld [vmem:[#allocation7 + $0x8c8] sm:$0xf]  ;;  %v11873_v58 = vld [vmem:[#allocation7 + $0x8e0] sm:$0xf0]  ;;  %v9193_v59 = vor.u32 %v11817_v20, %v9192_v52 }
 0x179   : > { %v13070_v11 = vor.u32 %v2180_v9, %v13029_v31  ;;  %v9668_v4 = vld [vmem:[#allocation7 + $0xac0] sm:$0xf]  ;;  %v11936_v21 = vld [vmem:[#allocation7 + $0xad8] sm:$0xf0]  ;;  %v9808_v2 = vld [vmem:[#allocation7 + $0xbd8] sm:$0xf]  ;;  %v9417_v31 = vor.u32 %v11873_v58, %v9416_v38 }
 0x17a   : > { %v13049_v48 = vrot.slane %v2161_v17, 1  ;;  %v13051_v50 = vrot.slane %v2173_v62, 1  ;;  %v11971_v5 = vld [vmem:[#allocation7 + $0xbf0] sm:$0xf0]  ;;  %v2183_v22 = vshrl.u32 %v13039_v42, 16  ;;  %v9669_v32 = vor.u32 %v11936_v21, %v9668_v4 }
 0x17b   : > { %3362 = vmatpush.bf16.msrb.mxu0 %v9277_v49  ;;  %3381 = vmatpush.bf16.msrb.mxu1 %v9501_v40  ;;  %v9809_v17 = vor.u32 %v11971_v5, %v9808_v2  ;;  %v9164_v62 = vld [vmem:[#allocation7 + $0x6d0] sm:$0xf]  ;;  %v11810_v44 = vld [vmem:[#allocation7 + $0x6e8] sm:$0xf0]  ;;  %v9640_v25 = vld [vmem:[#allocation7 + $0xa88] sm:$0xf] }
 0x17c   : > { %v13055_v7 = vsel %vm434_vm0, %v2159_v60, %v13049_v48  ;;  %v13059_v19 = vsel %vm434_vm0, %v2171_v46, %v13051_v50  ;;  %3331 = vmatpush.bf16.msra.mxu2 %v9525_v53  ;;  %v9388_v34 = vld [vmem:[#allocation7 + $0x890] sm:$0xf]  ;;  %v11866_v60 = vld [vmem:[#allocation7 + $0x8a8] sm:$0xf0]  ;;  %v2186_v46 = vshrl.u32 %v13041_v33, 16  ;;  %v13077_v49 = vor.u32 %v2183_v22, %v13049_v48 }
 0x17d   : > { %3256 = vmatmul.bf16.vlgmr.msrb.gmra.mxu2 %v13055_v7  ;;  %9854 = vmatmul.msk.bf16.vlgmr.msrb.gmra.mxu3 %vm3203_vm5, %v13059_v19  ;;  %v11929_v10 = vld [vmem:[#allocation7 + $0xaa0] sm:$0xf0]  ;;  %v9165_v41 = vor.u32 %v11810_v44, %v9164_v62  ;;  %v9389_v57 = vor.u32 %v11866_v60, %v9388_v34  ;;  %v9136_v28 = vld [vmem:[#allocation7 + $0x698] sm:$0xf]  ;;  %v11803_v12 = vld [vmem:[#allocation7 + $0x6b0] sm:$0xf0] }
 0x17e   : > { %3423 = vmatpush.bf16.msrb.mxu3 %v9837_v18  ;;  %v13080_v40 = vor.u32 %v2186_v46, %v13051_v50  ;;  %v9641_v26 = vor.u32 %v11929_v10, %v9640_v25  ;;  %v9360_v35 = vld [vmem:[#allocation7 + $0x858] sm:$0xf]  ;;  %v11859_v1 = vld [vmem:[#allocation7 + $0x870] sm:$0xf0]  ;;  %v9612_v48 = vld [vmem:[#allocation7 + $0xa50] sm:$0xf]  ;;  %v9137_v53 = vor.u32 %v11803_v12, %v9136_v28 }
 0x17f   : > { %3363 = vmatpush.bf16.msrb.mxu0 %v9249_v0  ;;  %3382 = vmatpush.bf16.msrb.mxu1 %v9473_v23  ;;  %v11922_v43 = vld [vmem:[#allocation7 + $0xa68] sm:$0xf0]  ;;  %v9780_v30 = vld [vmem:[#allocation7 + $0xba0] sm:$0xf]  ;;  %v11964_v50 = vld [vmem:[#allocation7 + $0xbb8] sm:$0xf0]  ;;  %v9361_v6 = vor.u32 %v11859_v1, %v9360_v35 }
 0x180   : > { %3400 = vmatpush.bf16.msrb.mxu2 %v9725_v36  ;;  %v9781_v0 = vor.u32 %v11964_v50, %v9780_v30  ;;  %v9108_v23 = vld [vmem:[#allocation7 + $0x660] sm:$0xf]  ;;  %v9613_v18 = vor.u32 %v11922_v43, %v9612_v48  ;;  %v11796_v51 = vld [vmem:[#allocation7 + $0x678] sm:$0xf0]  ;;  %v9584_v63 = vld [vmem:[#allocation7 + $0xa18] sm:$0xf] }
 0x181   : > { %v9332_v36 = vld [vmem:[#allocation7 + $0x820] sm:$0xf]  ;;  %v11852_v39 = vld [vmem:[#allocation7 + $0x838] sm:$0xf0]  ;;  %v11915_v55 = vld [vmem:[#allocation7 + $0xa30] sm:$0xf0]  ;;  %v9109_v56 = vor.u32 %v11796_v51, %v9108_v23 }
 0x182   : > { %3424 = vmatpush.bf16.msrb.mxu3 %v9809_v17  ;;  %v9333_v37 = vor.u32 %v11852_v39, %v9332_v36  ;;  %v9080_v47 = vld [vmem:[#allocation7 + $0x628] sm:$0xf]  ;;  %v9585_v9 = vor.u32 %v11915_v55, %v9584_v63  ;;  %v11845_v52 = vld [vmem:[#allocation7 + $0x800] sm:$0xf0]  ;;  %v11908_v20 = vld [vmem:[#allocation7 + $0x9f8] sm:$0xf0] }
 0x183   : > { %3364 = vmatpush.bf16.msrb.mxu0 %v9221_v16  ;;  %3383 = vmatpush.bf16.msrb.mxu1 %v9445_v45  ;;  %v11789_v16 = vld [vmem:[#allocation7 + $0x640] sm:$0xf0]  ;;  %v9304_v45 = vld [vmem:[#allocation7 + $0x7e8] sm:$0xf]  ;;  %v11835_v4 = vld [vmem:[#allocation7 + $0x7b4] sm:$0xf] }
 0x184   : > { %3401 = vmatpush.bf16.msrb.mxu2 %v9697_v15  ;;  %v9556_v15 = vld [vmem:[#allocation7 + $0x9e0] sm:$0xf]  ;;  %v9752_v38 = vld [vmem:[#allocation7 + $0xb68] sm:$0xf]  ;;  %v11957_v58 = vld [vmem:[#allocation7 + $0xb80] sm:$0xf0]  ;;  %v9081_v21 = vor.u32 %v11789_v16, %v9080_v47  ;;  %v9305_v2 = vor.u32 %v11845_v52, %v9304_v45 }
 0x185   : > { %v9753_v5 = vor.u32 %v11957_v58, %v9752_v38  ;;  %v9278_v22 = vld [vmem:[#allocation7 + $0x7cc] sm:$0xf0]  ;;  %v9557_v17 = vor.u32 %v11908_v20, %v9556_v15  ;;  %v11901_v44 = vld [vmem:[#allocation7 + $0x9c0] sm:$0xf0]  ;;  %v11828_v34 = vld [vmem:[#allocation7 + $0x77c] sm:$0xf] }
 0x186   : > { %3223 = vmatmul.bf16.gmra.mxu0 %v13067_v13  ;;  %3242 = vmatmul.bf16.gmra.mxu1 %v13070_v11  ;;  %v9281_v62 = vor.u32 %v11835_v4, %v9278_v22  ;;  %v9250_v60 = vld [vmem:[#allocation7 + $0x794] sm:$0xf0]  ;;  %v11884_v25 = vld [vmem:[#allocation7 + $0x93c] sm:$0xf]  ;;  %v11947_v28 = vld [vmem:[#allocation7 + $0xb34] sm:$0xf] }
 0x187   : > { %3365 = vmatpush.bf16.msrb.mxu0 %v9193_v59  ;;  %3384 = vmatpush.bf16.msrb.mxu1 %v9417_v31  ;;  %v11891_v59 = vld [vmem:[#allocation7 + $0x974] sm:$0xf]  ;;  %v9502_v31 = vld [vmem:[#allocation7 + $0x98c] sm:$0xf0]  ;;  %v9474_v10 = vld [vmem:[#allocation7 + $0x954] sm:$0xf0] }
 0x188   : > { %3402 = vmatpush.bf16.msrb.mxu2 %v9669_v32  ;;  %3425 = vmatpush.bf16.msrb.mxu3 %v9781_v0  ;;  %v9528_v32 = vld [vmem:[#allocation7 + $0x9a8] sm:$0xf]  ;;  %v9505_v46 = vor.u32 %v11891_v59, %v9502_v31  ;;  %v11975_v12 = vld [vmem:[#allocation7 + $0xc14] sm:$0xf]  ;;  %v9477_v35 = vor.u32 %v11884_v25, %v9474_v10  ;;  %v9838_v48 = vld [vmem:[#allocation7 + $0xc2c] sm:$0xf0] }
 0x189   : > { %v11821_v43 = vld [vmem:[#allocation7 + $0x744] sm:$0xf]  ;;  %v9222_v30 = vld [vmem:[#allocation7 + $0x75c] sm:$0xf0]  ;;  %v9841_v50 = vor.u32 %v11975_v12, %v9838_v48  ;;  %v11814_v36 = vld [vmem:[#allocation7 + $0x70c] sm:$0xf] }
 0x18a   : > { %v11877_v0 = vld [vmem:[#allocation7 + $0x904] sm:$0xf]  ;;  %v9446_v23 = vld [vmem:[#allocation7 + $0x91c] sm:$0xf0]  ;;  %v9194_v39 = vld [vmem:[#allocation7 + $0x724] sm:$0xf0] }
 0x18b   : > { %3366 = vmatpush.bf16.msrb.mxu0 %v9165_v41  ;;  %3385 = vmatpush.bf16.msrb.mxu1 %v9389_v57  ;;  %v9529_v41 = vor.u32 %v11901_v44, %v9528_v32  ;;  %v9253_v57 = vor.u32 %v11828_v34, %v9250_v60  ;;  %v11933_v63 = vld [vmem:[#allocation7 + $0xac4] sm:$0xf]  ;;  %v9670_v55 = vld [vmem:[#allocation7 + $0xadc] sm:$0xf0]  ;;  %v11870_v47 = vld [vmem:[#allocation7 + $0x8cc] sm:$0xf] }
 0x18c   : > { %3403 = vmatpush.bf16.msrb.mxu2 %v9641_v26  ;;  %3426 = vmatpush.bf16.msrb.mxu3 %v9753_v5  ;;  %v9726_v26 = vld [vmem:[#allocation7 + $0xb4c] sm:$0xf0]  ;;  %v9673_v16 = vor.u32 %v11933_v63, %v9670_v55  ;;  %v11968_v45 = vld [vmem:[#allocation7 + $0xbdc] sm:$0xf]  ;;  %v9810_v52 = vld [vmem:[#allocation7 + $0xbf4] sm:$0xf0] }
 0x18d   : > { %3261 = vmatmul.bf16.gmra.mxu2 %v13077_v49  ;;  %9855 = vmatmul.msk.bf16.gmra.mxu3 %vm3203_vm5, %v13080_v40  ;;  %v9729_v1 = vor.u32 %v11947_v28, %v9726_v26  ;;  %v11807_v15 = vld [vmem:[#allocation7 + $0x6d4] sm:$0xf]  ;;  %v9813_v38 = vor.u32 %v11968_v45, %v9810_v52  ;;  %v9166_v58 = vld [vmem:[#allocation7 + $0x6ec] sm:$0xf0]  ;;  %v11926_v5 = vld [vmem:[#allocation7 + $0xa8c] sm:$0xf] }
 0x18e   : > { %v11863_v4 = vld [vmem:[#allocation7 + $0x894] sm:$0xf]  ;;  %v9642_v22 = vld [vmem:[#allocation7 + $0xaa4] sm:$0xf0]  ;;  %v11800_v59 = vld [vmem:[#allocation7 + $0x69c] sm:$0xf] }
 0x18f   : > { %3367 = vmatpush.bf16.msrb.mxu0 %v9137_v53  ;;  %3386 = vmatpush.bf16.msrb.mxu1 %v9361_v6  ;;  %v11940_v53 = vld [vmem:[#allocation7 + $0xafc] sm:$0xf]  ;;  %v9225_v6 = vor.u32 %v11821_v43, %v9222_v30  ;;  %v9138_v31 = vld [vmem:[#allocation7 + $0x6b4] sm:$0xf0]  ;;  %v11919_v60 = vld [vmem:[#allocation7 + $0xa54] sm:$0xf] }
 0x190   : > { %3404 = vmatpush.bf16.msrb.mxu2 %v9613_v18  ;;  %v9698_v18 = vld [vmem:[#allocation7 + $0xb14] sm:$0xf0]  ;;  %v9141_v32 = vor.u32 %v11800_v59, %v9138_v31  ;;  %v11856_v44 = vld [vmem:[#allocation7 + $0x85c] sm:$0xf]  ;;  %v11961_v25 = vld [vmem:[#allocation7 + $0xba4] sm:$0xf] }
 0x191   : > { %v9701_v51 = vor.u32 %v11940_v53, %v9698_v18  ;;  %v9362_v34 = vld [vmem:[#allocation7 + $0x874] sm:$0xf0]  ;;  %v9110_v28 = vld [vmem:[#allocation7 + $0x67c] sm:$0xf0]  ;;  %v11912_v43 = vld [vmem:[#allocation7 + $0xa1c] sm:$0xf] }
 0x192   : > { %v9365_v26 = vor.u32 %v11856_v44, %v9362_v34  ;;  %v9334_v48 = vld [vmem:[#allocation7 + $0x83c] sm:$0xf0]  ;;  %v9586_v30 = vld [vmem:[#allocation7 + $0xa34] sm:$0xf0]  ;;  %v9082_v53 = vld [vmem:[#allocation7 + $0x644] sm:$0xf0] }
 0x193   : > { %3368 = vmatpush.bf16.msrb.mxu0 %v9109_v56  ;;  %3387 = vmatpush.bf16.msrb.mxu1 %v9333_v37  ;;  %v9449_v56 = vor.u32 %v11877_v0, %v9446_v23  ;;  %v9197_v37 = vor.u32 %v11814_v36, %v9194_v39  ;;  %v9589_v0 = vor.u32 %v11912_v43, %v9586_v30  ;;  %v11842_v23 = vld [vmem:[#allocation7 + $0x7ec] sm:$0xf]  ;;  %v11905_v36 = vld [vmem:[#allocation7 + $0x9e4] sm:$0xf]  ;;  %v9558_v39 = vld [vmem:[#allocation7 + $0x9fc] sm:$0xf0] }
 0x194   : > { %3405 = vmatpush.bf16.msrb.mxu2 %v9585_v9  ;;  %v9418_v9 = vld [vmem:[#allocation7 + $0x8e4] sm:$0xf0]  ;;  %v11954_v63 = vld [vmem:[#allocation7 + $0xb6c] sm:$0xf]  ;;  %v9508_v45 = vld [vmem:[#allocation7 + $0x978] sm:$0xf] }
 0x195   : > { %v9421_v20 = vor.u32 %v11870_v47, %v9418_v9  ;;  %v9754_v55 = vld [vmem:[#allocation7 + $0xb84] sm:$0xf0]  ;;  %v9561_v47 = vor.u32 %v11905_v36, %v9558_v39  ;;  %v11895_v52 = vld [vmem:[#allocation7 + $0x990] sm:$0xf0]  ;;  %v9424_v43 = vld [vmem:[#allocation7 + $0x8d0] sm:$0xf] }
 0x196   : > { %3294 = vmatmul.bf16.vlgmr.msra.gmra.mxu0 %v13033_v61  ;;  %3313 = vmatmul.bf16.vlgmr.msra.gmra.mxu1 %v13037_v27  ;;  %v9757_v9 = vor.u32 %v11954_v63, %v9754_v55  ;;  %v11979_v34 = vld [vmem:[#allocation7 + $0xc30] sm:$0xf0]  ;;  %v11874_v30 = vld [vmem:[#allocation7 + $0x8e8] sm:$0xf0]  ;;  %v9172_v36 = vld [vmem:[#allocation7 + $0x6d8] sm:$0xf] }
 0x197   : > { %3369 = vmatpush.bf16.msrb.mxu0 %v9081_v21  ;;  %3388 = vmatpush.bf16.msrb.mxu1 %v9305_v2  ;;  %v9169_v21 = vor.u32 %v11807_v15, %v9166_v58  ;;  %v9390_v2 = vld [vmem:[#allocation7 + $0x8ac] sm:$0xf0]  ;;  %v9530_v58 = vld [vmem:[#allocation7 + $0x9c4] sm:$0xf0]  ;;  %v11811_v63 = vld [vmem:[#allocation7 + $0x6f0] sm:$0xf0] }
 0x198   : > { %3406 = vmatpush.bf16.msrb.mxu2 %v9557_v17  ;;  %v9645_v17 = vor.u32 %v11926_v5, %v9642_v22  ;;  %v11888_v5 = vld [vmem:[#allocation7 + $0x958] sm:$0xf0]  ;;  %v9396_v55 = vld [vmem:[#allocation7 + $0x898] sm:$0xf]  ;;  %vm8372_vm0 = vcmask 72704  }
 0x19b   : > { %3438 = vmatpush.bf16.msra.mxu0 %v9281_v62  ;;  %3457 = vmatpush.bf16.msra.mxu1 %v9505_v46  ;;  %v9393_v62 = vor.u32 %v11863_v4, %v9390_v2  ;;  %v9614_v46 = vld [vmem:[#allocation7 + $0xa6c] sm:$0xf0]  ;;  %v9256_v4 = vld [vmem:[#allocation7 + $0x780] sm:$0xf] }
 0x19c   : > { %3407 = vmatpush.bf16.msrb.mxu2 %v9529_v41  ;;  %v9617_v10 = vor.u32 %v11919_v60, %v9614_v46  ;;  %v9782_v41 = vld [vmem:[#allocation7 + $0xbbc] sm:$0xf0]  ;;  %v9228_v60 = vld [vmem:[#allocation7 + $0x748] sm:$0xf]  ;;  %v11825_v46 = vld [vmem:[#allocation7 + $0x760] sm:$0xf0] }
 0x19d   : > { %3332 = vmatmul.bf16.vlgmr.msra.gmra.mxu2 %v13055_v7  ;;  %9856 = vmatmul.msk.bf16.vlgmr.msra.gmra.mxu3 %vm3203_vm5, %v13059_v19  ;;  %v9785_v12 = vor.u32 %v11961_v25, %v9782_v41  ;;  %v9480_v2 = vld [vmem:[#allocation7 + $0x940] sm:$0xf]  ;;  %v9452_v41 = vld [vmem:[#allocation7 + $0x908] sm:$0xf] }
 0x19e   : > { %3499 = vmatpush.bf16.msra.mxu3 %v9841_v50  ;;  %v11786_v50 = vld [vmem:[#allocation7 + $0x62c] sm:$0xf]  ;;  %v9481_v31 = vor.u32 %v11888_v5, %v9480_v2  ;;  %v11923_v2 = vld [vmem:[#allocation7 + $0xa70] sm:$0xf0]  ;;  %v9788_v5 = vld [vmem:[#allocation7 + $0xba8] sm:$0xf] }
 0x19f   : > { %3439 = vmatpush.bf16.msra.mxu0 %v9253_v57  ;;  %3458 = vmatpush.bf16.msra.mxu1 %v9477_v35  ;;  %v11793_v57 = vld [vmem:[#allocation7 + $0x664] sm:$0xf]  ;;  %v9085_v18 = vor.u32 %v11786_v50, %v9082_v53  ;;  %v9676_v50 = vld [vmem:[#allocation7 + $0xac8] sm:$0xf] }
 0x1a0   : > { %3476 = vmatpush.bf16.msra.mxu2 %v9729_v1  ;;  %v11849_v35 = vld [vmem:[#allocation7 + $0x824] sm:$0xf]  ;;  %v9113_v1 = vor.u32 %v11793_v57, %v9110_v28  ;;  %v9704_v28 = vld [vmem:[#allocation7 + $0xb00] sm:$0xf] }
 0x1a1   : > { %v11881_v57 = vld [vmem:[#allocation7 + $0x920] sm:$0xf0] }
 0x1a2   : > { %3500 = vmatpush.bf16.msra.mxu3 %v9813_v38  ;;  %v11898_v38 = vld [vmem:[#allocation7 + $0x9ac] sm:$0xf]  ;;  %v11937_v53 = vld [vmem:[#allocation7 + $0xae0] sm:$0xf0] }
 0x1a3   : > { %3440 = vmatpush.bf16.msra.mxu0 %v9225_v6  ;;  %3459 = vmatpush.bf16.msra.mxu1 %v9449_v56  ;;  %v9337_v6 = vor.u32 %v11849_v35, %v9334_v48  ;;  %v9284_v56 = vld [vmem:[#allocation7 + $0x7b8] sm:$0xf]  ;;  %v9533_v59 = vor.u32 %v11898_v38, %v9530_v58  ;;  %v9200_v35 = vld [vmem:[#allocation7 + $0x710] sm:$0xf]  ;;  %v11860_v38 = vld [vmem:[#allocation7 + $0x878] sm:$0xf0] }
 0x1a4   : > { %3477 = vmatpush.bf16.msra.mxu2 %v9701_v51  ;;  %v9306_v51 = vld [vmem:[#allocation7 + $0x804] sm:$0xf0] }
 0x1a6   : > { %3299 = vmatmul.bf16.gmra.mxu0 %v13067_v13  ;;  %3318 = vmatmul.bf16.gmra.mxu1 %v13070_v11 }
 0x1a7   : > { %3441 = vmatpush.bf16.msra.mxu0 %v9197_v37  ;;  %3460 = vmatpush.bf16.msra.mxu1 %v9421_v20  ;;  %v9309_v37 = vor.u32 %v11842_v23, %v9306_v51  ;;  %v9509_v20 = vor.u32 %v11895_v52, %v9508_v45  ;;  %v9677_v23 = vor.u32 %v11937_v53, %v9676_v50  ;;  %v11972_v51 = vld [vmem:[#allocation7 + $0xbf8] sm:$0xf0]  ;;  %v9144_v45 = vld [vmem:[#allocation7 + $0x6a0] sm:$0xf]  ;;  %v11958_v50 = vld [vmem:[#allocation7 + $0xb88] sm:$0xf0] }
 0x1a8   : > { %3478 = vmatpush.bf16.msra.mxu2 %v9673_v16  ;;  %3501 = vmatpush.bf16.msra.mxu3 %v9785_v12  ;;  %v11839_v16 = vld [vmem:[#allocation7 + $0x7d0] sm:$0xf0]  ;;  %v11944_v12 = vld [vmem:[#allocation7 + $0xb18] sm:$0xf0] }
 0x1a9   : > { %v9285_v15 = vor.u32 %v11839_v16, %v9284_v56  ;;  %v9705_v48 = vor.u32 %v11944_v12, %v9704_v28  ;;  %v11867_v56 = vld [vmem:[#allocation7 + $0x8b0] sm:$0xf0]  ;;  %v11930_v16 = vld [vmem:[#allocation7 + $0xaa8] sm:$0xf0]  ;;  %v9312_v28 = vld [vmem:[#allocation7 + $0x7f0] sm:$0xf] }
 0x1aa   : > { %v11846_v12 = vld [vmem:[#allocation7 + $0x808] sm:$0xf0]  ;;  %v11836_v53 = vld [vmem:[#allocation7 + $0x7bc] sm:$0xf] }
 0x1ab   : > { %3442 = vmatpush.bf16.msra.mxu0 %v9169_v21  ;;  %3461 = vmatpush.bf16.msra.mxu1 %v9393_v62  ;;  %v11832_v21 = vld [vmem:[#allocation7 + $0x798] sm:$0xf0]  ;;  %v11951_v62 = vld [vmem:[#allocation7 + $0xb50] sm:$0xf0] }
 0x1ac   : > { %3479 = vmatpush.bf16.msra.mxu2 %v9645_v17  ;;  %3502 = vmatpush.bf16.msra.mxu3 %v9757_v9  ;;  %v9257_v22 = vor.u32 %v11832_v21, %v9256_v4  ;;  %v9732_v17 = vld [vmem:[#allocation7 + $0xb38] sm:$0xf]  ;;  %v9648_v9 = vld [vmem:[#allocation7 + $0xa90] sm:$0xf] }
 0x1ad   : > { %3337 = vmatmul.bf16.gmra.mxu2 %v13077_v49  ;;  %9857 = vmatmul.msk.bf16.gmra.mxu3 %vm3203_vm5, %v13080_v40  ;;  %v9733_v44 = vor.u32 %v11951_v62, %v9732_v17  ;;  %v9649_v52 = vor.u32 %v11930_v16, %v9648_v9  ;;  %v9620_v21 = vld [vmem:[#allocation7 + $0xa58] sm:$0xf]  ;;  %v11797_v17 = vld [vmem:[#allocation7 + $0x680] sm:$0xf0]  ;;  %v9482_v16 = vld [vmem:[#allocation7 + $0x95c] sm:$0xf0] }
 0x1af   : > { %3443 = vmatpush.bf16.msra.mxu0 %v9141_v32  ;;  %3462 = vmatpush.bf16.msra.mxu1 %v9365_v26  ;;  %v9844_v32 = vld [vmem:[#allocation7 + $0xc18] sm:$0xf]  ;;  %v9453_v26 = vor.u32 %v11881_v57, %v9452_v41  ;;  %v9088_v41 = vld [vmem:[#allocation7 + $0x630] sm:$0xf]  ;;  %v11790_v57 = vld [vmem:[#allocation7 + $0x648] sm:$0xf0] }
 0x1b0   : > { %3480 = vmatpush.bf16.msra.mxu2 %v9617_v10  ;;  %v9845_v25 = vor.u32 %v11979_v34, %v9844_v32  ;;  %v9229_v10 = vor.u32 %v11825_v46, %v9228_v60  ;;  %v11853_v34 = vld [vmem:[#allocation7 + $0x840] sm:$0xf0]  ;;  %v9592_v60 = vld [vmem:[#allocation7 + $0xa20] sm:$0xf] }
 0x1b3   : > { %3444 = vmatpush.bf16.msra.mxu0 %v9113_v1  ;;  %3463 = vmatpush.bf16.msra.mxu1 %v9337_v6  ;;  %v11818_v1 = vld [vmem:[#allocation7 + $0x728] sm:$0xf0] }
 0x1b4   : > { %3481 = vmatpush.bf16.msra.mxu2 %v9589_v0  ;;  %v9201_v6 = vor.u32 %v11818_v1, %v9200_v35  ;;  %v9425_v0 = vor.u32 %v11874_v30, %v9424_v43  ;;  %v9564_v35 = vld [vmem:[#allocation7 + $0x9e8] sm:$0xf]  ;;  %v11909_v1 = vld [vmem:[#allocation7 + $0xa00] sm:$0xf0]  ;;  %v9760_v30 = vld [vmem:[#allocation7 + $0xb70] sm:$0xf] }
 0x1b5   : > { %v9565_v43 = vor.u32 %v11909_v1, %v9564_v35  ;;  %v11808_v1 = vld [vmem:[#allocation7 + $0x6dc] sm:$0xf] }
 0x1b6   : > { %3370 = vmatmul.bf16.vlgmr.msrb.gmra.mxu0 %v13033_v61  ;;  %3389 = vmatmul.bf16.vlgmr.msrb.gmra.mxu1 %v13037_v27 }
 0x1b7   : > { %3445 = vmatpush.bf16.msra.mxu0 %v9085_v18  ;;  %3464 = vmatpush.bf16.msra.mxu1 %v9309_v37  ;;  %v9816_v18 = vld [vmem:[#allocation7 + $0xbe0] sm:$0xf]  ;;  %v9173_v37 = vor.u32 %v11811_v63, %v9172_v36  ;;  %v11902_v63 = vld [vmem:[#allocation7 + $0x9c8] sm:$0xf0] }
 0x1b8   : > { %3482 = vmatpush.bf16.msra.mxu2 %v9561_v47  ;;  %v9817_v39 = vor.u32 %v11972_v51, %v9816_v18  ;;  %v9397_v47 = vor.u32 %v11867_v56, %v9396_v55  ;;  %v9510_v18 = vld [vmem:[#allocation7 + $0x994] sm:$0xf0]  ;;  %v11829_v56 = vld [vmem:[#allocation7 + $0x784] sm:$0xf] }
 0x1bb   : > { %3514 = vmatpush.bf16.msrb.mxu0 %v9285_v15  ;;  %3533 = vmatpush.bf16.msrb.mxu1 %v9509_v20  ;;  %v11804_v15 = vld [vmem:[#allocation7 + $0x6b8] sm:$0xf0]  ;;  %v9368_v20 = vld [vmem:[#allocation7 + $0x860] sm:$0xf] }
 0x1bc   : > { %3483 = vmatpush.bf16.msra.mxu2 %v9533_v59  ;;  %v9145_v58 = vor.u32 %v11804_v15, %v9144_v45  ;;  %v9369_v4 = vor.u32 %v11860_v38, %v9368_v20  ;;  %v11965_v59 = vld [vmem:[#allocation7 + $0xbc0] sm:$0xf0]  ;;  %v11948_v45 = vld [vmem:[#allocation7 + $0xb3c] sm:$0xf] }
 0x1bd   : > { %3408 = vmatmul.bf16.vlgmr.msrb.gmra.mxu2 %v13055_v7  ;;  %9858 = vmatmul.msk.bf16.vlgmr.msrb.gmra.mxu3 %vm3203_vm5, %v13059_v19  ;;  %v9789_v62 = vor.u32 %v11965_v59, %v9788_v5  ;;  %v11976_v38 = vld [vmem:[#allocation7 + $0xc1c] sm:$0xf]  ;;  %v11878_v5 = vld [vmem:[#allocation7 + $0x90c] sm:$0xf]  ;;  %v9454_v59 = vld [vmem:[#allocation7 + $0x924] sm:$0xf0] }
 0x1be   : > { %3575 = vmatpush.bf16.msrb.mxu3 %v9845_v25  ;;  %v11916_v25 = vld [vmem:[#allocation7 + $0xa38] sm:$0xf0] }
 0x1bf   : > { %3515 = vmatpush.bf16.msrb.mxu0 %v9257_v22  ;;  %3534 = vmatpush.bf16.msrb.mxu1 %v9481_v31  ;;  %v9621_v22 = vor.u32 %v11923_v2, %v9620_v21  ;;  %v9116_v31 = vld [vmem:[#allocation7 + $0x668] sm:$0xf]  ;;  %v11822_v21 = vld [vmem:[#allocation7 + $0x74c] sm:$0xf] }
 0x1c0   : > { %3552 = vmatpush.bf16.msrb.mxu2 %v9733_v44  ;;  %v9117_v32 = vor.u32 %v11797_v17, %v9116_v31  ;;  %v9340_v44 = vld [vmem:[#allocation7 + $0x828] sm:$0xf]  ;;  %v9457_v31 = vor.u32 %v11878_v5, %v9454_v59  ;;  %v11941_v17 = vld [vmem:[#allocation7 + $0xb04] sm:$0xf] }
 0x1c1   : > { %v9341_v46 = vor.u32 %v11853_v34, %v9340_v44  ;;  %v9230_v2 = vld [vmem:[#allocation7 + $0x764] sm:$0xf0]  ;;  %v11815_v44 = vld [vmem:[#allocation7 + $0x714] sm:$0xf]  ;;  %v9202_v34 = vld [vmem:[#allocation7 + $0x72c] sm:$0xf0] }
 0x1c2   : > { %3576 = vmatpush.bf16.msrb.mxu3 %v9817_v39  ;;  %v9536_v39 = vld [vmem:[#allocation7 + $0x9b0] sm:$0xf] }
 0x1c3   : > { %3516 = vmatpush.bf16.msrb.mxu0 %v9229_v10  ;;  %3535 = vmatpush.bf16.msrb.mxu1 %v9453_v26  ;;  %v9593_v10 = vor.u32 %v11916_v25, %v9592_v60  ;;  %v9089_v26 = vor.u32 %v11790_v57, %v9088_v41  ;;  %v9537_v55 = vor.u32 %v11902_v63, %v9536_v39  ;;  %v11871_v60 = vld [vmem:[#allocation7 + $0x8d4] sm:$0xf]  ;;  %v9426_v25 = vld [vmem:[#allocation7 + $0x8ec] sm:$0xf0]  ;;  %v9678_v41 = vld [vmem:[#allocation7 + $0xae4] sm:$0xf0] }
 0x1c4   : > { %3553 = vmatpush.bf16.msrb.mxu2 %v9705_v48  ;;  %v9313_v48 = vor.u32 %v11846_v12, %v9312_v28  ;;  %v9429_v57 = vor.u32 %v11871_v60, %v9426_v25  ;;  %v9818_v12 = vld [vmem:[#allocation7 + $0xbfc] sm:$0xf0]  ;;  %v11906_v60 = vld [vmem:[#allocation7 + $0x9ec] sm:$0xf] }
 0x1c5   : > { %v9370_v63 = vld [vmem:[#allocation7 + $0x87c] sm:$0xf0] }
 0x1c6   : > { %3375 = vmatmul.bf16.gmra.mxu0 %v13067_v13  ;;  %3394 = vmatmul.bf16.gmra.mxu1 %v13070_v11 }
 0x1c7   : > { %3517 = vmatpush.bf16.msrb.mxu0 %v9201_v6  ;;  %3536 = vmatpush.bf16.msrb.mxu1 %v9425_v0  ;;  %v9761_v6 = vor.u32 %v11958_v50, %v9760_v30  ;;  %v9286_v0 = vld [vmem:[#allocation7 + $0x7d4] sm:$0xf0] }
 0x1c8   : > { %3554 = vmatpush.bf16.msrb.mxu2 %v9677_v23  ;;  %3577 = vmatpush.bf16.msrb.mxu3 %v9789_v62  ;;  %v11892_v23 = vld [vmem:[#allocation7 + $0x97c] sm:$0xf]  ;;  %v9289_v51 = vor.u32 %v11836_v53, %v9286_v0  ;;  %v9706_v62 = vld [vmem:[#allocation7 + $0xb1c] sm:$0xf0]  ;;  %v9398_v50 = vld [vmem:[#allocation7 + $0x8b4] sm:$0xf0] }
 0x1c9   : > { %v9513_v36 = vor.u32 %v11892_v23, %v9510_v18  ;;  %v9650_v0 = vld [vmem:[#allocation7 + $0xaac] sm:$0xf0]  ;;  %v11801_v18 = vld [vmem:[#allocation7 + $0x6a4] sm:$0xf] }
 0x1cb   : > { %3518 = vmatpush.bf16.msrb.mxu0 %v9173_v37  ;;  %3537 = vmatpush.bf16.msrb.mxu1 %v9397_v47  ;;  %v9258_v37 = vld [vmem:[#allocation7 + $0x79c] sm:$0xf0]  ;;  %v11885_v47 = vld [vmem:[#allocation7 + $0x944] sm:$0xf] }
 0x1cc   : > { %3555 = vmatpush.bf16.msrb.mxu2 %v9649_v52  ;;  %3578 = vmatpush.bf16.msrb.mxu3 %v9761_v6  ;;  %v9261_v9 = vor.u32 %v11829_v56, %v9258_v37  ;;  %v9734_v52 = vld [vmem:[#allocation7 + $0xb54] sm:$0xf0]  ;;  %v9485_v15 = vor.u32 %v11885_v47, %v9482_v16  ;;  %v11927_v6 = vld [vmem:[#allocation7 + $0xa94] sm:$0xf]  ;;  %v9790_v16 = vld [vmem:[#allocation7 + $0xbc4] sm:$0xf0] }
 0x1cd   : > { %3413 = vmatmul.bf16.gmra.mxu2 %v13077_v49  ;;  %9859 = vmatmul.msk.bf16.gmra.mxu3 %vm3203_vm5, %v13080_v40  ;;  %v9737_v20 = vor.u32 %v11948_v45, %v9734_v52  ;;  %v9653_v23 = vor.u32 %v11927_v6, %v9650_v0  ;;  %v9622_v56 = vld [vmem:[#allocation7 + $0xa74] sm:$0xf0]  ;;  %v11794_v52 = vld [vmem:[#allocation7 + $0x66c] sm:$0xf] }
 0x1cf   : > { %3519 = vmatpush.bf16.msrb.mxu0 %v9145_v58  ;;  %3538 = vmatpush.bf16.msrb.mxu1 %v9369_v4  ;;  %v9846_v58 = vld [vmem:[#allocation7 + $0xc34] sm:$0xf0] }
 0x1d0   : > { %3556 = vmatpush.bf16.msrb.mxu2 %v9621_v22  ;;  %v9849_v4 = vor.u32 %v11976_v38, %v9846_v58  ;;  %v9233_v22 = vor.u32 %v11822_v21, %v9230_v2  ;;  %v9342_v58 = vld [vmem:[#allocation7 + $0x844] sm:$0xf0]  ;;  %v11913_v21 = vld [vmem:[#allocation7 + $0xa24] sm:$0xf]  ;;  %v9594_v2 = vld [vmem:[#allocation7 + $0xa3c] sm:$0xf0] }
 0x1d1   : > { %v9597_v59 = vor.u32 %v11913_v21, %v9594_v2  ;;  %v11882_v2 = vld [vmem:[#allocation7 + $0x928] sm:$0xf0] }
 0x1d3   : > { %3520 = vmatpush.bf16.msrb.mxu0 %v9117_v32  ;;  %3539 = vmatpush.bf16.msrb.mxu1 %v9341_v46  ;;  %v9709_v32 = vor.u32 %v11941_v17, %v9706_v62  ;;  %v9205_v46 = vor.u32 %v11815_v44, %v9202_v34  ;;  %v11787_v17 = vld [vmem:[#allocation7 + $0x634] sm:$0xf]  ;;  %v9090_v62 = vld [vmem:[#allocation7 + $0x64c] sm:$0xf0] }
 0x1d4   : > { %3557 = vmatpush.bf16.msrb.mxu2 %v9593_v10  ;;  %v11934_v10 = vld [vmem:[#allocation7 + $0xacc] sm:$0xf]  ;;  %v9093_v44 = vor.u32 %v11787_v17, %v9090_v62  ;;  %v9314_v34 = vld [vmem:[#allocation7 + $0x80c] sm:$0xf0] }
 0x1d5   : > { %v9681_v28 = vor.u32 %v11934_v10, %v9678_v41  ;;  %v11955_v10 = vld [vmem:[#allocation7 + $0xb74] sm:$0xf]  ;;  %v9762_v41 = vld [vmem:[#allocation7 + $0xb8c] sm:$0xf0] }
 0x1d6   : > { %3446 = vmatmul.bf16.vlgmr.msra.gmra.mxu0 %v13033_v61  ;;  %3465 = vmatmul.bf16.vlgmr.msra.gmra.mxu1 %v13037_v27 }
 0x1d7   : > { %3521 = vmatpush.bf16.msrb.mxu0 %v9089_v26  ;;  %3540 = vmatpush.bf16.msrb.mxu1 %v9313_v48  ;;  %v11969_v26 = vld [vmem:[#allocation7 + $0xbe4] sm:$0xf]  ;;  %v9174_v48 = vld [vmem:[#allocation7 + $0x6f4] sm:$0xf0] }
 0x1d8   : > { %3558 = vmatpush.bf16.msrb.mxu2 %v9565_v43  ;;  %v9821_v35 = vor.u32 %v11969_v26, %v9818_v12  ;;  %v11864_v43 = vld [vmem:[#allocation7 + $0x89c] sm:$0xf]  ;;  %v9177_v30 = vor.u32 %v11808_v1, %v9174_v48  ;;  %v9292_v26 = vld [vmem:[#allocation7 + $0x7c0] sm:$0xf] }
 0x1d9   : > { %v9401_v53 = vor.u32 %v11864_v43, %v9398_v50  ;;  %v11840_v12 = vld [vmem:[#allocation7 + $0x7d8] sm:$0xf0]  ;;  %v9538_v50 = vld [vmem:[#allocation7 + $0x9cc] sm:$0xf0] }
 0x1da   : > { %v9293_v1 = vor.u32 %v11840_v12, %v9292_v26  ;;  %v11896_v48 = vld [vmem:[#allocation7 + $0x998] sm:$0xf0]  ;;  %v9824_v12 = vld [vmem:[#allocation7 + $0xbe8] sm:$0xf] }
 0x1db   : > { %3590 = vmatpush.bf16.msra.mxu0 %v9289_v51  ;;  %3609 = vmatpush.bf16.msra.mxu1 %v9513_v36  ;;  %v9146_v51 = vld [vmem:[#allocation7 + $0x6bc] sm:$0xf0]  ;;  %v11857_v36 = vld [vmem:[#allocation7 + $0x864] sm:$0xf] }
 0x1dc   : > { %3559 = vmatpush.bf16.msrb.mxu2 %v9537_v55  ;;  %v9149_v39 = vor.u32 %v11801_v18, %v9146_v51  ;;  %v11920_v55 = vld [vmem:[#allocation7 + $0xa5c] sm:$0xf]  ;;  %v9373_v37 = vor.u32 %v11857_v36, %v9370_v63  ;;  %v9264_v18 = vld [vmem:[#allocation7 + $0x788] sm:$0xf]  ;;  %v11833_v51 = vld [vmem:[#allocation7 + $0x7a0] sm:$0xf0] }
 0x1dd   : > { %3484 = vmatmul.bf16.vlgmr.msra.gmra.mxu2 %v13055_v7  ;;  %9860 = vmatmul.msk.bf16.vlgmr.msra.gmra.mxu3 %vm3203_vm5, %v13059_v19  ;;  %v9625_v47 = vor.u32 %v11920_v55, %v9622_v56  ;;  %v9488_v36 = vld [vmem:[#allocation7 + $0x948] sm:$0xf]  ;;  %v11889_v63 = vld [vmem:[#allocation7 + $0x960] sm:$0xf0]  ;;  %v9740_v55 = vld [vmem:[#allocation7 + $0xb40] sm:$0xf] }
 0x1de   : > { %3651 = vmatpush.bf16.msra.mxu3 %v9849_v4  ;;  %v11952_v56 = vld [vmem:[#allocation7 + $0xb58] sm:$0xf0] }
 0x1df   : > { %3591 = vmatpush.bf16.msra.mxu0 %v9261_v9  ;;  %3610 = vmatpush.bf16.msra.mxu1 %v9485_v15  ;;  %v11962_v9 = vld [vmem:[#allocation7 + $0xbac] sm:$0xf]  ;;  %v9118_v15 = vld [vmem:[#allocation7 + $0x684] sm:$0xf0] }
 0x1e0   : > { %3628 = vmatpush.bf16.msra.mxu2 %v9737_v20  ;;  %v9793_v45 = vor.u32 %v11962_v9, %v9790_v16  ;;  %v11850_v20 = vld [vmem:[#allocation7 + $0x82c] sm:$0xf]  ;;  %v9121_v38 = vor.u32 %v11794_v52, %v9118_v15  ;;  %v9852_v9 = vld [vmem:[#allocation7 + $0xc20] sm:$0xf]  ;;  %v11980_v16 = vld [vmem:[#allocation7 + $0xc38] sm:$0xf0] }
 0x1e1   : > { %v9345_v4 = vor.u32 %v11850_v20, %v9342_v58  ;;  %v9236_v20 = vld [vmem:[#allocation7 + $0x750] sm:$0xf] }
 0x1e2   : > { %3652 = vmatpush.bf16.msra.mxu3 %v9821_v35  ;;  %v9516_v35 = vld [vmem:[#allocation7 + $0x980] sm:$0xf]  ;;  %v9460_v58 = vld [vmem:[#allocation7 + $0x910] sm:$0xf] }
 0x1e3   : > { %3592 = vmatpush.bf16.msra.mxu0 %v9233_v22  ;;  %3611 = vmatpush.bf16.msra.mxu1 %v9457_v31  ;;  %v9517_v43 = vor.u32 %v11896_v48, %v9516_v35  ;;  %v11973_v35 = vld [vmem:[#allocation7 + $0xc00] sm:$0xf0] }
 0x1e4   : > { %3629 = vmatpush.bf16.msra.mxu2 %v9709_v32  ;;  %v11843_v32 = vld [vmem:[#allocation7 + $0x7f4] sm:$0xf] }
 0x1e5   : > { %v9317_v25 = vor.u32 %v11843_v32, %v9314_v34 }
 0x1e6   : > { %3451 = vmatmul.bf16.gmra.mxu0 %v13067_v13  ;;  %3470 = vmatmul.bf16.gmra.mxu1 %v13070_v11 }
 0x1e7   : > { %3593 = vmatpush.bf16.msra.mxu0 %v9205_v46  ;;  %3612 = vmatpush.bf16.msra.mxu1 %v9429_v57  ;;  %v9566_v46 = vld [vmem:[#allocation7 + $0xa04] sm:$0xf0] }
 0x1e8   : > { %3630 = vmatpush.bf16.msra.mxu2 %v9681_v28  ;;  %3653 = vmatpush.bf16.msra.mxu3 %v9793_v45  ;;  %v9569_v57 = vor.u32 %v11906_v60, %v9566_v46  ;;  %v9765_v28 = vor.u32 %v11955_v10, %v9762_v41  ;;  %v9853_v45 = vor.u32 %v11980_v16, %v9852_v9  ;;  %v9208_v60 = vld [vmem:[#allocation7 + $0x718] sm:$0xf]  ;;  %v11819_v46 = vld [vmem:[#allocation7 + $0x730] sm:$0xf0]  ;;  %v9684_v41 = vld [vmem:[#allocation7 + $0xad0] sm:$0xf] }
 0x1e9   : > { %v9209_v10 = vor.u32 %v11819_v46, %v9208_v60  ;;  %v9152_v9 = vld [vmem:[#allocation7 + $0x6a8] sm:$0xf]  ;;  %v11805_v16 = vld [vmem:[#allocation7 + $0x6c0] sm:$0xf0]  ;;  %v11854_v46 = vld [vmem:[#allocation7 + $0x848] sm:$0xf0] }
 0x1eb   : > { %3594 = vmatpush.bf16.msra.mxu0 %v9177_v30  ;;  %3613 = vmatpush.bf16.msra.mxu1 %v9401_v53  ;;  %v11899_v30 = vld [vmem:[#allocation7 + $0x9b4] sm:$0xf] }
 0x1ec   : > { %3631 = vmatpush.bf16.msra.mxu2 %v9653_v23  ;;  %3654 = vmatpush.bf16.msra.mxu3 %v9765_v28  ;;  %v9541_v0 = vor.u32 %v11899_v30, %v9538_v50  ;;  %v9180_v30 = vld [vmem:[#allocation7 + $0x6e0] sm:$0xf]  ;;  %v11812_v50 = vld [vmem:[#allocation7 + $0x6f8] sm:$0xf0] }
 0x1ed   : > { %3489 = vmatmul.bf16.gmra.mxu2 %v13077_v49  ;;  %9861 = vmatmul.msk.bf16.gmra.mxu3 %vm3203_vm5, %v13080_v40 }
 0x1ef   : > { %3595 = vmatpush.bf16.msra.mxu0 %v9149_v39  ;;  %3614 = vmatpush.bf16.msra.mxu1 %v9373_v37  ;;  %v9265_v39 = vor.u32 %v11833_v51, %v9264_v18  ;;  %v9489_v37 = vor.u32 %v11889_v63, %v9488_v36  ;;  %v11868_v18 = vld [vmem:[#allocation7 + $0x8b8] sm:$0xf0]  ;;  %v9656_v36 = vld [vmem:[#allocation7 + $0xa98] sm:$0xf] }
 0x1f0   : > { %3632 = vmatpush.bf16.msra.mxu2 %v9625_v47  ;;  %v9741_v47 = vor.u32 %v11952_v56, %v9740_v55 }
 0x1f3   : > { %v3219_v5 = vpop.f32.mrf.mxu0  ;;  %v3238_v22 = vpop.f32.mrf.mxu1  ;;  %3596 = vmatpush.bf16.msra.mxu0 %v9121_v38  ;;  %3615 = vmatpush.bf16.msra.mxu1 %v9345_v4  ;;  %v11826_v38 = vld [vmem:[#allocation7 + $0x768] sm:$0xf0] }
 0x1f4   : > { %v3239_v31 = vadd.f32 %v3238_v22, %v3219_v5  ;;  %3633 = vmatpush.bf16.msra.mxu2 %v9597_v59  ;;  %v9237_v21 = vor.u32 %v11826_v38, %v9236_v20  ;;  %v9461_v5 = vor.u32 %v11882_v2, %v9460_v58  ;;  %v9712_v22 = vld [vmem:[#allocation7 + $0xb08] sm:$0xf]  ;;  %v11945_v59 = vld [vmem:[#allocation7 + $0xb20] sm:$0xf0]  ;;  %v11924_v20 = vld [vmem:[#allocation7 + $0xa78] sm:$0xf0] }
 0x1f6   : > { %3522 = vmatmul.bf16.vlgmr.msrb.gmra.mxu0 %v13033_v61  ;;  %3541 = vmatmul.bf16.vlgmr.msrb.gmra.mxu1 %v13037_v27 }
 0x1f7   : > { %3597 = vmatpush.bf16.msra.mxu0 %v9093_v44  ;;  %3616 = vmatpush.bf16.msra.mxu1 %v9317_v25  ;;  %v9713_v44 = vor.u32 %v11945_v59, %v9712_v22  ;;  %v9432_v25 = vld [vmem:[#allocation7 + $0x8d8] sm:$0xf]  ;;  %v9124_v59 = vld [vmem:[#allocation7 + $0x670] sm:$0xf] }
 0x1f8   : > { %3634 = vmatpush.bf16.msra.mxu2 %v9569_v57  ;;  %v11938_v57 = vld [vmem:[#allocation7 + $0xae8] sm:$0xf0] }
 0x1f9   : > { %v9685_v26 = vor.u32 %v11938_v57, %v9684_v41 }
 0x1fb   : > { %v3221_v53 = vpop.f32.mrf.mxu0  ;;  %v3240_v6 = vpop.f32.mrf.mxu1  ;;  %3666 = vmatpush.bf16.msrb.mxu0 %v9293_v1  ;;  %3685 = vmatpush.bf16.msrb.mxu1 %v9517_v43  ;;  %v9825_v1 = vor.u32 %v11973_v35, %v9824_v12  ;;  %v9096_v35 = vld [vmem:[#allocation7 + $0x638] sm:$0xf] }
 0x1fc   : > { %v3241_v23 = vadd.f32 %v3240_v6, %v3221_v53  ;;  %3635 = vmatpush.bf16.msra.mxu2 %v9541_v0  ;;  %v9404_v53 = vld [vmem:[#allocation7 + $0x8a0] sm:$0xf]  ;;  %v9181_v0 = vor.u32 %v11812_v50, %v9180_v30  ;;  %v9572_v30 = vld [vmem:[#allocation7 + $0x9f0] sm:$0xf]  ;;  %v11910_v50 = vld [vmem:[#allocation7 + $0xa08] sm:$0xf0] }
 0x1fd   : > { %3560 = vmatmul.bf16.vlgmr.msrb.gmra.mxu2 %v13055_v7  ;;  %9862 = vmatmul.msk.bf16.vlgmr.msrb.gmra.mxu3 %vm3203_vm5, %v13059_v19  ;;  %v9405_v51 = vor.u32 %v11868_v18, %v9404_v53  ;;  %v9573_v18 = vor.u32 %v11910_v50, %v9572_v30  ;;  %v10486_v30 = vld [vmem:[#allocation7 + $0x4d0] sm:$0xf]  ;;  %v11746_v50 = vld [vmem:[#allocation7 + $0x4e8] sm:$0xf0] }
 0x1fe   : > { %3727 = vmatpush.bf16.msrb.mxu3 %v9853_v45  ;;  %v9376_v45 = vld [vmem:[#allocation7 + $0x868] sm:$0xf] }
 0x1ff   : > { %3667 = vmatpush.bf16.msrb.mxu0 %v9265_v39  ;;  %3686 = vmatpush.bf16.msrb.mxu1 %v9489_v37  ;;  %v11931_v39 = vld [vmem:[#allocation7 + $0xab0] sm:$0xf0] }
 0x200   : > { %v3257_v52 = vpop.f32.mrf.mxu2  ;;  %v3276_v15 = vpop.f32.mrf.mxu3  ;;  %3704 = vmatpush.bf16.msrb.mxu2 %v9741_v47  ;;  %v9657_v37 = vor.u32 %v11931_v39, %v9656_v36 }
 0x201   : > { %v3258_v4 = vadd.f32 %v3257_v52, %v3239_v31  ;;  %v11875_v31 = vld [vmem:[#allocation7 + $0x8f0] sm:$0xf0]  ;;  %v11861_v52 = vld [vmem:[#allocation7 + $0x880] sm:$0xf0] }
 0x202   : > { %v9433_v28 = vor.u32 %v11875_v31, %v9432_v25  ;;  %3728 = vmatpush.bf16.msrb.mxu3 %v9825_v1  ;;  %v9377_v38 = vor.u32 %v11861_v52, %v9376_v45  ;;  %v11917_v31 = vld [vmem:[#allocation7 + $0xa40] sm:$0xf0]  ;;  %v11791_v1 = vld [vmem:[#allocation7 + $0x650] sm:$0xf0]  ;;  %v9544_v52 = vld [vmem:[#allocation7 + $0x9b8] sm:$0xf] }
 0x203   : > { %v13120_v17 = vadd.f32 %v3276_v15, %v3258_v4  ;;  %v3224_v62 = vpop.f32.mrf.mxu0  ;;  %v3243_v32 = vpop.f32.mrf.mxu1  ;;  %3668 = vmatpush.bf16.msrb.mxu0 %v9237_v21  ;;  %3687 = vmatpush.bf16.msrb.mxu1 %v9461_v5  ;;  %v9628_v15 = vld [vmem:[#allocation7 + $0xa60] sm:$0xf]  ;;  %v9796_v4 = vld [vmem:[#allocation7 + $0xbb0] sm:$0xf]  ;;  %v11966_v21 = vld [vmem:[#allocation7 + $0xbc8] sm:$0xf0] }
 0x204   : > { %v3244_v34 = vadd.f32 %v3243_v32, %v3224_v62  ;;  %3705 = vmatpush.bf16.msrb.mxu2 %v9713_v44  ;;  %v9629_v58 = vor.u32 %v11924_v20, %v9628_v15  ;;  %v9797_v2 = vor.u32 %v11966_v21, %v9796_v4  ;;  %v11798_v62 = vld [vmem:[#allocation7 + $0x688] sm:$0xf0]  ;;  %v9348_v32 = vld [vmem:[#allocation7 + $0x830] sm:$0xf]  ;;  %v11697_v45 = vld [vmem:[#allocation7 + $0x360] sm:$0xf0] }
 0x205   : > { %v9125_v60 = vor.u32 %v11798_v62, %v9124_v59  ;;  %v9349_v25 = vor.u32 %v11854_v46, %v9348_v32  ;;  %v11903_v15 = vld [vmem:[#allocation7 + $0x9d0] sm:$0xf0]  ;;  %v11690_v59 = vld [vmem:[#allocation7 + $0x328] sm:$0xf0]  ;;  %v10514_v62 = vld [vmem:[#allocation7 + $0x508] sm:$0xf] }
 0x206   : > { %3527 = vmatmul.bf16.gmra.mxu0 %v13067_v13  ;;  %3546 = vmatmul.bf16.gmra.mxu1 %v13070_v11  ;;  %v9545_v4 = vor.u32 %v11903_v15, %v9544_v52  ;;  %v11753_v32 = vld [vmem:[#allocation7 + $0x520] sm:$0xf0]  ;;  %v10626_v46 = vld [vmem:[#allocation7 + $0x5e8] sm:$0xf]  ;;  %v11774_v52 = vld [vmem:[#allocation7 + $0x5c8] sm:$0xf0] }
 0x207   : > { %3669 = vmatpush.bf16.msrb.mxu0 %v9209_v10  ;;  %3688 = vmatpush.bf16.msrb.mxu1 %v9433_v28  ;;  %v9600_v10 = vld [vmem:[#allocation7 + $0xa28] sm:$0xf] }
 0x208   : > { %v3259_v48 = vpop.f32.mrf.mxu2  ;;  %v3278_v43 = vpop.f32.mrf.mxu3  ;;  %3706 = vmatpush.bf16.msrb.mxu2 %v9685_v26  ;;  %3729 = vmatpush.bf16.msrb.mxu3 %v9797_v2  ;;  %v9601_v26 = vor.u32 %v11917_v31, %v9600_v10  ;;  %v10038_v2 = vld [vmem:[#allocation7 + $0x150] sm:$0xf] }
 0x209   : > { %v3260_v6 = vadd.f32 %v3259_v48, %v3241_v23  ;;  %v9153_v23 = vor.u32 %v11805_v16, %v9152_v9  ;;  %v9320_v48 = vld [vmem:[#allocation7 + $0x7f8] sm:$0xf] }
 0x20b   : > { %v13124_v63 = vadd.f32 %v3278_v43, %v3260_v6  ;;  %v3226_v55 = vpop.f32.mrf.mxu0  ;;  %v3245_v56 = vpop.f32.mrf.mxu1  ;;  %3670 = vmatpush.bf16.msrb.mxu0 %v9181_v0  ;;  %3689 = vmatpush.bf16.msrb.mxu1 %v9405_v51  ;;  %v9097_v43 = vor.u32 %v11791_v1, %v9096_v35  ;;  %v9768_v6 = vld [vmem:[#allocation7 + $0xb78] sm:$0xf]  ;;  %v11959_v0 = vld [vmem:[#allocation7 + $0xb90] sm:$0xf0] }
 0x20c   : > { %v3246_v47 = vadd.f32 %v3245_v56, %v3226_v55  ;;  %3707 = vmatpush.bf16.msrb.mxu2 %v9657_v37  ;;  %v9769_v51 = vor.u32 %v11959_v0, %v9768_v6  ;;  %v10066_v55 = vld [vmem:[#allocation7 + $0x188] sm:$0xf]  ;;  %v11641_v56 = vld [vmem:[#allocation7 + $0x1a0] sm:$0xf0]  ;;  %v10234_v35 = vld [vmem:[#allocation7 + $0x2d8] sm:$0xf] }
 0x20d   : > { %3565 = vmatmul.bf16.gmra.mxu2 %v13077_v49  ;;  %9863 = vmatmul.msk.bf16.gmra.mxu3 %vm3203_vm5, %v13080_v40  ;;  %v10290_v37 = vld [vmem:[#allocation7 + $0x348] sm:$0xf]  ;;  %v10067_v16 = vor.u32 %v11641_v56, %v10066_v55  ;;  %v10206_v55 = vld [vmem:[#allocation7 + $0x2a0] sm:$0xf] }
 0x20e   : > { %3730 = vmatpush.bf16.msrb.mxu3 %v9769_v51 }
 0x20f   : > { %3671 = vmatpush.bf16.msrb.mxu0 %v9153_v23  ;;  %3690 = vmatpush.bf16.msrb.mxu1 %v9377_v38  ;;  %v10291_v23 = vor.u32 %v11697_v45, %v10290_v37  ;;  %v10458_v37 = vld [vmem:[#allocation7 + $0x498] sm:$0xf] }
 0x210   : > { %v3262_v5 = vpop.f32.mrf.mxu2  ;;  %v3281_v22 = vpop.f32.mrf.mxu3  ;;  %3708 = vmatpush.bf16.msrb.mxu2 %v9629_v58 }
 0x211   : > { %v3263_v44 = vadd.f32 %v3262_v5, %v3244_v34  ;;  %v11847_v34 = vld [vmem:[#allocation7 + $0x810] sm:$0xf0]  ;;  %v11634_v5 = vld [vmem:[#allocation7 + $0x168] sm:$0xf0] }
 0x212   : > { %v9321_v53 = vor.u32 %v11847_v34, %v9320_v48 }
 0x213   : > { %v13129_v41 = vadd.f32 %v3281_v22, %v3263_v44  ;;  %v3295_v57 = vpop.f32.mrf.mxu0  ;;  %v3314_v28 = vpop.f32.mrf.mxu1  ;;  %3672 = vmatpush.bf16.msrb.mxu0 %v9125_v60  ;;  %3691 = vmatpush.bf16.msrb.mxu1 %v9349_v25  ;;  %v10262_v22 = vld [vmem:[#allocation7 + $0x310] sm:$0xf]  ;;  %v10515_v60 = vor.u32 %v11753_v32, %v10514_v62  ;;  %v11781_v25 = vld [vmem:[#allocation7 + $0x600] sm:$0xf0]  ;;  %v10430_v32 = vld [vmem:[#allocation7 + $0x460] sm:$0xf] }
 0x214   : > { %v3315_v12 = vadd.f32 %v3314_v28, %v3295_v57  ;;  %3709 = vmatpush.bf16.msrb.mxu2 %v9601_v26  ;;  %v10263_v44 = vor.u32 %v11690_v59, %v10262_v22  ;;  %v10627_v10 = vor.u32 %v11781_v25, %v10626_v46  ;;  %v10010_v28 = vld [vmem:[#allocation7 + $0x118] sm:$0xf]  ;;  %v11627_v26 = vld [vmem:[#allocation7 + $0x130] sm:$0xf0]  ;;  %v11669_v59 = vld [vmem:[#allocation7 + $0x280] sm:$0xf0] }
 0x215   : > { %v10011_v48 = vor.u32 %v11627_v26, %v10010_v28  ;;  %v11606_v28 = vld [vmem:[#allocation7 + $0x88] sm:$0xf0]  ;;  %v10150_v26 = vld [vmem:[#allocation7 + $0x230] sm:$0xf] }
 0x216   : > { %3598 = vmatmul.bf16.vlgmr.msra.gmra.mxu0 %v13033_v61  ;;  %3617 = vmatmul.bf16.vlgmr.msra.gmra.mxu1 %v13037_v27 }
 0x217   : > { %3673 = vmatpush.bf16.msrb.mxu0 %v9097_v43  ;;  %3692 = vmatpush.bf16.msrb.mxu1 %v9321_v53  ;;  %v11683_v43 = vld [vmem:[#allocation7 + $0x2f0] sm:$0xf0] }
 0x218   : > { %v3264_v36 = vpop.f32.mrf.mxu2  ;;  %v3283_v39 = vpop.f32.mrf.mxu3  ;;  %3710 = vmatpush.bf16.msrb.mxu2 %v9573_v18  ;;  %v10235_v34 = vor.u32 %v11683_v43, %v10234_v35  ;;  %v10487_v18 = vor.u32 %v11746_v50, %v10486_v30  ;;  %v11662_v35 = vld [vmem:[#allocation7 + $0x248] sm:$0xf0]  ;;  %v10570_v30 = vld [vmem:[#allocation7 + $0x578] sm:$0xf]  ;;  %v11767_v50 = vld [vmem:[#allocation7 + $0x590] sm:$0xf0] }
 0x219   : > { %v3265_v9 = vadd.f32 %v3264_v36, %v3246_v47  ;;  %v10039_v47 = vor.u32 %v11634_v5, %v10038_v2  ;;  %v9982_v36 = vld [vmem:[#allocation7 + $0xe0] sm:$0xf]  ;;  %v11613_v2 = vld [vmem:[#allocation7 + $0xc0] sm:$0xf0]  ;;  %v10178_v5 = vld [vmem:[#allocation7 + $0x268] sm:$0xf]  ;;  %v10151_v43 = vor.u32 %v11662_v35, %v10150_v26 }
 0x21a   : > { %v10179_v62 = vor.u32 %v11669_v59, %v10178_v5  ;;  %v10094_v5 = vld [vmem:[#allocation7 + $0x1c0] sm:$0xf]  ;;  %v11711_v59 = vld [vmem:[#allocation7 + $0x3d0] sm:$0xf0]  ;;  %v10068_v26 = vld [vmem:[#allocation7 + $0x1a4] sm:$0xf0] }
 0x21b   : > { %v13133_v20 = vadd.f32 %v3283_v39, %v3265_v9  ;;  %v3297_v38 = vpop.f32.mrf.mxu0  ;;  %v3316_v58 = vpop.f32.mrf.mxu1  ;;  %4760 = vmatpush.bf16.msra.mxu0 %v10067_v16  ;;  %4779 = vmatpush.bf16.msra.mxu1 %v10291_v23  ;;  %v11620_v39 = vld [vmem:[#allocation7 + $0xf8] sm:$0xf0]  ;;  %v11739_v9 = vld [vmem:[#allocation7 + $0x4b0] sm:$0xf0]  ;;  %v10598_v23 = vld [vmem:[#allocation7 + $0x5b0] sm:$0xf] }
 0x21c   : > { %v3317_v21 = vadd.f32 %v3316_v58, %v3297_v38  ;;  %3711 = vmatpush.bf16.msrb.mxu2 %v9545_v4  ;;  %v9983_v56 = vor.u32 %v11620_v39, %v9982_v36  ;;  %v10459_v45 = vor.u32 %v11739_v9, %v10458_v37  ;;  %v10599_v15 = vor.u32 %v11774_v52, %v10598_v23  ;;  %v9954_v4 = vld [vmem:[#allocation7 + $0xa8] sm:$0xf]  ;;  %v9898_v36 = vld [vmem:[#allocation7 + $0x38] sm:$0xf]  ;;  %v11599_v39 = vld [vmem:[#allocation7 + $0x50] sm:$0xf0] }
 0x21d   : > { %3636 = vmatmul.bf16.vlgmr.msra.gmra.mxu2 %v13055_v7  ;;  %9864 = vmatmul.msk.bf16.vlgmr.msra.gmra.mxu3 %vm3203_vm5, %v13059_v19  ;;  %v11655_v37 = vld [vmem:[#allocation7 + $0x210] sm:$0xf0] }
 0x21e   : > { %4821 = vmatpush.bf16.msra.mxu3 %v10627_v10 }
 0x21f   : > { %4761 = vmatpush.bf16.msra.mxu0 %v10039_v47  ;;  %4780 = vmatpush.bf16.msra.mxu1 %v10263_v44  ;;  %v9955_v47 = vor.u32 %v11613_v2, %v9954_v4  ;;  %v11732_v44 = vld [vmem:[#allocation7 + $0x478] sm:$0xf0]  ;;  %v9870_v4 = vld [vmem:[#allocation7] sm:$0xf] }
 0x220   : > { %v3333_v31 = vpop.f32.mrf.mxu2  ;;  %v3352_v57 = vpop.f32.mrf.mxu3  ;;  %4798 = vmatpush.bf16.msra.mxu2 %v10515_v60  ;;  %v10431_v10 = vor.u32 %v11732_v44, %v10430_v32  ;;  %v11592_v2 = vld [vmem:[#allocation7 + $0x18] sm:$0xf0]  ;;  %v10542_v32 = vld [vmem:[#allocation7 + $0x540] sm:$0xf] }
 0x221   : > { %v3334_v1 = vadd.f32 %v3333_v31, %v3315_v12  ;;  %v11676_v12 = vld [vmem:[#allocation7 + $0x2b8] sm:$0xf0] }
 0x222   : > { %v10207_v16 = vor.u32 %v11676_v12, %v10206_v55  ;;  %4822 = vmatpush.bf16.msra.mxu3 %v10599_v15  ;;  %v10122_v55 = vld [vmem:[#allocation7 + $0x1f8] sm:$0xf]  ;;  %v9899_v12 = vor.u32 %v11599_v39, %v9898_v36  ;;  %v11760_v44 = vld [vmem:[#allocation7 + $0x558] sm:$0xf0]  ;;  %v10040_v36 = vld [vmem:[#allocation7 + $0x16c] sm:$0xf0] }
 0x223   : > { %v13138_v53 = vadd.f32 %v3352_v57, %v3334_v1  ;;  %v3300_v6 = vpop.f32.mrf.mxu0  ;;  %v3319_v0 = vpop.f32.mrf.mxu1  ;;  %4762 = vmatpush.bf16.msra.mxu0 %v10011_v48  ;;  %4781 = vmatpush.bf16.msra.mxu1 %v10235_v34  ;;  %v9926_v57 = vld [vmem:[#allocation7 + $0x70] sm:$0xf]  ;;  %v10402_v1 = vld [vmem:[#allocation7 + $0x428] sm:$0xf]  ;;  %v11725_v48 = vld [vmem:[#allocation7 + $0x440] sm:$0xf0]  ;;  %v10123_v9 = vor.u32 %v11655_v37, %v10122_v55 }
 0x224   : > { %v3320_v51 = vadd.f32 %v3319_v0, %v3300_v6  ;;  %4799 = vmatpush.bf16.msra.mxu2 %v10487_v18  ;;  %v10403_v34 = vor.u32 %v11725_v48, %v10402_v1  ;;  %v10571_v6 = vor.u32 %v11767_v50, %v10570_v30  ;;  %v10292_v48 = vld [vmem:[#allocation7 + $0x364] sm:$0xf0]  ;;  %v11687_v39 = vld [vmem:[#allocation7 + $0x314] sm:$0xf]  ;;  %v10264_v55 = vld [vmem:[#allocation7 + $0x32c] sm:$0xf0] }
 0x225   : > { %v10267_v37 = vor.u32 %v11687_v39, %v10264_v55  ;;  %v10180_v55 = vld [vmem:[#allocation7 + $0x284] sm:$0xf0] }
 0x226   : > { %3603 = vmatmul.bf16.gmra.mxu0 %v13067_v13  ;;  %3622 = vmatmul.bf16.gmra.mxu1 %v13070_v11 }
 0x227   : > { %4763 = vmatpush.bf16.msra.mxu0 %v9983_v56  ;;  %4782 = vmatpush.bf16.msra.mxu1 %v10207_v16  ;;  %v10374_v16 = vld [vmem:[#allocation7 + $0x3f0] sm:$0xf] }
 0x228   : > { %v3335_v38 = vpop.f32.mrf.mxu2  ;;  %v3354_v58 = vpop.f32.mrf.mxu3  ;;  %4800 = vmatpush.bf16.msra.mxu2 %v10459_v45  ;;  %4823 = vmatpush.bf16.msra.mxu3 %v10571_v6  ;;  %v11718_v45 = vld [vmem:[#allocation7 + $0x408] sm:$0xf0] }
 0x229   : > { %v3336_v22 = vadd.f32 %v3335_v38, %v3317_v21  ;;  %v9927_v21 = vor.u32 %v11606_v28, %v9926_v57  ;;  %v10375_v38 = vor.u32 %v11718_v45, %v10374_v16  ;;  %v11638_v28 = vld [vmem:[#allocation7 + $0x18c] sm:$0xf]  ;;  %v10628_v45 = vld [vmem:[#allocation7 + $0x604] sm:$0xf0] }
 0x22a   : > { %v10071_v1 = vor.u32 %v11638_v28, %v10068_v26  ;;  %v11778_v16 = vld [vmem:[#allocation7 + $0x5ec] sm:$0xf]  ;;  %v11673_v28 = vld [vmem:[#allocation7 + $0x2a4] sm:$0xf] }
 0x22b   : > { %v13142_v60 = vadd.f32 %v3354_v58, %v3336_v22  ;;  %v3302_v46 = vpop.f32.mrf.mxu0  ;;  %v3321_v25 = vpop.f32.mrf.mxu1  ;;  %4764 = vmatpush.bf16.msra.mxu0 %v9955_v47  ;;  %4783 = vmatpush.bf16.msra.mxu1 %v10179_v62  ;;  %v9871_v22 = vor.u32 %v11592_v2, %v9870_v4  ;;  %v10346_v47 = vld [vmem:[#allocation7 + $0x3b8] sm:$0xf]  ;;  %v11624_v4 = vld [vmem:[#allocation7 + $0x11c] sm:$0xf] }
 0x22c   : > { %v3322_v31 = vadd.f32 %v3321_v25, %v3302_v46  ;;  %4801 = vmatpush.bf16.msra.mxu2 %v10431_v10  ;;  %v10347_v46 = vor.u32 %v11711_v59, %v10346_v47  ;;  %v10543_v25 = vor.u32 %v11760_v44, %v10542_v32  ;;  %v11680_v2 = vld [vmem:[#allocation7 + $0x2dc] sm:$0xf]  ;;  %v11743_v47 = vld [vmem:[#allocation7 + $0x4d4] sm:$0xf]  ;;  %v10488_v59 = vld [vmem:[#allocation7 + $0x4ec] sm:$0xf0] }
 0x22d   : > { %3641 = vmatmul.bf16.gmra.mxu2 %v13077_v49  ;;  %9865 = vmatmul.msk.bf16.gmra.mxu3 %vm3203_vm5, %v13080_v40 }
 0x22e   : > { %4824 = vmatpush.bf16.msra.mxu3 %v10543_v25 }
 0x22f   : > { %4765 = vmatpush.bf16.msra.mxu0 %v9927_v21  ;;  %4784 = vmatpush.bf16.msra.mxu1 %v10151_v43  ;;  %v11694_v21 = vld [vmem:[#allocation7 + $0x34c] sm:$0xf]  ;;  %v10318_v43 = vld [vmem:[#allocation7 + $0x380] sm:$0xf] }
 0x230   : > { %v3338_v0 = vpop.f32.mrf.mxu2  ;;  %v3357_v18 = vpop.f32.mrf.mxu3  ;;  %4802 = vmatpush.bf16.msra.mxu2 %v10403_v34 }
 0x231   : > { %v3339_v56 = vadd.f32 %v3338_v0, %v3320_v51  ;;  %v11648_v51 = vld [vmem:[#allocation7 + $0x1d8] sm:$0xf0] }
 0x232   : > { %v10095_v62 = vor.u32 %v11648_v51, %v10094_v5 }
 0x233   : > { %v13147_v23 = vadd.f32 %v3357_v18, %v3339_v56  ;;  %v3371_v52 = vpop.f32.mrf.mxu0  ;;  %v3390_v15 = vpop.f32.mrf.mxu1  ;;  %4766 = vmatpush.bf16.msra.mxu0 %v9899_v12  ;;  %4785 = vmatpush.bf16.msra.mxu1 %v10123_v9  ;;  %v11631_v18 = vld [vmem:[#allocation7 + $0x154] sm:$0xf]  ;;  %v11750_v56 = vld [vmem:[#allocation7 + $0x50c] sm:$0xf]  ;;  %v10516_v12 = vld [vmem:[#allocation7 + $0x524] sm:$0xf0] }
 0x234   : > { %v3391_v58 = vadd.f32 %v3390_v15, %v3371_v52  ;;  %4803 = vmatpush.bf16.msra.mxu2 %v10375_v38  ;;  %v10519_v9 = vor.u32 %v11750_v56, %v10516_v12  ;;  %v10631_v52 = vor.u32 %v11778_v16, %v10628_v45  ;;  %v11729_v56 = vld [vmem:[#allocation7 + $0x464] sm:$0xf] }
 0x236   : > { %3674 = vmatmul.bf16.vlgmr.msrb.gmra.mxu0 %v13033_v61  ;;  %3693 = vmatmul.bf16.vlgmr.msrb.gmra.mxu1 %v13037_v27  ;;  %v10295_v61 = vor.u32 %v11694_v21, %v10292_v48  ;;  %v11704_v27 = vld [vmem:[#allocation7 + $0x398] sm:$0xf0] }
 0x237   : > { %4767 = vmatpush.bf16.msra.mxu0 %v9871_v22  ;;  %4786 = vmatpush.bf16.msra.mxu1 %v10095_v62  ;;  %v10319_v6 = vor.u32 %v11704_v27, %v10318_v43  ;;  %v10236_v22 = vld [vmem:[#allocation7 + $0x2f4] sm:$0xf0]  ;;  %v11736_v21 = vld [vmem:[#allocation7 + $0x49c] sm:$0xf]  ;;  %v10600_v43 = vld [vmem:[#allocation7 + $0x5cc] sm:$0xf0] }
 0x238   : > { %v3340_v10 = vpop.f32.mrf.mxu2  ;;  %v3359_v57 = vpop.f32.mrf.mxu3  ;;  %4804 = vmatpush.bf16.msra.mxu2 %v10347_v46  ;;  %v10239_v51 = vor.u32 %v11680_v2, %v10236_v22  ;;  %v10491_v46 = vor.u32 %v11743_v47, %v10488_v59  ;;  %v10404_v2 = vld [vmem:[#allocation7 + $0x444] sm:$0xf0]  ;;  %v11764_v22 = vld [vmem:[#allocation7 + $0x57c] sm:$0xf] }
 0x239   : > { %v3341_v35 = vadd.f32 %v3340_v10, %v3322_v31  ;;  %v10043_v31 = vor.u32 %v11631_v18, %v10040_v36  ;;  %v11617_v10 = vld [vmem:[#allocation7 + $0xe4] sm:$0xf]  ;;  %v9956_v18 = vld [vmem:[#allocation7 + $0xc4] sm:$0xf0]  ;;  %v11666_v36 = vld [vmem:[#allocation7 + $0x26c] sm:$0xf] }
 0x23b   : > { %v13151_v34 = vadd.f32 %v3359_v57, %v3341_v35  ;;  %v3373_v30 = vpop.f32.mrf.mxu0  ;;  %v3392_v50 = vpop.f32.mrf.mxu1  ;;  %4836 = vmatpush.bf16.msrb.mxu0 %v10071_v1  ;;  %4855 = vmatpush.bf16.msrb.mxu1 %v10295_v61  ;;  %v9984_v57 = vld [vmem:[#allocation7 + $0xfc] sm:$0xf0]  ;;  %v10460_v35 = vld [vmem:[#allocation7 + $0x4b4] sm:$0xf0]  ;;  %v11771_v61 = vld [vmem:[#allocation7 + $0x5b4] sm:$0xf] }
 0x23c   : > { %v3393_v0 = vadd.f32 %v3392_v50, %v3373_v30  ;;  %4805 = vmatpush.bf16.msra.mxu2 %v10319_v6  ;;  %v9987_v26 = vor.u32 %v11617_v10, %v9984_v57  ;;  %v10463_v48 = vor.u32 %v11736_v21, %v10460_v35  ;;  %v10603_v27 = vor.u32 %v11771_v61, %v10600_v43  ;;  %v11610_v6 = vld [vmem:[#allocation7 + $0xac] sm:$0xf]  ;;  %v10124_v57 = vld [vmem:[#allocation7 + $0x214] sm:$0xf0]  ;;  %v11589_v43 = vld [vmem:[#allocation7 + $0x4] sm:$0xf] }
 0x23d   : > { %3712 = vmatmul.bf16.vlgmr.msrb.gmra.mxu2 %v13055_v7  ;;  %9866 = vmatmul.msk.bf16.vlgmr.msrb.gmra.mxu3 %vm3203_vm5, %v13059_v19  ;;  %v10012_v7 = vld [vmem:[#allocation7 + $0x134] sm:$0xf0] }
 0x23e   : > { %4897 = vmatpush.bf16.msrb.mxu3 %v10631_v52  ;;  %v10015_v19 = vor.u32 %v11624_v4, %v10012_v7  ;;  %v11603_v52 = vld [vmem:[#allocation7 + $0x74] sm:$0xf]  ;;  %v10152_v4 = vld [vmem:[#allocation7 + $0x24c] sm:$0xf0]  ;;  %v11722_v7 = vld [vmem:[#allocation7 + $0x42c] sm:$0xf] }
 0x23f   : > { %4837 = vmatpush.bf16.msrb.mxu0 %v10043_v31  ;;  %4856 = vmatpush.bf16.msrb.mxu1 %v10267_v37  ;;  %v9959_v31 = vor.u32 %v11610_v6, %v9956_v18  ;;  %v11708_v6 = vld [vmem:[#allocation7 + $0x3bc] sm:$0xf]  ;;  %v10348_v18 = vld [vmem:[#allocation7 + $0x3d4] sm:$0xf0] }
 0x240   : > { %v3409_v15 = vpop.f32.mrf.mxu2  ;;  %v3428_v38 = vpop.f32.mrf.mxu3  ;;  %4874 = vmatpush.bf16.msrb.mxu2 %v10519_v9 }
 0x241   : > { %v3410_v5 = vadd.f32 %v3409_v15, %v3391_v58  ;;  %v10208_v58 = vld [vmem:[#allocation7 + $0x2bc] sm:$0xf0]  ;;  %v9928_v15 = vld [vmem:[#allocation7 + $0x8c] sm:$0xf0] }
 0x242   : > { %v10211_v1 = vor.u32 %v11673_v28, %v10208_v58  ;;  %4898 = vmatpush.bf16.msrb.mxu3 %v10603_v27  ;;  %v10376_v58 = vld [vmem:[#allocation7 + $0x40c] sm:$0xf0]  ;;  %v9872_v27 = vld [vmem:[#allocation7 + $0x1c] sm:$0xf0] }
 0x243   : > { %v13156_v62 = vadd.f32 %v3428_v38, %v3410_v5  ;;  %v3376_v32 = vpop.f32.mrf.mxu0  ;;  %v3395_v44 = vpop.f32.mrf.mxu1  ;;  %4838 = vmatpush.bf16.msrb.mxu0 %v10015_v19  ;;  %4857 = vmatpush.bf16.msrb.mxu1 %v10239_v51  ;;  %v11659_v38 = vld [vmem:[#allocation7 + $0x234] sm:$0xf]  ;;  %v10407_v19 = vor.u32 %v11722_v7, %v10404_v2  ;;  %v10572_v51 = vld [vmem:[#allocation7 + $0x594] sm:$0xf0]  ;;  %v10320_v7 = vld [vmem:[#allocation7 + $0x39c] sm:$0xf0] }
 0x244   : > { %v3396_v25 = vadd.f32 %v3395_v44, %v3376_v32  ;;  %4875 = vmatpush.bf16.msrb.mxu2 %v10491_v46  ;;  %v10155_v5 = vor.u32 %v11659_v38, %v10152_v4  ;;  %v10575_v47 = vor.u32 %v11764_v22, %v10572_v51  ;;  %v11596_v44 = vld [vmem:[#allocation7 + $0x3c] sm:$0xf]  ;;  %v9900_v46 = vld [vmem:[#allocation7 + $0x54] sm:$0xf0]  ;;  %v11698_v38 = vld [vmem:[#allocation7 + $0x368] sm:$0xf0] }
 0x245   : > { %v11701_v4 = vld [vmem:[#allocation7 + $0x384] sm:$0xf] }
 0x246   : > { %3679 = vmatmul.bf16.gmra.mxu0 %v13067_v13  ;;  %3698 = vmatmul.bf16.gmra.mxu1 %v13070_v11  ;;  %v10183_v13 = vor.u32 %v11666_v36, %v10180_v55  ;;  %v10432_v11 = vld [vmem:[#allocation7 + $0x47c] sm:$0xf0]  ;;  %v10351_v55 = vor.u32 %v11708_v6, %v10348_v18  ;;  %v10323_v22 = vor.u32 %v11701_v4, %v10320_v7  ;;  %v10494_v6 = vld [vmem:[#allocation7 + $0x4d8] sm:$0xf]  ;;  %v11747_v18 = vld [vmem:[#allocation7 + $0x4f0] sm:$0xf0] }
 0x247   : > { %4839 = vmatpush.bf16.msrb.mxu0 %v9987_v26  ;;  %4858 = vmatpush.bf16.msrb.mxu1 %v10211_v1  ;;  %v10435_v16 = vor.u32 %v11729_v56, %v10432_v11  ;;  %v11715_v26 = vld [vmem:[#allocation7 + $0x3f4] sm:$0xf] }
 0x248   : > { %v3411_v30 = vpop.f32.mrf.mxu2  ;;  %v3430_v50 = vpop.f32.mrf.mxu3  ;;  %4876 = vmatpush.bf16.msrb.mxu2 %v10463_v48  ;;  %4899 = vmatpush.bf16.msrb.mxu3 %v10575_v47  ;;  %v10379_v48 = vor.u32 %v11715_v26, %v10376_v58  ;;  %v10046_v47 = vld [vmem:[#allocation7 + $0x158] sm:$0xf]  ;;  %v11775_v4 = vld [vmem:[#allocation7 + $0x5d0] sm:$0xf0] }
 0x249   : > { %v3412_v39 = vadd.f32 %v3411_v30, %v3393_v0  ;;  %v9931_v0 = vor.u32 %v11603_v52, %v9928_v15  ;;  %v11645_v30 = vld [vmem:[#allocation7 + $0x1c4] sm:$0xf] }
 0x24b   : > { %v13160_v12 = vadd.f32 %v3430_v50, %v3412_v39  ;;  %v3378_v37 = vpop.f32.mrf.mxu0  ;;  %v3397_v9 = vpop.f32.mrf.mxu1  ;;  %4840 = vmatpush.bf16.msrb.mxu0 %v9959_v31  ;;  %4859 = vmatpush.bf16.msrb.mxu1 %v10183_v13  ;;  %v9875_v50 = vor.u32 %v11589_v43, %v9872_v27  ;;  %v11757_v39 = vld [vmem:[#allocation7 + $0x544] sm:$0xf]  ;;  %v10544_v31 = vld [vmem:[#allocation7 + $0x55c] sm:$0xf0] }
 0x24c   : > { %v3398_v45 = vadd.f32 %v3397_v9, %v3378_v37  ;;  %4877 = vmatpush.bf16.msrb.mxu2 %v10435_v16  ;;  %v10547_v13 = vor.u32 %v11757_v39, %v10544_v31  ;;  %v10074_v37 = vld [vmem:[#allocation7 + $0x190] sm:$0xf]  ;;  %v11642_v9 = vld [vmem:[#allocation7 + $0x1a8] sm:$0xf0]  ;;  %v10242_v43 = vld [vmem:[#allocation7 + $0x2e0] sm:$0xf] }
 0x24d   : > { %3717 = vmatmul.bf16.gmra.mxu2 %v13077_v49  ;;  %9867 = vmatmul.msk.bf16.gmra.mxu3 %vm3203_vm5, %v13080_v40  ;;  %v11652_v49 = vld [vmem:[#allocation7 + $0x1fc] sm:$0xf]  ;;  %v9903_v40 = vor.u32 %v11596_v44, %v9900_v46  ;;  %v10298_v16 = vld [vmem:[#allocation7 + $0x350] sm:$0xf]  ;;  %v10075_v15 = vor.u32 %v11642_v9, %v10074_v37  ;;  %v11691_v44 = vld [vmem:[#allocation7 + $0x330] sm:$0xf0] }
 0x24e   : > { %v10127_v28 = vor.u32 %v11652_v49, %v10124_v57  ;;  %4900 = vmatpush.bf16.msrb.mxu3 %v10547_v13  ;;  %v10522_v46 = vld [vmem:[#allocation7 + $0x510] sm:$0xf]  ;;  %v11754_v49 = vld [vmem:[#allocation7 + $0x528] sm:$0xf0]  ;;  %v10214_v37 = vld [vmem:[#allocation7 + $0x2a8] sm:$0xf] }
 0x24f   : > { %4841 = vmatpush.bf16.msrb.mxu0 %v9931_v0  ;;  %4860 = vmatpush.bf16.msrb.mxu1 %v10155_v5  ;;  %v10299_v0 = vor.u32 %v11698_v38, %v10298_v16  ;;  %v10634_v57 = vld [vmem:[#allocation7 + $0x5f0] sm:$0xf]  ;;  %v10466_v16 = vld [vmem:[#allocation7 + $0x4a0] sm:$0xf] }
 0x250   : > { %v3414_v59 = vpop.f32.mrf.mxu2  ;;  %v3433_v32 = vpop.f32.mrf.mxu3  ;;  %4878 = vmatpush.bf16.msrb.mxu2 %v10407_v19 }
 0x251   : > { %v3415_v10 = vadd.f32 %v3414_v59, %v3396_v25  ;;  %v10096_v25 = vld [vmem:[#allocation7 + $0x1dc] sm:$0xf0]  ;;  %v11635_v59 = vld [vmem:[#allocation7 + $0x170] sm:$0xf0] }
 0x252   : > { %v10099_v36 = vor.u32 %v11645_v30, %v10096_v25 }
 0x253   : > { %v13165_v21 = vadd.f32 %v3433_v32, %v3415_v10  ;;  %v3447_v35 = vpop.f32.mrf.mxu0  ;;  %v3466_v1 = vpop.f32.mrf.mxu1  ;;  %4842 = vmatpush.bf16.msrb.mxu0 %v9903_v40  ;;  %4861 = vmatpush.bf16.msrb.mxu1 %v10127_v28  ;;  %v10270_v32 = vld [vmem:[#allocation7 + $0x318] sm:$0xf]  ;;  %v10523_v40 = vor.u32 %v11754_v49, %v10522_v46  ;;  %v11782_v28 = vld [vmem:[#allocation7 + $0x608] sm:$0xf0]  ;;  %v10438_v49 = vld [vmem:[#allocation7 + $0x468] sm:$0xf] }
 0x254   : > { %v3467_v61 = vadd.f32 %v3466_v1, %v3447_v35  ;;  %4879 = vmatpush.bf16.msrb.mxu2 %v10379_v48  ;;  %v10271_v10 = vor.u32 %v11691_v44, %v10270_v32  ;;  %v10635_v26 = vor.u32 %v11782_v28, %v10634_v57  ;;  %v10018_v1 = vld [vmem:[#allocation7 + $0x120] sm:$0xf]  ;;  %v11628_v48 = vld [vmem:[#allocation7 + $0x138] sm:$0xf0]  ;;  %v11670_v44 = vld [vmem:[#allocation7 + $0x288] sm:$0xf0] }
 0x255   : > { %v10019_v30 = vor.u32 %v11628_v48, %v10018_v1  ;;  %v11607_v1 = vld [vmem:[#allocation7 + $0x90] sm:$0xf0]  ;;  %v10158_v48 = vld [vmem:[#allocation7 + $0x238] sm:$0xf] }
 0x256   : > { %4768 = vmatmul.bf16.vlgmr.msra.gmra.mxu0 %v12983_v8  ;;  %4787 = vmatmul.bf16.vlgmr.msra.gmra.mxu1 %v12985_v29 }
 0x257   : > { %4843 = vmatpush.bf16.msrb.mxu0 %v9875_v50  ;;  %4862 = vmatpush.bf16.msrb.mxu1 %v10099_v36  ;;  %v11684_v50 = vld [vmem:[#allocation7 + $0x2f8] sm:$0xf0] }
 0x258   : > { %v3416_v56 = vpop.f32.mrf.mxu2  ;;  %v3435_v11 = vpop.f32.mrf.mxu3  ;;  %4880 = vmatpush.bf16.msrb.mxu2 %v10351_v55  ;;  %v10243_v25 = vor.u32 %v11684_v50, %v10242_v43  ;;  %v10495_v55 = vor.u32 %v11747_v18, %v10494_v6  ;;  %v11663_v43 = vld [vmem:[#allocation7 + $0x250] sm:$0xf0]  ;;  %v10578_v6 = vld [vmem:[#allocation7 + $0x580] sm:$0xf]  ;;  %v11768_v18 = vld [vmem:[#allocation7 + $0x598] sm:$0xf0] }
 0x259   : > { %v3417_v52 = vadd.f32 %v3416_v56, %v3398_v45  ;;  %v10047_v45 = vor.u32 %v11635_v59, %v10046_v47  ;;  %v9990_v56 = vld [vmem:[#allocation7 + $0xe8] sm:$0xf]  ;;  %v11614_v47 = vld [vmem:[#allocation7 + $0xc8] sm:$0xf0]  ;;  %v10186_v59 = vld [vmem:[#allocation7 + $0x270] sm:$0xf]  ;;  %v10159_v50 = vor.u32 %v11663_v43, %v10158_v48 }
 0x25a   : > { %v10187_v46 = vor.u32 %v11670_v44, %v10186_v59  ;;  %v10102_v59 = vld [vmem:[#allocation7 + $0x1c8] sm:$0xf]  ;;  %v11712_v44 = vld [vmem:[#allocation7 + $0x3d8] sm:$0xf0]  ;;  %v10076_v48 = vld [vmem:[#allocation7 + $0x1ac] sm:$0xf0] }
 0x25b   : > { %v13169_v2 = vadd.f32 %v3435_v11, %v3417_v52  ;;  %v3449_v5 = vpop.f32.mrf.mxu0  ;;  %v3468_v19 = vpop.f32.mrf.mxu1  ;;  %4912 = vmatpush.bf16.msra.mxu0 %v10075_v15  ;;  %4931 = vmatpush.bf16.msra.mxu1 %v10299_v0  ;;  %v11621_v11 = vld [vmem:[#allocation7 + $0x100] sm:$0xf0]  ;;  %v11740_v52 = vld [vmem:[#allocation7 + $0x4b8] sm:$0xf0]  ;;  %v10606_v0 = vld [vmem:[#allocation7 + $0x5b8] sm:$0xf] }
 0x25c   : > { %v3469_v51 = vadd.f32 %v3468_v19, %v3449_v5  ;;  %4881 = vmatpush.bf16.msrb.mxu2 %v10323_v22  ;;  %v9991_v9 = vor.u32 %v11621_v11, %v9990_v56  ;;  %v10467_v38 = vor.u32 %v11740_v52, %v10466_v16  ;;  %v10607_v7 = vor.u32 %v11775_v4, %v10606_v0  ;;  %v9962_v22 = vld [vmem:[#allocation7 + $0xb0] sm:$0xf]  ;;  %v9906_v56 = vld [vmem:[#allocation7 + $0x40] sm:$0xf]  ;;  %v11600_v11 = vld [vmem:[#allocation7 + $0x58] sm:$0xf0] }
 0x25d   : > { %4806 = vmatmul.bf16.vlgmr.msra.gmra.mxu2 %v12994_v3  ;;  %10652 = vmatmul.msk.bf16.vlgmr.msra.gmra.mxu3 %vm3203_vm5, %v13004_v14  ;;  %v11656_v16 = vld [vmem:[#allocation7 + $0x218] sm:$0xf0] }
 0x25e   : > { %4973 = vmatpush.bf16.msra.mxu3 %v10635_v26 }
 0x25f   : > { %4913 = vmatpush.bf16.msra.mxu0 %v10047_v45  ;;  %4932 = vmatpush.bf16.msra.mxu1 %v10271_v10  ;;  %v9963_v45 = vor.u32 %v11614_v47, %v9962_v22  ;;  %v11733_v10 = vld [vmem:[#allocation7 + $0x480] sm:$0xf0]  ;;  %v9878_v22 = vld [vmem:[#allocation7 + $0x8] sm:$0xf] }
 0x260   : > { %v3485_v58 = vpop.f32.mrf.mxu2  ;;  %v3504_v35 = vpop.f32.mrf.mxu3  ;;  %4950 = vmatpush.bf16.msra.mxu2 %v10523_v40  ;;  %v10439_v26 = vor.u32 %v11733_v10, %v10438_v49  ;;  %v11593_v47 = vld [vmem:[#allocation7 + $0x20] sm:$0xf0]  ;;  %v10550_v49 = vld [vmem:[#allocation7 + $0x548] sm:$0xf] }
 0x261   : > { %v3486_v27 = vadd.f32 %v3485_v58, %v3467_v61  ;;  %v11677_v61 = vld [vmem:[#allocation7 + $0x2c0] sm:$0xf0] }
 0x262   : > { %v10215_v15 = vor.u32 %v11677_v61, %v10214_v37  ;;  %4974 = vmatpush.bf16.msra.mxu3 %v10607_v7  ;;  %v10130_v37 = vld [vmem:[#allocation7 + $0x200] sm:$0xf]  ;;  %v9907_v61 = vor.u32 %v11600_v11, %v9906_v56  ;;  %v11761_v10 = vld [vmem:[#allocation7 + $0x560] sm:$0xf0]  ;;  %v11632_v11 = vld [vmem:[#allocation7 + $0x15c] sm:$0xf] }
 0x263   : > { %v13174_v36 = vadd.f32 %v3504_v35, %v3486_v27  ;;  %v3452_v39 = vpop.f32.mrf.mxu0  ;;  %v3471_v31 = vpop.f32.mrf.mxu1  ;;  %4914 = vmatpush.bf16.msra.mxu0 %v10019_v30  ;;  %4933 = vmatpush.bf16.msra.mxu1 %v10243_v25  ;;  %v9934_v35 = vld [vmem:[#allocation7 + $0x78] sm:$0xf]  ;;  %v10410_v27 = vld [vmem:[#allocation7 + $0x430] sm:$0xf]  ;;  %v11726_v30 = vld [vmem:[#allocation7 + $0x448] sm:$0xf0]  ;;  %v10131_v52 = vor.u32 %v11656_v16, %v10130_v37 }
 0x264   : > { %v3472_v13 = vadd.f32 %v3471_v31, %v3452_v39  ;;  %4951 = vmatpush.bf16.msra.mxu2 %v10495_v55  ;;  %v10411_v25 = vor.u32 %v11726_v30, %v10410_v27  ;;  %v10579_v39 = vor.u32 %v11768_v18, %v10578_v6  ;;  %v10300_v30 = vld [vmem:[#allocation7 + $0x36c] sm:$0xf0]  ;;  %v11705_v6 = vld [vmem:[#allocation7 + $0x3a0] sm:$0xf0]  ;;  %v10048_v37 = vld [vmem:[#allocation7 + $0x174] sm:$0xf0] }
 0x265   : > { %v11751_v16 = vld [vmem:[#allocation7 + $0x514] sm:$0xf] }
 0x266   : > { %4773 = vmatmul.bf16.gmra.mxu0 %v13016_v54  ;;  %4792 = vmatmul.bf16.gmra.mxu1 %v13018_v24 }
 0x267   : > { %4915 = vmatpush.bf16.msra.mxu0 %v9991_v9  ;;  %4934 = vmatpush.bf16.msra.mxu1 %v10215_v15  ;;  %v10382_v15 = vld [vmem:[#allocation7 + $0x3f8] sm:$0xf] }
 0x268   : > { %v3487_v5 = vpop.f32.mrf.mxu2  ;;  %v3506_v19 = vpop.f32.mrf.mxu3  ;;  %4952 = vmatpush.bf16.msra.mxu2 %v10467_v38  ;;  %4975 = vmatpush.bf16.msra.mxu3 %v10579_v39  ;;  %v11719_v38 = vld [vmem:[#allocation7 + $0x410] sm:$0xf0] }
 0x269   : > { %v3488_v32 = vadd.f32 %v3487_v5, %v3469_v51  ;;  %v9935_v51 = vor.u32 %v11607_v1, %v9934_v35  ;;  %v10383_v5 = vor.u32 %v11719_v38, %v10382_v15  ;;  %v11639_v1 = vld [vmem:[#allocation7 + $0x194] sm:$0xf] }
 0x26a   : > { %v10079_v27 = vor.u32 %v11639_v1, %v10076_v48 }
 0x26b   : > { %v13178_v40 = vadd.f32 %v3506_v19, %v3488_v32  ;;  %v3454_v57 = vpop.f32.mrf.mxu0  ;;  %v3473_v28 = vpop.f32.mrf.mxu1  ;;  %4916 = vmatpush.bf16.msra.mxu0 %v9963_v45  ;;  %4935 = vmatpush.bf16.msra.mxu1 %v10187_v46  ;;  %v9879_v32 = vor.u32 %v11593_v47, %v9878_v22  ;;  %v10354_v45 = vld [vmem:[#allocation7 + $0x3c0] sm:$0xf] }
 0x26c   : > { %v3474_v58 = vadd.f32 %v3473_v28, %v3454_v57  ;;  %4953 = vmatpush.bf16.msra.mxu2 %v10439_v26  ;;  %v10355_v57 = vor.u32 %v11712_v44, %v10354_v45  ;;  %v10551_v28 = vor.u32 %v11761_v10, %v10550_v49  ;;  %v11744_v10 = vld [vmem:[#allocation7 + $0x4dc] sm:$0xf] }
 0x26d   : > { %4811 = vmatmul.bf16.gmra.mxu2 %v13039_v42  ;;  %10653 = vmatmul.msk.bf16.gmra.mxu3 %vm3203_vm5, %v13041_v33 }
 0x26e   : > { %4976 = vmatpush.bf16.msra.mxu3 %v10551_v28 }
 0x26f   : > { %4917 = vmatpush.bf16.msra.mxu0 %v9935_v51  ;;  %4936 = vmatpush.bf16.msra.mxu1 %v10159_v50  ;;  %v11695_v51 = vld [vmem:[#allocation7 + $0x354] sm:$0xf] }
 0x270   : > { %v3490_v31 = vpop.f32.mrf.mxu2  ;;  %v3509_v55 = vpop.f32.mrf.mxu3  ;;  %4954 = vmatpush.bf16.msra.mxu2 %v10411_v25  ;;  %v10303_v50 = vor.u32 %v11695_v51, %v10300_v30  ;;  %v10326_v25 = vld [vmem:[#allocation7 + $0x388] sm:$0xf]  ;;  %v11618_v51 = vld [vmem:[#allocation7 + $0xec] sm:$0xf] }
 0x271   : > { %v3491_v9 = vadd.f32 %v3490_v31, %v3472_v13  ;;  %v11649_v13 = vld [vmem:[#allocation7 + $0x1e0] sm:$0xf0] }
 0x272   : > { %v10103_v46 = vor.u32 %v11649_v13, %v10102_v59  ;;  %v11625_v59 = vld [vmem:[#allocation7 + $0x124] sm:$0xf] }
 0x273   : > { %v13183_v0 = vadd.f32 %v3509_v55, %v3491_v9  ;;  %v3523_v4 = vpop.f32.mrf.mxu0  ;;  %v3542_v7 = vpop.f32.mrf.mxu1  ;;  %4918 = vmatpush.bf16.msra.mxu0 %v9907_v61  ;;  %4937 = vmatpush.bf16.msra.mxu1 %v10131_v52  ;;  %v10327_v55 = vor.u32 %v11705_v6, %v10326_v25  ;;  %v11688_v9 = vld [vmem:[#allocation7 + $0x31c] sm:$0xf]  ;;  %v10272_v61 = vld [vmem:[#allocation7 + $0x334] sm:$0xf0]  ;;  %v10524_v52 = vld [vmem:[#allocation7 + $0x52c] sm:$0xf0] }
 0x274   : > { %v3543_v19 = vadd.f32 %v3542_v7, %v3523_v4  ;;  %4955 = vmatpush.bf16.msra.mxu2 %v10383_v5  ;;  %v10275_v15 = vor.u32 %v11688_v9, %v10272_v61  ;;  %v10527_v38 = vor.u32 %v11751_v16, %v10524_v52  ;;  %v11779_v4 = vld [vmem:[#allocation7 + $0x5f4] sm:$0xf]  ;;  %v10636_v7 = vld [vmem:[#allocation7 + $0x60c] sm:$0xf0]  ;;  %v11681_v13 = vld [vmem:[#allocation7 + $0x2e4] sm:$0xf] }
 0x275   : > { %v10639_v5 = vor.u32 %v11779_v4, %v10636_v7  ;;  %v10468_v25 = vld [vmem:[#allocation7 + $0x4bc] sm:$0xf0]  ;;  %v9964_v61 = vld [vmem:[#allocation7 + $0xcc] sm:$0xf0]  ;;  %v11667_v16 = vld [vmem:[#allocation7 + $0x274] sm:$0xf] }
 0x276   : > { %4844 = vmatmul.bf16.vlgmr.msrb.gmra.mxu0 %v12983_v8  ;;  %4863 = vmatmul.bf16.vlgmr.msrb.gmra.mxu1 %v12985_v29  ;;  %v11730_v7 = vld [vmem:[#allocation7 + $0x46c] sm:$0xf] }
 0x277   : > { %4919 = vmatpush.bf16.msra.mxu0 %v9879_v32  ;;  %4938 = vmatpush.bf16.msra.mxu1 %v10103_v46  ;;  %v10020_v32 = vld [vmem:[#allocation7 + $0x13c] sm:$0xf0] }
 0x278   : > { %v3492_v26 = vpop.f32.mrf.mxu2  ;;  %v3511_v35 = vpop.f32.mrf.mxu3  ;;  %4956 = vmatpush.bf16.msra.mxu2 %v10355_v57  ;;  %v10023_v44 = vor.u32 %v11625_v59, %v10020_v32  ;;  %v10244_v46 = vld [vmem:[#allocation7 + $0x2fc] sm:$0xf0]  ;;  %v10496_v57 = vld [vmem:[#allocation7 + $0x4f4] sm:$0xf0] }
 0x279   : > { %v3493_v43 = vadd.f32 %v3492_v26, %v3474_v58  ;;  %v10051_v58 = vor.u32 %v11632_v11, %v10048_v37  ;;  %v10247_v49 = vor.u32 %v11681_v13, %v10244_v46  ;;  %v10499_v1 = vor.u32 %v11744_v10, %v10496_v57  ;;  %v11660_v46 = vld [vmem:[#allocation7 + $0x23c] sm:$0xf]  ;;  %v11723_v10 = vld [vmem:[#allocation7 + $0x434] sm:$0xf]  ;;  %v10412_v57 = vld [vmem:[#allocation7 + $0x44c] sm:$0xf0] }
 0x27b   : > { %v13187_v18 = vadd.f32 %v3511_v35, %v3493_v43  ;;  %v3525_v39 = vpop.f32.mrf.mxu0  ;;  %v3544_v31 = vpop.f32.mrf.mxu1  ;;  %4988 = vmatpush.bf16.msrb.mxu0 %v10079_v27  ;;  %5007 = vmatpush.bf16.msrb.mxu1 %v10303_v50  ;;  %v9992_v43 = vld [vmem:[#allocation7 + $0x104] sm:$0xf0]  ;;  %v11674_v27 = vld [vmem:[#allocation7 + $0x2ac] sm:$0xf]  ;;  %v11737_v50 = vld [vmem:[#allocation7 + $0x4a4] sm:$0xf] }
 0x27c   : > { %v3545_v56 = vadd.f32 %v3544_v31, %v3525_v39  ;;  %4957 = vmatpush.bf16.msra.mxu2 %v10327_v55  ;;  %v9995_v30 = vor.u32 %v11618_v51, %v9992_v43  ;;  %v10471_v39 = vor.u32 %v11737_v50, %v10468_v25  ;;  %v11772_v31 = vld [vmem:[#allocation7 + $0x5bc] sm:$0xf]  ;;  %v10608_v55 = vld [vmem:[#allocation7 + $0x5d4] sm:$0xf0]  ;;  %v10580_v51 = vld [vmem:[#allocation7 + $0x59c] sm:$0xf0] }
 0x27d   : > { %4882 = vmatmul.bf16.vlgmr.msrb.gmra.mxu2 %v12994_v3  ;;  %10654 = vmatmul.msk.bf16.vlgmr.msrb.gmra.mxu3 %vm3203_vm5, %v13004_v14  ;;  %v10611_v11 = vor.u32 %v11772_v31, %v10608_v55  ;;  %v9908_v50 = vld [vmem:[#allocation7 + $0x5c] sm:$0xf0]  ;;  %v11653_v25 = vld [vmem:[#allocation7 + $0x204] sm:$0xf] }
 0x27e   : > { %5049 = vmatpush.bf16.msrb.mxu3 %v10639_v5  ;;  %v10440_v5 = vld [vmem:[#allocation7 + $0x484] sm:$0xf0]  ;;  %v10132_v31 = vld [vmem:[#allocation7 + $0x21c] sm:$0xf0] }
 0x27f   : > { %4989 = vmatpush.bf16.msrb.mxu0 %v10051_v58  ;;  %5008 = vmatpush.bf16.msrb.mxu1 %v10275_v15  ;;  %v11611_v58 = vld [vmem:[#allocation7 + $0xb4] sm:$0xf]  ;;  %v10443_v32 = vor.u32 %v11730_v7, %v10440_v5  ;;  %v10135_v55 = vor.u32 %v11653_v25, %v10132_v31  ;;  %v11709_v5 = vld [vmem:[#allocation7 + $0x3c4] sm:$0xf]  ;;  %v10054_v31 = vld [vmem:[#allocation7 + $0x160] sm:$0xf] }
 0x280   : > { %v3561_v22 = vpop.f32.mrf.mxu2  ;;  %v3580_v47 = vpop.f32.mrf.mxu3  ;;  %5026 = vmatpush.bf16.msrb.mxu2 %v10527_v38  ;;  %v9967_v15 = vor.u32 %v11611_v58, %v9964_v61  ;;  %v10188_v38 = vld [vmem:[#allocation7 + $0x28c] sm:$0xf0] }
 0x281   : > { %v3562_v45 = vadd.f32 %v3561_v22, %v3543_v19  ;;  %v10216_v19 = vld [vmem:[#allocation7 + $0x2c4] sm:$0xf0]  ;;  %v10191_v4 = vor.u32 %v11667_v16, %v10188_v38 }
 0x282   : > { %v10219_v6 = vor.u32 %v11674_v27, %v10216_v19  ;;  %5050 = vmatpush.bf16.msrb.mxu3 %v10611_v11  ;;  %v11597_v19 = vld [vmem:[#allocation7 + $0x44] sm:$0xf]  ;;  %v11716_v11 = vld [vmem:[#allocation7 + $0x3fc] sm:$0xf]  ;;  %v9880_v38 = vld [vmem:[#allocation7 + $0x24] sm:$0xf0] }
 0x283   : > { %v13192_v28 = vadd.f32 %v3580_v47, %v3562_v45  ;;  %v3528_v26 = vpop.f32.mrf.mxu0  ;;  %v3547_v35 = vpop.f32.mrf.mxu1  ;;  %4990 = vmatpush.bf16.msrb.mxu0 %v10023_v44  ;;  %5009 = vmatpush.bf16.msrb.mxu1 %v10247_v49  ;;  %v11604_v45 = vld [vmem:[#allocation7 + $0x7c] sm:$0xf]  ;;  %v9936_v44 = vld [vmem:[#allocation7 + $0x94] sm:$0xf0] }
 0x284   : > { %v3548_v48 = vadd.f32 %v3547_v35, %v3528_v26  ;;  %5027 = vmatpush.bf16.msrb.mxu2 %v10499_v1  ;;  %v10160_v49 = vld [vmem:[#allocation7 + $0x254] sm:$0xf0]  ;;  %v10415_v35 = vor.u32 %v11723_v10, %v10412_v57  ;;  %v11765_v1 = vld [vmem:[#allocation7 + $0x584] sm:$0xf]  ;;  %v11643_v57 = vld [vmem:[#allocation7 + $0x1b0] sm:$0xf0] }
 0x285   : > { %v10163_v26 = vor.u32 %v11660_v46, %v10160_v49  ;;  %v10583_v43 = vor.u32 %v11765_v1, %v10580_v51  ;;  %v10082_v10 = vld [vmem:[#allocation7 + $0x198] sm:$0xf]  ;;  %v11699_v51 = vld [vmem:[#allocation7 + $0x370] sm:$0xf0] }
 0x286   : > { %4849 = vmatmul.bf16.gmra.mxu0 %v13016_v54  ;;  %4868 = vmatmul.bf16.gmra.mxu1 %v13018_v24  ;;  %v10083_v1 = vor.u32 %v11643_v57, %v10082_v10  ;;  %v11748_v10 = vld [vmem:[#allocation7 + $0x4f8] sm:$0xf0] }
 0x287   : > { %4991 = vmatpush.bf16.msrb.mxu0 %v9995_v30  ;;  %5010 = vmatpush.bf16.msrb.mxu1 %v10219_v6 }
 0x288   : > { %v3563_v37 = vpop.f32.mrf.mxu2  ;;  %v3582_v9 = vpop.f32.mrf.mxu3  ;;  %5028 = vmatpush.bf16.msrb.mxu2 %v10471_v39  ;;  %5051 = vmatpush.bf16.msrb.mxu3 %v10583_v43  ;;  %v9911_v39 = vor.u32 %v11597_v19, %v9908_v50 }
 0x289   : > { %v3564_v52 = vadd.f32 %v3563_v37, %v3545_v56  ;;  %v9939_v56 = vor.u32 %v11604_v45, %v9936_v44  ;;  %v10384_v37 = vld [vmem:[#allocation7 + $0x414] sm:$0xf0]  ;;  %v10552_v45 = vld [vmem:[#allocation7 + $0x564] sm:$0xf0] }
 0x28a   : > { %v10387_v16 = vor.u32 %v11716_v11, %v10384_v37  ;;  %v10278_v11 = vld [vmem:[#allocation7 + $0x320] sm:$0xf]  ;;  %v11692_v37 = vld [vmem:[#allocation7 + $0x338] sm:$0xf0] }
 0x28b   : > { %v13196_v22 = vadd.f32 %v3582_v9, %v3564_v52  ;;  %v3530_v47 = vpop.f32.mrf.mxu0  ;;  %v3549_v59 = vpop.f32.mrf.mxu1  ;;  %4992 = vmatpush.bf16.msrb.mxu0 %v9967_v15  ;;  %5011 = vmatpush.bf16.msrb.mxu1 %v10191_v4  ;;  %v11590_v15 = vld [vmem:[#allocation7 + $0xc] sm:$0xf] }
 0x28c   : > { %v3550_v13 = vadd.f32 %v3549_v59, %v3530_v47  ;;  %5029 = vmatpush.bf16.msrb.mxu2 %v10443_v32  ;;  %v11646_v4 = vld [vmem:[#allocation7 + $0x1cc] sm:$0xf]  ;;  %v9883_v7 = vor.u32 %v11590_v15, %v9880_v38  ;;  %v10356_v47 = vld [vmem:[#allocation7 + $0x3dc] sm:$0xf0]  ;;  %v10642_v38 = vld [vmem:[#allocation7 + $0x5f8] sm:$0xf] }
 0x28d   : > { %4887 = vmatmul.bf16.gmra.mxu2 %v13039_v42  ;;  %10655 = vmatmul.msk.bf16.gmra.mxu3 %vm3203_vm5, %v13041_v33  ;;  %v11758_v32 = vld [vmem:[#allocation7 + $0x54c] sm:$0xf]  ;;  %v10359_v44 = vor.u32 %v11709_v5, %v10356_v47  ;;  %v10026_v47 = vld [vmem:[#allocation7 + $0x128] sm:$0xf] }
 0x28e   : > { %v10555_v46 = vor.u32 %v11758_v32, %v10552_v45  ;;  %v10250_v32 = vld [vmem:[#allocation7 + $0x2e8] sm:$0xf] }
 0x28f   : > { %4993 = vmatpush.bf16.msrb.mxu0 %v9939_v56  ;;  %5012 = vmatpush.bf16.msrb.mxu1 %v10163_v26  ;;  %v10306_v26 = vld [vmem:[#allocation7 + $0x358] sm:$0xf] }
 0x290   : > { %v3566_v27 = vpop.f32.mrf.mxu2  ;;  %v3585_v30 = vpop.f32.mrf.mxu3  ;;  %5030 = vmatpush.bf16.msrb.mxu2 %v10415_v35  ;;  %5052 = vmatpush.bf16.msrb.mxu3 %v10555_v46  ;;  %v10307_v43 = vor.u32 %v11699_v51, %v10306_v26  ;;  %v11685_v46 = vld [vmem:[#allocation7 + $0x300] sm:$0xf0] }
 0x291   : > { %v3567_v6 = vadd.f32 %v3566_v27, %v3548_v48  ;;  %v10104_v48 = vld [vmem:[#allocation7 + $0x1e4] sm:$0xf0]  ;;  %v11702_v27 = vld [vmem:[#allocation7 + $0x38c] sm:$0xf] }
 0x292   : > { %v10107_v59 = vor.u32 %v11646_v4, %v10104_v48  ;;  %v11783_v4 = vld [vmem:[#allocation7 + $0x610] sm:$0xf0] }
 0x293   : > { %v13201_v9 = vadd.f32 %v3585_v30, %v3567_v6  ;;  %v3599_v58 = vpop.f32.mrf.mxu0  ;;  %v3618_v61 = vpop.f32.mrf.mxu1  ;;  %4994 = vmatpush.bf16.msrb.mxu0 %v9911_v39  ;;  %5013 = vmatpush.bf16.msrb.mxu1 %v10135_v55  ;;  %v10328_v30 = vld [vmem:[#allocation7 + $0x3a4] sm:$0xf0]  ;;  %v11636_v55 = vld [vmem:[#allocation7 + $0x178] sm:$0xf0] }
 0x294   : > { %v3619_v52 = vadd.f32 %v3618_v61, %v3599_v58  ;;  %5031 = vmatpush.bf16.msrb.mxu2 %v10387_v16  ;;  %v10331_v6 = vor.u32 %v11702_v27, %v10328_v30  ;;  %v10530_v58 = vld [vmem:[#allocation7 + $0x518] sm:$0xf]  ;;  %v11755_v61 = vld [vmem:[#allocation7 + $0x530] sm:$0xf0]  ;;  %v10279_v16 = vor.u32 %v11692_v37, %v10278_v11  ;;  %v11622_v27 = vld [vmem:[#allocation7 + $0x108] sm:$0xf0] }
 0x295   : > { %v10531_v15 = vor.u32 %v11755_v61, %v10530_v58  ;;  %v10222_v30 = vld [vmem:[#allocation7 + $0x2b0] sm:$0xf]  ;;  %v10614_v11 = vld [vmem:[#allocation7 + $0x5c0] sm:$0xf] }
 0x296   : > { %4920 = vmatmul.bf16.vlgmr.msra.gmra.mxu0 %v12983_v8  ;;  %4939 = vmatmul.bf16.vlgmr.msra.gmra.mxu1 %v12985_v29 }
 0x297   : > { %4995 = vmatpush.bf16.msrb.mxu0 %v9883_v7  ;;  %5014 = vmatpush.bf16.msrb.mxu1 %v10107_v59  ;;  %v10643_v7 = vor.u32 %v11783_v4, %v10642_v38  ;;  %v11629_v59 = vld [vmem:[#allocation7 + $0x140] sm:$0xf0]  ;;  %v10194_v38 = vld [vmem:[#allocation7 + $0x278] sm:$0xf] }
 0x298   : > { %v3568_v56 = vpop.f32.mrf.mxu2  ;;  %v3587_v49 = vpop.f32.mrf.mxu3  ;;  %5032 = vmatpush.bf16.msrb.mxu2 %v10359_v44  ;;  %v10027_v44 = vor.u32 %v11629_v59, %v10026_v47  ;;  %v10446_v47 = vld [vmem:[#allocation7 + $0x470] sm:$0xf]  ;;  %v11734_v59 = vld [vmem:[#allocation7 + $0x488] sm:$0xf0] }
 0x299   : > { %v3569_v35 = vadd.f32 %v3568_v56, %v3550_v13  ;;  %v10055_v13 = vor.u32 %v11636_v55, %v10054_v31  ;;  %v10251_v56 = vor.u32 %v11685_v46, %v10250_v32  ;;  %v10447_v46 = vor.u32 %v11734_v59, %v10446_v47  ;;  %v9886_v59 = vld [vmem:[#allocation7 + $0x10] sm:$0xf] }
 0x29b   : > { %v13205_v19 = vadd.f32 %v3587_v49, %v3569_v35  ;;  %v3601_v50 = vpop.f32.mrf.mxu0  ;;  %v3620_v25 = vpop.f32.mrf.mxu1  ;;  %5064 = vmatpush.bf16.msra.mxu0 %v10083_v1  ;;  %5083 = vmatpush.bf16.msra.mxu1 %v10307_v43  ;;  %v10502_v49 = vld [vmem:[#allocation7 + $0x4e0] sm:$0xf]  ;;  %v9998_v43 = vld [vmem:[#allocation7 + $0xf0] sm:$0xf] }
 0x29c   : > { %v3621_v39 = vadd.f32 %v3620_v25, %v3601_v50  ;;  %5033 = vmatpush.bf16.msrb.mxu2 %v10331_v6  ;;  %v10503_v1 = vor.u32 %v11748_v10, %v10502_v49  ;;  %v9999_v50 = vor.u32 %v11622_v27, %v9998_v43  ;;  %v10474_v25 = vld [vmem:[#allocation7 + $0x4a8] sm:$0xf]  ;;  %v11741_v6 = vld [vmem:[#allocation7 + $0x4c0] sm:$0xf0]  ;;  %v9942_v49 = vld [vmem:[#allocation7 + $0x80] sm:$0xf] }
 0x29d   : > { %4958 = vmatmul.bf16.vlgmr.msra.gmra.mxu2 %v12994_v3  ;;  %10656 = vmatmul.msk.bf16.vlgmr.msra.gmra.mxu3 %vm3203_vm5, %v13004_v14  ;;  %v10475_v55 = vor.u32 %v11741_v6, %v10474_v25  ;;  %v11608_v10 = vld [vmem:[#allocation7 + $0x98] sm:$0xf0]  ;;  %v11727_v43 = vld [vmem:[#allocation7 + $0x450] sm:$0xf0] }
 0x29e   : > { %5125 = vmatpush.bf16.msra.mxu3 %v10643_v7 }
 0x29f   : > { %5065 = vmatpush.bf16.msra.mxu0 %v10055_v13  ;;  %5084 = vmatpush.bf16.msra.mxu1 %v10279_v16  ;;  %v11776_v13 = vld [vmem:[#allocation7 + $0x5d8] sm:$0xf0]  ;;  %v9970_v16 = vld [vmem:[#allocation7 + $0xb8] sm:$0xf] }
 0x2a0   : > { %v3637_v48 = vpop.f32.mrf.mxu2  ;;  %v3656_v5 = vpop.f32.mrf.mxu3  ;;  %5102 = vmatpush.bf16.msra.mxu2 %v10531_v15  ;;  %v10615_v37 = vor.u32 %v11776_v13, %v10614_v11  ;;  %v11615_v15 = vld [vmem:[#allocation7 + $0xd0] sm:$0xf0]  ;;  %v11601_v11 = vld [vmem:[#allocation7 + $0x60] sm:$0xf0]  ;;  %v10138_v13 = vld [vmem:[#allocation7 + $0x208] sm:$0xf] }
 0x2a1   : > { %v3638_v45 = vadd.f32 %v3637_v48, %v3619_v52  ;;  %v11678_v52 = vld [vmem:[#allocation7 + $0x2c8] sm:$0xf0]  ;;  %v9971_v7 = vor.u32 %v11615_v15, %v9970_v16  ;;  %v11671_v48 = vld [vmem:[#allocation7 + $0x290] sm:$0xf0]  ;;  %v10390_v15 = vld [vmem:[#allocation7 + $0x400] sm:$0xf] }
 0x2a2   : > { %v10223_v31 = vor.u32 %v11678_v52, %v10222_v30  ;;  %5126 = vmatpush.bf16.msra.mxu3 %v10615_v37  ;;  %v11769_v52 = vld [vmem:[#allocation7 + $0x5a0] sm:$0xf0] }
 0x2a3   : > { %v13210_v57 = vadd.f32 %v3656_v5, %v3638_v45  ;;  %v3604_v26 = vpop.f32.mrf.mxu0  ;;  %v3623_v35 = vpop.f32.mrf.mxu1  ;;  %5066 = vmatpush.bf16.msra.mxu0 %v10027_v44  ;;  %5085 = vmatpush.bf16.msra.mxu1 %v10251_v56  ;;  %v10195_v5 = vor.u32 %v11671_v48, %v10194_v38  ;;  %v11720_v38 = vld [vmem:[#allocation7 + $0x418] sm:$0xf0] }
 0x2a4   : > { %v3624_v51 = vadd.f32 %v3623_v35, %v3604_v26  ;;  %5103 = vmatpush.bf16.msra.mxu2 %v10503_v1  ;;  %v10166_v26 = vld [vmem:[#allocation7 + $0x240] sm:$0xf]  ;;  %v11664_v35 = vld [vmem:[#allocation7 + $0x258] sm:$0xf0]  ;;  %v10418_v1 = vld [vmem:[#allocation7 + $0x438] sm:$0xf] }
 0x2a5   : > { %v10167_v27 = vor.u32 %v11664_v35, %v10166_v26  ;;  %v10419_v30 = vor.u32 %v11727_v43, %v10418_v1  ;;  %v11713_v26 = vld [vmem:[#allocation7 + $0x3e0] sm:$0xf0]  ;;  %v11762_v1 = vld [vmem:[#allocation7 + $0x568] sm:$0xf0] }
 0x2a6   : > { %4925 = vmatmul.bf16.gmra.mxu0 %v13016_v54  ;;  %4944 = vmatmul.bf16.gmra.mxu1 %v13018_v24 }
 0x2a7   : > { %5067 = vmatpush.bf16.msra.mxu0 %v9999_v50  ;;  %5086 = vmatpush.bf16.msra.mxu1 %v10223_v31  ;;  %v10586_v50 = vld [vmem:[#allocation7 + $0x588] sm:$0xf] }
 0x2a8   : > { %v3639_v58 = vpop.f32.mrf.mxu2  ;;  %v3658_v61 = vpop.f32.mrf.mxu3  ;;  %5104 = vmatpush.bf16.msra.mxu2 %v10475_v55  ;;  %v10587_v25 = vor.u32 %v11769_v52, %v10586_v50  ;;  %v9914_v55 = vld [vmem:[#allocation7 + $0x48] sm:$0xf]  ;;  %v11640_v50 = vld [vmem:[#allocation7 + $0x19c] sm:$0xf]  ;;  %v10084_v52 = vld [vmem:[#allocation7 + $0x1b4] sm:$0xf0] }
 0x2a9   : > { %v3640_v4 = vadd.f32 %v3639_v58, %v3621_v39  ;;  %v9943_v39 = vor.u32 %v11608_v10, %v9942_v49  ;;  %v9915_v58 = vor.u32 %v11601_v11, %v9914_v55  ;;  %v10362_v10 = vld [vmem:[#allocation7 + $0x3c8] sm:$0xf]  ;;  %v10308_v55 = vld [vmem:[#allocation7 + $0x374] sm:$0xf0] }
 0x2aa   : > { %5127 = vmatpush.bf16.msra.mxu3 %v10587_v25  ;;  %v10363_v35 = vor.u32 %v11713_v26, %v10362_v10  ;;  %v11696_v25 = vld [vmem:[#allocation7 + $0x35c] sm:$0xf]  ;;  %v10644_v10 = vld [vmem:[#allocation7 + $0x614] sm:$0xf0] }
 0x2ab   : > { %v13214_v32 = vadd.f32 %v3658_v61, %v3640_v4  ;;  %v3606_v45 = vpop.f32.mrf.mxu0  ;;  %v3625_v44 = vpop.f32.mrf.mxu1  ;;  %5068 = vmatpush.bf16.msra.mxu0 %v9971_v7  ;;  %5087 = vmatpush.bf16.msra.mxu1 %v10195_v5  ;;  %v11657_v61 = vld [vmem:[#allocation7 + $0x220] sm:$0xf0]  ;;  %v10391_v5 = vor.u32 %v11720_v38, %v10390_v15  ;;  %v10311_v11 = vor.u32 %v11696_v25, %v10308_v55 }
 0x2ac   : > { %v3626_v56 = vadd.f32 %v3625_v44, %v3606_v45  ;;  %5105 = vmatpush.bf16.msra.mxu2 %v10447_v46  ;;  %v10139_v16 = vor.u32 %v11657_v61, %v10138_v13  ;;  %v11594_v45 = vld [vmem:[#allocation7 + $0x28] sm:$0xf0]  ;;  %v10110_v44 = vld [vmem:[#allocation7 + $0x1d0] sm:$0xf] }
 0x2ad   : > { %4963 = vmatmul.bf16.gmra.mxu2 %v13039_v42  ;;  %10657 = vmatmul.msk.bf16.gmra.mxu3 %vm3203_vm5, %v13041_v33  ;;  %v9887_v46 = vor.u32 %v11594_v45, %v9886_v59  ;;  %v10334_v13 = vld [vmem:[#allocation7 + $0x390] sm:$0xf]  ;;  %v10280_v59 = vld [vmem:[#allocation7 + $0x33c] sm:$0xf0] }
 0x2af   : > { %5069 = vmatpush.bf16.msra.mxu0 %v9943_v39  ;;  %5088 = vmatpush.bf16.msra.mxu1 %v10167_v27  ;;  %v10558_v39 = vld [vmem:[#allocation7 + $0x550] sm:$0xf] }
 0x2b0   : > { %v3642_v6 = vpop.f32.mrf.mxu2  ;;  %v3661_v31 = vpop.f32.mrf.mxu3  ;;  %5106 = vmatpush.bf16.msra.mxu2 %v10419_v30  ;;  %v10559_v30 = vor.u32 %v11762_v1, %v10558_v39  ;;  %v11626_v1 = vld [vmem:[#allocation7 + $0x12c] sm:$0xf] }
 0x2b1   : > { %v3643_v37 = vadd.f32 %v3642_v6, %v3624_v51  ;;  %v11650_v51 = vld [vmem:[#allocation7 + $0x1e8] sm:$0xf0] }
 0x2b2   : > { %v10111_v49 = vor.u32 %v11650_v51, %v10110_v44  ;;  %5128 = vmatpush.bf16.msra.mxu3 %v10559_v30  ;;  %v11752_v44 = vld [vmem:[#allocation7 + $0x51c] sm:$0xf] }
 0x2b3   : > { %v13219_v4 = vadd.f32 %v3661_v31, %v3643_v37  ;;  %v3675_v7 = vpop.f32.mrf.mxu0  ;;  %v3694_v48 = vpop.f32.mrf.mxu1  ;;  %5070 = vmatpush.bf16.msra.mxu0 %v9915_v58  ;;  %5089 = vmatpush.bf16.msra.mxu1 %v10139_v16  ;;  %v10087_v31 = vor.u32 %v11640_v50, %v10084_v52  ;;  %v11706_v37 = vld [vmem:[#allocation7 + $0x3a8] sm:$0xf0]  ;;  %v11780_v51 = vld [vmem:[#allocation7 + $0x5fc] sm:$0xf]  ;;  %v10252_v52 = vld [vmem:[#allocation7 + $0x304] sm:$0xf0] }
 0x2b4   : > { %v3695_v47 = vadd.f32 %v3694_v48, %v3675_v7  ;;  %5107 = vmatpush.bf16.msra.mxu2 %v10391_v5  ;;  %v10335_v15 = vor.u32 %v11706_v37, %v10334_v13  ;;  %v11633_v7 = vld [vmem:[#allocation7 + $0x164] sm:$0xf]  ;;  %v10056_v48 = vld [vmem:[#allocation7 + $0x17c] sm:$0xf0] }
 0x2b5   : > { %v11689_v5 = vld [vmem:[#allocation7 + $0x324] sm:$0xf] }
 0x2b6   : > { %4996 = vmatmul.bf16.vlgmr.msrb.gmra.mxu0 %v12983_v8  ;;  %5015 = vmatmul.bf16.vlgmr.msrb.gmra.mxu1 %v12985_v29  ;;  %v10283_v45 = vor.u32 %v11689_v5, %v10280_v59  ;;  %v10476_v59 = vld [vmem:[#allocation7 + $0x4c4] sm:$0xf0] }
 0x2b7   : > { %5071 = vmatpush.bf16.msra.mxu0 %v9887_v46  ;;  %5090 = vmatpush.bf16.msra.mxu1 %v10111_v49  ;;  %v10532_v46 = vld [vmem:[#allocation7 + $0x534] sm:$0xf0] }
 0x2b8   : > { %v3644_v43 = vpop.f32.mrf.mxu2  ;;  %v3663_v27 = vpop.f32.mrf.mxu3  ;;  %5108 = vmatpush.bf16.msra.mxu2 %v10363_v35  ;;  %v10535_v49 = vor.u32 %v11752_v44, %v10532_v46  ;;  %v10647_v35 = vor.u32 %v11780_v51, %v10644_v10  ;;  %v10616_v46 = vld [vmem:[#allocation7 + $0x5dc] sm:$0xf0] }
 0x2b9   : > { %v3645_v6 = vadd.f32 %v3644_v43, %v3626_v56  ;;  %v10059_v56 = vor.u32 %v11633_v7, %v10056_v48  ;;  %v10028_v43 = vld [vmem:[#allocation7 + $0x144] sm:$0xf0]  ;;  %v11675_v7 = vld [vmem:[#allocation7 + $0x2b4] sm:$0xf]  ;;  %v10224_v48 = vld [vmem:[#allocation7 + $0x2cc] sm:$0xf0] }
 0x2ba   : > { %v10031_v50 = vor.u32 %v11626_v1, %v10028_v43  ;;  %v10227_v5 = vor.u32 %v11675_v7, %v10224_v48  ;;  %v10168_v7 = vld [vmem:[#allocation7 + $0x25c] sm:$0xf0]  ;;  %v11724_v48 = vld [vmem:[#allocation7 + $0x43c] sm:$0xf] }
 0x2bb   : > { %v13223_v58 = vadd.f32 %v3663_v27, %v3645_v6  ;;  %v3677_v61 = vpop.f32.mrf.mxu0  ;;  %v3696_v16 = vpop.f32.mrf.mxu1  ;;  %5140 = vmatpush.bf16.msrb.mxu0 %v10087_v31  ;;  %5159 = vmatpush.bf16.msrb.mxu1 %v10311_v11  ;;  %v11682_v27 = vld [vmem:[#allocation7 + $0x2ec] sm:$0xf]  ;;  %v11745_v6 = vld [vmem:[#allocation7 + $0x4e4] sm:$0xf]  ;;  %v10504_v31 = vld [vmem:[#allocation7 + $0x4fc] sm:$0xf0] }
 0x2bc   : > { %v3697_v38 = vadd.f32 %v3696_v16, %v3677_v61  ;;  %5109 = vmatpush.bf16.msra.mxu2 %v10335_v15  ;;  %v10255_v25 = vor.u32 %v11682_v27, %v10252_v52  ;;  %v10507_v37 = vor.u32 %v11745_v6, %v10504_v31  ;;  %v11619_v16 = vld [vmem:[#allocation7 + $0xf4] sm:$0xf]  ;;  %v10000_v15 = vld [vmem:[#allocation7 + $0x10c] sm:$0xf0]  ;;  %v10196_v27 = vld [vmem:[#allocation7 + $0x294] sm:$0xf0] }
 0x2bd   : > { %5034 = vmatmul.bf16.vlgmr.msrb.gmra.mxu2 %v12994_v3  ;;  %10658 = vmatmul.msk.bf16.vlgmr.msrb.gmra.mxu3 %vm3203_vm5, %v13004_v14  ;;  %v10448_v52 = vld [vmem:[#allocation7 + $0x48c] sm:$0xf0] }
 0x2be   : > { %5201 = vmatpush.bf16.msrb.mxu3 %v10647_v35  ;;  %v11668_v35 = vld [vmem:[#allocation7 + $0x27c] sm:$0xf] }
 0x2bf   : > { %5141 = vmatpush.bf16.msrb.mxu0 %v10059_v56  ;;  %5160 = vmatpush.bf16.msrb.mxu1 %v10283_v45  ;;  %v11738_v56 = vld [vmem:[#allocation7 + $0x4ac] sm:$0xf]  ;;  %v11773_v45 = vld [vmem:[#allocation7 + $0x5c4] sm:$0xf] }
 0x2c0   : > { %v3713_v26 = vpop.f32.mrf.mxu2  ;;  %v3732_v39 = vpop.f32.mrf.mxu3  ;;  %5178 = vmatpush.bf16.msrb.mxu2 %v10535_v49  ;;  %v10479_v44 = vor.u32 %v11738_v56, %v10476_v59  ;;  %v10619_v10 = vor.u32 %v11773_v45, %v10616_v46  ;;  %v11766_v56 = vld [vmem:[#allocation7 + $0x58c] sm:$0xf]  ;;  %v10588_v45 = vld [vmem:[#allocation7 + $0x5a4] sm:$0xf0] }
 0x2c1   : > { %v3714_v30 = vadd.f32 %v3713_v26, %v3695_v47  ;;  %v10003_v47 = vor.u32 %v11619_v16, %v10000_v15  ;;  %v11612_v26 = vld [vmem:[#allocation7 + $0xbc] sm:$0xf]  ;;  %v9944_v16 = vld [vmem:[#allocation7 + $0x9c] sm:$0xf0]  ;;  %v11661_v15 = vld [vmem:[#allocation7 + $0x244] sm:$0xf] }
 0x2c2   : > { %5202 = vmatpush.bf16.msrb.mxu3 %v10619_v10  ;;  %v9916_v10 = vld [vmem:[#allocation7 + $0x64] sm:$0xf0] }
 0x2c3   : > { %v13228_v55 = vadd.f32 %v3732_v39, %v3714_v30  ;;  %v3680_v11 = vpop.f32.mrf.mxu0  ;;  %v3699_v13 = vpop.f32.mrf.mxu1  ;;  %5142 = vmatpush.bf16.msrb.mxu0 %v10031_v50  ;;  %5161 = vmatpush.bf16.msrb.mxu1 %v10255_v25  ;;  %v9972_v39 = vld [vmem:[#allocation7 + $0xd4] sm:$0xf0]  ;;  %v10199_v30 = vor.u32 %v11668_v35, %v10196_v27  ;;  %v11731_v50 = vld [vmem:[#allocation7 + $0x474] sm:$0xf]  ;;  %v11717_v27 = vld [vmem:[#allocation7 + $0x404] sm:$0xf] }
 0x2c4   : > { %v3700_v61 = vadd.f32 %v3699_v13, %v3680_v11  ;;  %5179 = vmatpush.bf16.msrb.mxu2 %v10507_v37  ;;  %v9975_v43 = vor.u32 %v11612_v26, %v9972_v39  ;;  %v10451_v11 = vor.u32 %v11731_v50, %v10448_v52  ;;  %v11605_v37 = vld [vmem:[#allocation7 + $0x84] sm:$0xf]  ;;  %v11654_v26 = vld [vmem:[#allocation7 + $0x20c] sm:$0xf] }
 0x2c6   : > { %5001 = vmatmul.bf16.gmra.mxu0 %v13016_v54  ;;  %5020 = vmatmul.bf16.gmra.mxu1 %v13018_v24 }
 0x2c7   : > { %5143 = vmatpush.bf16.msrb.mxu0 %v10003_v47  ;;  %5162 = vmatpush.bf16.msrb.mxu1 %v10227_v5  ;;  %v10171_v47 = vor.u32 %v11661_v15, %v10168_v7  ;;  %v10420_v5 = vld [vmem:[#allocation7 + $0x454] sm:$0xf0]  ;;  %v11647_v15 = vld [vmem:[#allocation7 + $0x1d4] sm:$0xf] }
 0x2c8   : > { %v3715_v51 = vpop.f32.mrf.mxu2  ;;  %v3734_v49 = vpop.f32.mrf.mxu3  ;;  %5180 = vmatpush.bf16.msrb.mxu2 %v10479_v44  ;;  %v10423_v59 = vor.u32 %v11724_v48, %v10420_v5  ;;  %v11710_v48 = vld [vmem:[#allocation7 + $0x3cc] sm:$0xf]  ;;  %v10364_v5 = vld [vmem:[#allocation7 + $0x3e4] sm:$0xf0] }
 0x2c9   : > { %v3716_v1 = vadd.f32 %v3715_v51, %v3697_v38  ;;  %v9947_v38 = vor.u32 %v11605_v37, %v9944_v16  ;;  %v10591_v51 = vor.u32 %v11766_v56, %v10588_v45  ;;  %v11591_v37 = vld [vmem:[#allocation7 + $0x14] sm:$0xf]  ;;  %v9888_v16 = vld [vmem:[#allocation7 + $0x2c] sm:$0xf0] }
 0x2ca   : > { %v11759_v56 = vld [vmem:[#allocation7 + $0x554] sm:$0xf]  ;;  %v10560_v45 = vld [vmem:[#allocation7 + $0x56c] sm:$0xf0] }
 0x2cb   : > { %v13232_v25 = vadd.f32 %v3734_v49, %v3716_v1  ;;  %v3682_v6 = vpop.f32.mrf.mxu0  ;;  %v3701_v31 = vpop.f32.mrf.mxu1  ;;  %5144 = vmatpush.bf16.msrb.mxu0 %v9975_v43  ;;  %5163 = vmatpush.bf16.msrb.mxu1 %v10199_v30  ;;  %v11598_v49 = vld [vmem:[#allocation7 + $0x4c] sm:$0xf]  ;;  %v10140_v1 = vld [vmem:[#allocation7 + $0x224] sm:$0xf0]  ;;  %v10392_v30 = vld [vmem:[#allocation7 + $0x41c] sm:$0xf0] }
 0x2cc   : > { %v3702_v13 = vadd.f32 %v3701_v31, %v3682_v6  ;;  %5181 = vmatpush.bf16.msrb.mxu2 %v10451_v11  ;;  %v9919_v35 = vor.u32 %v11598_v49, %v9916_v10  ;;  %5203 = vmatpush.bf16.msrb.mxu3 %v10591_v51  ;;  %v10143_v43 = vor.u32 %v11654_v26, %v10140_v1  ;;  %v10090_v51 = vld [vmem:[#allocation7 + $0x1a0] sm:$0xf]  ;;  %v11644_v49 = vld [vmem:[#allocation7 + $0x1b8] sm:$0xf0] }
 0x2cd   : > { %5039 = vmatmul.bf16.gmra.mxu2 %v13039_v42  ;;  %10659 = vmatmul.msk.bf16.gmra.mxu3 %vm3203_vm5, %v13041_v33  ;;  %v10395_v31 = vor.u32 %v11717_v27, %v10392_v30  ;;  %v10314_v10 = vld [vmem:[#allocation7 + $0x360] sm:$0xf]  ;;  %v10336_v27 = vld [vmem:[#allocation7 + $0x3ac] sm:$0xf0] }
 0x2cf   : > { %5145 = vmatpush.bf16.msrb.mxu0 %v9947_v38  ;;  %5164 = vmatpush.bf16.msrb.mxu1 %v10171_v47  ;;  %v10112_v38 = vld [vmem:[#allocation7 + $0x1ec] sm:$0xf0] }
 0x2d0   : > { %v3718_v44 = vpop.f32.mrf.mxu2  ;;  %v3737_v46 = vpop.f32.mrf.mxu3  ;;  %5182 = vmatpush.bf16.msrb.mxu2 %v10423_v59  ;;  %v10115_v47 = vor.u32 %v11647_v15, %v10112_v38  ;;  %v10367_v59 = vor.u32 %v11710_v48, %v10364_v5  ;;  %v10286_v15 = vld [vmem:[#allocation7 + $0x328] sm:$0xf]  ;;  %v10538_v48 = vld [vmem:[#allocation7 + $0x520] sm:$0xf]  ;;  %v11756_v5 = vld [vmem:[#allocation7 + $0x538] sm:$0xf0] }
 0x2d1   : > { %v3719_v39 = vadd.f32 %v3718_v44, %v3700_v61  ;;  %v9891_v61 = vor.u32 %v11591_v37, %v9888_v16  ;;  %v10062_v37 = vld [vmem:[#allocation7 + $0x168] sm:$0xf]  ;;  %v11637_v16 = vld [vmem:[#allocation7 + $0x180] sm:$0xf0] }
 0x2d3   : > { %v13237_v50 = vadd.f32 %v3737_v46, %v3719_v39  ;;  %v4769_v52 = vpop.f32.mrf.mxu0  ;;  %v4788_v6 = vpop.f32.mrf.mxu1  ;;  %5146 = vmatpush.bf16.msrb.mxu0 %v9919_v35  ;;  %5165 = vmatpush.bf16.msrb.mxu1 %v10143_v43  ;;  %v10563_v46 = vor.u32 %v11759_v56, %v10560_v45  ;;  %v10091_v39 = vor.u32 %v11644_v49, %v10090_v51  ;;  %v11700_v35 = vld [vmem:[#allocation7 + $0x378] sm:$0xf0]  ;;  %v11703_v43 = vld [vmem:[#allocation7 + $0x394] sm:$0xf]  ;;  %v10650_v56 = vld [vmem:[#allocation7 + $0x600] sm:$0xf] }
 0x2d4   : > { %v4770_v11 = vadd.f32 %v4769_v52, %v13120_v17  ;;  %5183 = vmatpush.bf16.msrb.mxu2 %v10395_v31  ;;  %v10315_v1 = vor.u32 %v11700_v35, %v10314_v10  ;;  %v10339_v31 = vor.u32 %v11703_v43, %v10336_v27  ;;  %v11630_v51 = vld [vmem:[#allocation7 + $0x148] sm:$0xf0]  ;;  %v10258_v49 = vld [vmem:[#allocation7 + $0x2f0] sm:$0xf]  ;;  %v11749_v43 = vld [vmem:[#allocation7 + $0x500] sm:$0xf0] }
 0x2d5   : > { %5204 = vmatpush.bf16.msrb.mxu3 %v10563_v46  ;;  %v10034_v46 = vld [vmem:[#allocation7 + $0x130] sm:$0xf] }
 0x2d6   : > { %v4789_v7 = vadd.f32 %v4788_v6, %v4770_v11  ;;  %5072 = vmatmul.bf16.vlgmr.msra.gmra.mxu0 %v12983_v8  ;;  %5091 = vmatmul.bf16.vlgmr.msra.gmra.mxu1 %v12985_v29 }
 0x2d7   : > { %5147 = vmatpush.bf16.msrb.mxu0 %v9891_v61  ;;  %5166 = vmatpush.bf16.msrb.mxu1 %v10115_v47  ;;  %v11693_v61 = vld [vmem:[#allocation7 + $0x340] sm:$0xf0] }
 0x2d8   : > { %v3720_v17 = vpop.f32.mrf.mxu2  ;;  %v3739_v44 = vpop.f32.mrf.mxu3  ;;  %5184 = vmatpush.bf16.msrb.mxu2 %v10367_v59  ;;  %v10287_v47 = vor.u32 %v11693_v61, %v10286_v15  ;;  %v10539_v59 = vor.u32 %v11756_v5, %v10538_v48  ;;  %v10230_v15 = vld [vmem:[#allocation7 + $0x2b8] sm:$0xf]  ;;  %v10482_v48 = vld [vmem:[#allocation7 + $0x4b0] sm:$0xf]  ;;  %v11742_v5 = vld [vmem:[#allocation7 + $0x4c8] sm:$0xf0] }
 0x2d9   : > { %v3721_v26 = vadd.f32 %v3720_v17, %v3702_v13  ;;  %v10063_v13 = vor.u32 %v11637_v16, %v10062_v37  ;;  %v10006_v37 = vld [vmem:[#allocation7 + $0xf8] sm:$0xf]  ;;  %v11623_v16 = vld [vmem:[#allocation7 + $0x110] sm:$0xf0] }
 0x2db   : > { %v13242_v30 = vadd.f32 %v3739_v44, %v3721_v26  ;;  %v4771_v52 = vpop.f32.mrf.mxu0  ;;  %v4790_v6 = vpop.f32.mrf.mxu1  ;;  %5216 = vmatpush.bf16.msra.mxu0 %v10091_v39  ;;  %5235 = vmatpush.bf16.msra.mxu1 %v10315_v1  ;;  %v10035_v26 = vor.u32 %v11630_v51, %v10034_v46  ;;  %v11686_v39 = vld [vmem:[#allocation7 + $0x308] sm:$0xf0]  ;;  %v10510_v1 = vld [vmem:[#allocation7 + $0x4e8] sm:$0xf]  ;;  %v11616_v46 = vld [vmem:[#allocation7 + $0xd8] sm:$0xf0] }
 0x2dc   : > { %v4772_v11 = vadd.f32 %v4771_v52, %v13124_v63  ;;  %5185 = vmatpush.bf16.msrb.mxu2 %v10339_v31  ;;  %v11784_v63 = vld [vmem:[#allocation7 + $0x618] sm:$0xf0]  ;;  %v10259_v35 = vor.u32 %v11686_v39, %v10258_v49  ;;  %v10511_v31 = vor.u32 %v11749_v43, %v10510_v1  ;;  %v10202_v51 = vld [vmem:[#allocation7 + $0x280] sm:$0xf]  ;;  %v11735_v1 = vld [vmem:[#allocation7 + $0x490] sm:$0xf0] }
 0x2dd   : > { %5110 = vmatmul.bf16.vlgmr.msra.gmra.mxu2 %v12994_v3  ;;  %10660 = vmatmul.msk.bf16.vlgmr.msra.gmra.mxu3 %vm3203_vm5, %v13004_v14  ;;  %v10651_v44 = vor.u32 %v11784_v63, %v10650_v56  ;;  %v10622_v56 = vld [vmem:[#allocation7 + $0x5c8] sm:$0xf]  ;;  %v11777_v63 = vld [vmem:[#allocation7 + $0x5e0] sm:$0xf0] }
 0x2de   : > { %v4791_v38 = vadd.f32 %v4790_v6, %v4772_v11 }
 0x2df   : > { %5217 = vmatpush.bf16.msra.mxu0 %v10063_v13  ;;  %5236 = vmatpush.bf16.msra.mxu1 %v10287_v47  ;;  %v11679_v13 = vld [vmem:[#allocation7 + $0x2d0] sm:$0xf0] }
 0x2e0   : > { %v4807_v45 = vpop.f32.mrf.mxu2  ;;  %v4826_v17 = vpop.f32.mrf.mxu3  ;;  %5254 = vmatpush.bf16.msra.mxu2 %v10539_v59  ;;  %5277 = vmatpush.bf16.msra.mxu3 %v10651_v44  ;;  %v10231_v47 = vor.u32 %v11679_v13, %v10230_v15  ;;  %v10483_v59 = vor.u32 %v11742_v5, %v10482_v48  ;;  %v9978_v44 = vld [vmem:[#allocation7 + $0xc0] sm:$0xf]  ;;  %v10174_v15 = vld [vmem:[#allocation7 + $0x248] sm:$0xf]  ;;  %v11728_v5 = vld [vmem:[#allocation7 + $0x458] sm:$0xf0] }
 0x2e1   : > { %v4808_v10 = vadd.f32 %v4807_v45, %v4789_v7  ;;  %v10007_v7 = vor.u32 %v11623_v16, %v10006_v37  ;;  %v9950_v37 = vld [vmem:[#allocation7 + $0x88] sm:$0xf]  ;;  %v11609_v16 = vld [vmem:[#allocation7 + $0xa0] sm:$0xf0]  ;;  %v10426_v48 = vld [vmem:[#allocation7 + $0x440] sm:$0xf] }
 0x2e3   : > { %v13248_v27 = vadd.f32 %v4826_v17, %v4808_v10  ;;  %v4774_v52 = vpop.f32.mrf.mxu0  ;;  %v4793_v6 = vpop.f32.mrf.mxu1  ;;  %5218 = vmatpush.bf16.msra.mxu0 %v10035_v26  ;;  %5237 = vmatpush.bf16.msra.mxu1 %v10259_v35  ;;  %v10623_v17 = vor.u32 %v11777_v63, %v10622_v56  ;;  %v9979_v10 = vor.u32 %v11616_v46, %v9978_v44  ;;  %v11672_v26 = vld [vmem:[#allocation7 + $0x298] sm:$0xf0]  ;;  %v10454_v35 = vld [vmem:[#allocation7 + $0x478] sm:$0xf]  ;;  %v10594_v56 = vld [vmem:[#allocation7 + $0x590] sm:$0xf] }
 0x2e4   : > { %v4775_v11 = vadd.f32 %v4774_v52, %v13129_v41  ;;  %5255 = vmatpush.bf16.msra.mxu2 %v10511_v31  ;;  %v10203_v39 = vor.u32 %v11672_v26, %v10202_v51  ;;  %v10455_v31 = vor.u32 %v11735_v1, %v10454_v35  ;;  %v11602_v44 = vld [vmem:[#allocation7 + $0x68] sm:$0xf0]  ;;  %v10146_v46 = vld [vmem:[#allocation7 + $0x210] sm:$0xf]  ;;  %v11721_v35 = vld [vmem:[#allocation7 + $0x420] sm:$0xf0] }
 0x2e5   : > { %5278 = vmatpush.bf16.msra.mxu3 %v10623_v17  ;;  %v9922_v17 = vld [vmem:[#allocation7 + $0x50] sm:$0xf] }
 0x2e6   : > { %v4794_v61 = vadd.f32 %v4793_v6, %v4775_v11  ;;  %5077 = vmatmul.bf16.gmra.mxu0 %v13016_v54  ;;  %5096 = vmatmul.bf16.gmra.mxu1 %v13018_v24 }
 0x2e7   : > { %5219 = vmatpush.bf16.msra.mxu0 %v10007_v7  ;;  %5238 = vmatpush.bf16.msra.mxu1 %v10231_v47  ;;  %v11665_v7 = vld [vmem:[#allocation7 + $0x260] sm:$0xf0] }
 0x2e8   : > { %v4809_v41 = vpop.f32.mrf.mxu2  ;;  %v4828_v45 = vpop.f32.mrf.mxu3  ;;  %5256 = vmatpush.bf16.msra.mxu2 %v10483_v59  ;;  %v10175_v47 = vor.u32 %v11665_v7, %v10174_v15  ;;  %v10427_v59 = vor.u32 %v11728_v5, %v10426_v48  ;;  %v10118_v15 = vld [vmem:[#allocation7 + $0x1d8] sm:$0xf]  ;;  %v10370_v48 = vld [vmem:[#allocation7 + $0x3d0] sm:$0xf]  ;;  %v11714_v5 = vld [vmem:[#allocation7 + $0x3e8] sm:$0xf0] }
 0x2e9   : > { %v4810_v49 = vadd.f32 %v4809_v41, %v4791_v38  ;;  %v9951_v38 = vor.u32 %v11609_v16, %v9950_v37  ;;  %v9894_v37 = vld [vmem:[#allocation7 + $0x18] sm:$0xf]  ;;  %v11595_v16 = vld [vmem:[#allocation7 + $0x30] sm:$0xf0] }
 0x2eb   : > { %v13253_v43 = vadd.f32 %v4828_v45, %v4810_v49  ;;  %v4776_v52 = vpop.f32.mrf.mxu0  ;;  %v4795_v6 = vpop.f32.mrf.mxu1  ;;  %5220 = vmatpush.bf16.msra.mxu0 %v9979_v10  ;;  %5239 = vmatpush.bf16.msra.mxu1 %v10203_v39  ;;  %v9923_v49 = vor.u32 %v11602_v44, %v9922_v17  ;;  %v11658_v10 = vld [vmem:[#allocation7 + $0x228] sm:$0xf0]  ;;  %v10398_v39 = vld [vmem:[#allocation7 + $0x408] sm:$0xf]  ;;  %v12033_v17 = vld [vmem:[#allocation7 + $0xde0] sm:$0xf0] }
 0x2ec   : > { %v4777_v11 = vadd.f32 %v4776_v52, %v13133_v20  ;;  %5257 = vmatpush.bf16.msra.mxu2 %v10455_v31  ;;  %v11770_v20 = vld [vmem:[#allocation7 + $0x5a8] sm:$0xf0]  ;;  %v10147_v26 = vor.u32 %v11658_v10, %v10146_v46  ;;  %v10399_v31 = vor.u32 %v11721_v35, %v10398_v39  ;;  %v11088_v44 = vld [vmem:[#allocation7 + $0xf88] sm:$0xf]  ;;  %v11707_v39 = vld [vmem:[#allocation7 + $0x3b0] sm:$0xf0] }
 0x2ed   : > { %5115 = vmatmul.bf16.gmra.mxu2 %v13039_v42  ;;  %10661 = vmatmul.msk.bf16.gmra.mxu3 %vm3203_vm5, %v13041_v33  ;;  %v10595_v45 = vor.u32 %v11770_v20, %v10594_v56  ;;  %v10566_v56 = vld [vmem:[#allocation7 + $0x558] sm:$0xf]  ;;  %v11763_v20 = vld [vmem:[#allocation7 + $0x570] sm:$0xf0] }
 0x2ee   : > { %v4796_v13 = vadd.f32 %v4795_v6, %v4777_v11 }
 0x2ef   : > { %5221 = vmatpush.bf16.msra.mxu0 %v9951_v38  ;;  %5240 = vmatpush.bf16.msra.mxu1 %v10175_v47  ;;  %v11651_v38 = vld [vmem:[#allocation7 + $0x1f0] sm:$0xf0] }
 0x2f0   : > { %v4812_v63 = vpop.f32.mrf.mxu2  ;;  %v4831_v41 = vpop.f32.mrf.mxu3  ;;  %5258 = vmatpush.bf16.msra.mxu2 %v10427_v59  ;;  %5279 = vmatpush.bf16.msra.mxu3 %v10595_v45  ;;  %v10119_v47 = vor.u32 %v11651_v38, %v10118_v15  ;;  %v10371_v59 = vor.u32 %v11714_v5, %v10370_v48  ;;  %v10864_v45 = vld [vmem:[#allocation7 + $0xdc8] sm:$0xf]  ;;  %v11060_v15 = vld [vmem:[#allocation7 + $0xf50] sm:$0xf]  ;;  %v12145_v5 = vld [vmem:[#allocation7 + $0x1160] sm:$0xf0] }
 0x2f1   : > { %v4813_v51 = vadd.f32 %v4812_v63, %v4794_v61  ;;  %v9895_v61 = vor.u32 %v11595_v16, %v9894_v37  ;;  %v10836_v37 = vld [vmem:[#allocation7 + $0xd90] sm:$0xf]  ;;  %v12026_v16 = vld [vmem:[#allocation7 + $0xda8] sm:$0xf0]  ;;  %v11312_v48 = vld [vmem:[#allocation7 + $0x1148] sm:$0xf] }
 0x2f3   : > { %v13259_v1 = vadd.f32 %v4831_v41, %v4813_v51  ;;  %v4845_v52 = vpop.f32.mrf.mxu0  ;;  %v4864_v6 = vpop.f32.mrf.mxu1  ;;  %5222 = vmatpush.bf16.msra.mxu0 %v9923_v49  ;;  %5241 = vmatpush.bf16.msra.mxu1 %v10147_v26  ;;  %v10567_v41 = vor.u32 %v11763_v20, %v10566_v56  ;;  %v10865_v51 = vor.u32 %v12033_v17, %v10864_v45  ;;  %v12089_v49 = vld [vmem:[#allocation7 + $0xfa0] sm:$0xf0]  ;;  %v10342_v26 = vld [vmem:[#allocation7 + $0x398] sm:$0xf]  ;;  %v11424_v56 = vld [vmem:[#allocation7 + $0x1228] sm:$0xf] }
 0x2f4   : > { %v4846_v11 = vadd.f32 %v4845_v52, %v13138_v53  ;;  %5259 = vmatpush.bf16.msra.mxu2 %v10399_v31  ;;  %v11089_v10 = vor.u32 %v12089_v49, %v11088_v44  ;;  %v10343_v31 = vor.u32 %v11707_v39, %v10342_v26  ;;  %v12019_v45 = vld [vmem:[#allocation7 + $0xd70] sm:$0xf0]  ;;  %v11032_v17 = vld [vmem:[#allocation7 + $0xf18] sm:$0xf]  ;;  %v12138_v26 = vld [vmem:[#allocation7 + $0x1128] sm:$0xf0] }
 0x2f5   : > { %5280 = vmatpush.bf16.msra.mxu3 %v10567_v41  ;;  %v10808_v41 = vld [vmem:[#allocation7 + $0xd58] sm:$0xf] }
 0x2f6   : > { %v4865_v7 = vadd.f32 %v4864_v6, %v4846_v11  ;;  %5148 = vmatmul.bf16.vlgmr.msrb.gmra.mxu0 %v12983_v8  ;;  %5167 = vmatmul.bf16.vlgmr.msrb.gmra.mxu1 %v12985_v29 }
 0x2f7   : > { %5223 = vmatpush.bf16.msra.mxu0 %v9895_v61  ;;  %5242 = vmatpush.bf16.msra.mxu1 %v10119_v47  ;;  %v12082_v61 = vld [vmem:[#allocation7 + $0xf68] sm:$0xf0] }
 0x2f8   : > { %v4814_v53 = vpop.f32.mrf.mxu2  ;;  %v4833_v63 = vpop.f32.mrf.mxu3  ;;  %5260 = vmatpush.bf16.msra.mxu2 %v10371_v59  ;;  %v11061_v47 = vor.u32 %v12082_v61, %v11060_v15  ;;  %v11313_v59 = vor.u32 %v12145_v5, %v11312_v48  ;;  %v11004_v15 = vld [vmem:[#allocation7 + $0xee0] sm:$0xf]  ;;  %v11256_v48 = vld [vmem:[#allocation7 + $0x10d8] sm:$0xf]  ;;  %v12131_v5 = vld [vmem:[#allocation7 + $0x10f0] sm:$0xf0] }
 0x2f9   : > { %v4815_v46 = vadd.f32 %v4814_v53, %v4796_v13  ;;  %v10837_v13 = vor.u32 %v12026_v16, %v10836_v37  ;;  %v10780_v37 = vld [vmem:[#allocation7 + $0xd20] sm:$0xf]  ;;  %v12012_v16 = vld [vmem:[#allocation7 + $0xd38] sm:$0xf0] }
 0x2fb   : > { %v13264_v35 = vadd.f32 %v4833_v63, %v4815_v46  ;;  %v4847_v52 = vpop.f32.mrf.mxu0  ;;  %v4866_v6 = vpop.f32.mrf.mxu1  ;;  %6549 = vmatpush.bf16.msrb.mxu0 %v10865_v51  ;;  %6568 = vmatpush.bf16.msrb.mxu1 %v11089_v10  ;;  %v10809_v46 = vor.u32 %v12019_v45, %v10808_v41  ;;  %v12075_v51 = vld [vmem:[#allocation7 + $0xf30] sm:$0xf0]  ;;  %v11284_v10 = vld [vmem:[#allocation7 + $0x1110] sm:$0xf]  ;;  %v12005_v41 = vld [vmem:[#allocation7 + $0xd00] sm:$0xf0] }
 0x2fc   : > { %v4848_v11 = vadd.f32 %v4847_v52, %v13142_v60  ;;  %5261 = vmatpush.bf16.msra.mxu2 %v10343_v31  ;;  %v12173_v60 = vld [vmem:[#allocation7 + $0x1240] sm:$0xf0]  ;;  %v11033_v49 = vor.u32 %v12075_v51, %v11032_v17  ;;  %v11285_v31 = vor.u32 %v12138_v26, %v11284_v10  ;;  %v10976_v45 = vld [vmem:[#allocation7 + $0xea8] sm:$0xf]  ;;  %v12124_v10 = vld [vmem:[#allocation7 + $0x10b8] sm:$0xf0] }
 0x2fd   : > { %5186 = vmatmul.bf16.vlgmr.msrb.gmra.mxu2 %v12994_v3  ;;  %10662 = vmatmul.msk.bf16.vlgmr.msrb.gmra.mxu3 %vm3203_vm5, %v13004_v14  ;;  %v11425_v63 = vor.u32 %v12173_v60, %v11424_v56  ;;  %v11396_v56 = vld [vmem:[#allocation7 + $0x11f0] sm:$0xf]  ;;  %v12166_v60 = vld [vmem:[#allocation7 + $0x1208] sm:$0xf0] }
 0x2fe   : > { %v4867_v38 = vadd.f32 %v4866_v6, %v4848_v11 }
 0x2ff   : > { %6550 = vmatpush.bf16.msrb.mxu0 %v10837_v13  ;;  %6569 = vmatpush.bf16.msrb.mxu1 %v11061_v47  ;;  %v12068_v13 = vld [vmem:[#allocation7 + $0xef8] sm:$0xf0] }
 0x300   : > { %v4883_v20 = vpop.f32.mrf.mxu2  ;;  %v4902_v53 = vpop.f32.mrf.mxu3  ;;  %6587 = vmatpush.bf16.msrb.mxu2 %v11313_v59  ;;  %6610 = vmatpush.bf16.msrb.mxu3 %v11425_v63  ;;  %v11005_v47 = vor.u32 %v12068_v13, %v11004_v15  ;;  %v11257_v59 = vor.u32 %v12131_v5, %v11256_v48  ;;  %v10752_v63 = vld [vmem:[#allocation7 + $0xce8] sm:$0xf]  ;;  %v10948_v15 = vld [vmem:[#allocation7 + $0xe70] sm:$0xf]  ;;  %v12117_v5 = vld [vmem:[#allocation7 + $0x1080] sm:$0xf0] }
 0x301   : > { %v4884_v44 = vadd.f32 %v4883_v20, %v4865_v7  ;;  %v10781_v7 = vor.u32 %v12012_v16, %v10780_v37  ;;  %v10724_v37 = vld [vmem:[#allocation7 + $0xcb0] sm:$0xf]  ;;  %v11998_v16 = vld [vmem:[#allocation7 + $0xcc8] sm:$0xf0]  ;;  %v11200_v48 = vld [vmem:[#allocation7 + $0x1068] sm:$0xf] }
 0x303   : > { %v13270_v39 = vadd.f32 %v4902_v53, %v4884_v44  ;;  %v4850_v52 = vpop.f32.mrf.mxu0  ;;  %v4869_v6 = vpop.f32.mrf.mxu1  ;;  %6551 = vmatpush.bf16.msrb.mxu0 %v10809_v46  ;;  %6570 = vmatpush.bf16.msrb.mxu1 %v11033_v49  ;;  %v11397_v53 = vor.u32 %v12166_v60, %v11396_v56  ;;  %v10753_v44 = vor.u32 %v12005_v41, %v10752_v63  ;;  %v12061_v46 = vld [vmem:[#allocation7 + $0xec0] sm:$0xf0]  ;;  %v11228_v49 = vld [vmem:[#allocation7 + $0x10a0] sm:$0xf]  ;;  %v11368_v56 = vld [vmem:[#allocation7 + $0x11b8] sm:$0xf] }
 0x304   : > { %v4851_v11 = vadd.f32 %v4850_v52, %v13147_v23  ;;  %6588 = vmatpush.bf16.msrb.mxu2 %v11285_v31  ;;  %v10977_v51 = vor.u32 %v12061_v46, %v10976_v45  ;;  %v11229_v31 = vor.u32 %v12124_v10, %v11228_v49  ;;  %v11991_v63 = vld [vmem:[#allocation7 + $0xc90] sm:$0xf0]  ;;  %v10920_v41 = vld [vmem:[#allocation7 + $0xe38] sm:$0xf]  ;;  %v12110_v49 = vld [vmem:[#allocation7 + $0x1048] sm:$0xf0] }
 0x305   : > { %6611 = vmatpush.bf16.msrb.mxu3 %v11397_v53  ;;  %v10696_v53 = vld [vmem:[#allocation7 + $0xc78] sm:$0xf] }
 0x306   : > { %v4870_v61 = vadd.f32 %v4869_v6, %v4851_v11  ;;  %5153 = vmatmul.bf16.gmra.mxu0 %v13016_v54  ;;  %5172 = vmatmul.bf16.gmra.mxu1 %v13018_v24 }
 0x307   : > { %6552 = vmatpush.bf16.msrb.mxu0 %v10781_v7  ;;  %6571 = vmatpush.bf16.msrb.mxu1 %v11005_v47  ;;  %v12054_v7 = vld [vmem:[#allocation7 + $0xe88] sm:$0xf0] }
 0x308   : > { %v4885_v23 = vpop.f32.mrf.mxu2  ;;  %v4904_v20 = vpop.f32.mrf.mxu3  ;;  %6589 = vmatpush.bf16.msrb.mxu2 %v11257_v59  ;;  %v10949_v47 = vor.u32 %v12054_v7, %v10948_v15  ;;  %v11201_v59 = vor.u32 %v12117_v5, %v11200_v48  ;;  %v10892_v15 = vld [vmem:[#allocation7 + $0xe00] sm:$0xf]  ;;  %v11144_v48 = vld [vmem:[#allocation7 + $0xff8] sm:$0xf]  ;;  %v12103_v5 = vld [vmem:[#allocation7 + $0x1010] sm:$0xf0] }
 0x309   : > { %v4886_v17 = vadd.f32 %v4885_v23, %v4867_v38  ;;  %v10725_v38 = vor.u32 %v11998_v16, %v10724_v37  ;;  %v10668_v37 = vld [vmem:[#allocation7 + $0xc40] sm:$0xf]  ;;  %v11984_v16 = vld [vmem:[#allocation7 + $0xc58] sm:$0xf0] }
 0x30b   : > { %v13275_v26 = vadd.f32 %v4904_v20, %v4886_v17  ;;  %v4852_v52 = vpop.f32.mrf.mxu0  ;;  %v4871_v6 = vpop.f32.mrf.mxu1  ;;  %6553 = vmatpush.bf16.msrb.mxu0 %v10753_v44  ;;  %6572 = vmatpush.bf16.msrb.mxu1 %v10977_v51  ;;  %v10697_v17 = vor.u32 %v11991_v63, %v10696_v53  ;;  %v12047_v44 = vld [vmem:[#allocation7 + $0xe50] sm:$0xf0]  ;;  %v11172_v51 = vld [vmem:[#allocation7 + $0x1030] sm:$0xf] }
 0x30c   : > { %v4853_v11 = vadd.f32 %v4852_v52, %v13151_v34  ;;  %6590 = vmatpush.bf16.msrb.mxu2 %v11229_v31  ;;  %v12159_v34 = vld [vmem:[#allocation7 + $0x11d0] sm:$0xf0]  ;;  %v10921_v46 = vor.u32 %v12047_v44, %v10920_v41  ;;  %v11173_v31 = vor.u32 %v12110_v49, %v11172_v51  ;;  %v12086_v44 = vld [vmem:[#allocation7 + $0xf8c] sm:$0xf]  ;;  %v11090_v49 = vld [vmem:[#allocation7 + $0xfa4] sm:$0xf0] }
 0x30d   : > { %5191 = vmatmul.bf16.gmra.mxu2 %v13039_v42  ;;  %10663 = vmatmul.msk.bf16.gmra.mxu3 %vm3203_vm5, %v13041_v33  ;;  %v11369_v20 = vor.u32 %v12159_v34, %v11368_v56  ;;  %v11340_v56 = vld [vmem:[#allocation7 + $0x1180] sm:$0xf]  ;;  %v12152_v34 = vld [vmem:[#allocation7 + $0x1198] sm:$0xf0] }
 0x30e   : > { %v4872_v13 = vadd.f32 %v4871_v6, %v4853_v11 }
 0x30f   : > { %6554 = vmatpush.bf16.msrb.mxu0 %v10725_v38  ;;  %6573 = vmatpush.bf16.msrb.mxu1 %v10949_v47  ;;  %v12040_v38 = vld [vmem:[#allocation7 + $0xe18] sm:$0xf0] }
 0x310   : > { %v4888_v60 = vpop.f32.mrf.mxu2  ;;  %v4907_v23 = vpop.f32.mrf.mxu3  ;;  %6591 = vmatpush.bf16.msrb.mxu2 %v11201_v59  ;;  %6612 = vmatpush.bf16.msrb.mxu3 %v11369_v20  ;;  %v10893_v47 = vor.u32 %v12040_v38, %v10892_v15  ;;  %v11145_v59 = vor.u32 %v12103_v5, %v11144_v48  ;;  %v12079_v15 = vld [vmem:[#allocation7 + $0xf54] sm:$0xf]  ;;  %v12142_v38 = vld [vmem:[#allocation7 + $0x114c] sm:$0xf] }
 0x311   : > { %v4889_v45 = vadd.f32 %v4888_v60, %v4870_v61  ;;  %v10669_v61 = vor.u32 %v11984_v16, %v10668_v37  ;;  %v12023_v37 = vld [vmem:[#allocation7 + $0xd94] sm:$0xf]  ;;  %v10838_v16 = vld [vmem:[#allocation7 + $0xdac] sm:$0xf0] }
 0x313   : > { %v13281_v10 = vadd.f32 %v4907_v23, %v4889_v45  ;;  %v4921_v52 = vpop.f32.mrf.mxu0  ;;  %v4940_v6 = vpop.f32.mrf.mxu1  ;;  %6555 = vmatpush.bf16.msrb.mxu0 %v10697_v17  ;;  %6574 = vmatpush.bf16.msrb.mxu1 %v10921_v46  ;;  %v11341_v23 = vor.u32 %v12152_v34, %v11340_v56  ;;  %v12030_v45 = vld [vmem:[#allocation7 + $0xdcc] sm:$0xf]  ;;  %v10866_v17 = vld [vmem:[#allocation7 + $0xde4] sm:$0xf0] }
 0x314   : > { %v4922_v11 = vadd.f32 %v4921_v52, %v13156_v62  ;;  %6592 = vmatpush.bf16.msrb.mxu2 %v11173_v31  ;;  %v10869_v51 = vor.u32 %v12030_v45, %v10866_v17  ;;  %v11116_v52 = vld [vmem:[#allocation7 + $0xfc0] sm:$0xf]  ;;  %v12170_v34 = vld [vmem:[#allocation7 + $0x122c] sm:$0xf]  ;;  %v12016_v45 = vld [vmem:[#allocation7 + $0xd5c] sm:$0xf] }
 0x315   : > { %15291 = vst [vmem:[#allocation19_spill] sm:$0xff] %v13281_v10  ;;  %6613 = vmatpush.bf16.msrb.mxu3 %v11341_v23  ;;  %v10810_v17 = vld [vmem:[#allocation7 + $0xd74] sm:$0xf0]  ;;  %v10972_v10 = vld [vmem:[#allocation7 + $0xe88] sm:$0xf] }
 0x316   : > { %v4941_v7 = vadd.f32 %v4940_v6, %v4922_v11  ;;  %5224 = vmatmul.bf16.vlgmr.msra.gmra.mxu0 %v12983_v8  ;;  %5243 = vmatmul.bf16.vlgmr.msra.gmra.mxu1 %v12985_v29  ;;  %v12096_v6 = vld [vmem:[#allocation7 + $0xfd8] sm:$0xf0] }
 0x317   : > { %6556 = vmatpush.bf16.msrb.mxu0 %v10669_v61  ;;  %6575 = vmatpush.bf16.msrb.mxu1 %v10893_v47  ;;  %v11117_v31 = vor.u32 %v12096_v6, %v11116_v52  ;;  %v10841_v61 = vor.u32 %v12023_v37, %v10838_v16  ;;  %v11314_v47 = vld [vmem:[#allocation7 + $0x1164] sm:$0xf0]  ;;  %v12135_v52 = vld [vmem:[#allocation7 + $0x1114] sm:$0xf]  ;;  %v11286_v6 = vld [vmem:[#allocation7 + $0x112c] sm:$0xf0] }
 0x318   : > { %v4890_v62 = vpop.f32.mrf.mxu2  ;;  %v4909_v60 = vpop.f32.mrf.mxu3  ;;  %6593 = vmatpush.bf16.msrb.mxu2 %v11145_v59  ;;  %v11317_v59 = vor.u32 %v12142_v38, %v11314_v47  ;;  %v12009_v37 = vld [vmem:[#allocation7 + $0xd24] sm:$0xf]  ;;  %v10782_v16 = vld [vmem:[#allocation7 + $0xd3c] sm:$0xf0]  ;;  %v12128_v38 = vld [vmem:[#allocation7 + $0x10dc] sm:$0xf] }
 0x319   : > { %v4891_v20 = vadd.f32 %v4890_v62, %v4872_v13  ;;  %v11093_v13 = vor.u32 %v12086_v44, %v11090_v49  ;;  %v11426_v62 = vld [vmem:[#allocation7 + $0x1244] sm:$0xf0]  ;;  %v12072_v44 = vld [vmem:[#allocation7 + $0xf1c] sm:$0xf]  ;;  %v11034_v49 = vld [vmem:[#allocation7 + $0xf34] sm:$0xf0] }
 0x31a   : > { %v11429_v23 = vor.u32 %v12170_v34, %v11426_v62  ;;  %v11398_v34 = vld [vmem:[#allocation7 + $0x120c] sm:$0xf0] }
 0x31b   : > { %v13286_v53 = vadd.f32 %v4909_v60, %v4891_v20  ;;  %v4923_v63 = vpop.f32.mrf.mxu0  ;;  %v4942_v41 = vpop.f32.mrf.mxu1  ;;  %6625 = vmatpush.bf16.msra.mxu0 %v10869_v51  ;;  %6644 = vmatpush.bf16.msra.mxu1 %v11093_v13  ;;  %v10813_v51 = vor.u32 %v12016_v45, %v10810_v17  ;;  %v11037_v13 = vor.u32 %v12072_v44, %v11034_v49  ;;  %v12002_v45 = vld [vmem:[#allocation7 + $0xcec] sm:$0xf]  ;;  %v10754_v17 = vld [vmem:[#allocation7 + $0xd04] sm:$0xf0] }
 0x31c   : > { %v4924_v46 = vadd.f32 %v4923_v63, %v13160_v12  ;;  %6594 = vmatpush.bf16.msrb.mxu2 %v11117_v31  ;;  %v11062_v12 = vld [vmem:[#allocation7 + $0xf6c] sm:$0xf0]  ;;  %v12058_v44 = vld [vmem:[#allocation7 + $0xeac] sm:$0xf]  ;;  %v10978_v49 = vld [vmem:[#allocation7 + $0xec4] sm:$0xf0] }
 0x31d   : > { %15292 = vst [vmem:[#allocation20_spill] sm:$0xff] %v13286_v53  ;;  %5262 = vmatmul.bf16.vlgmr.msra.gmra.mxu2 %v12994_v3  ;;  %10664 = vmatmul.msk.bf16.vlgmr.msra.gmra.mxu3 %vm3203_vm5, %v13004_v14  ;;  %v11065_v56 = vor.u32 %v12079_v15, %v11062_v12  ;;  %v12065_v15 = vld [vmem:[#allocation7 + $0xee4] sm:$0xf]  ;;  %v11006_v12 = vld [vmem:[#allocation7 + $0xefc] sm:$0xf0] }
 0x31e   : > { %v4943_v11 = vadd.f32 %v4942_v41, %v4924_v46  ;;  %6686 = vmatpush.bf16.msra.mxu3 %v11429_v23 }
 0x31f   : > { %6626 = vmatpush.bf16.msra.mxu0 %v10841_v61  ;;  %6645 = vmatpush.bf16.msra.mxu1 %v11065_v56  ;;  %v10785_v61 = vor.u32 %v12009_v37, %v10782_v16  ;;  %v11995_v37 = vld [vmem:[#allocation7 + $0xcb4] sm:$0xf]  ;;  %v10726_v16 = vld [vmem:[#allocation7 + $0xccc] sm:$0xf0] }
 0x320   : > { %v4959_v48 = vpop.f32.mrf.mxu2  ;;  %v4978_v5 = vpop.f32.mrf.mxu3  ;;  %6663 = vmatpush.bf16.msra.mxu2 %v11317_v59  ;;  %v12163_v59 = vld [vmem:[#allocation7 + $0x11f4] sm:$0xf] }
 0x321   : > { %v4960_v60 = vadd.f32 %v4959_v48, %v4941_v7  ;;  %v11289_v7 = vor.u32 %v12135_v52, %v11286_v6  ;;  %v12121_v52 = vld [vmem:[#allocation7 + $0x10a4] sm:$0xf]  ;;  %v11230_v6 = vld [vmem:[#allocation7 + $0x10bc] sm:$0xf0] }
 0x323   : > { %v13292_v20 = vadd.f32 %v4978_v5, %v4960_v60  ;;  %v4926_v63 = vpop.f32.mrf.mxu0  ;;  %v4945_v41 = vpop.f32.mrf.mxu1  ;;  %6627 = vmatpush.bf16.msra.mxu0 %v10813_v51  ;;  %6646 = vmatpush.bf16.msra.mxu1 %v11037_v13  ;;  %v11009_v5 = vor.u32 %v12065_v15, %v11006_v12  ;;  %v11401_v60 = vor.u32 %v12163_v59, %v11398_v34  ;;  %v12051_v15 = vld [vmem:[#allocation7 + $0xe74] sm:$0xf]  ;;  %v12114_v12 = vld [vmem:[#allocation7 + $0x106c] sm:$0xf]  ;;  %v12156_v59 = vld [vmem:[#allocation7 + $0x11bc] sm:$0xf] }
 0x324   : > { %v4927_v46 = vadd.f32 %v4926_v63, %v13165_v21  ;;  %v11258_v21 = vld [vmem:[#allocation7 + $0x10f4] sm:$0xf0]  ;;  %6664 = vmatpush.bf16.msra.mxu2 %v11289_v7  ;;  %v10757_v51 = vor.u32 %v12002_v45, %v10754_v17  ;;  %v11233_v13 = vor.u32 %v12121_v52, %v11230_v6  ;;  %v5520_v45 = vrot.slane %v12985_v29, 1  ;;  %v12107_v29 = vld [vmem:[#allocation7 + $0x1034] sm:$0xf] }
 0x325   : > { %15293 = vst [vmem:[#allocation21_spill] sm:$0xff] %v13292_v20  ;;  %v11261_v56 = vor.u32 %v12128_v38, %v11258_v21  ;;  %6687 = vmatpush.bf16.msra.mxu3 %v11401_v60  ;;  %v11202_v38 = vld [vmem:[#allocation7 + $0x1084] sm:$0xf0]  ;;  %v11370_v34 = vld [vmem:[#allocation7 + $0x11d4] sm:$0xf0]  ;;  %v13309_v60 = vrot.slane %v13018_v24, 1 }
 0x326   : > { %v4946_v31 = vadd.f32 %v4945_v41, %v4927_v46  ;;  %5229 = vmatmul.bf16.gmra.mxu0 %v13016_v54  ;;  %5248 = vmatmul.bf16.gmra.mxu1 %v13018_v24  ;;  %v11174_v6 = vld [vmem:[#allocation7 + $0x104c] sm:$0xf0] }
 0x327   : > { %6628 = vmatpush.bf16.msra.mxu0 %v10785_v61  ;;  %6647 = vmatpush.bf16.msra.mxu1 %v11009_v5  ;;  %v10950_v61 = vld [vmem:[#allocation7 + $0xe8c] sm:$0xf0] }
 0x328   : > { %v4961_v47 = vpop.f32.mrf.mxu2  ;;  %v4980_v48 = vpop.f32.mrf.mxu3  ;;  %6665 = vmatpush.bf16.msra.mxu2 %v11261_v56  ;;  %v10953_v5 = vor.u32 %v12051_v15, %v10950_v61  ;;  %v11205_v56 = vor.u32 %v12114_v12, %v11202_v38  ;;  %v11981_v15 = vld [vmem:[#allocation7 + $0xc44] sm:$0xf]  ;;  %v10894_v38 = vld [vmem:[#allocation7 + $0xe1c] sm:$0xf0] }
 0x329   : > { %v4962_v62 = vadd.f32 %v4961_v47, %v4943_v11  ;;  %v10981_v11 = vor.u32 %v12058_v44, %v10978_v49  ;;  %v12044_v49 = vld [vmem:[#allocation7 + $0xe3c] sm:$0xf]  ;;  %v12037_v61 = vld [vmem:[#allocation7 + $0xe04] sm:$0xf] }
 0x32b   : > { %v13297_v23 = vadd.f32 %v4980_v48, %v4962_v62  ;;  %v4928_v63 = vpop.f32.mrf.mxu0  ;;  %v4947_v41 = vpop.f32.mrf.mxu1  ;;  %6629 = vmatpush.bf16.msra.mxu0 %v10757_v51  ;;  %6648 = vmatpush.bf16.msra.mxu1 %v10981_v11  ;;  %v13306_v48 = vrot.slane %v13016_v54, 1  ;;  %v11988_v54 = vld [vmem:[#allocation7 + $0xc7c] sm:$0xf]  ;;  %v10698_v51 = vld [vmem:[#allocation7 + $0xc94] sm:$0xf0]  ;;  %v13322_v11 = vsel %vm878_vm2, %v5520_v45, %v13309_v60  ;;  %v5523_v45 = vrot.slane %v12994_v3, 1 }
 0x32c   : > { %v4929_v46 = vadd.f32 %v4928_v63, %v13169_v2  ;;  %v10729_v2 = vor.u32 %v11995_v37, %v10726_v16  ;;  %6666 = vmatpush.bf16.msra.mxu2 %v11233_v13  ;;  %v11373_v63 = vor.u32 %v12156_v59, %v11370_v34  ;;  %15297 = vst [vmem:[#allocation25_spill] sm:$0xff] %v13322_v11  ;;  %v13325_v13 = vrot.slane %v13039_v42, 1 }
 0x32d   : > { %15294 = vst [vmem:[#allocation22_spill] sm:$0xff] %v13297_v23  ;;  %5267 = vmatmul.bf16.gmra.mxu2 %v13039_v42  ;;  %10665 = vmatmul.msk.bf16.gmra.mxu3 %vm3203_vm5, %v13041_v33  ;;  %v11177_v16 = vor.u32 %v12107_v29, %v11174_v6  ;;  %v13330_v42 = vrot.slane %v13041_v33, 1  ;;  %v10897_v59 = vor.u32 %v12037_v61, %v10894_v38  ;;  %v12090_v29 = vld [vmem:[#allocation7 + $0xfa8] sm:$0xf0]  ;;  %v12093_v6 = vld [vmem:[#allocation7 + $0xfc4] sm:$0xf] }
 0x32e   : > { %v13303_v7 = vadd.f32 %v4947_v41, %v4929_v46  ;;  %v5517_v41 = vrot.slane %v12983_v8, 1  ;;  %6688 = vmatpush.bf16.msra.mxu3 %v11373_v63  ;;  %v10701_v8 = vor.u32 %v11988_v54, %v10698_v51  ;;  %v11342_v63 = vld [vmem:[#allocation7 + $0x119c] sm:$0xf0]  ;;  %v13339_v33 = vsel %vm878_vm2, %v5523_v45, %v13325_v13  ;;  %v12027_v61 = vld [vmem:[#allocation7 + $0xdb0] sm:$0xf0] }
 0x32f   : > { %6630 = vmatpush.bf16.msra.mxu0 %v10729_v2  ;;  %6649 = vmatpush.bf16.msra.mxu1 %v10953_v5  ;;  %v10670_v2 = vld [vmem:[#allocation7 + $0xc5c] sm:$0xf0]  ;;  %15299 = vst [vmem:[#allocation27_spill] sm:$0xff] %v13339_v33 }
 0x330   : > { %v4964_v21 = vpop.f32.mrf.mxu2  ;;  %v4983_v47 = vpop.f32.mrf.mxu3  ;;  %v13318_v24 = vsel %vm878_vm2, %v5517_v41, %v13306_v48  ;;  %6667 = vmatpush.bf16.msra.mxu2 %v11205_v56  ;;  %v10673_v12 = vor.u32 %v11981_v15, %v10670_v2 }
 0x331   : > { %v4965_v62 = vadd.f32 %v4964_v21, %v4946_v31  ;;  %15296 = vst [vmem:[#allocation24_spill] sm:$0xff] %v13318_v24  ;;  %v10922_v31 = vld [vmem:[#allocation7 + $0xe54] sm:$0xf0]  ;;  %v12100_v21 = vld [vmem:[#allocation7 + $0xffc] sm:$0xf] }
 0x332   : > { %v10925_v37 = vor.u32 %v12044_v49, %v10922_v31  ;;  %v11096_v31 = vld [vmem:[#allocation7 + $0xf90] sm:$0xf] }
 0x333   : > { %v13313_v17 = vadd.f32 %v4983_v47, %v4965_v62  ;;  %v4997_v44 = vpop.f32.mrf.mxu0  ;;  %v5016_v46 = vpop.f32.mrf.mxu1  ;;  %6631 = vmatpush.bf16.msra.mxu0 %v10701_v8  ;;  %v11146_v47 = vld [vmem:[#allocation7 + $0x1014] sm:$0xf0]  ;;  %v12149_v62 = vld [vmem:[#allocation7 + $0x1184] sm:$0xf]  ;;  %v12034_v8 = vld [vmem:[#allocation7 + $0xde8] sm:$0xf0] }
 0x334   : > { %v4998_v52 = vadd.f32 %v4997_v44, %v13174_v36  ;;  %6650 = vmatpush.bf16.msra.mxu1 %v10925_v37  ;;  %6668 = vmatpush.bf16.msra.mxu2 %v11177_v16  ;;  %v11149_v34 = vor.u32 %v12100_v21, %v11146_v47  ;;  %v11345_v44 = vor.u32 %v12149_v62, %v11342_v63  ;;  %v11118_v37 = vld [vmem:[#allocation7 + $0xfdc] sm:$0xf0]  ;;  %v12083_v21 = vld [vmem:[#allocation7 + $0xf70] sm:$0xf0]  ;;  %v11320_v47 = vld [vmem:[#allocation7 + $0x1150] sm:$0xf] }
 0x335   : > { %15295 = vst [vmem:[#allocation23_spill] sm:$0xff] %v13313_v17  ;;  %v11097_v16 = vor.u32 %v12090_v29, %v11096_v31  ;;  %v11121_v15 = vor.u32 %v12093_v6, %v11118_v37  ;;  %v11432_v63 = vld [vmem:[#allocation7 + $0x1230] sm:$0xf]  ;;  %v11040_v31 = vld [vmem:[#allocation7 + $0xf20] sm:$0xf] }
 0x336   : > { %v5017_v36 = vadd.f32 %v5016_v46, %v4998_v52  ;;  %6557 = vmatmul.bf16.vlgmr.msrb.gmra.mxu0 %v13318_v24  ;;  %6576 = vmatmul.bf16.vlgmr.msrb.gmra.mxu1 %v13322_v11  ;;  %v5526_v46 = vrot.slane %v13004_v14, 1  ;;  %v10872_v52 = vld [vmem:[#allocation7 + $0xdd0] sm:$0xf]  ;;  %v12076_v29 = vld [vmem:[#allocation7 + $0xf38] sm:$0xf0] }
 0x337   : > { %6632 = vmatpush.bf16.msra.mxu0 %v10673_v12  ;;  %6689 = vmatpush.bf16.msra.mxu3 %v11345_v44  ;;  %v10873_v14 = vor.u32 %v12034_v8, %v10872_v52  ;;  %v11068_v12 = vld [vmem:[#allocation7 + $0xf58] sm:$0xf]  ;;  %v10816_v52 = vld [vmem:[#allocation7 + $0xd60] sm:$0xf]  ;;  %v12020_v8 = vld [vmem:[#allocation7 + $0xd78] sm:$0xf0] }
 0x338   : > { %v4966_v5 = vpop.f32.mrf.mxu2  ;;  %v4985_v56 = vpop.f32.mrf.mxu3  ;;  %6651 = vmatpush.bf16.msra.mxu1 %v10897_v59  ;;  %v13344_v3 = vsel %vm878_vm2, %v5526_v46, %v13330_v42  ;;  %6669 = vmatpush.bf16.msra.mxu2 %v11149_v34  ;;  %v11069_v34 = vor.u32 %v12083_v21, %v11068_v12  ;;  %v11292_v6 = vld [vmem:[#allocation7 + $0x1118] sm:$0xf]  ;;  %v12139_v37 = vld [vmem:[#allocation7 + $0x1130] sm:$0xf0]  ;;  %v11012_v12 = vld [vmem:[#allocation7 + $0xee8] sm:$0xf] }
 0x339   : > { %v4967_v41 = vadd.f32 %v4966_v5, %v13303_v7  ;;  %15300 = vst [vmem:[#allocation28_spill] sm:$0xff] %v13344_v3  ;;  %v12146_v5 = vld [vmem:[#allocation7 + $0x1168] sm:$0xf0]  ;;  %v12069_v21 = vld [vmem:[#allocation7 + $0xf00] sm:$0xf0]  ;;  %vm8383_vm2 = vcmask 74752  }
 0x33a   : > { %v11321_v62 = vor.u32 %v12146_v5, %v11320_v47  ;;  %v11264_v47 = vld [vmem:[#allocation7 + $0x10e0] sm:$0xf] }
 0x33b   : > { %v13335_v54 = vadd.f32 %v4985_v56, %v4967_v41  ;;  %v4999_v51 = vpop.f32.mrf.mxu0  ;;  %v5018_v49 = vpop.f32.mrf.mxu1  ;;  %6701 = vmatpush.bf16.msrb.mxu0 %v10873_v14  ;;  %v12174_v41 = vld [vmem:[#allocation7 + $0x1248] sm:$0xf0]  ;;  %v10817_v14 = vor.u32 %v12020_v8, %v10816_v52  ;;  %v10760_v52 = vld [vmem:[#allocation7 + $0xcf0] sm:$0xf] }
 0x33c   : > { %v5000_v7 = vadd.f32 %v4999_v51, %v13178_v40  ;;  %v10844_v40 = vld [vmem:[#allocation7 + $0xd98] sm:$0xf]  ;;  %6720 = vmatpush.bf16.msrb.mxu1 %v11097_v16  ;;  %6670 = vmatpush.bf16.msra.mxu2 %v11121_v15  ;;  %v11433_v44 = vor.u32 %v12174_v41, %v11432_v63  ;;  %v11041_v16 = vor.u32 %v12076_v29, %v11040_v31  ;;  %v12167_v63 = vld [vmem:[#allocation7 + $0x1210] sm:$0xf0]  ;;  %v12006_v8 = vld [vmem:[#allocation7 + $0xd08] sm:$0xf0] }
 0x33d   : > { %15298 = vst [vmem:[#allocation26_spill] sm:$0xff] %v13335_v54  ;;  %6595 = vmatmul.bf16.vlgmr.msrb.gmra.mxu2 %v13339_v33  ;;  %11450 = vmatmul.msk.bf16.vlgmr.msrb.gmra.mxu3 %vm3203_vm5, %v13344_v3  ;;  %v10845_v38 = vor.u32 %v12027_v61, %v10844_v40  ;;  %v10788_v40 = vld [vmem:[#allocation7 + $0xd28] sm:$0xf]  ;;  %v12013_v61 = vld [vmem:[#allocation7 + $0xd40] sm:$0xf0] }
 0x33e   : > { %v5019_v2 = vadd.f32 %v5018_v49, %v5000_v7  ;;  %6762 = vmatpush.bf16.msrb.mxu3 %v11433_v44  ;;  %v10984_v31 = vld [vmem:[#allocation7 + $0xeb0] sm:$0xf]  ;;  %v12062_v29 = vld [vmem:[#allocation7 + $0xec8] sm:$0xf0] }
 0x33f   : > { %6702 = vmatpush.bf16.msrb.mxu0 %v10845_v38  ;;  %v10789_v38 = vor.u32 %v12013_v61, %v10788_v40  ;;  %v10732_v40 = vld [vmem:[#allocation7 + $0xcb8] sm:$0xf]  ;;  %v11999_v61 = vld [vmem:[#allocation7 + $0xcd0] sm:$0xf0] }
 0x340   : > { %v5035_v56 = vpop.f32.mrf.mxu2  ;;  %v5054_v59 = vpop.f32.mrf.mxu3  ;;  %6739 = vmatpush.bf16.msrb.mxu2 %v11321_v62  ;;  %6721 = vmatpush.bf16.msrb.mxu1 %v11069_v34  ;;  %v11404_v62 = vld [vmem:[#allocation7 + $0x11f8] sm:$0xf] }
 0x341   : > { %v5036_v45 = vadd.f32 %v5035_v56, %v5017_v36  ;;  %v11293_v36 = vor.u32 %v12139_v37, %v11292_v6  ;;  %v11236_v6 = vld [vmem:[#allocation7 + $0x10a8] sm:$0xf]  ;;  %v12125_v37 = vld [vmem:[#allocation7 + $0x10c0] sm:$0xf0] }
 0x343   : > { %v13349_v46 = vadd.f32 %v5054_v59, %v5036_v45  ;;  %v5002_v51 = vpop.f32.mrf.mxu0  ;;  %v5021_v49 = vpop.f32.mrf.mxu1  ;;  %6703 = vmatpush.bf16.msrb.mxu0 %v10817_v14  ;;  %v11013_v59 = vor.u32 %v12069_v21, %v11012_v12  ;;  %v11405_v45 = vor.u32 %v12167_v63, %v11404_v62  ;;  %v10761_v14 = vor.u32 %v12006_v8, %v10760_v52  ;;  %v10956_v12 = vld [vmem:[#allocation7 + $0xe78] sm:$0xf]  ;;  %v11208_v21 = vld [vmem:[#allocation7 + $0x1070] sm:$0xf]  ;;  %v12160_v62 = vld [vmem:[#allocation7 + $0x11d8] sm:$0xf0] }
 0x344   : > { %v5003_v7 = vadd.f32 %v5002_v51, %v13183_v0  ;;  %6722 = vmatpush.bf16.msrb.mxu1 %v11041_v16  ;;  %v12132_v0 = vld [vmem:[#allocation7 + $0x10f8] sm:$0xf0]  ;;  %6740 = vmatpush.bf16.msrb.mxu2 %v11293_v36  ;;  %v11237_v16 = vor.u32 %v12125_v37, %v11236_v6  ;;  %v10704_v52 = vld [vmem:[#allocation7 + $0xc80] sm:$0xf]  ;;  %v11180_v6 = vld [vmem:[#allocation7 + $0x1038] sm:$0xf] }
 0x345   : > { %15301 = vst [vmem:[#allocation29_spill] sm:$0xff] %v13349_v46  ;;  %v11265_v34 = vor.u32 %v12132_v0, %v11264_v47  ;;  %6763 = vmatpush.bf16.msrb.mxu3 %v11405_v45  ;;  %v12118_v47 = vld [vmem:[#allocation7 + $0x1088] sm:$0xf0]  ;;  %v11992_v8 = vld [vmem:[#allocation7 + $0xc98] sm:$0xf0] }
 0x346   : > { %v5022_v15 = vadd.f32 %v5021_v49, %v5003_v7  ;;  %6562 = vmatmul.bf16.gmra.mxu0 %v13306_v48  ;;  %6581 = vmatmul.bf16.gmra.mxu1 %v13309_v60  ;;  %v12111_v37 = vld [vmem:[#allocation7 + $0x1050] sm:$0xf0] }
 0x347   : > { %6704 = vmatpush.bf16.msrb.mxu0 %v10789_v38  ;;  %v12055_v38 = vld [vmem:[#allocation7 + $0xe90] sm:$0xf0] }
 0x348   : > { %v5037_v5 = vpop.f32.mrf.mxu2  ;;  %v5056_v56 = vpop.f32.mrf.mxu3  ;;  %6723 = vmatpush.bf16.msrb.mxu1 %v11013_v59  ;;  %6741 = vmatpush.bf16.msrb.mxu2 %v11265_v34  ;;  %v11209_v59 = vor.u32 %v12118_v47, %v11208_v21  ;;  %v11376_v34 = vld [vmem:[#allocation7 + $0x11c0] sm:$0xf]  ;;  %v12104_v21 = vld [vmem:[#allocation7 + $0x1018] sm:$0xf0] }
 0x349   : > { %v5038_v41 = vadd.f32 %v5037_v5, %v5019_v2  ;;  %v10985_v2 = vor.u32 %v12062_v29, %v10984_v31  ;;  %v10928_v31 = vld [vmem:[#allocation7 + $0xe40] sm:$0xf]  ;;  %v12048_v29 = vld [vmem:[#allocation7 + $0xe58] sm:$0xf0] }
 0x34b   : > { %v13354_v44 = vadd.f32 %v5056_v56, %v5038_v41  ;;  %v5004_v51 = vpop.f32.mrf.mxu0  ;;  %v5023_v49 = vpop.f32.mrf.mxu1  ;;  %6705 = vmatpush.bf16.msrb.mxu0 %v10761_v14  ;;  %v10957_v56 = vor.u32 %v12055_v38, %v10956_v12  ;;  %v11377_v41 = vor.u32 %v12160_v62, %v11376_v34  ;;  %v10705_v14 = vor.u32 %v11992_v8, %v10704_v52  ;;  %v10900_v12 = vld [vmem:[#allocation7 + $0xe08] sm:$0xf]  ;;  %v11152_v38 = vld [vmem:[#allocation7 + $0x1000] sm:$0xf]  ;;  %v12153_v34 = vld [vmem:[#allocation7 + $0x11a0] sm:$0xf0] }
 0x34c   : > { %v5005_v7 = vadd.f32 %v5004_v51, %v13187_v18  ;;  %6724 = vmatpush.bf16.msrb.mxu1 %v10985_v2  ;;  %v10733_v18 = vor.u32 %v11999_v61, %v10732_v40  ;;  %6742 = vmatpush.bf16.msrb.mxu2 %v11237_v16  ;;  %v10929_v2 = vor.u32 %v12048_v29, %v10928_v31  ;;  %v10676_v40 = vld [vmem:[#allocation7 + $0xc48] sm:$0xf]  ;;  %v11985_v61 = vld [vmem:[#allocation7 + $0xc60] sm:$0xf0]  ;;  %v12031_v52 = vld [vmem:[#allocation7 + $0xdd4] sm:$0xf] }
 0x34d   : > { %15302 = vst [vmem:[#allocation30_spill] sm:$0xff] %v13354_v44  ;;  %6600 = vmatmul.bf16.gmra.mxu2 %v13325_v13  ;;  %11451 = vmatmul.msk.bf16.gmra.mxu3 %vm3203_vm5, %v13330_v42  ;;  %v10874_v8 = vld [vmem:[#allocation7 + $0xdec] sm:$0xf0]  ;;  %v12087_v31 = vld [vmem:[#allocation7 + $0xf94] sm:$0xf] }
 0x34e   : > { %v5024_v36 = vadd.f32 %v5023_v49, %v5005_v7  ;;  %6764 = vmatpush.bf16.msrb.mxu3 %v11377_v41  ;;  %v11098_v29 = vld [vmem:[#allocation7 + $0xfac] sm:$0xf0]  ;;  %v11252_v44 = vld [vmem:[#allocation7 + $0x10b8] sm:$0xf] }
 0x34f   : > { %6706 = vmatpush.bf16.msrb.mxu0 %v10733_v18  ;;  %v10677_v18 = vor.u32 %v11985_v61, %v10676_v40  ;;  %v12024_v40 = vld [vmem:[#allocation7 + $0xd9c] sm:$0xf]  ;;  %v10846_v61 = vld [vmem:[#allocation7 + $0xdb4] sm:$0xf0] }
 0x350   : > { %v5040_v0 = vpop.f32.mrf.mxu2  ;;  %v5059_v5 = vpop.f32.mrf.mxu3  ;;  %6725 = vmatpush.bf16.msrb.mxu1 %v10957_v56  ;;  %6743 = vmatpush.bf16.msrb.mxu2 %v11209_v59  ;;  %v11153_v56 = vor.u32 %v12104_v21, %v11152_v38  ;;  %v11348_v59 = vld [vmem:[#allocation7 + $0x1188] sm:$0xf]  ;;  %v11322_v38 = vld [vmem:[#allocation7 + $0x116c] sm:$0xf0] }
 0x351   : > { %v5041_v63 = vadd.f32 %v5040_v0, %v5022_v15  ;;  %v11181_v15 = vor.u32 %v12111_v37, %v11180_v6  ;;  %v11124_v6 = vld [vmem:[#allocation7 + $0xfc8] sm:$0xf]  ;;  %v12097_v37 = vld [vmem:[#allocation7 + $0xfe0] sm:$0xf0] }
 0x353   : > { %v13360_v45 = vadd.f32 %v5059_v5, %v5041_v63  ;;  %v5073_v51 = vpop.f32.mrf.mxu0  ;;  %v5092_v49 = vpop.f32.mrf.mxu1  ;;  %6707 = vmatpush.bf16.msrb.mxu0 %v10705_v14  ;;  %v11349_v63 = vor.u32 %v12153_v34, %v11348_v59  ;;  %v10877_v14 = vor.u32 %v12031_v52, %v10874_v8  ;;  %v11434_v59 = vld [vmem:[#allocation7 + $0x124c] sm:$0xf0]  ;;  %v12017_v52 = vld [vmem:[#allocation7 + $0xd64] sm:$0xf]  ;;  %v10818_v8 = vld [vmem:[#allocation7 + $0xd7c] sm:$0xf0] }
 0x354   : > { %v5074_v7 = vadd.f32 %v5073_v51, %v13192_v28  ;;  %6726 = vmatpush.bf16.msrb.mxu1 %v10929_v2  ;;  %v12041_v28 = vld [vmem:[#allocation7 + $0xe20] sm:$0xf0]  ;;  %6744 = vmatpush.bf16.msrb.mxu2 %v11181_v15  ;;  %v11125_v2 = vor.u32 %v12097_v37, %v11124_v6  ;;  %v12136_v6 = vld [vmem:[#allocation7 + $0x111c] sm:$0xf]  ;;  %v11294_v37 = vld [vmem:[#allocation7 + $0x1134] sm:$0xf0] }
 0x355   : > { %15303 = vst [vmem:[#allocation31_spill] sm:$0xff] %v13360_v45  ;;  %v10901_v5 = vor.u32 %v12041_v28, %v10900_v12  ;;  %6765 = vmatpush.bf16.msrb.mxu3 %v11349_v63  ;;  %v12080_v12 = vld [vmem:[#allocation7 + $0xf5c] sm:$0xf]  ;;  %v12143_v28 = vld [vmem:[#allocation7 + $0x1154] sm:$0xf] }
 0x356   : > { %v5093_v16 = vadd.f32 %v5092_v49, %v5074_v7  ;;  %6633 = vmatmul.bf16.vlgmr.msra.gmra.mxu0 %v13318_v24  ;;  %6652 = vmatmul.bf16.vlgmr.msra.gmra.mxu1 %v13322_v11  ;;  %v11000_v45 = vld [vmem:[#allocation7 + $0xec0] sm:$0xf] }
 0x357   : > { %6708 = vmatpush.bf16.msrb.mxu0 %v10677_v18  ;;  %v11070_v18 = vld [vmem:[#allocation7 + $0xf74] sm:$0xf0] }
 0x358   : > { %v5042_v47 = vpop.f32.mrf.mxu2  ;;  %v5061_v0 = vpop.f32.mrf.mxu3  ;;  %6727 = vmatpush.bf16.msrb.mxu1 %v10901_v5  ;;  %6745 = vmatpush.bf16.msrb.mxu2 %v11153_v56  ;;  %v11325_v5 = vor.u32 %v12143_v28, %v11322_v38  ;;  %v12171_v56 = vld [vmem:[#allocation7 + $0x1234] sm:$0xf]  ;;  %v12129_v28 = vld [vmem:[#allocation7 + $0x10e4] sm:$0xf] }
 0x359   : > { %v5043_v62 = vadd.f32 %v5042_v47, %v5024_v36  ;;  %v11101_v36 = vor.u32 %v12087_v31, %v11098_v29  ;;  %v12073_v31 = vld [vmem:[#allocation7 + $0xf24] sm:$0xf]  ;;  %v11042_v29 = vld [vmem:[#allocation7 + $0xf3c] sm:$0xf0] }
 0x35b   : > { %v13365_v41 = vadd.f32 %v5061_v0, %v5043_v62  ;;  %v5075_v51 = vpop.f32.mrf.mxu0  ;;  %v5094_v49 = vpop.f32.mrf.mxu1  ;;  %6777 = vmatpush.bf16.msra.mxu0 %v10877_v14  ;;  %v11073_v0 = vor.u32 %v12080_v12, %v11070_v18  ;;  %v11437_v62 = vor.u32 %v12171_v56, %v11434_v59  ;;  %v10821_v14 = vor.u32 %v12017_v52, %v10818_v8  ;;  %v12066_v12 = vld [vmem:[#allocation7 + $0xeec] sm:$0xf]  ;;  %v11014_v18 = vld [vmem:[#allocation7 + $0xf04] sm:$0xf0]  ;;  %v11406_v56 = vld [vmem:[#allocation7 + $0x1214] sm:$0xf0] }
 0x35c   : > { %v5076_v7 = vadd.f32 %v5075_v51, %v13196_v22  ;;  %6796 = vmatpush.bf16.msra.mxu1 %v11101_v36  ;;  %v10849_v22 = vor.u32 %v12024_v40, %v10846_v61  ;;  %6746 = vmatpush.bf16.msrb.mxu2 %v11125_v2  ;;  %v11045_v36 = vor.u32 %v12073_v31, %v11042_v29  ;;  %v12010_v40 = vld [vmem:[#allocation7 + $0xd2c] sm:$0xf]  ;;  %v10790_v61 = vld [vmem:[#allocation7 + $0xd44] sm:$0xf0]  ;;  %v12003_v52 = vld [vmem:[#allocation7 + $0xcf4] sm:$0xf] }
 0x35d   : > { %15304 = vst [vmem:[#allocation32_spill] sm:$0xff] %v13365_v41  ;;  %6671 = vmatmul.bf16.vlgmr.msra.gmra.mxu2 %v13339_v33  ;;  %11452 = vmatmul.msk.bf16.vlgmr.msra.gmra.mxu3 %vm3203_vm5, %v13344_v3  ;;  %v10762_v8 = vld [vmem:[#allocation7 + $0xd0c] sm:$0xf0]  ;;  %v12059_v31 = vld [vmem:[#allocation7 + $0xeb4] sm:$0xf] }
 0x35e   : > { %v5095_v15 = vadd.f32 %v5094_v49, %v5076_v7  ;;  %6838 = vmatpush.bf16.msra.mxu3 %v11437_v62  ;;  %v10986_v29 = vld [vmem:[#allocation7 + $0xecc] sm:$0xf0] }
 0x35f   : > { %6778 = vmatpush.bf16.msra.mxu0 %v10849_v22  ;;  %v10793_v22 = vor.u32 %v12010_v40, %v10790_v61  ;;  %v11996_v40 = vld [vmem:[#allocation7 + $0xcbc] sm:$0xf]  ;;  %v10734_v61 = vld [vmem:[#allocation7 + $0xcd4] sm:$0xf0] }
 0x360   : > { %v5111_v21 = vpop.f32.mrf.mxu2  ;;  %v5130_v47 = vpop.f32.mrf.mxu3  ;;  %6815 = vmatpush.bf16.msra.mxu2 %v11325_v5  ;;  %6797 = vmatpush.bf16.msra.mxu1 %v11073_v0  ;;  %v12164_v5 = vld [vmem:[#allocation7 + $0x11fc] sm:$0xf] }
 0x361   : > { %v5112_v34 = vadd.f32 %v5111_v21, %v5093_v16  ;;  %v11297_v16 = vor.u32 %v12136_v6, %v11294_v37  ;;  %v12122_v6 = vld [vmem:[#allocation7 + $0x10ac] sm:$0xf]  ;;  %v11238_v37 = vld [vmem:[#allocation7 + $0x10c4] sm:$0xf0] }
 0x363   : > { %v13371_v63 = vadd.f32 %v5130_v47, %v5112_v34  ;;  %v5078_v51 = vpop.f32.mrf.mxu0  ;;  %v5097_v49 = vpop.f32.mrf.mxu1  ;;  %6779 = vmatpush.bf16.msra.mxu0 %v10821_v14  ;;  %v11017_v47 = vor.u32 %v12066_v12, %v11014_v18  ;;  %v11409_v34 = vor.u32 %v12164_v5, %v11406_v56  ;;  %v10765_v14 = vor.u32 %v12003_v52, %v10762_v8  ;;  %v12052_v12 = vld [vmem:[#allocation7 + $0xe7c] sm:$0xf]  ;;  %v12115_v18 = vld [vmem:[#allocation7 + $0x1074] sm:$0xf]  ;;  %v11378_v5 = vld [vmem:[#allocation7 + $0x11dc] sm:$0xf0] }
 0x364   : > { %v5079_v7 = vadd.f32 %v5078_v51, %v13201_v9  ;;  %6798 = vmatpush.bf16.msra.mxu1 %v11045_v36  ;;  %v11266_v9 = vld [vmem:[#allocation7 + $0x10fc] sm:$0xf0]  ;;  %6816 = vmatpush.bf16.msra.mxu2 %v11297_v16  ;;  %v11241_v36 = vor.u32 %v12122_v6, %v11238_v37  ;;  %v11989_v52 = vld [vmem:[#allocation7 + $0xc84] sm:$0xf]  ;;  %v12108_v6 = vld [vmem:[#allocation7 + $0x103c] sm:$0xf] }
 0x365   : > { %15305 = vst [vmem:[#allocation33_spill] sm:$0xff] %v13371_v63  ;;  %v11269_v0 = vor.u32 %v12129_v28, %v11266_v9  ;;  %6839 = vmatpush.bf16.msra.mxu3 %v11409_v34  ;;  %v11210_v28 = vld [vmem:[#allocation7 + $0x108c] sm:$0xf0]  ;;  %v10706_v8 = vld [vmem:[#allocation7 + $0xc9c] sm:$0xf0]  ;;  %v13513_v63 = vld [vmem:[#allocation10 + $0x32c] sm:$0xff] }
 0x366   : > { %v5098_v2 = vadd.f32 %v5097_v49, %v5079_v7  ;;  %6638 = vmatmul.bf16.gmra.mxu0 %v13306_v48  ;;  %6657 = vmatmul.bf16.gmra.mxu1 %v13309_v60  ;;  %v11182_v37 = vld [vmem:[#allocation7 + $0x1054] sm:$0xf0]  ;;  %15318 = vst [vmem:[#allocation46_spill] sm:$0xff] %v13513_v63 }
 0x367   : > { %6780 = vmatpush.bf16.msra.mxu0 %v10793_v22  ;;  %v10958_v22 = vld [vmem:[#allocation7 + $0xe94] sm:$0xf0] }
 0x368   : > { %v5113_v38 = vpop.f32.mrf.mxu2  ;;  %v5132_v21 = vpop.f32.mrf.mxu3  ;;  %6799 = vmatpush.bf16.msra.mxu1 %v11017_v47  ;;  %6817 = vmatpush.bf16.msra.mxu2 %v11269_v0  ;;  %v11213_v47 = vor.u32 %v12115_v18, %v11210_v28  ;;  %v12157_v0 = vld [vmem:[#allocation7 + $0x11c4] sm:$0xf]  ;;  %v11154_v18 = vld [vmem:[#allocation7 + $0x101c] sm:$0xf0] }
 0x369   : > { %v5114_v59 = vadd.f32 %v5113_v38, %v5095_v15  ;;  %v10989_v15 = vor.u32 %v12059_v31, %v10986_v29  ;;  %v12045_v31 = vld [vmem:[#allocation7 + $0xe44] sm:$0xf]  ;;  %v10930_v29 = vld [vmem:[#allocation7 + $0xe5c] sm:$0xf0] }
 0x36b   : > { %v13376_v62 = vadd.f32 %v5132_v21, %v5114_v59  ;;  %v5080_v51 = vpop.f32.mrf.mxu0  ;;  %v5099_v49 = vpop.f32.mrf.mxu1  ;;  %6781 = vmatpush.bf16.msra.mxu0 %v10765_v14  ;;  %v10961_v21 = vor.u32 %v12052_v12, %v10958_v22  ;;  %v11381_v59 = vor.u32 %v12157_v0, %v11378_v5  ;;  %v10709_v14 = vor.u32 %v11989_v52, %v10706_v8  ;;  %v12038_v12 = vld [vmem:[#allocation7 + $0xe0c] sm:$0xf]  ;;  %v12101_v22 = vld [vmem:[#allocation7 + $0x1004] sm:$0xf]  ;;  %v11350_v0 = vld [vmem:[#allocation7 + $0x11a4] sm:$0xf0] }
 0x36c   : > { %v5081_v7 = vadd.f32 %v5080_v51, %v13205_v19  ;;  %6800 = vmatpush.bf16.msra.mxu1 %v10989_v15  ;;  %v10737_v19 = vor.u32 %v11996_v40, %v10734_v61  ;;  %6818 = vmatpush.bf16.msra.mxu2 %v11241_v36  ;;  %v10933_v15 = vor.u32 %v12045_v31, %v10930_v29  ;;  %v11982_v40 = vld [vmem:[#allocation7 + $0xc4c] sm:$0xf]  ;;  %v10678_v61 = vld [vmem:[#allocation7 + $0xc64] sm:$0xf0]  ;;  %v10880_v52 = vld [vmem:[#allocation7 + $0xdd8] sm:$0xf] }
 0x36d   : > { %15306 = vst [vmem:[#allocation34_spill] sm:$0xff] %v13376_v62  ;;  %6676 = vmatmul.bf16.gmra.mxu2 %v13325_v13  ;;  %11453 = vmatmul.msk.bf16.gmra.mxu3 %vm3203_vm5, %v13330_v42  ;;  %v12035_v8 = vld [vmem:[#allocation7 + $0xdf0] sm:$0xf0]  ;;  %v11104_v31 = vld [vmem:[#allocation7 + $0xf98] sm:$0xf]  ;;  %v13511_v62 = vld [vmem:[#allocation10 + $0x1dc] sm:$0xff] }
 0x36e   : > { %v5100_v16 = vadd.f32 %v5099_v49, %v5081_v7  ;;  %6840 = vmatpush.bf16.msra.mxu3 %v11381_v59  ;;  %v12091_v29 = vld [vmem:[#allocation7 + $0xfb0] sm:$0xf0] }
 0x36f   : > { %6782 = vmatpush.bf16.msra.mxu0 %v10737_v19  ;;  %v10681_v19 = vor.u32 %v11982_v40, %v10678_v61  ;;  %v10852_v40 = vld [vmem:[#allocation7 + $0xda0] sm:$0xf]  ;;  %v12028_v61 = vld [vmem:[#allocation7 + $0xdb8] sm:$0xf0] }
 0x370   : > { %v5116_v9 = vpop.f32.mrf.mxu2  ;;  %v5135_v38 = vpop.f32.mrf.mxu3  ;;  %6801 = vmatpush.bf16.msra.mxu1 %v10961_v21  ;;  %6819 = vmatpush.bf16.msra.mxu2 %v11213_v47  ;;  %v11157_v21 = vor.u32 %v12101_v22, %v11154_v18  ;;  %v12150_v47 = vld [vmem:[#allocation7 + $0x118c] sm:$0xf]  ;;  %v12147_v22 = vld [vmem:[#allocation7 + $0x1170] sm:$0xf0] }
 0x371   : > { %v5117_v56 = vadd.f32 %v5116_v9, %v5098_v2  ;;  %v11185_v2 = vor.u32 %v12108_v6, %v11182_v37  ;;  %v12094_v6 = vld [vmem:[#allocation7 + $0xfcc] sm:$0xf]  ;;  %v11126_v37 = vld [vmem:[#allocation7 + $0xfe4] sm:$0xf0] }
 0x373   : > { %v13382_v34 = vadd.f32 %v5135_v38, %v5117_v56  ;;  %v5149_v51 = vpop.f32.mrf.mxu0  ;;  %v5168_v49 = vpop.f32.mrf.mxu1  ;;  %6783 = vmatpush.bf16.msra.mxu0 %v10709_v14  ;;  %v11353_v56 = vor.u32 %v12150_v47, %v11350_v0  ;;  %v10881_v14 = vor.u32 %v12035_v8, %v10880_v52  ;;  %v12175_v47 = vld [vmem:[#allocation7 + $0x1250] sm:$0xf0]  ;;  %v10824_v52 = vld [vmem:[#allocation7 + $0xd68] sm:$0xf]  ;;  %v12021_v8 = vld [vmem:[#allocation7 + $0xd80] sm:$0xf0] }
 0x374   : > { %v5150_v7 = vadd.f32 %v5149_v51, %v13210_v57  ;;  %6802 = vmatpush.bf16.msra.mxu1 %v10933_v15  ;;  %v10902_v57 = vld [vmem:[#allocation7 + $0xe24] sm:$0xf0]  ;;  %6820 = vmatpush.bf16.msra.mxu2 %v11185_v2  ;;  %v11129_v15 = vor.u32 %v12094_v6, %v11126_v37  ;;  %v11300_v6 = vld [vmem:[#allocation7 + $0x1120] sm:$0xf]  ;;  %v12140_v37 = vld [vmem:[#allocation7 + $0x1138] sm:$0xf0] }
 0x375   : > { %15307 = vst [vmem:[#allocation35_spill] sm:$0xff] %v13382_v34  ;;  %v10905_v38 = vor.u32 %v12038_v12, %v10902_v57  ;;  %6841 = vmatpush.bf16.msra.mxu3 %v11353_v56  ;;  %v11076_v12 = vld [vmem:[#allocation7 + $0xf60] sm:$0xf]  ;;  %v11328_v57 = vld [vmem:[#allocation7 + $0x1158] sm:$0xf] }
 0x376   : > { %v5169_v36 = vadd.f32 %v5168_v49, %v5150_v7  ;;  %6709 = vmatmul.bf16.vlgmr.msrb.gmra.mxu0 %v13318_v24  ;;  %6728 = vmatmul.bf16.vlgmr.msrb.gmra.mxu1 %v13322_v11 }
 0x377   : > { %6784 = vmatpush.bf16.msra.mxu0 %v10681_v19  ;;  %v12084_v19 = vld [vmem:[#allocation7 + $0xf78] sm:$0xf0] }
 0x378   : > { %v5118_v28 = vpop.f32.mrf.mxu2  ;;  %v5137_v9 = vpop.f32.mrf.mxu3  ;;  %6803 = vmatpush.bf16.msra.mxu1 %v10905_v38  ;;  %6821 = vmatpush.bf16.msra.mxu2 %v11157_v21  ;;  %v11329_v38 = vor.u32 %v12147_v22, %v11328_v57  ;;  %v11440_v21 = vld [vmem:[#allocation7 + $0x1238] sm:$0xf]  ;;  %v11272_v57 = vld [vmem:[#allocation7 + $0x10e8] sm:$0xf] }
 0x379   : > { %v5119_v5 = vadd.f32 %v5118_v28, %v5100_v16  ;;  %v11105_v16 = vor.u32 %v12091_v29, %v11104_v31  ;;  %v11048_v31 = vld [vmem:[#allocation7 + $0xf28] sm:$0xf]  ;;  %v12077_v29 = vld [vmem:[#allocation7 + $0xf40] sm:$0xf0] }
 0x37b   : > { %v13387_v59 = vadd.f32 %v5137_v9, %v5119_v5  ;;  %v5151_v51 = vpop.f32.mrf.mxu0  ;;  %v5170_v49 = vpop.f32.mrf.mxu1  ;;  %6853 = vmatpush.bf16.msrb.mxu0 %v10881_v14  ;;  %v11077_v9 = vor.u32 %v12084_v19, %v11076_v12  ;;  %v11441_v5 = vor.u32 %v12175_v47, %v11440_v21  ;;  %v10825_v14 = vor.u32 %v12021_v8, %v10824_v52  ;;  %v11020_v12 = vld [vmem:[#allocation7 + $0xef0] sm:$0xf]  ;;  %v12070_v19 = vld [vmem:[#allocation7 + $0xf08] sm:$0xf0]  ;;  %v12168_v21 = vld [vmem:[#allocation7 + $0x1218] sm:$0xf0] }
 0x37c   : > { %v5152_v7 = vadd.f32 %v5151_v51, %v13214_v32  ;;  %6872 = vmatpush.bf16.msrb.mxu1 %v11105_v16  ;;  %v10853_v32 = vor.u32 %v12028_v61, %v10852_v40  ;;  %6822 = vmatpush.bf16.msra.mxu2 %v11129_v15  ;;  %v11049_v16 = vor.u32 %v12077_v29, %v11048_v31  ;;  %v10796_v40 = vld [vmem:[#allocation7 + $0xd30] sm:$0xf]  ;;  %v12014_v61 = vld [vmem:[#allocation7 + $0xd48] sm:$0xf0]  ;;  %v10768_v52 = vld [vmem:[#allocation7 + $0xcf8] sm:$0xf] }
 0x37d   : > { %15308 = vst [vmem:[#allocation36_spill] sm:$0xff] %v13387_v59  ;;  %6747 = vmatmul.bf16.vlgmr.msrb.gmra.mxu2 %v13339_v33  ;;  %11454 = vmatmul.msk.bf16.vlgmr.msrb.gmra.mxu3 %vm3203_vm5, %v13344_v3  ;;  %v12007_v8 = vld [vmem:[#allocation7 + $0xd10] sm:$0xf0]  ;;  %v10992_v31 = vld [vmem:[#allocation7 + $0xeb8] sm:$0xf] }
 0x37e   : > { %v5171_v2 = vadd.f32 %v5170_v49, %v5152_v7  ;;  %6914 = vmatpush.bf16.msrb.mxu3 %v11441_v5  ;;  %v12063_v29 = vld [vmem:[#allocation7 + $0xed0] sm:$0xf0] }
 0x37f   : > { %6854 = vmatpush.bf16.msrb.mxu0 %v10853_v32  ;;  %v10797_v32 = vor.u32 %v12014_v61, %v10796_v40  ;;  %v10740_v40 = vld [vmem:[#allocation7 + $0xcc0] sm:$0xf]  ;;  %v12000_v61 = vld [vmem:[#allocation7 + $0xcd8] sm:$0xf0] }
 0x380   : > { %v5187_v18 = vpop.f32.mrf.mxu2  ;;  %v5206_v28 = vpop.f32.mrf.mxu3  ;;  %6891 = vmatpush.bf16.msrb.mxu2 %v11329_v38  ;;  %6873 = vmatpush.bf16.msrb.mxu1 %v11077_v9  ;;  %v11412_v38 = vld [vmem:[#allocation7 + $0x1200] sm:$0xf] }
 0x381   : > { %v5188_v0 = vadd.f32 %v5187_v18, %v5169_v36  ;;  %v11301_v36 = vor.u32 %v12140_v37, %v11300_v6  ;;  %v11244_v6 = vld [vmem:[#allocation7 + $0x10b0] sm:$0xf]  ;;  %v12126_v37 = vld [vmem:[#allocation7 + $0x10c8] sm:$0xf0] }
 0x383   : > { %v13393_v56 = vadd.f32 %v5206_v28, %v5188_v0  ;;  %v5154_v51 = vpop.f32.mrf.mxu0  ;;  %v5173_v49 = vpop.f32.mrf.mxu1  ;;  %6855 = vmatpush.bf16.msrb.mxu0 %v10825_v14  ;;  %v11021_v28 = vor.u32 %v12070_v19, %v11020_v12  ;;  %v11413_v0 = vor.u32 %v12168_v21, %v11412_v38  ;;  %v10769_v14 = vor.u32 %v12007_v8, %v10768_v52  ;;  %v10964_v12 = vld [vmem:[#allocation7 + $0xe80] sm:$0xf]  ;;  %v11216_v19 = vld [vmem:[#allocation7 + $0x1078] sm:$0xf]  ;;  %v12161_v38 = vld [vmem:[#allocation7 + $0x11e0] sm:$0xf0] }
 0x384   : > { %v5155_v7 = vadd.f32 %v5154_v51, %v13219_v4  ;;  %6874 = vmatpush.bf16.msrb.mxu1 %v11049_v16  ;;  %v12133_v4 = vld [vmem:[#allocation7 + $0x1100] sm:$0xf0]  ;;  %6892 = vmatpush.bf16.msrb.mxu2 %v11301_v36  ;;  %v11245_v16 = vor.u32 %v12126_v37, %v11244_v6  ;;  %v10712_v52 = vld [vmem:[#allocation7 + $0xc88] sm:$0xf]  ;;  %v11188_v6 = vld [vmem:[#allocation7 + $0x1040] sm:$0xf] }
 0x385   : > { %15309 = vst [vmem:[#allocation37_spill] sm:$0xff] %v13393_v56  ;;  %v11273_v9 = vor.u32 %v12133_v4, %v11272_v57  ;;  %6915 = vmatpush.bf16.msrb.mxu3 %v11413_v0  ;;  %v12119_v57 = vld [vmem:[#allocation7 + $0x1090] sm:$0xf0]  ;;  %v11993_v8 = vld [vmem:[#allocation7 + $0xca0] sm:$0xf0] }
 0x386   : > { %v5174_v15 = vadd.f32 %v5173_v49, %v5155_v7  ;;  %6714 = vmatmul.bf16.gmra.mxu0 %v13306_v48  ;;  %6733 = vmatmul.bf16.gmra.mxu1 %v13309_v60  ;;  %v12112_v37 = vld [vmem:[#allocation7 + $0x1058] sm:$0xf0] }
 0x387   : > { %6856 = vmatpush.bf16.msrb.mxu0 %v10797_v32  ;;  %v12056_v32 = vld [vmem:[#allocation7 + $0xe98] sm:$0xf0] }
 0x388   : > { %v5189_v22 = vpop.f32.mrf.mxu2  ;;  %v5208_v18 = vpop.f32.mrf.mxu3  ;;  %6875 = vmatpush.bf16.msrb.mxu1 %v11021_v28  ;;  %6893 = vmatpush.bf16.msrb.mxu2 %v11273_v9  ;;  %v11217_v28 = vor.u32 %v12119_v57, %v11216_v19  ;;  %v11384_v9 = vld [vmem:[#allocation7 + $0x11c8] sm:$0xf]  ;;  %v12105_v19 = vld [vmem:[#allocation7 + $0x1020] sm:$0xf0] }
 0x389   : > { %v5190_v47 = vadd.f32 %v5189_v22, %v5171_v2  ;;  %v10993_v2 = vor.u32 %v12063_v29, %v10992_v31  ;;  %v10936_v31 = vld [vmem:[#allocation7 + $0xe48] sm:$0xf]  ;;  %v12049_v29 = vld [vmem:[#allocation7 + $0xe60] sm:$0xf0] }
 0x38b   : > { %v13398_v5 = vadd.f32 %v5208_v18, %v5190_v47  ;;  %v5156_v51 = vpop.f32.mrf.mxu0  ;;  %v5175_v49 = vpop.f32.mrf.mxu1  ;;  %6857 = vmatpush.bf16.msrb.mxu0 %v10769_v14  ;;  %v10965_v18 = vor.u32 %v12056_v32, %v10964_v12  ;;  %v11385_v47 = vor.u32 %v12161_v38, %v11384_v9  ;;  %v10713_v14 = vor.u32 %v11993_v8, %v10712_v52  ;;  %v11160_v32 = vld [vmem:[#allocation7 + $0x1008] sm:$0xf]  ;;  %v12032_v52 = vld [vmem:[#allocation7 + $0xddc] sm:$0xf]  ;;  %v10882_v8 = vld [vmem:[#allocation7 + $0xdf4] sm:$0xf0] }
 0x38c   : > { %v5157_v7 = vadd.f32 %v5156_v51, %v13223_v58  ;;  %6876 = vmatpush.bf16.msrb.mxu1 %v10993_v2  ;;  %v10741_v58 = vor.u32 %v12000_v61, %v10740_v40  ;;  %6894 = vmatpush.bf16.msrb.mxu2 %v11245_v16  ;;  %v10937_v2 = vor.u32 %v12049_v29, %v10936_v31  ;;  %v10684_v16 = vld [vmem:[#allocation7 + $0xc50] sm:$0xf]  ;;  %v11986_v40 = vld [vmem:[#allocation7 + $0xc68] sm:$0xf0]  ;;  %v12088_v31 = vld [vmem:[#allocation7 + $0xf9c] sm:$0xf] }
 0x38d   : > { %15310 = vst [vmem:[#allocation38_spill] sm:$0xff] %v13398_v5  ;;  %6752 = vmatmul.bf16.gmra.mxu2 %v13325_v13  ;;  %11455 = vmatmul.msk.bf16.gmra.mxu3 %vm3203_vm5, %v13330_v42  ;;  %v10908_v61 = vld [vmem:[#allocation7 + $0xe10] sm:$0xf]  ;;  %v11161_v9 = vor.u32 %v12105_v19, %v11160_v32  ;;  %v11106_v29 = vld [vmem:[#allocation7 + $0xfb4] sm:$0xf0] }
 0x38e   : > { %v5176_v36 = vadd.f32 %v5175_v49, %v5157_v7  ;;  %6916 = vmatpush.bf16.msrb.mxu3 %v11385_v47  ;;  %v11078_v32 = vld [vmem:[#allocation7 + $0xf7c] sm:$0xf0]  ;;  %v11330_v19 = vld [vmem:[#allocation7 + $0x1174] sm:$0xf0] }
 0x38f   : > { %6858 = vmatpush.bf16.msrb.mxu0 %v10741_v58  ;;  %v12042_v58 = vld [vmem:[#allocation7 + $0xe28] sm:$0xf0] }
 0x390   : > { %v5192_v4 = vpop.f32.mrf.mxu2  ;;  %v5211_v22 = vpop.f32.mrf.mxu3  ;;  %6877 = vmatpush.bf16.msrb.mxu1 %v10965_v18  ;;  %6895 = vmatpush.bf16.msrb.mxu2 %v11217_v28  ;;  %v10909_v57 = vor.u32 %v12042_v58, %v10908_v61 }
 0x391   : > { %v5193_v21 = vadd.f32 %v5192_v4, %v5174_v15  ;;  %v11189_v15 = vor.u32 %v12112_v37, %v11188_v6  ;;  %v11356_v4 = vld [vmem:[#allocation7 + $0x1190] sm:$0xf]  ;;  %v12098_v37 = vld [vmem:[#allocation7 + $0xfe8] sm:$0xf0] }
 0x392   : > { %v11132_v6 = vld [vmem:[#allocation7 + $0xfd0] sm:$0xf] }
 0x393   : > { %v13404_v0 = vadd.f32 %v5211_v22, %v5193_v21  ;;  %v5225_v51 = vpop.f32.mrf.mxu0  ;;  %v5244_v49 = vpop.f32.mrf.mxu1  ;;  %6859 = vmatpush.bf16.msrb.mxu0 %v10713_v14  ;;  %v12154_v22 = vld [vmem:[#allocation7 + $0x11a8] sm:$0xf0]  ;;  %v10885_v14 = vor.u32 %v12032_v52, %v10882_v8 }
 0x394   : > { %v5226_v7 = vadd.f32 %v5225_v51, %v13228_v55  ;;  %6878 = vmatpush.bf16.msrb.mxu1 %v10937_v2  ;;  %v10685_v55 = vor.u32 %v11986_v40, %v10684_v16  ;;  %6896 = vmatpush.bf16.msrb.mxu2 %v11189_v15  ;;  %v11357_v38 = vor.u32 %v12154_v22, %v11356_v4  ;;  %v12025_v15 = vld [vmem:[#allocation7 + $0xda4] sm:$0xf]  ;;  %v10854_v16 = vld [vmem:[#allocation7 + $0xdbc] sm:$0xf0]  ;;  %v12172_v4 = vld [vmem:[#allocation7 + $0x123c] sm:$0xf] }
 0x395   : > { %15311 = vst [vmem:[#allocation39_spill] sm:$0xff] %v13404_v0  ;;  %v11133_v2 = vor.u32 %v12098_v37, %v11132_v6  ;;  %v12081_v40 = vld [vmem:[#allocation7 + $0xf64] sm:$0xf]  ;;  %v10857_v58 = vor.u32 %v12025_v15, %v10854_v16  ;;  %v11442_v22 = vld [vmem:[#allocation7 + $0x1254] sm:$0xf0] }
 0x396   : > { %v5245_v12 = vadd.f32 %v5244_v49, %v5226_v7  ;;  %6785 = vmatmul.bf16.vlgmr.msra.gmra.mxu0 %v13318_v24  ;;  %6804 = vmatmul.bf16.vlgmr.msra.gmra.mxu1 %v13322_v11  ;;  %v12074_v6 = vld [vmem:[#allocation7 + $0xf2c] sm:$0xf]  ;;  %v11302_v15 = vld [vmem:[#allocation7 + $0x113c] sm:$0xf0]  ;;  %v12169_v0 = vld [vmem:[#allocation7 + $0x1220] sm:$0xf0] }
 0x397   : > { %6917 = vmatpush.bf16.msrb.mxu3 %v11357_v38  ;;  %6860 = vmatpush.bf16.msrb.mxu0 %v10685_v55  ;;  %v11081_v55 = vor.u32 %v12081_v40, %v11078_v32 }
 0x398   : > { %v5194_v18 = vpop.f32.mrf.mxu2  ;;  %v5213_v28 = vpop.f32.mrf.mxu3  ;;  %6879 = vmatpush.bf16.msrb.mxu1 %v10909_v57  ;;  %6897 = vmatpush.bf16.msrb.mxu2 %v11161_v9  ;;  %v11445_v9 = vor.u32 %v12172_v4, %v11442_v22  ;;  %v11022_v4 = vld [vmem:[#allocation7 + $0xf0c] sm:$0xf0]  ;;  %v12130_v22 = vld [vmem:[#allocation7 + $0x10ec] sm:$0xf] }
 0x399   : > { %v5195_v21 = vadd.f32 %v5194_v18, %v5176_v36  ;;  %v11109_v36 = vor.u32 %v12088_v31, %v11106_v29  ;;  %v12018_v29 = vld [vmem:[#allocation7 + $0xd6c] sm:$0xf] }
 0x39b   : > { %v13409_v47 = vadd.f32 %v5213_v28, %v5195_v21  ;;  %v5227_v51 = vpop.f32.mrf.mxu0  ;;  %v5246_v49 = vpop.f32.mrf.mxu1  ;;  %6929 = vmatpush.bf16.msra.mxu0 %v10885_v14 }
 0x39c   : > { %v5228_v7 = vadd.f32 %v5227_v51, %v13232_v25  ;;  %v12144_v25 = vld [vmem:[#allocation7 + $0x115c] sm:$0xf]  ;;  %6948 = vmatpush.bf16.msra.mxu1 %v11109_v36  ;;  %6898 = vmatpush.bf16.msrb.mxu2 %v11133_v2  ;;  %v11050_v36 = vld [vmem:[#allocation7 + $0xf44] sm:$0xf0]  ;;  %v12137_v2 = vld [vmem:[#allocation7 + $0x1124] sm:$0xf] }
 0x39d   : > { %15312 = vst [vmem:[#allocation40_spill] sm:$0xff] %v13409_v47  ;;  %6823 = vmatmul.bf16.vlgmr.msra.gmra.mxu2 %v13339_v33  ;;  %11456 = vmatmul.msk.bf16.vlgmr.msra.gmra.mxu3 %vm3203_vm5, %v13344_v3  ;;  %v11333_v57 = vor.u32 %v12144_v25, %v11330_v19  ;;  %v11305_v32 = vor.u32 %v12137_v2, %v11302_v15  ;;  %v12011_v25 = vld [vmem:[#allocation7 + $0xd34] sm:$0xf]  ;;  %v10798_v19 = vld [vmem:[#allocation7 + $0xd4c] sm:$0xf0] }
 0x39e   : > { %v5247_v61 = vadd.f32 %v5246_v49, %v5228_v7  ;;  %6990 = vmatpush.bf16.msra.mxu3 %v11445_v9  ;;  %v12165_v9 = vld [vmem:[#allocation7 + $0x1204] sm:$0xf]  ;;  %v11246_v2 = vld [vmem:[#allocation7 + $0x10cc] sm:$0xf0]  ;;  %v11420_v47 = vld [vmem:[#allocation7 + $0x1208] sm:$0xf] }
 0x39f   : > { %6930 = vmatpush.bf16.msra.mxu0 %v10857_v58 }
 0x3a0   : > { %v5263_v18 = vpop.f32.mrf.mxu2  ;;  %v5282_v28 = vpop.f32.mrf.mxu3  ;;  %6967 = vmatpush.bf16.msra.mxu2 %v11333_v57  ;;  %6949 = vmatpush.bf16.msra.mxu1 %v11081_v55  ;;  %v12067_v55 = vld [vmem:[#allocation7 + $0xef4] sm:$0xf] }
 0x3a1   : > { %v5264_v38 = vadd.f32 %v5263_v18, %v5245_v12  ;;  %v10826_v12 = vld [vmem:[#allocation7 + $0xd84] sm:$0xf0] }
 0x3a2   : > { %v10829_v37 = vor.u32 %v12018_v29, %v10826_v12  ;;  %v11274_v18 = vld [vmem:[#allocation7 + $0x1104] sm:$0xf0]  ;;  %v10770_v29 = vld [vmem:[#allocation7 + $0xd14] sm:$0xf0]  ;;  %v12060_v12 = vld [vmem:[#allocation7 + $0xebc] sm:$0xf] }
 0x3a3   : > { %v13415_v21 = vadd.f32 %v5282_v28, %v5264_v38  ;;  %v5230_v51 = vpop.f32.mrf.mxu0  ;;  %v5249_v49 = vpop.f32.mrf.mxu1  ;;  %v11025_v28 = vor.u32 %v12067_v55, %v11022_v4  ;;  %v11414_v38 = vld [vmem:[#allocation7 + $0x121c] sm:$0xf0]  ;;  %v12053_v55 = vld [vmem:[#allocation7 + $0xe84] sm:$0xf]  ;;  %v12116_v4 = vld [vmem:[#allocation7 + $0x107c] sm:$0xf] }
 0x3a4   : > { %v5231_v52 = vadd.f32 %v5230_v51, %v13237_v50  ;;  %v11053_v50 = vor.u32 %v12074_v6, %v11050_v36  ;;  %6931 = vmatpush.bf16.msra.mxu0 %v10829_v37  ;;  %6968 = vmatpush.bf16.msra.mxu2 %v11305_v32  ;;  %v10994_v37 = vld [vmem:[#allocation7 + $0xed4] sm:$0xf0]  ;;  %v12123_v36 = vld [vmem:[#allocation7 + $0x10b4] sm:$0xf] }
 0x3a5   : > { %15313 = vst [vmem:[#allocation41_spill] sm:$0xff] %v13415_v21  ;;  %v11249_v32 = vor.u32 %v12123_v36, %v11246_v2  ;;  %v11190_v36 = vld [vmem:[#allocation7 + $0x105c] sm:$0xf0]  ;;  %v12071_v21 = vld [vmem:[#allocation7 + $0xf10] sm:$0xf0] }
 0x3a6   : > { %v5250_v8 = vadd.f32 %v5249_v49, %v5231_v52  ;;  %6790 = vmatmul.bf16.gmra.mxu0 %v13306_v48  ;;  %6809 = vmatmul.bf16.gmra.mxu1 %v13309_v60  ;;  %v11277_v49 = vor.u32 %v12130_v22, %v11274_v18  ;;  %v11417_v52 = vor.u32 %v12165_v9, %v11414_v38  ;;  %v11218_v22 = vld [vmem:[#allocation7 + $0x1094] sm:$0xf0]  ;;  %v12158_v18 = vld [vmem:[#allocation7 + $0x11cc] sm:$0xf] }
 0x3a7   : > { %6950 = vmatpush.bf16.msra.mxu1 %v11053_v50  ;;  %v10997_v50 = vor.u32 %v12060_v12, %v10994_v37  ;;  %v12109_v37 = vld [vmem:[#allocation7 + $0x1044] sm:$0xf] }
 0x3a8   : > { %v5265_v31 = vpop.f32.mrf.mxu2  ;;  %v5284_v7 = vpop.f32.mrf.mxu3  ;;  %6991 = vmatpush.bf16.msra.mxu3 %v11417_v52  ;;  %6969 = vmatpush.bf16.msra.mxu2 %v11277_v49  ;;  %v11221_v49 = vor.u32 %v12116_v4, %v11218_v22  ;;  %v12102_v4 = vld [vmem:[#allocation7 + $0x100c] sm:$0xf]  ;;  %v11162_v22 = vld [vmem:[#allocation7 + $0x1024] sm:$0xf0] }
 0x3a9   : > { %v5266_v14 = vadd.f32 %v5265_v31, %v5247_v61  ;;  %v10801_v61 = vor.u32 %v12011_v25, %v10798_v19  ;;  %v11997_v25 = vld [vmem:[#allocation7 + $0xcc4] sm:$0xf]  ;;  %v10742_v19 = vld [vmem:[#allocation7 + $0xcdc] sm:$0xf0] }
 0x3ab   : > { %v13420_v16 = vadd.f32 %v5284_v7, %v5266_v14  ;;  %v5232_v40 = vpop.f32.mrf.mxu0  ;;  %v5251_v58 = vpop.f32.mrf.mxu1  ;;  %6932 = vmatpush.bf16.msra.mxu0 %v10801_v61  ;;  %v12004_v14 = vld [vmem:[#allocation7 + $0xcfc] sm:$0xf]  ;;  %6951 = vmatpush.bf16.msra.mxu1 %v11025_v28  ;;  %v10966_v61 = vld [vmem:[#allocation7 + $0xe9c] sm:$0xf0]  ;;  %v11386_v28 = vld [vmem:[#allocation7 + $0x11e4] sm:$0xf0] }
 0x3ac   : > { %v5233_v57 = vadd.f32 %v5232_v40, %v13242_v30  ;;  %v10773_v6 = vor.u32 %v12004_v14, %v10770_v29  ;;  %v11389_v9 = vor.u32 %v12158_v18, %v11386_v28  ;;  %6970 = vmatpush.bf16.msra.mxu2 %v11249_v32  ;;  %v10969_v38 = vor.u32 %v12053_v55, %v10966_v61  ;;  %v10714_v14 = vld [vmem:[#allocation7 + $0xca4] sm:$0xf0]  ;;  %v12046_v29 = vld [vmem:[#allocation7 + $0xe4c] sm:$0xf]  ;;  %v12039_v55 = vld [vmem:[#allocation7 + $0xe14] sm:$0xf] }
 0x3ad   : > { %15314 = vst [vmem:[#allocation42_spill] sm:$0xff] %v13420_v16  ;;  %6828 = vmatmul.bf16.gmra.mxu2 %v13325_v13  ;;  %11457 = vmatmul.msk.bf16.gmra.mxu3 %vm3203_vm5, %v13330_v42  ;;  %v11193_v32 = vor.u32 %v12109_v37, %v11190_v36  ;;  %v10910_v61 = vld [vmem:[#allocation7 + $0xe2c] sm:$0xf0]  ;;  %v13437_v18 = vld [vmem:[#allocation8] sm:$0x7f] }
 0x3ae   : > { %v5252_v51 = vadd.f32 %v5251_v58, %v5233_v57  ;;  %6992 = vmatpush.bf16.msra.mxu3 %v11389_v9  ;;  %v12151_v28 = vld [vmem:[#allocation7 + $0x1194] sm:$0xf]  ;;  %v11358_v9 = vld [vmem:[#allocation7 + $0x11ac] sm:$0xf0]  ;;  %v12092_v36 = vld [vmem:[#allocation7 + $0xfb8] sm:$0xf0] }
 0x3af   : > { %6933 = vmatpush.bf16.msra.mxu0 %v10773_v6  ;;  %6952 = vmatpush.bf16.msra.mxu1 %v10997_v50  ;;  %v10938_v6 = vld [vmem:[#allocation7 + $0xe64] sm:$0xf0]  ;;  %v11028_v16 = vld [vmem:[#allocation7 + $0xef8] sm:$0xf] }
 0x3b0   : > { %v5268_v31 = vpop.f32.mrf.mxu2  ;;  %v5287_v30 = vpop.f32.mrf.mxu3  ;;  %6971 = vmatpush.bf16.msra.mxu2 %v11221_v49  ;;  %v10941_v50 = vor.u32 %v12046_v29, %v10938_v6  ;;  %v10913_v49 = vor.u32 %v12039_v55, %v10910_v61  ;;  %v10888_v29 = vld [vmem:[#allocation7 + $0xde0] sm:$0xf]  ;;  %v10860_v61 = vld [vmem:[#allocation7 + $0xda8] sm:$0xf] }
 0x3b1   : > { %v5269_v7 = vadd.f32 %v5268_v31, %v5250_v8  ;;  %v10745_v8 = vor.u32 %v11997_v25, %v10742_v19  ;;  %v11983_v25 = vld [vmem:[#allocation7 + $0xc54] sm:$0xf]  ;;  %v10686_v19 = vld [vmem:[#allocation7 + $0xc6c] sm:$0xf0]  ;;  %v11112_v6 = vld [vmem:[#allocation7 + $0xfa0] sm:$0xf] }
 0x3b3   : > { %v13426_v15 = vadd.f32 %v5287_v30, %v5269_v7  ;;  %v6558_v40 = vpop.f32.mrf.mxu0  ;;  %v6577_v58 = vpop.f32.mrf.mxu1  ;;  %6934 = vmatpush.bf16.msra.mxu0 %v10745_v8  ;;  %v11990_v7 = vld [vmem:[#allocation7 + $0xc8c] sm:$0xf]  ;;  %6953 = vmatpush.bf16.msra.mxu1 %v10969_v38  ;;  %v11361_v38 = vor.u32 %v12151_v28, %v11358_v9  ;;  %v12085_v28 = vld [vmem:[#allocation7 + $0xf80] sm:$0xf0]  ;;  %v11336_v9 = vld [vmem:[#allocation7 + $0x1160] sm:$0xf] }
 0x3b4   : > { %v6578_v57 = vadd.f32 %v6577_v58, %v6558_v40  ;;  %v10717_v12 = vor.u32 %v11990_v7, %v10714_v14  ;;  %6972 = vmatpush.bf16.msra.mxu2 %v11193_v32  ;;  %v13440_v7 = vperm.slane %v13437_v18, 0 }
 0x3b5   : > { %15315 = vst [vmem:[#allocation43_spill] sm:$0xff] %v13426_v15  ;;  %6993 = vmatpush.bf16.msra.mxu3 %v11361_v38  ;;  %v12148_v38 = vld [vmem:[#allocation7 + $0x1178] sm:$0xf0] }
 0x3b6   : > { %6861 = vmatmul.bf16.vlgmr.msrb.gmra.mxu0 %v13318_v24  ;;  %6880 = vmatmul.bf16.vlgmr.msrb.gmra.mxu1 %v13322_v11 }
 0x3b7   : > { %6935 = vmatpush.bf16.msra.mxu0 %v10717_v12  ;;  %6954 = vmatpush.bf16.msra.mxu1 %v10941_v50  ;;  %v12036_v12 = vld [vmem:[#allocation7 + $0xdf8] sm:$0xf0] }
 0x3b8   : > { %v5270_v52 = vpop.f32.mrf.mxu2  ;;  %v5289_v31 = vpop.f32.mrf.mxu3  ;;  %v10889_v37 = vor.u32 %v12036_v12, %v10888_v29  ;;  %v11448_v29 = vld [vmem:[#allocation7 + $0x1240] sm:$0xf] }
 0x3b9   : > { %v5271_v30 = vadd.f32 %v5270_v52, %v5252_v51  ;;  %v10689_v51 = vor.u32 %v11983_v25, %v10686_v19  ;;  %v11165_v52 = vor.u32 %v12102_v4, %v11162_v22  ;;  %v11113_v19 = vor.u32 %v12092_v36, %v11112_v6  ;;  %v12029_v4 = vld [vmem:[#allocation7 + $0xdc0] sm:$0xf0]  ;;  %v11084_v22 = vld [vmem:[#allocation7 + $0xf68] sm:$0xf] }
 0x3ba   : > { %v13448_v6 = vld [vmem:[#allocation10 + $0x1c0] sm:$0xff] }
 0x3bb   : > { %v13430_v2 = vadd.f32 %v5289_v31, %v5271_v30  ;;  %v6560_v40 = vpop.f32.mrf.mxu0  ;;  %v6579_v58 = vpop.f32.mrf.mxu1  ;;  %6936 = vmatpush.bf16.msra.mxu0 %v10689_v51  ;;  %6955 = vmatpush.bf16.msra.mxu1 %v10913_v49  ;;  %v12176_v49 = vld [vmem:[#allocation7 + $0x1258] sm:$0xf0] }
 0x3bc   : > { %v13432_v8 = vadd.f32 %v6579_v58, %v6560_v40  ;;  %v12095_v40 = vld [vmem:[#allocation7 + $0xfd4] sm:$0xf]  ;;  %v11134_v58 = vld [vmem:[#allocation7 + $0xfec] sm:$0xf0]  ;;  %6973 = vmatpush.bf16.msra.mxu2 %v11165_v52  ;;  %v11449_v52 = vor.u32 %v12176_v49, %v11448_v29 }
 0x3bd   : > { %15316 = vst [vmem:[#allocation44_spill] sm:$0xff] %v13430_v2  ;;  %6899 = vmatmul.bf16.vlgmr.msrb.gmra.mxu2 %v13339_v33  ;;  %11458 = vmatmul.msk.bf16.vlgmr.msrb.gmra.mxu3 %vm3203_vm5, %v13344_v3  ;;  %v11137_v55 = vor.u32 %v12095_v40, %v11134_v58  ;;  %v13454_v58 = vld [vmem:[#allocation10 + $0x380] sm:$0xff]  ;;  %v13470_v2 = vld [vmem:[#allocation10 + $0x310] sm:$0xff] }
 0x3be   : > { %7066 = vmatpush.bf16.msrb.mxu3 %v11449_v52  ;;  %v7659_v52 = vunpack.c.l.bf16 %v13448_v6 }
 0x3bf   : > { %7005 = vmatpush.bf16.msrb.mxu0 %v10889_v37  ;;  %7024 = vmatpush.bf16.msrb.mxu1 %v11113_v19  ;;  %v13450_v37 = vld [vmem:[#allocation10 + $0x70] sm:$0xff]  ;;  %v10832_v19 = vld [vmem:[#allocation7 + $0xd70] sm:$0xf] }
 0x3c0   : > { %v6596_v31 = vpop.f32.mrf.mxu2  ;;  %v6615_v30 = vpop.f32.mrf.mxu3  ;;  %6974 = vmatpush.bf16.msra.mxu2 %v11137_v55  ;;  %v12022_v55 = vld [vmem:[#allocation7 + $0xd88] sm:$0xf0] }
 0x3c1   : > { %v6597_v14 = vadd.f32 %v6596_v31, %v6578_v57  ;;  %v10861_v57 = vor.u32 %v12029_v4, %v10860_v61  ;;  %v13461_v61 = vld [vmem:[#allocation10 + $0x150] sm:$0xff]  ;;  %v10833_v4 = vor.u32 %v12022_v55, %v10832_v19 }
 0x3c3   : > { %v6616_v25 = vadd.f32 %v6615_v30, %v6597_v14  ;;  %v6563_v50 = vpop.f32.mrf.mxu0  ;;  %v6582_v32 = vpop.f32.mrf.mxu1  ;;  %v11085_v30 = vor.u32 %v12085_v28, %v11084_v22  ;;  %v11337_v14 = vor.u32 %v12148_v38, %v11336_v9  ;;  %7006 = vmatpush.bf16.msrb.mxu0 %v10861_v57  ;;  %v11056_v22 = vld [vmem:[#allocation7 + $0xf30] sm:$0xf]  ;;  %v12078_v57 = vld [vmem:[#allocation7 + $0xf48] sm:$0xf0]  ;;  %v11308_v28 = vld [vmem:[#allocation7 + $0x1128] sm:$0xf] }
 0x3c4   : > { %v13442_v51 = vadd.f32 %v6582_v32, %v6563_v50  ;;  %v13463_v9 = vld [vmem:[#allocation10 + $0x3f0] sm:$0xff]  ;;  %v11057_v49 = vor.u32 %v12078_v57, %v11056_v22  ;;  %v12134_v57 = vld [vmem:[#allocation7 + $0x1108] sm:$0xf0] }
 0x3c5   : > { %v7081_v31 = vadd.f32 %v6616_v25, %v13248_v27  ;;  %7043 = vmatpush.bf16.msrb.mxu2 %v11337_v14  ;;  %v13452_v27 = vld [vmem:[#allocation10] sm:$0xff]  ;;  %7025 = vmatpush.bf16.msrb.mxu1 %v11085_v30  ;;  %v13465_v38 = vld [vmem:[#allocation10 + $0x230] sm:$0xff]  ;;  %v12015_v30 = vld [vmem:[#allocation7 + $0xd50] sm:$0xf0]  ;;  %v8234_v5 = vunpack.c.l.bf16 %v13463_v9 }
 0x3c6   : > { %6866 = vmatmul.bf16.gmra.mxu0 %v13306_v48  ;;  %6885 = vmatmul.bf16.gmra.mxu1 %v13309_v60  ;;  %v13456_v25 = vld [vmem:[#allocation10 + $0xe0] sm:$0xff]  ;;  %v7774_v56 = vunpack.c.l.bf16 %v13465_v38 }
 0x3c7   : > { %v7125_v12 = vadd.f32 %v13440_v7, %v7081_v31  ;;  %7007 = vmatpush.bf16.msrb.mxu0 %v10833_v4  ;;  %v8119_v4 = vunpack.c.l.bf16 %v13454_v58 }
 0x3c8   : > { %v6598_v36 = vpop.f32.mrf.mxu2  ;;  %v6617_v40 = vpop.f32.mrf.mxu3 }
 0x3c9   : > { %v13458_v50 = vmax.f32 %v7125_v12, 0.0  ;;  %v6599_v32 = vadd.f32 %v6598_v36, %v13432_v8  ;;  %v12141_v12 = vld [vmem:[#allocation7 + $0x1140] sm:$0xf0]  ;;  %v10804_v8 = vld [vmem:[#allocation7 + $0xd38] sm:$0xf]  ;;  %v13468_v36 = vld [vmem:[#allocation10 + $0x2a0] sm:$0xff]  ;;  %7026 = vmatpush.bf16.msrb.mxu1 %v11057_v49 }
 0x3ca   : > { %v11309_v55 = vor.u32 %v12141_v12, %v11308_v28  ;;  %v10805_v15 = vor.u32 %v12015_v30, %v10804_v8  ;;  %v7429_v28 = vunpack.c.l.bf16 %v13456_v25  ;;  %v11421_v8 = vor.u32 %v12169_v0, %v11420_v47  ;;  %v13484_v30 = vld [vmem:[#allocation10 + $0x16c] sm:$0xff] }
 0x3cb   : > { %v6618_v31 = vadd.f32 %v6617_v40, %v6599_v32  ;;  %v6565_v14 = vpop.f32.mrf.mxu0  ;;  %v6584_v29 = vpop.f32.mrf.mxu1  ;;  %v11280_v40 = vld [vmem:[#allocation7 + $0x10f0] sm:$0xf]  ;;  %v7314_v32 = vunpack.c.l.bf16 %v13450_v37  ;;  %v13489_v49 = vmul.f32 %v7659_v52, %v13458_v50  ;;  %v13494_v0 = vld [vmem:[#allocation10 + $0x24c] sm:$0xff]  ;;  %v12008_v52 = vld [vmem:[#allocation7 + $0xd18] sm:$0xf0] }
 0x3cc   : > { %v13472_v19 = vadd.f32 %v6584_v29, %v6565_v14  ;;  %v7197_v14 = vunpack.c.l.bf16 %v13452_v27  ;;  %7044 = vmatpush.bf16.msrb.mxu2 %v11309_v55  ;;  %v11029_v29 = vor.u32 %v12071_v21, %v11028_v16  ;;  %v11281_v12 = vor.u32 %v12134_v57, %v11280_v40  ;;  %7008 = vmatpush.bf16.msrb.mxu0 %v10805_v15  ;;  %v13496_v47 = vld [vmem:[#allocation10 + $0x8c] sm:$0xff]  ;;  %v13499_v55 = vld [vmem:[#allocation10 + $0x2bc] sm:$0xff]  ;;  %v10776_v57 = vld [vmem:[#allocation7 + $0xd00] sm:$0xf] }
 0x3cd   : > { %v7088_v22 = vadd.f32 %v6618_v31, %v13253_v43  ;;  %6904 = vmatmul.bf16.gmra.mxu2 %v13325_v13  ;;  %11459 = vmatmul.msk.bf16.gmra.mxu3 %vm3203_vm5, %v13330_v42  ;;  %v7544_v43 = vunpack.c.l.bf16 %v13461_v61  ;;  %v13492_v21 = vmul.f32 %v7314_v32, %v13458_v50  ;;  %v7889_v16 = vunpack.c.l.bf16 %v13468_v36 }
 0x3ce   : > { %7067 = vmatpush.bf16.msrb.mxu3 %v11421_v8  ;;  %v8004_v40 = vunpack.c.l.bf16 %v13470_v2  ;;  %v13506_v8 = vmul.f32 %v7197_v14, %v13458_v50  ;;  %v13509_v32 = vmul.f32 %v8119_v4, %v13458_v50  ;;  %7027 = vmatpush.bf16.msrb.mxu1 %v11029_v29  ;;  %v10777_v41 = vor.u32 %v12008_v52, %v10776_v57  ;;  %v13522_v4 = vld [vmem:[#allocation10 + $0x39c] sm:$0xff]  ;;  %v12127_v29 = vld [vmem:[#allocation7 + $0x10d0] sm:$0xf0] }
 0x3cf   : > { %v7132_v31 = vadd.f32 %v13440_v7, %v7088_v22  ;;  %v7551_v14 = vunpack.c.l.bf16 %v13484_v30  ;;  %15321 = vst [vmem:[#allocation49_spill] sm:$0xff] %v13522_v4  ;;  %v12001_v57 = vld [vmem:[#allocation7 + $0xce0] sm:$0xf0]  ;;  %v13525_v52 = vmul.f32 %v8234_v5, %v13458_v50  ;;  %v13533_v5 = vmul.f32 %v7774_v56, %v13458_v50 }
 0x3d0   : > { %v6601_v59 = vpop.f32.mrf.mxu2  ;;  %v6620_v34 = vpop.f32.mrf.mxu3  ;;  %15317 = vst [vmem:[#allocation45_spill] sm:$0xff] %v13509_v32  ;;  %7045 = vmatpush.bf16.msrb.mxu2 %v11281_v12  ;;  %v10748_v12 = vld [vmem:[#allocation7 + $0xcc8] sm:$0xf]  ;;  %7009 = vmatpush.bf16.msrb.mxu0 %v10777_v41  ;;  %v12162_v32 = vld [vmem:[#allocation7 + $0x11e8] sm:$0xf0] }
 0x3d1   : > { %v13502_v22 = vmax.f32 %v7132_v31, 0.0  ;;  %v6602_v15 = vadd.f32 %v6601_v59, %v13442_v51  ;;  %v12064_v31 = vld [vmem:[#allocation7 + $0xed8] sm:$0xf0]  ;;  %v13516_v59 = vmul.f32 %v7429_v28, %v13458_v50  ;;  %v13519_v51 = vmul.f32 %v7544_v43, %v13458_v50  ;;  %15322 = vst [vmem:[#allocation50_spill] sm:$0xff] %v13525_v52  ;;  %v13546_v41 = vld [vmem:[#allocation10 + $0x1c] sm:$0xff] }
 0x3d2   : > { %v11001_v23 = vor.u32 %v12064_v31, %v11000_v45  ;;  %v7781_v28 = vunpack.c.l.bf16 %v13494_v0  ;;  %v11253_v43 = vor.u32 %v12127_v29, %v11252_v44  ;;  %v10749_v53 = vor.u32 %v12001_v57, %v10748_v12  ;;  %v11392_v31 = vld [vmem:[#allocation7 + $0x11d0] sm:$0xf]  ;;  %15323 = vst [vmem:[#allocation51_spill] sm:$0xff] %v13533_v5  ;;  %v13550_v57 = vld [vmem:[#allocation10 + $0x38] sm:$0xff]  ;;  %v12155_v5 = vld [vmem:[#allocation7 + $0x11b0] sm:$0xf0] }
 0x3d3   : > { %15319 = vst [vmem:[#allocation47_spill] sm:$0xff] %v13516_v59  ;;  %v6621_v46 = vadd.f32 %v6620_v34, %v6602_v15  ;;  %v6634_v54 = vpop.f32.mrf.mxu0  ;;  %v6653_v17 = vpop.f32.mrf.mxu1  ;;  %v11224_v59 = vld [vmem:[#allocation7 + $0x1080] sm:$0xf]  ;;  %v7321_v34 = vunpack.c.l.bf16 %v13496_v47  ;;  %v12120_v15 = vld [vmem:[#allocation7 + $0x1098] sm:$0xf0]  ;;  %v13536_v52 = vmul.f32 %v7889_v16, %v13458_v50  ;;  %v7666_v44 = vunpack.c.l.bf16 %v13511_v62 }
 0x3d4   : > { %15320 = vst [vmem:[#allocation48_spill] sm:$0xff] %v13519_v51  ;;  %v13528_v20 = vadd.f32 %v6653_v17, %v6634_v54  ;;  %v12057_v51 = vld [vmem:[#allocation7 + $0xea0] sm:$0xf0]  ;;  %v7896_v17 = vunpack.c.l.bf16 %v13499_v55  ;;  %v11393_v54 = vor.u32 %v12162_v32, %v11392_v31  ;;  %7028 = vmatpush.bf16.msrb.mxu1 %v11001_v23  ;;  %7046 = vmatpush.bf16.msrb.mxu2 %v11253_v43  ;;  %v8126_v12 = vunpack.c.l.bf16 %v13522_v4 }
 0x3d5   : > { %v7095_v45 = vadd.f32 %v6621_v46, %v13259_v1  ;;  %15324 = vst [vmem:[#allocation52_spill] sm:$0xff] %v13536_v52  ;;  %v13543_v1 = vmul.f32 %v8004_v40, %v13458_v50  ;;  %v8011_v46 = vunpack.c.l.bf16 %v13513_v63  ;;  %v10973_v16 = vor.u32 %v12057_v51, %v10972_v10  ;;  %v13552_v32 = vld [vmem:[#allocation10 + $0xfc] sm:$0xff]  ;;  %7010 = vmatpush.bf16.msrb.mxu0 %v10749_v53  ;;  %v13563_v10 = vld [vmem:[#allocation10 + $0x188] sm:$0xff] }
 0x3d6   : > { %6937 = vmatmul.bf16.vlgmr.msra.gmra.mxu0 %v13318_v24  ;;  %6956 = vmatmul.bf16.vlgmr.msra.gmra.mxu1 %v13322_v11  ;;  %15326 = vst [vmem:[#allocation54_spill] sm:$0xff] %v13546_v41  ;;  %v11225_v29 = vor.u32 %v12120_v15, %v11224_v59  ;;  %v13555_v50 = vmul.f32 %v7551_v14, %v13502_v22  ;;  %v13565_v59 = vld [vmem:[#allocation10 + $0x118] sm:$0xff]  ;;  %v11994_v15 = vld [vmem:[#allocation7 + $0xca8] sm:$0xf0]  ;;  %v11987_v63 = vld [vmem:[#allocation7 + $0xc70] sm:$0xf0] }
 0x3d7   : > { %15325 = vst [vmem:[#allocation53_spill] sm:$0xff] %v13543_v1  ;;  %v7139_v56 = vadd.f32 %v13440_v7, %v7095_v45  ;;  %7068 = vmatpush.bf16.msrb.mxu3 %v11393_v54  ;;  %v13558_v40 = vmul.f32 %v7781_v28, %v13502_v22  ;;  %v13561_v23 = vmul.f32 %v7321_v34, %v13502_v22  ;;  %v13567_v51 = vld [vmem:[#allocation10 + $0x1f8] sm:$0xff]  ;;  %v10720_v45 = vld [vmem:[#allocation7 + $0xc90] sm:$0xf]  ;;  %v7204_v28 = vunpack.c.l.bf16 %v13546_v41  ;;  %v13576_v54 = vld [vmem:[#allocation10 + $0x40c] sm:$0xff] }
 0x3d8   : > { %15327 = vst [vmem:[#allocation55_spill] sm:$0xff] %v13550_v57  ;;  %v6603_v31 = vpop.f32.mrf.mxu2  ;;  %v6622_v11 = vpop.f32.mrf.mxu3  ;;  %v13573_v14 = vmul.f32 %v7896_v17, %v13502_v22  ;;  %v13578_v34 = vld [vmem:[#allocation10 + $0x348] sm:$0xff]  ;;  %v10721_v24 = vor.u32 %v11994_v15, %v10720_v45  ;;  %7029 = vmatpush.bf16.msrb.mxu1 %v10973_v16  ;;  %7047 = vmatpush.bf16.msrb.mxu2 %v11225_v29  ;;  %v12113_v45 = vld [vmem:[#allocation7 + $0x1060] sm:$0xf0]  ;;  %v10692_v15 = vld [vmem:[#allocation7 + $0xc58] sm:$0xf] }
 0x3d9   : > { %15328 = vst [vmem:[#allocation56_spill] sm:$0xff] %v13552_v32  ;;  %v13569_v43 = vmax.f32 %v7139_v56, 0.0  ;;  %v6604_v53 = vadd.f32 %v6603_v31, %v13472_v19  ;;  %v13581_v56 = vmul.f32 %v7666_v44, %v13502_v22  ;;  %v13584_v19 = vmul.f32 %v8011_v46, %v13502_v22  ;;  %v13587_v17 = vld [vmem:[#allocation10 + $0x268] sm:$0xff] }
 0x3da   : > { %15329 = vst [vmem:[#allocation57_spill] sm:$0xff] %v13555_v50  ;;  %v11196_v50 = vld [vmem:[#allocation7 + $0x1048] sm:$0xf]  ;;  %v7436_v31 = vunpack.c.l.bf16 %v13552_v32  ;;  %v13590_v52 = vmul.f32 %v8126_v12, %v13502_v22  ;;  %v7211_v44 = vunpack.c.l.bf16 %v13550_v57  ;;  %v13593_v46 = vld [vmem:[#allocation10 + $0xa8] sm:$0xff]  ;;  %v13597_v32 = vld [vmem:[#allocation10 + $0x2d8] sm:$0xff]  ;;  %7011 = vmatpush.bf16.msrb.mxu0 %v10721_v24  ;;  %v10693_v29 = vor.u32 %v11987_v63, %v10692_v15 }
 0x3db   : > { %15330 = vst [vmem:[#allocation58_spill] sm:$0xff] %v13558_v40  ;;  %v12050_v40 = vld [vmem:[#allocation7 + $0xe68] sm:$0xf0]  ;;  %v6636_v41 = vpop.f32.mrf.mxu0  ;;  %v6655_v1 = vpop.f32.mrf.mxu1  ;;  %v11197_v16 = vor.u32 %v12113_v45, %v11196_v50  ;;  %v11364_v57 = vld [vmem:[#allocation7 + $0x1198] sm:$0xf]  ;;  %v7443_v24 = vunpack.c.l.bf16 %v13565_v59  ;;  %v7673_v63 = vunpack.c.l.bf16 %v13567_v51 }
 0x3dc   : > { %15331 = vst [vmem:[#allocation59_spill] sm:$0xff] %v13561_v23  ;;  %v10944_v23 = vld [vmem:[#allocation7 + $0xe50] sm:$0xf]  ;;  %v13612_v50 = vmul.f32 %v7436_v31, %v13502_v22 }
 0x3dd   : > { %15332 = vst [vmem:[#allocation60_spill] sm:$0xff] %v13567_v51  ;;  %v10945_v4 = vor.u32 %v12050_v40, %v10944_v23  ;;  %v10916_v40 = vld [vmem:[#allocation7 + $0xe18] sm:$0xf]  ;;  %v12043_v23 = vld [vmem:[#allocation7 + $0xe30] sm:$0xf0]  ;;  %6975 = vmatmul.bf16.vlgmr.msra.gmra.mxu2 %v13339_v33  ;;  %11460 = vmatmul.msk.bf16.vlgmr.msra.gmra.mxu3 %vm3203_vm5, %v13344_v3 }
 0x3de   : > { %15333 = vst [vmem:[#allocation61_spill] sm:$0xff] %v13569_v43  ;;  %7048 = vmatpush.bf16.msrb.mxu2 %v11197_v16  ;;  %v10917_v15 = vor.u32 %v12043_v23, %v10916_v40  ;;  %v13618_v33 = vld [vmem:[#allocation10 + $0x54] sm:$0x11]  ;;  %7012 = vmatpush.bf16.msrb.mxu0 %v10693_v29  ;;  %v12099_v16 = vld [vmem:[#allocation7 + $0xff0] sm:$0xf0]  ;;  %v13631_v23 = vmul.f32 %v7443_v24, %v13569_v43 }
 0x3df   : > { %15334 = vst [vmem:[#allocation62_spill] sm:$0xff] %v13573_v14  ;;  %v6623_v14 = vadd.f32 %v6622_v11, %v6604_v53  ;;  %v13599_v11 = vadd.f32 %v6655_v1, %v6636_v41  ;;  %v11168_v53 = vld [vmem:[#allocation7 + $0x1010] sm:$0xf]  ;;  %v13607_v1 = vmul.f32 %v7204_v28, %v13502_v22  ;;  %v11365_v41 = vor.u32 %v12155_v5, %v11364_v57 }
 0x3e0   : > { %15335 = vst [vmem:[#allocation63_spill] sm:$0xff] %v13581_v56  ;;  %v7558_v56 = vunpack.c.l.bf16 %v13563_v10  ;;  %7030 = vmatpush.bf16.msrb.mxu1 %v10945_v4  ;;  %v7788_v28 = vunpack.c.l.bf16 %v13587_v17  ;;  %v6691_v51 = vpop.f32.mrf.mxu3  ;;  %v13621_v5 = vmul.f32 %v7211_v44, %v13569_v43  ;;  %v7328_v57 = vunpack.c.l.bf16 %v13593_v46 }
 0x3e1   : > { %15336 = vst [vmem:[#allocation64_spill] sm:$0xff] %v13584_v19  ;;  %v13595_v19 = vld [vmem:[#allocation10 + $0x3b8] sm:$0xff]  ;;  %v7102_v12 = vadd.f32 %v6623_v14, %v13264_v35  ;;  %v8241_v35 = vunpack.c.l.bf16 %v13576_v54  ;;  %v8018_v14 = vunpack.c.l.bf16 %v13578_v34  ;;  %7069 = vmatpush.bf16.msrb.mxu3 %v11365_v41  ;;  %v13634_v29 = vmul.f32 %v7673_v63, %v13569_v43 }
 0x3e2   : > { %15337 = vst [vmem:[#allocation65_spill] sm:$0xff] %v13590_v52  ;;  %v12106_v52 = vld [vmem:[#allocation7 + $0x1028] sm:$0xf0]  ;;  %v8133_v31 = vunpack.c.l.bf16 %v13595_v19  ;;  %v13628_v40 = vmul.f32 %v7558_v56, %v13569_v43  ;;  %v13648_v41 = vperm.slane %v13437_v18, 1 }
 0x3e3   : > { %15338 = vst [vmem:[#allocation66_spill] sm:$0xff] %v13597_v32  ;;  %v7146_v45 = vadd.f32 %v13440_v7, %v7102_v12  ;;  %v11169_v3 = vor.u32 %v12106_v52, %v11168_v53  ;;  %v7903_v7 = vunpack.c.l.bf16 %v13597_v32  ;;  %v11140_v52 = vld [vmem:[#allocation7 + $0xfd8] sm:$0xf]  ;;  %v13639_v53 = vmul.f32 %v8241_v35, %v13502_v22  ;;  %v6639_v24 = vpop.f32.mrf.mxu0  ;;  %v6658_v32 = vpop.f32.mrf.mxu1 }
 0x3e4   : > { %15339 = vst [vmem:[#allocation67_spill] sm:$0xff] %v13607_v1  ;;  %v6672_v1 = vpop.f32.mrf.mxu2  ;;  %v13642_v12 = vmul.f32 %v8018_v14, %v13569_v43  ;;  %7031 = vmatpush.bf16.msrb.mxu1 %v10917_v15  ;;  %v11141_v63 = vor.u32 %v12099_v16, %v11140_v52  ;;  %v13653_v22 = vadd.f32 %v6658_v32, %v6639_v24  ;;  %v7660_v15 = vunpack.c.h.bf16 %v13448_v6 }
 0x3e5   : > { %15340 = vst [vmem:[#allocation68_spill] sm:$0xff] %v13618_v33  ;;  %v6673_v4 = vadd.f32 %v6672_v1, %v13528_v20  ;;  %v13636_v44 = vmax.f32 %v7146_v45, 0.0  ;;  %v7218_v20 = vunpack.c.l.bf16 %v13618_v33  ;;  %v13645_v1 = vld [vmem:[#allocation10 + $0x1a4] sm:$0x11]  ;;  %7049 = vmatpush.bf16.msrb.mxu2 %v11169_v3  ;;  %v13651_v45 = vmul.f32 %v7788_v28, %v13569_v43 }
 0x3e6   : > { %v13656_v35 = vmul.f32 %v7328_v57, %v13569_v43  ;;  %v13659_v14 = vmul.f32 %v8133_v31, %v13569_v43  ;;  %v13666_v33 = vld [vmem:[#allocation10 + $0xc4] sm:$0x11]  ;;  %v7565_v32 = vunpack.c.l.bf16 %v13645_v1  ;;  %6942 = vmatmul.bf16.gmra.mxu0 %v13306_v48  ;;  %6961 = vmatmul.bf16.gmra.mxu1 %v13309_v60  ;;  %v7315_v28 = vunpack.c.h.bf16 %v13450_v37 }
 0x3e7   : > { %15341 = vst [vmem:[#allocation69_spill] sm:$0xff] %v13636_v44  ;;  %v6692_v56 = vadd.f32 %v6691_v51, %v6673_v4  ;;  %v13662_v51 = vmul.f32 %v7903_v7, %v13569_v43  ;;  %v13664_v4 = vld [vmem:[#allocation10 + $0x134] sm:$0x11]  ;;  %v7198_v57 = vunpack.c.h.bf16 %v13452_v27  ;;  %v8120_v31 = vunpack.c.h.bf16 %v13454_v58 }
 0x3e8   : > { %15343 = vst [vmem:[#allocation71_spill] sm:$0xff] %v13664_v4  ;;  %v7246_v7 = vmul.f32 %v7218_v20, %v13636_v44  ;;  %v7450_v6 = vunpack.c.l.bf16 %v13664_v4  ;;  %v7335_v16 = vunpack.c.l.bf16 %v13666_v33  ;;  %v6693_v24 = vpop.f32.mrf.mxu3  ;;  %v13682_v43 = vperm.slane %v13437_v18, 2 }
 0x3e9   : > { %15342 = vst [vmem:[#allocation70_spill] sm:$0xff] %v13662_v51  ;;  %v7082_v3 = vadd.f32 %v6692_v56, %v13270_v39  ;;  %7050 = vmatpush.bf16.msrb.mxu2 %v11141_v63  ;;  %v7430_v39 = vunpack.c.h.bf16 %v13456_v25  ;;  %v7545_v37 = vunpack.c.h.bf16 %v13461_v61  ;;  %v8235_v27 = vunpack.c.h.bf16 %v13463_v9 }
 0x3ea   : > { %15344 = vst [vmem:[#allocation72_spill] sm:$0xff] %v13666_v33  ;;  %v7775_v58 = vunpack.c.h.bf16 %v13465_v38  ;;  %v7890_v25 = vunpack.c.h.bf16 %v13468_v36  ;;  %v13691_v33 = vsel %vm7280_vm6, %v7246_v7, 0.0  ;;  %v13694_v4 = vmul.f32 %v7565_v32, %v13636_v44 }
 0x3eb   : > { %v7126_v52 = vadd.f32 %v13648_v41, %v7082_v3  ;;  %15345 = vst [vmem:[#allocation73_spill] sm:$0xff] %v13682_v43  ;;  %v8005_v3 = vunpack.c.h.bf16 %v13470_v2  ;;  %v13697_v51 = vmul.f32 %v7450_v6, %v13636_v44  ;;  %v13700_v61 = vmul.f32 %v7335_v16, %v13636_v44  ;;  %v6641_v38 = vpop.f32.mrf.mxu0 }
 0x3ec   : > { %v6674_v56 = vpop.f32.mrf.mxu2  ;;  %15346 = vst [vmem:[#allocation74_spill] sm:$0xff] %v13691_v33 }
 0x3ed   : > { %v7154_v20 = vmax.f32 %v7126_v52, 0.0  ;;  %v6675_v63 = vadd.f32 %v6674_v56, %v13599_v11  ;;  %v6660_v52 = vpop.f32.mrf.mxu1  ;;  %6980 = vmatmul.bf16.gmra.mxu2 %v13325_v13  ;;  %11461 = vmatmul.msk.bf16.gmra.mxu3 %vm3203_vm5, %v13330_v42 }
 0x3ee   : > { %v13702_v43 = vadd.f32 %v6660_v52, %v6641_v38 }
 0x3ef   : > { %v6694_v9 = vadd.f32 %v6693_v24, %v6675_v63  ;;  %v7688_v11 = vmul.f32 %v7660_v15, %v7154_v20  ;;  %v7343_v56 = vmul.f32 %v7315_v28, %v7154_v20  ;;  %v7226_v36 = vmul.f32 %v7198_v57, %v7154_v20  ;;  %v15347_v57 = vld [vmem:[#allocation45_spill] sm:$0xff]  ;;  %v15349_v24 = vld [vmem:[#allocation48_spill] sm:$0xff] }
 0x3f0   : > { %v8148_v2 = vmul.f32 %v8120_v31, %v7154_v20  ;;  %v7458_v7 = vmul.f32 %v7430_v39, %v7154_v20  ;;  %v7573_v33 = vmul.f32 %v7545_v37, %v7154_v20  ;;  %v7552_v15 = vunpack.c.h.bf16 %v13484_v30  ;;  %v6696_v30 = vpop.f32.mrf.mxu3 }
 0x3f1   : > { %v7089_v32 = vadd.f32 %v6694_v9, %v13275_v26  ;;  %v13709_v6 = vadd.f32 %v7688_v11, %v13489_v49  ;;  %v13712_v16 = vadd.f32 %v7343_v56, %v13492_v21  ;;  %v13716_v28 = vadd.f32 %v7226_v36, %v13506_v8  ;;  %v15348_v26 = vld [vmem:[#allocation47_spill] sm:$0xff] }
 0x3f2   : > { %v13719_v31 = vadd.f32 %v8148_v2, %v15347_v57  ;;  %v13722_v39 = vadd.f32 %v7458_v7, %v15348_v26  ;;  %v13725_v37 = vadd.f32 %v7573_v33, %v15349_v24  ;;  %v8263_v63 = vmul.f32 %v8235_v27, %v7154_v20  ;;  %v15351_v33 = vld [vmem:[#allocation50_spill] sm:$0xff] }
 0x3f3   : > { %v7133_v49 = vadd.f32 %v13648_v41, %v7089_v32  ;;  %v7803_v9 = vmul.f32 %v7775_v58, %v7154_v20  ;;  %v7782_v21 = vunpack.c.h.bf16 %v13494_v0  ;;  %v7322_v8 = vunpack.c.h.bf16 %v13496_v47  ;;  %v15352_v32 = vld [vmem:[#allocation51_spill] sm:$0xff]  ;;  %v15353_v58 = vld [vmem:[#allocation52_spill] sm:$0xff]  ;;  %v15354_v26 = vld [vmem:[#allocation46_spill] sm:$0xff]  ;;  %v6710_v44 = vpop.f32.mrf.mxu0 }
 0x3f4   : > { %15350 = vst [vmem:[#allocation45_spill] sm:$0xff] %v13725_v37  ;;  %v6677_v38 = vpop.f32.mrf.mxu2  ;;  %v7918_v52 = vmul.f32 %v7890_v25, %v7154_v20  ;;  %v7897_v11 = vunpack.c.h.bf16 %v13499_v55  ;;  %v7667_v56 = vunpack.c.h.bf16 %v13511_v62  ;;  %v13734_v7 = vadd.f32 %v8263_v63, %v15351_v33  ;;  %v15355_v25 = vld [vmem:[#allocation49_spill] sm:$0xff] }
 0x3f5   : > { %v7161_v36 = vmax.f32 %v7133_v49, 0.0  ;;  %v6678_v2 = vadd.f32 %v6677_v38, %v13653_v22  ;;  %v13737_v27 = vadd.f32 %v7803_v9, %v15352_v32  ;;  %v8033_v57 = vmul.f32 %v8005_v3, %v7154_v20  ;;  %v6729_v62 = vpop.f32.mrf.mxu1  ;;  %v15356_v9 = vld [vmem:[#allocation53_spill] sm:$0xff] }
 0x3f6   : > { %v13740_v0 = vadd.f32 %v7918_v52, %v15353_v58  ;;  %v8012_v47 = vunpack.c.h.bf16 %v15354_v26  ;;  %v8127_v24 = vunpack.c.h.bf16 %v15355_v25  ;;  %v13744_v38 = vadd.f32 %v6729_v62, %v6710_v44  ;;  %v15357_v52 = vld [vmem:[#allocation19_spill] sm:$0xff]  ;;  %v15358_v20 = vld [vmem:[#allocation57_spill] sm:$0xff]  ;;  %v15359_v26 = vld [vmem:[#allocation58_spill] sm:$0xff] }
 0x3f7   : > { %v6697_v55 = vadd.f32 %v6696_v30, %v6678_v2  ;;  %v7580_v49 = vmul.f32 %v7552_v15, %v7161_v36  ;;  %v7810_v37 = vmul.f32 %v7782_v21, %v7161_v36  ;;  %v7350_v22 = vmul.f32 %v7322_v8, %v7161_v36  ;;  %v15360_v30 = vld [vmem:[#allocation59_spill] sm:$0xff]  ;;  %v15361_v15 = vld [vmem:[#allocation24_spill] sm:$0xff]  ;;  %v15362_v44 = vld [vmem:[#allocation25_spill] sm:$0xff] }
 0x3f8   : > { %v7925_v63 = vmul.f32 %v7897_v11, %v7161_v36  ;;  %v7695_v33 = vmul.f32 %v7667_v56, %v7161_v36  ;;  %v13747_v32 = vadd.f32 %v8033_v57, %v15356_v9  ;;  %7013 = vmatmul.bf16.vlgmr.msrb.gmra.mxu0 %v15361_v15  ;;  %7032 = vmatmul.bf16.vlgmr.msrb.gmra.mxu1 %v15362_v44  ;;  %v15363_v21 = vld [vmem:[#allocation62_spill] sm:$0xff]  ;;  %v15365_v11 = vld [vmem:[#allocation63_spill] sm:$0xff]  ;;  %v15370_v44 = vld [vmem:[#allocation56_spill] sm:$0xff] }
 0x3f9   : > { %v7096_v58 = vadd.f32 %v6697_v55, %v15357_v52  ;;  %v13751_v3 = vadd.f32 %v7580_v49, %v15358_v20  ;;  %v13754_v25 = vadd.f32 %v7810_v37, %v15359_v26  ;;  %v13757_v2 = vadd.f32 %v7350_v22, %v15360_v30  ;;  %v15367_v55 = vld [vmem:[#allocation54_spill] sm:$0xff]  ;;  %v15368_v9 = vld [vmem:[#allocation55_spill] sm:$0xff]  ;;  %v6698_v26 = vpop.f32.mrf.mxu3  ;;  %v15369_v30 = vld [vmem:[#allocation64_spill] sm:$0xff] }
 0x3fa   : > { %v13762_v8 = vadd.f32 %v7925_v63, %v15363_v21  ;;  %v13765_v56 = vadd.f32 %v7695_v33, %v15365_v11  ;;  %v8040_v57 = vmul.f32 %v8012_v47, %v7161_v36  ;;  %v7205_v62 = vunpack.c.h.bf16 %v15367_v55  ;;  %v15373_v55 = vld [vmem:[#allocation60_spill] sm:$0xff] }
 0x3fb   : > { %v7140_v49 = vadd.f32 %v13648_v41, %v7096_v58  ;;  %v8155_v37 = vmul.f32 %v8127_v24, %v7161_v36  ;;  %v7212_v52 = vunpack.c.h.bf16 %v15368_v9  ;;  %v7559_v22 = vunpack.c.h.bf16 %v13563_v10  ;;  %v15372_v58 = vld [vmem:[#allocation65_spill] sm:$0xff]  ;;  %v15374_v10 = vld [vmem:[#allocation67_spill] sm:$0xff] }
 0x3fc   : > { %15364 = vst [vmem:[#allocation47_spill] sm:$0xff] %v13762_v8  ;;  %v6679_v20 = vpop.f32.mrf.mxu2  ;;  %v13772_v15 = vadd.f32 %v8040_v57, %v15369_v30  ;;  %v7233_v63 = vmul.f32 %v7205_v62, %v7161_v36  ;;  %v7437_v21 = vunpack.c.h.bf16 %v15370_v44  ;;  %v7444_v33 = vunpack.c.h.bf16 %v13565_v59  ;;  %v6712_v44 = vpop.f32.mrf.mxu0 }
 0x3fd   : > { %15366 = vst [vmem:[#allocation48_spill] sm:$0xff] %v13765_v56  ;;  %v13776_v47 = vmax.f32 %v7140_v49, 0.0  ;;  %v6680_v11 = vadd.f32 %v6679_v20, %v13702_v43  ;;  %v13780_v24 = vadd.f32 %v8155_v37, %v15372_v58  ;;  %v7674_v9 = vunpack.c.h.bf16 %v15373_v55  ;;  %v6731_v59 = vpop.f32.mrf.mxu1 }
 0x3fe   : > { %v13784_v56 = vadd.f32 %v7233_v63, %v15374_v10  ;;  %v7465_v8 = vmul.f32 %v7437_v21, %v7161_v36  ;;  %v8242_v57 = vunpack.c.h.bf16 %v13576_v54  ;;  %v8019_v62 = vunpack.c.h.bf16 %v13578_v34  ;;  %v15375_v54 = vld [vmem:[#allocation20_spill] sm:$0xff]  ;;  %v15376_v34 = vld [vmem:[#allocation27_spill] sm:$0xff] }
 0x3ff   : > { %15371 = vst [vmem:[#allocation50_spill] sm:$0xff] %v13776_v47  ;;  %v6699_v30 = vadd.f32 %v6698_v26, %v6680_v11  ;;  %v7240_v49 = vmul.f32 %v7212_v52, %v13776_v47  ;;  %v7587_v43 = vmul.f32 %v7559_v22, %v13776_v47  ;;  %v7472_v37 = vmul.f32 %v7444_v33, %v13776_v47  ;;  %v15377_v26 = vld [vmem:[#allocation28_spill] sm:$0xff] }
 0x400   : > { %v13791_v20 = vadd.f32 %v6731_v59, %v6712_v44  ;;  %v13794_v58 = vadd.f32 %v7465_v8, %v13612_v50  ;;  %v7702_v63 = vmul.f32 %v7674_v9, %v13776_v47  ;;  %v8270_v21 = vmul.f32 %v8242_v57, %v7161_v36  ;;  %7051 = vmatmul.bf16.vlgmr.msrb.gmra.mxu2 %v15376_v34  ;;  %v15379_v44 = vld [vmem:[#allocation68_spill] sm:$0xff] }
 0x401   : > { %v7103_v55 = vadd.f32 %v6699_v30, %v15375_v54  ;;  %11462 = vmatmul.msk.bf16.vlgmr.msrb.gmra.mxu3 %vm3203_vm5, %v15377_v26  ;;  %v13802_v52 = vadd.f32 %v7240_v49, %v13621_v5  ;;  %v13805_v22 = vadd.f32 %v7587_v43, %v13628_v40  ;;  %v7789_v33 = vunpack.c.h.bf16 %v13587_v17  ;;  %v6767_v57 = vpop.f32.mrf.mxu3  ;;  %v13836_v49 = vld [vmem:[#allocation10 + $0x1c8] sm:$0xff] }
 0x402   : > { %v13809_v50 = vadd.f32 %v7472_v37, %v13631_v23  ;;  %v13812_v36 = vadd.f32 %v7702_v63, %v13634_v29  ;;  %v13815_v8 = vadd.f32 %v8270_v21, %v13639_v53  ;;  %v8047_v11 = vmul.f32 %v8019_v62, %v13776_v47  ;;  %v15378_v29 = vld [vmem:[#allocation66_spill] sm:$0xff]  ;;  %v13840_v43 = vld [vmem:[#allocation10 + $0x8] sm:$0xff] }
 0x403   : > { %v7147_v9 = vadd.f32 %v13648_v41, %v7103_v55  ;;  %v7817_v5 = vmul.f32 %v7789_v33, %v13776_v47  ;;  %v7329_v40 = vunpack.c.h.bf16 %v13593_v46  ;;  %v8134_v10 = vunpack.c.h.bf16 %v13595_v19  ;;  %v13851_v34 = vld [vmem:[#allocation10 + $0x388] sm:$0xff]  ;;  %v13855_v33 = vld [vmem:[#allocation10 + $0x158] sm:$0xff] }
 0x404   : > { %v6748_v17 = vpop.f32.mrf.mxu2  ;;  %v13823_v23 = vadd.f32 %v8047_v11, %v13642_v12  ;;  %v7904_v30 = vunpack.c.h.bf16 %v15378_v29  ;;  %v7219_v53 = vunpack.c.h.bf16 %v15379_v44  ;;  %v7627_v62 = vsel %vm7280_vm6, %v13694_v4, 0.0  ;;  %v13838_v12 = vld [vmem:[#allocation10 + $0x78] sm:$0xff]  ;;  %v6715_v21 = vpop.f32.mrf.mxu0  ;;  %15382 = vst [vmem:[#allocation46_spill] sm:$0xff] %v13851_v34  ;;  %v13853_v26 = vld [vmem:[#allocation10 + $0xe8] sm:$0xff] }
 0x405   : > { %v13829_v59 = vmax.f32 %v7147_v9, 0.0  ;;  %v6749_v41 = vadd.f32 %v6748_v17, %v13744_v38  ;;  %v13833_v46 = vadd.f32 %v7817_v5, %v13651_v45  ;;  %v7566_v19 = vunpack.c.h.bf16 %v13645_v1  ;;  %v6734_v54 = vpop.f32.mrf.mxu1  ;;  %15383 = vst [vmem:[#allocation49_spill] sm:$0xff] %v13853_v26  ;;  %v13868_v17 = vld [vmem:[#allocation10 + $0x238] sm:$0xff] }
 0x406   : > { %v7357_v37 = vmul.f32 %v7329_v40, %v13776_v47  ;;  %v8162_v63 = vmul.f32 %v8134_v10, %v13776_v47  ;;  %v7932_v4 = vmul.f32 %v7904_v30, %v13776_v47  ;;  %v13847_v38 = vsel %vm7280_vm6, %v13697_v51, 0.0  ;;  %15384 = vst [vmem:[#allocation53_spill] sm:$0xff] %v13855_v33  ;;  %v13866_v10 = vld [vmem:[#allocation10 + $0x3f8] sm:$0xff] }
 0x407   : > { %15380 = vst [vmem:[#allocation51_spill] sm:$0xff] %v13829_v59  ;;  %v6768_v45 = vadd.f32 %v6767_v57, %v6749_v41  ;;  %v7661_v1 = vunpack.c.l.bf16 %v13836_v49  ;;  %v7316_v55 = vunpack.c.l.bf16 %v13838_v12  ;;  %v13859_v11 = vsel %vm7280_vm6, %v13700_v61, 0.0  ;;  %v13870_v57 = vld [vmem:[#allocation10 + $0x2a8] sm:$0xff]  ;;  %v15389_v29 = vld [vmem:[#allocation21_spill] sm:$0xff] }
 0x408   : > { %15381 = vst [vmem:[#allocation52_spill] sm:$0xff] %v13847_v38  ;;  %v13861_v9 = vadd.f32 %v6734_v54, %v6715_v21  ;;  %v7199_v51 = vunpack.c.l.bf16 %v13840_v43  ;;  %v8121_v5 = vunpack.c.l.bf16 %v13851_v34  ;;  %v7431_v40 = vunpack.c.l.bf16 %v13853_v26  ;;  %v13878_v21 = vld [vmem:[#allocation10 + $0x318] sm:$0xff]  ;;  %7018 = vmatmul.bf16.gmra.mxu0 %v13306_v48  ;;  %7037 = vmatmul.bf16.gmra.mxu1 %v13309_v60 }
 0x409   : > { %15385 = vst [vmem:[#allocation19_spill] sm:$0xff] %v13859_v11  ;;  %v7083_v30 = vadd.f32 %v6768_v45, %v15389_v29  ;;  %v13874_v44 = vperm.slane %v13437_v18, 3  ;;  %v7546_v61 = vunpack.c.l.bf16 %v13855_v33  ;;  %v8236_v41 = vunpack.c.l.bf16 %v13866_v10  ;;  %v13890_v45 = vld [vmem:[#allocation10 + $0x284] sm:$0x11]  ;;  %v15395_v29 = vld [vmem:[#allocation73_spill] sm:$0xff]  ;;  %v6769_v33 = vpop.f32.mrf.mxu3 }
 0x40a   : > { %15386 = vst [vmem:[#allocation57_spill] sm:$0xff] %v13866_v10  ;;  %v7776_v54 = vunpack.c.l.bf16 %v13868_v17  ;;  %v7891_v47 = vunpack.c.l.bf16 %v13870_v57  ;;  %v13885_v11 = vadd.f32 %v7357_v37, %v13656_v35  ;;  %v13888_v18 = vadd.f32 %v8162_v63, %v13659_v14  ;;  %v15398_v35 = vld [vmem:[#allocation71_spill] sm:$0xff] }
 0x40b   : > { %15387 = vst [vmem:[#allocation58_spill] sm:$0xff] %v13868_v17  ;;  %v7127_v38 = vadd.f32 %v15395_v29, %v7083_v30  ;;  %v7247_v48 = vmul.f32 %v7219_v53, %v13829_v59  ;;  %v7594_v60 = vmul.f32 %v7566_v19, %v13829_v59  ;;  %v7451_v37 = vunpack.c.h.bf16 %v15398_v35  ;;  %v13905_v53 = vld [vmem:[#allocation10 + $0x174] sm:$0xff]  ;;  %v15400_v19 = vld [vmem:[#allocation74_spill] sm:$0xff] }
 0x40c   : > { %15388 = vst [vmem:[#allocation59_spill] sm:$0xff] %v13870_v57  ;;  %v6750_v17 = vpop.f32.mrf.mxu2  ;;  %v8006_v57 = vunpack.c.l.bf16 %v13878_v21  ;;  %v6717_v63 = vpop.f32.mrf.mxu0 }
 0x40d   : > { %15390 = vst [vmem:[#allocation24_spill] sm:$0xff] %v13874_v44  ;;  %v15396_v44 = vld [vmem:[#allocation70_spill] sm:$0xff]  ;;  %v6751_v30 = vadd.f32 %v6750_v17, %v13791_v20  ;;  %v13913_v35 = vmul.f32 %v7451_v37, %v13829_v59  ;;  %v6736_v20 = vpop.f32.mrf.mxu1 }
 0x40e   : > { %15391 = vst [vmem:[#allocation25_spill] sm:$0xff] %v13878_v21  ;;  %v13894_v10 = vadd.f32 %v7932_v4, %v15396_v44  ;;  %v7282_v4 = vsel %vm7280_vm6, %v7247_v48, 0.0  ;;  %v7628_v44 = vsel %vm7280_vm6, %v7594_v60, 0.0  ;;  %v13918_v60 = vadd.f32 %v6736_v20, %v6717_v63  ;;  %v13955_v20 = vld [vmem:[#allocation10 + $0x3a4] sm:$0xff] }
 0x40f   : > { %15392 = vst [vmem:[#allocation62_spill] sm:$0xff] %v13885_v11  ;;  %v15399_v11 = vld [vmem:[#allocation72_spill] sm:$0xff]  ;;  %v13910_v26 = vadd.f32 %v7628_v44, %v7627_v62  ;;  %v15401_v62 = vld [vmem:[#allocation22_spill] sm:$0xff] }
 0x410   : > { %15393 = vst [vmem:[#allocation63_spill] sm:$0xff] %v13888_v18  ;;  %v7336_v14 = vunpack.c.h.bf16 %v15399_v11  ;;  %v7155_v18 = vmax.f32 %v7127_v38, 0.0  ;;  %v6770_v38 = vadd.f32 %v6769_v33, %v6751_v30  ;;  %7056 = vmatmul.bf16.gmra.mxu2 %v13325_v13 }
 0x411   : > { %15394 = vst [vmem:[#allocation54_spill] sm:$0xff] %v13890_v45  ;;  %11463 = vmatmul.msk.bf16.gmra.mxu3 %vm3203_vm5, %v13330_v42 }
 0x412   : > { %15397 = vst [vmem:[#allocation55_spill] sm:$0xff] %v13894_v10  ;;  %v13908_v10 = vadd.f32 %v7282_v4, %v15400_v19  ;;  %v13916_v11 = vmul.f32 %v7336_v14, %v13829_v59  ;;  %v7689_v17 = vmul.f32 %v7661_v1, %v7155_v18  ;;  %v7344_v48 = vmul.f32 %v7316_v55, %v7155_v18  ;;  %v13920_v19 = vld [vmem:[#allocation10 + $0x254] sm:$0xff] }
 0x413   : > { %v7227_v45 = vmul.f32 %v7199_v51, %v7155_v18  ;;  %v8149_v21 = vmul.f32 %v8121_v5, %v7155_v18  ;;  %v7459_v34 = vmul.f32 %v7431_v40, %v7155_v18  ;;  %v7574_v4 = vmul.f32 %v7546_v61, %v7155_v18  ;;  %v13933_v51 = vld [vmem:[#allocation10 + $0x94] sm:$0xff]  ;;  %v13935_v5 = vld [vmem:[#allocation10 + $0x2c4] sm:$0xff] }
 0x414   : > { %v7090_v44 = vadd.f32 %v6770_v38, %v15401_v62  ;;  %v13927_v33 = vadd.f32 %v13709_v6, %v7689_v17  ;;  %v13930_v1 = vadd.f32 %v13712_v16, %v7344_v48  ;;  %v7553_v55 = vunpack.c.l.bf16 %v13905_v53  ;;  %v13937_v40 = vld [vmem:[#allocation10 + $0x1e4] sm:$0xff]  ;;  %v15403_v6 = vld [vmem:[#allocation45_spill] sm:$0xff]  ;;  %v6786_v59 = vpop.f32.mrf.mxu0 }
 0x415   : > { %15402 = vst [vmem:[#allocation64_spill] sm:$0xff] %v13937_v40  ;;  %v13940_v61 = vadd.f32 %v13716_v28, %v7227_v45  ;;  %v13943_v13 = vadd.f32 %v13719_v31, %v8149_v21  ;;  %v13946_v42 = vadd.f32 %v13722_v39, %v7459_v34  ;;  %v13949_v16 = vadd.f32 %v15403_v6, %v7574_v4  ;;  %v13953_v38 = vld [vmem:[#allocation10 + $0x334] sm:$0xff]  ;;  %v6753_v28 = vpop.f32.mrf.mxu2  ;;  %v6772_v45 = vpop.f32.mrf.mxu3 }
 0x416   : > { %v7134_v37 = vadd.f32 %v15395_v29, %v7090_v44  ;;  %v8264_v14 = vmul.f32 %v8236_v41, %v7155_v18  ;;  %v7804_v63 = vmul.f32 %v7776_v54, %v7155_v18  ;;  %v7783_v30 = vunpack.c.l.bf16 %v13920_v19 }
 0x417   : > { %v7323_v31 = vunpack.c.l.bf16 %v13933_v51  ;;  %v7919_v21 = vmul.f32 %v7891_v47, %v7155_v18  ;;  %v7898_v39 = vunpack.c.l.bf16 %v13935_v5  ;;  %v7668_v34 = vunpack.c.l.bf16 %v13937_v40 }
 0x418   : > { %v13960_v17 = vmax.f32 %v7134_v37, 0.0  ;;  %v6754_v41 = vadd.f32 %v6753_v28, %v13861_v9  ;;  %v13964_v54 = vadd.f32 %v13734_v7, %v8264_v14  ;;  %v13967_v48 = vadd.f32 %v13737_v27, %v7804_v63  ;;  %v6805_v37 = vpop.f32.mrf.mxu1  ;;  %v13986_v63 = vld [vmem:[#allocation10 + $0x40] sm:$0xff]  ;;  %v13988_v28 = vld [vmem:[#allocation10 + $0x190] sm:$0xff] }
 0x419   : > { %v13970_v4 = vadd.f32 %v13740_v0, %v7919_v21  ;;  %v8034_v62 = vmul.f32 %v8006_v57, %v7155_v18  ;;  %v8013_v47 = vunpack.c.l.bf16 %v13953_v38  ;;  %v8128_v44 = vunpack.c.l.bf16 %v13955_v20  ;;  %v13984_v18 = vld [vmem:[#allocation10 + $0x24] sm:$0xff]  ;;  %15405 = vst [vmem:[#allocation65_spill] sm:$0xff] %v13986_v63 }
 0x41a   : > { %v6773_v6 = vadd.f32 %v6772_v45, %v6754_v41  ;;  %v7581_v40 = vmul.f32 %v7553_v55, %v13960_v17  ;;  %v7811_v9 = vmul.f32 %v7783_v30, %v13960_v17  ;;  %v7351_v7 = vmul.f32 %v7323_v31, %v13960_v17  ;;  %15404 = vst [vmem:[#allocation56_spill] sm:$0xff] %v13984_v18  ;;  %v15407_v55 = vld [vmem:[#allocation23_spill] sm:$0xff]  ;;  %v15411_v41 = vld [vmem:[#allocation48_spill] sm:$0xff] }
 0x41b   : > { %v13977_v14 = vadd.f32 %v6805_v37, %v6786_v59  ;;  %v7926_v27 = vmul.f32 %v7898_v39, %v13960_v17  ;;  %v7696_v0 = vmul.f32 %v7668_v34, %v13960_v17  ;;  %v13982_v57 = vadd.f32 %v13747_v32, %v8034_v62  ;;  %15406 = vst [vmem:[#allocation60_spill] sm:$0xff] %v13988_v28  ;;  %v14000_v21 = vld [vmem:[#allocation10 + $0x104] sm:$0xff] }
 0x41c   : > { %v7097_v45 = vadd.f32 %v6773_v6, %v15407_v55  ;;  %v13992_v30 = vadd.f32 %v13751_v3, %v7581_v40  ;;  %v13995_v59 = vadd.f32 %v13754_v25, %v7811_v9  ;;  %v13998_v31 = vadd.f32 %v13757_v2, %v7351_v7  ;;  %15408 = vst [vmem:[#allocation67_spill] sm:$0xff] %v14000_v21  ;;  %v14002_v32 = vld [vmem:[#allocation10 + $0x120] sm:$0xff]  ;;  %v14018_v7 = vld [vmem:[#allocation10 + $0x414] sm:$0xff] }
 0x41d   : > { %v15409_v39 = vld [vmem:[#allocation47_spill] sm:$0xff]  ;;  %v14008_v62 = vadd.f32 %v15411_v41, %v7696_v0  ;;  %v8041_v6 = vmul.f32 %v8013_v47, %v13960_v17  ;;  %v8156_v3 = vmul.f32 %v8128_v44, %v13960_v17  ;;  %v7206_v2 = vunpack.c.l.bf16 %v13984_v18  ;;  %15413 = vst [vmem:[#allocation28_spill] sm:$0xff] %v14018_v7  ;;  %v14022_v0 = vld [vmem:[#allocation10 + $0x270] sm:$0xff]  ;;  %v6755_v55 = vpop.f32.mrf.mxu2  ;;  %v6774_v47 = vpop.f32.mrf.mxu3 }
 0x41e   : > { %v14005_v34 = vadd.f32 %v15409_v39, %v7926_v27  ;;  %v14012_v40 = vld [vmem:[#allocation10 + $0x200] sm:$0xff]  ;;  %v7141_v25 = vadd.f32 %v15395_v29, %v7097_v45  ;;  %v7213_v37 = vunpack.c.l.bf16 %v13986_v63  ;;  %v7560_v9 = vunpack.c.l.bf16 %v13988_v28  ;;  %v14020_v27 = vld [vmem:[#allocation10 + $0x350] sm:$0xff]  ;;  %15415 = vst [vmem:[#allocation68_spill] sm:$0xff] %v14022_v0 }
 0x41f   : > { %15412 = vst [vmem:[#allocation27_spill] sm:$0xff] %v14008_v62  ;;  %v14025_v44 = vadd.f32 %v13772_v15, %v8041_v6  ;;  %v14028_v39 = vadd.f32 %v13780_v24, %v8156_v3  ;;  %v7438_v45 = vunpack.c.l.bf16 %v14000_v21  ;;  %v7445_v41 = vunpack.c.l.bf16 %v14002_v32  ;;  %v6788_v21 = vpop.f32.mrf.mxu0 }
 0x420   : > { %15410 = vst [vmem:[#allocation20_spill] sm:$0xff] %v14005_v34  ;;  %v14032_v63 = vmax.f32 %v7141_v25, 0.0  ;;  %v6756_v28 = vadd.f32 %v6755_v55, %v13918_v60  ;;  %v7234_v18 = vmul.f32 %v7206_v2, %v13960_v17  ;;  %v7675_v62 = vunpack.c.l.bf16 %v14012_v40 }
 0x421   : > { %15414 = vst [vmem:[#allocation66_spill] sm:$0xff] %v14020_v27  ;;  %v7466_v34 = vmul.f32 %v7438_v45, %v13960_v17  ;;  %v8243_v15 = vunpack.c.l.bf16 %v14018_v7  ;;  %v8020_v6 = vunpack.c.l.bf16 %v14020_v27  ;;  %v7790_v24 = vunpack.c.l.bf16 %v14022_v0  ;;  %v14053_v0 = vld [vmem:[#allocation10 + $0xb0] sm:$0xff] }
 0x422   : > { %15416 = vst [vmem:[#allocation21_spill] sm:$0xff] %v14028_v39  ;;  %v6775_v3 = vadd.f32 %v6774_v47, %v6756_v28  ;;  %v6807_v39 = vpop.f32.mrf.mxu1  ;;  %v14042_v25 = vadd.f32 %v13784_v56, %v7234_v18  ;;  %v7241_v60 = vmul.f32 %v7213_v37, %v14032_v63  ;;  %v7588_v2 = vmul.f32 %v7560_v9, %v14032_v63  ;;  %v14055_v28 = vld [vmem:[#allocation10 + $0x3c0] sm:$0xff] }
 0x423   : > { %15417 = vst [vmem:[#allocation73_spill] sm:$0xff] %v14032_v63  ;;  %v14046_v55 = vadd.f32 %v6807_v39, %v6788_v21  ;;  %v14049_v45 = vadd.f32 %v13794_v58, %v7466_v34  ;;  %v7473_v7 = vmul.f32 %v7445_v41, %v14032_v63  ;;  %v7703_v27 = vmul.f32 %v7675_v62, %v14032_v63  ;;  %v15420_v47 = vld [vmem:[#allocation26_spill] sm:$0xff] }
 0x424   : > { %15418 = vst [vmem:[#allocation70_spill] sm:$0xff] %v14053_v0  ;;  %v7104_v56 = vadd.f32 %v6775_v3, %v15420_v47  ;;  %v14059_v18 = vadd.f32 %v13802_v52, %v7241_v60  ;;  %v14062_v37 = vadd.f32 %v13805_v22, %v7588_v2  ;;  %v8271_v21 = vmul.f32 %v8243_v15, %v13960_v17  ;;  %v14065_v58 = vld [vmem:[#allocation10 + $0x2e0] sm:$0xff]  ;;  %v14083_v3 = vld [vmem:[#allocation10 + $0x1ac] sm:$0x11] }
 0x425   : > { %15419 = vst [vmem:[#allocation71_spill] sm:$0xff] %v14055_v28  ;;  %v14067_v34 = vld [vmem:[#allocation10 + $0x5c] sm:$0x11]  ;;  %v14070_v62 = vadd.f32 %v13809_v50, %v7473_v7  ;;  %v14073_v9 = vadd.f32 %v13812_v36, %v7703_v27  ;;  %v8048_v39 = vmul.f32 %v8020_v6, %v14032_v63  ;;  %v7818_v52 = vmul.f32 %v7790_v24, %v14032_v63  ;;  %v6824_v50 = vpop.f32.mrf.mxu2  ;;  %v6843_v7 = vpop.f32.mrf.mxu3 }
 0x426   : > { %15421 = vst [vmem:[#allocation72_spill] sm:$0xff] %v14059_v18  ;;  %v7148_v41 = vadd.f32 %v15395_v29, %v7104_v56  ;;  %v14079_v22 = vadd.f32 %v13815_v8, %v8271_v21  ;;  %v7330_v17 = vunpack.c.l.bf16 %v14053_v0  ;;  %v8135_v15 = vunpack.c.l.bf16 %v14055_v28  ;;  %v14118_v28 = vld [vmem:[#allocation10 + $0x13c] sm:$0x11] }
 0x427   : > { %15422 = vst [vmem:[#allocation74_spill] sm:$0xff] %v14062_v37  ;;  %v14086_v36 = vadd.f32 %v13823_v23, %v8048_v39  ;;  %v14089_v27 = vadd.f32 %v13833_v46, %v7818_v52  ;;  %v7905_v6 = vunpack.c.l.bf16 %v14065_v58  ;;  %v7220_v29 = vunpack.c.l.bf16 %v14067_v34  ;;  %v6791_v39 = vpop.f32.mrf.mxu0 }
 0x428   : > { %15423 = vst [vmem:[#allocation22_spill] sm:$0xff] %v14065_v58  ;;  %v14093_v8 = vmax.f32 %v7148_v41, 0.0  ;;  %v6825_v24 = vadd.f32 %v6824_v50, %v13977_v14  ;;  %v7358_v60 = vmul.f32 %v7330_v17, %v14032_v63  ;;  %v8163_v2 = vmul.f32 %v8135_v15, %v14032_v63  ;;  %v15432_v50 = vld [vmem:[#allocation46_spill] sm:$0xff] }
 0x429   : > { %15424 = vst [vmem:[#allocation45_spill] sm:$0xff] %v14067_v34  ;;  %v7933_v47 = vmul.f32 %v7905_v6, %v14032_v63  ;;  %v7567_v23 = vunpack.c.l.bf16 %v14083_v3  ;;  %v7513_v46 = vsel %vm7280_vm6, %v13913_v35, 0.0  ;;  %v7398_v56 = vsel %vm7280_vm6, %v13916_v11, 0.0  ;;  %v15433_v63 = vld [vmem:[#allocation49_spill] sm:$0xff] }
 0x42a   : > { %15425 = vst [vmem:[#allocation23_spill] sm:$0xff] %v14070_v62  ;;  %v6844_v21 = vadd.f32 %v6843_v7, %v6825_v24  ;;  %v6810_v52 = vpop.f32.mrf.mxu1  ;;  %v7662_v41 = vunpack.c.h.bf16 %v13836_v49  ;;  %v7317_v14 = vunpack.c.h.bf16 %v13838_v12  ;;  %v7200_v17 = vunpack.c.h.bf16 %v13840_v43  ;;  %v15434_v34 = vld [vmem:[#allocation53_spill] sm:$0xff]  ;;  %v15439_v24 = vld [vmem:[#allocation58_spill] sm:$0xff]  ;;  %v14120_v43 = vld [vmem:[#allocation10 + $0xcc] sm:$0x11] }
 0x42b   : > { %15426 = vst [vmem:[#allocation47_spill] sm:$0xff] %v14073_v9  ;;  %v6811_v15 = vadd.f32 %v6810_v52, %v6791_v39  ;;  %v8122_v6 = vunpack.c.h.bf16 %v15432_v50  ;;  %v7547_v58 = vunpack.c.h.bf16 %v15434_v34  ;;  %v15435_v35 = vld [vmem:[#allocation29_spill] sm:$0xff]  ;;  %v7777_v12 = vunpack.c.h.bf16 %v15439_v24  ;;  %v15441_v39 = vld [vmem:[#allocation59_spill] sm:$0xff]  ;;  %v15443_v34 = vld [vmem:[#allocation62_spill] sm:$0xff] }
 0x42c   : > { %15427 = vst [vmem:[#allocation48_spill] sm:$0xff] %v14079_v22  ;;  %v15438_v7 = vld [vmem:[#allocation57_spill] sm:$0xff]  ;;  %v7892_v52 = vunpack.c.h.bf16 %v15441_v39  ;;  %v14125_v0 = vadd.f32 %v15443_v34, %v7358_v60  ;;  %v15446_v22 = vld [vmem:[#allocation55_spill] sm:$0xff]  ;;  %v7248_v24 = vmul.f32 %v7220_v29, %v14093_v8  ;;  %v7595_v9 = vmul.f32 %v7567_v23, %v14093_v8 }
 0x42d   : > { %15428 = vst [vmem:[#allocation26_spill] sm:$0xff] %v14083_v3  ;;  %v7432_v3 = vunpack.c.h.bf16 %v15433_v63  ;;  %v8237_v49 = vunpack.c.h.bf16 %v15438_v7  ;;  %v15442_v63 = vld [vmem:[#allocation25_spill] sm:$0xff]  ;;  %v14132_v7 = vadd.f32 %v15446_v22, %v7933_v47  ;;  %v6826_v62 = vpop.f32.mrf.mxu2  ;;  %v6845_v37 = vpop.f32.mrf.mxu3  ;;  %v7452_v39 = vunpack.c.l.bf16 %v14118_v28 }
 0x42e   : > { %15429 = vst [vmem:[#allocation75_spill] sm:$0xff] %v14086_v36  ;;  %v14111_v36 = vld [vmem:[#allocation8] sm:$0x7f]  ;;  %v8007_v50 = vunpack.c.h.bf16 %v15442_v63  ;;  %v15447_v63 = vld [vmem:[#allocation52_spill] sm:$0xff]  ;;  %v7337_v60 = vunpack.c.l.bf16 %v14120_v43  ;;  %v6827_v22 = vadd.f32 %v6826_v62, %v14046_v55  ;;  %v7284_v47 = vsel %vm7280_vm6, %v7248_v24, 0.0 }
 0x42f   : > { %15430 = vst [vmem:[#allocation76_spill] sm:$0xff] %v14089_v27  ;;  %v7084_v27 = vadd.f32 %v6844_v21, %v15435_v35  ;;  %v14114_v11 = vperm.slane %v14111_v36, 4  ;;  %v15444_v21 = vld [vmem:[#allocation63_spill] sm:$0xff]  ;;  %v14138_v18 = vadd.f32 %v7513_v46, %v15447_v63  ;;  %v7630_v29 = vsel %vm7280_vm6, %v7595_v9, 0.0 }
 0x430   : > { %15431 = vst [vmem:[#allocation77_spill] sm:$0xff] %v14093_v8  ;;  %v14128_v35 = vadd.f32 %v15444_v21, %v8163_v2  ;;  %v15448_v2 = vld [vmem:[#allocation19_spill] sm:$0xff]  ;;  %v14148_v23 = vadd.f32 %v7284_v47, %v13908_v10  ;;  %v14151_v21 = vadd.f32 %v7630_v29, %v13910_v26  ;;  %v14154_v46 = vmul.f32 %v7452_v39, %v14093_v8  ;;  %v15451_v47 = vld [vmem:[#allocation30_spill] sm:$0xff] }
 0x431   : > { %15436 = vst [vmem:[#allocation46_spill] sm:$0xff] %v14111_v36  ;;  %v15445_v36 = vld [vmem:[#allocation24_spill] sm:$0xff]  ;;  %v14142_v34 = vadd.f32 %v7398_v56, %v15448_v2  ;;  %v14157_v63 = vmul.f32 %v7337_v60, %v14093_v8  ;;  %v6846_v56 = vadd.f32 %v6845_v37, %v6827_v22  ;;  %v7324_v22 = vunpack.c.h.bf16 %v13933_v51 }
 0x432   : > { %15437 = vst [vmem:[#allocation49_spill] sm:$0xff] %v14114_v11  ;;  %v7128_v11 = vadd.f32 %v15445_v36, %v7084_v27  ;;  %v6812_v2 = vpop.f32.mrf.mxu1  ;;  %v7899_v29 = vunpack.c.h.bf16 %v13935_v5  ;;  %v8129_v51 = vunpack.c.h.bf16 %v13955_v20 }
 0x433   : > { %15440 = vst [vmem:[#allocation53_spill] sm:$0xff] %v14120_v43 }
 0x434   : > { %15449 = vst [vmem:[#allocation29_spill] sm:$0xff] %v14142_v34  ;;  %v7156_v27 = vmax.f32 %v7128_v11, 0.0  ;;  %v6793_v11 = vpop.f32.mrf.mxu0 }
 0x435   : > { %15450 = vst [vmem:[#allocation57_spill] sm:$0xff] %v14148_v23  ;;  %v6813_v34 = vadd.f32 %v6812_v2, %v6793_v11  ;;  %v7091_v23 = vadd.f32 %v6846_v56, %v15451_v47  ;;  %v15455_v47 = vld [vmem:[#allocation27_spill] sm:$0xff] }
 0x436   : > { %v7690_v55 = vmul.f32 %v7662_v41, %v7156_v27  ;;  %v7345_v62 = vmul.f32 %v7317_v14, %v7156_v27  ;;  %v7228_v24 = vmul.f32 %v7200_v17, %v7156_v27  ;;  %v8150_v9 = vmul.f32 %v8122_v6, %v7156_v27  ;;  %v6829_v6 = vpop.f32.mrf.mxu2 }
 0x437   : > { %v7460_v43 = vmul.f32 %v7432_v3, %v7156_v27  ;;  %v7575_v10 = vmul.f32 %v7547_v58, %v7156_v27  ;;  %v7554_v58 = vunpack.c.h.bf16 %v13905_v53  ;;  %v8265_v14 = vmul.f32 %v8237_v49, %v7156_v27 }
 0x438   : > { %v14161_v26 = vadd.f32 %v13927_v33, %v7690_v55  ;;  %v14164_v39 = vadd.f32 %v13930_v1, %v7345_v62  ;;  %v14167_v60 = vadd.f32 %v13940_v61, %v7228_v24  ;;  %v14170_v37 = vadd.f32 %v13943_v13, %v8150_v9  ;;  %v6848_v61 = vpop.f32.mrf.mxu3  ;;  %v15453_v9 = vld [vmem:[#allocation31_spill] sm:$0xff] }
 0x439   : > { %v14173_v41 = vadd.f32 %v13946_v42, %v7460_v43  ;;  %v14176_v3 = vadd.f32 %v13949_v16, %v7575_v10  ;;  %v7135_v33 = vadd.f32 %v15445_v36, %v7091_v23  ;;  %v7805_v17 = vmul.f32 %v7777_v12, %v7156_v27  ;;  %v15452_v42 = vld [vmem:[#allocation64_spill] sm:$0xff] }
 0x43a   : > { %v7784_v1 = vunpack.c.h.bf16 %v13920_v19  ;;  %v7920_v13 = vmul.f32 %v7892_v52, %v7156_v27  ;;  %v7669_v43 = vunpack.c.h.bf16 %v15452_v42  ;;  %v6830_v16 = vadd.f32 %v6829_v6, %v6811_v15  ;;  %v6881_v23 = vpop.f32.mrf.mxu1 }
 0x43b   : > { %v7163_v56 = vmax.f32 %v7135_v33, 0.0  ;;  %v14185_v11 = vadd.f32 %v13964_v54, %v8265_v14  ;;  %v14188_v53 = vadd.f32 %v13967_v48, %v7805_v17  ;;  %v8035_v19 = vmul.f32 %v8007_v50, %v7156_v27  ;;  %v15454_v27 = vld [vmem:[#allocation20_spill] sm:$0xff] }
 0x43c   : > { %v14191_v49 = vadd.f32 %v13970_v4, %v7920_v13  ;;  %v8014_v12 = vunpack.c.h.bf16 %v13953_v38  ;;  %v6849_v52 = vadd.f32 %v6848_v61, %v6830_v16  ;;  %v6862_v5 = vpop.f32.mrf.mxu0  ;;  %v15456_v17 = vld [vmem:[#allocation56_spill] sm:$0xff] }
 0x43d   : > { %v7582_v2 = vmul.f32 %v7554_v58, %v7163_v56  ;;  %v7812_v55 = vmul.f32 %v7784_v1, %v7163_v56  ;;  %v7352_v15 = vmul.f32 %v7324_v22, %v7163_v56  ;;  %v6882_v62 = vadd.f32 %v6881_v23, %v6862_v5  ;;  %v15458_v61 = vld [vmem:[#allocation60_spill] sm:$0xff] }
 0x43e   : > { %v7927_v54 = vmul.f32 %v7899_v29, %v7163_v56  ;;  %v7697_v24 = vmul.f32 %v7669_v43, %v7163_v56  ;;  %v14196_v48 = vadd.f32 %v13982_v57, %v8035_v19  ;;  %v7098_v4 = vadd.f32 %v6849_v52, %v15453_v9  ;;  %v6831_v22 = vpop.f32.mrf.mxu2  ;;  %v15459_v29 = vld [vmem:[#allocation21_spill] sm:$0xff]  ;;  %v15460_v43 = vld [vmem:[#allocation67_spill] sm:$0xff] }
 0x43f   : > { %v14200_v50 = vadd.f32 %v13992_v30, %v7582_v2  ;;  %v14203_v38 = vadd.f32 %v13995_v59, %v7812_v55  ;;  %v14206_v20 = vadd.f32 %v13998_v31, %v7352_v15  ;;  %v8042_v33 = vmul.f32 %v8014_v12, %v7163_v56  ;;  %v15457_v30 = vld [vmem:[#allocation65_spill] sm:$0xff]  ;;  %v15462_v2 = vld [vmem:[#allocation28_spill] sm:$0xff]  ;;  %v15463_v15 = vld [vmem:[#allocation66_spill] sm:$0xff] }
 0x440   : > { %v14209_v10 = vadd.f32 %v15454_v27, %v7927_v54  ;;  %v14212_v58 = vadd.f32 %v15455_v47, %v7697_v24  ;;  %v8157_v57 = vmul.f32 %v8129_v51, %v7163_v56  ;;  %v7142_v14 = vadd.f32 %v15445_v36, %v7098_v4  ;;  %v6850_v13 = vpop.f32.mrf.mxu3 }
 0x441   : > { %v7207_v1 = vunpack.c.h.bf16 %v15456_v17  ;;  %v7214_v6 = vunpack.c.h.bf16 %v15457_v30  ;;  %v7561_v59 = vunpack.c.h.bf16 %v15458_v61  ;;  %v14219_v31 = vadd.f32 %v14025_v44, %v8042_v33  ;;  %v15464_v44 = vld [vmem:[#allocation68_spill] sm:$0xff] }
 0x442   : > { %v14222_v42 = vadd.f32 %v15459_v29, %v8157_v57  ;;  %v7439_v16 = vunpack.c.h.bf16 %v15460_v43  ;;  %v7446_v19 = vunpack.c.h.bf16 %v14002_v32  ;;  %v14226_v12 = vmax.f32 %v7142_v14, 0.0  ;;  %v6883_v27 = vpop.f32.mrf.mxu1  ;;  %v15465_v17 = vld [vmem:[#allocation32_spill] sm:$0xff]  ;;  %v15469_v29 = vld [vmem:[#allocation47_spill] sm:$0xff] }
 0x443   : > { %v6832_v51 = vadd.f32 %v6831_v22, %v6813_v34  ;;  %v7235_v52 = vmul.f32 %v7207_v1, %v7163_v56  ;;  %v7676_v5 = vunpack.c.h.bf16 %v14012_v40  ;;  %v8244_v55 = vunpack.c.h.bf16 %v15462_v2  ;;  %v15466_v30 = vld [vmem:[#allocation72_spill] sm:$0xff]  ;;  %v15472_v2 = vld [vmem:[#allocation71_spill] sm:$0xff] }
 0x444   : > { %15461 = vst [vmem:[#allocation58_spill] sm:$0xff] %v14226_v12  ;;  %v7467_v23 = vmul.f32 %v7439_v16, %v7163_v56  ;;  %v8021_v54 = vunpack.c.h.bf16 %v15463_v15  ;;  %v7791_v24 = vunpack.c.h.bf16 %v15464_v44  ;;  %v6864_v4 = vpop.f32.mrf.mxu0  ;;  %v7242_v32 = vmul.f32 %v7214_v6, %v14226_v12  ;;  %v15473_v44 = vld [vmem:[#allocation75_spill] sm:$0xff] }
 0x445   : > { %v6851_v9 = vadd.f32 %v6850_v13, %v6832_v51  ;;  %v14233_v47 = vadd.f32 %v14042_v25, %v7235_v52  ;;  %v7589_v34 = vmul.f32 %v7561_v59, %v14226_v12  ;;  %v14237_v33 = vadd.f32 %v6883_v27, %v6864_v4  ;;  %v15467_v25 = vld [vmem:[#allocation74_spill] sm:$0xff]  ;;  %v15468_v13 = vld [vmem:[#allocation23_spill] sm:$0xff]  ;;  %v15470_v51 = vld [vmem:[#allocation48_spill] sm:$0xff] }
 0x446   : > { %v14240_v40 = vadd.f32 %v14049_v45, %v7467_v23  ;;  %v7474_v57 = vmul.f32 %v7446_v19, %v14226_v12  ;;  %v7704_v14 = vmul.f32 %v7676_v5, %v14226_v12  ;;  %v14246_v61 = vadd.f32 %v15466_v30, %v7242_v32  ;;  %v15471_v5 = vld [vmem:[#allocation70_spill] sm:$0xff]  ;;  %v15474_v4 = vld [vmem:[#allocation76_spill] sm:$0xff] }
 0x447   : > { %v7105_v1 = vadd.f32 %v6851_v9, %v15465_v17  ;;  %v14249_v22 = vadd.f32 %v15467_v25, %v7589_v34  ;;  %v8272_v6 = vmul.f32 %v8244_v55, %v7163_v56  ;;  %v8049_v45 = vmul.f32 %v8021_v54, %v14226_v12  ;;  %v6900_v56 = vpop.f32.mrf.mxu2  ;;  %v15475_v54 = vld [vmem:[#allocation22_spill] sm:$0xff]  ;;  %v14281_v25 = vld [vmem:[#allocation10 + $0x10] sm:$0xff] }
 0x448   : > { %v14252_v59 = vadd.f32 %v15468_v13, %v7474_v57  ;;  %v14255_v43 = vadd.f32 %v15469_v29, %v7704_v14  ;;  %v7819_v16 = vmul.f32 %v7791_v24, %v14226_v12  ;;  %v7331_v23 = vunpack.c.h.bf16 %v15471_v5  ;;  %v6919_v55 = vpop.f32.mrf.mxu3  ;;  %v15476_v24 = vld [vmem:[#allocation45_spill] sm:$0xff]  ;;  %v14279_v30 = vld [vmem:[#allocation10 + $0x80] sm:$0xff]  ;;  %15480 = vst [vmem:[#allocation63_spill] sm:$0xff] %v14281_v25 }
 0x449   : > { %v7149_v19 = vadd.f32 %v15445_v36, %v7105_v1  ;;  %v14261_v52 = vadd.f32 %v15470_v51, %v8272_v6  ;;  %v8136_v15 = vunpack.c.h.bf16 %v15472_v2  ;;  %v14266_v9 = vadd.f32 %v15473_v44, %v8049_v45  ;;  %v14277_v1 = vld [vmem:[#allocation10 + $0x1d0] sm:$0xff]  ;;  %15479 = vst [vmem:[#allocation62_spill] sm:$0xff] %v14279_v30  ;;  %v15481_v13 = vld [vmem:[#allocation26_spill] sm:$0xff] }
 0x44a   : > { %v14269_v27 = vadd.f32 %v15474_v4, %v7819_v16  ;;  %v7906_v32 = vunpack.c.h.bf16 %v15475_v54  ;;  %v7221_v34 = vunpack.c.h.bf16 %v15476_v24  ;;  %v6901_v57 = vadd.f32 %v6900_v56, %v6882_v62  ;;  %15478 = vst [vmem:[#allocation25_spill] sm:$0xff] %v14277_v1  ;;  %v6886_v51 = vpop.f32.mrf.mxu1  ;;  %v14294_v56 = vld [vmem:[#allocation10 + $0xf0] sm:$0xff]  ;;  %v14296_v44 = vld [vmem:[#allocation10 + $0x160] sm:$0xff] }
 0x44b   : > { %v14273_v36 = vmax.f32 %v7149_v19, 0.0  ;;  %v7359_v14 = vmul.f32 %v7331_v23, %v14226_v12  ;;  %v8164_v17 = vmul.f32 %v8136_v15, %v14226_v12  ;;  %v7568_v29 = vunpack.c.h.bf16 %v15481_v13  ;;  %v14292_v15 = vld [vmem:[#allocation10 + $0x390] sm:$0xff]  ;;  %15483 = vst [vmem:[#allocation55_spill] sm:$0xff] %v14294_v56  ;;  %v14303_v54 = vld [vmem:[#allocation10 + $0x400] sm:$0xff] }
 0x44c   : > { %v7934_v6 = vmul.f32 %v7906_v32, %v14226_v12  ;;  %v7515_v45 = vsel %vm7280_vm6, %v14154_v46, 0.0  ;;  %v7400_v62 = vsel %vm7280_vm6, %v14157_v63, 0.0  ;;  %v6920_v16 = vadd.f32 %v6919_v55, %v6901_v57  ;;  %v6867_v19 = vpop.f32.mrf.mxu0  ;;  %15482 = vst [vmem:[#allocation24_spill] sm:$0xff] %v14292_v15  ;;  %v14305_v32 = vld [vmem:[#allocation10 + $0x240] sm:$0xff]  ;;  %v14307_v24 = vld [vmem:[#allocation10 + $0x2b0] sm:$0xff] }
 0x44d   : > { %15477 = vst [vmem:[#allocation59_spill] sm:$0xff] %v14273_v36  ;;  %v7663_v5 = vunpack.c.l.bf16 %v14277_v1  ;;  %v7318_v23 = vunpack.c.l.bf16 %v14279_v30  ;;  %v7201_v2 = vunpack.c.l.bf16 %v14281_v25  ;;  %v14298_v4 = vadd.f32 %v6886_v51, %v6867_v19  ;;  %v15488_v57 = vld [vmem:[#allocation33_spill] sm:$0xff]  ;;  %v15489_v12 = vld [vmem:[#allocation46_spill] sm:$0xff] }
 0x44e   : > { %15484 = vst [vmem:[#allocation52_spill] sm:$0xff] %v14296_v44  ;;  %v8123_v46 = vunpack.c.l.bf16 %v14292_v15  ;;  %v7433_v63 = vunpack.c.l.bf16 %v14294_v56  ;;  %v7548_v55 = vunpack.c.l.bf16 %v14296_v44  ;;  %v7085_v13 = vadd.f32 %v6920_v16, %v15488_v57  ;;  %v14315_v15 = vld [vmem:[#allocation10 + $0x320] sm:$0xff]  ;;  %v15492_v16 = vld [vmem:[#allocation49_spill] sm:$0xff] }
 0x44f   : > { %15485 = vst [vmem:[#allocation19_spill] sm:$0xff] %v14303_v54  ;;  %v14311_v8 = vperm.slane %v15489_v12, 5  ;;  %v8238_v19 = vunpack.c.l.bf16 %v14303_v54  ;;  %v7778_v51 = vunpack.c.l.bf16 %v14305_v32  ;;  %v7893_v56 = vunpack.c.l.bf16 %v14307_v24  ;;  %v6902_v12 = vpop.f32.mrf.mxu2 }
 0x450   : > { %15486 = vst [vmem:[#allocation30_spill] sm:$0xff] %v14305_v32  ;;  %v8008_v44 = vunpack.c.l.bf16 %v14315_v15  ;;  %v14320_v25 = vadd.f32 %v14125_v0, %v7359_v14  ;;  %v14323_v30 = vadd.f32 %v14128_v35, %v8164_v17  ;;  %v7129_v57 = vadd.f32 %v15492_v16, %v7085_v13  ;;  %v6921_v1 = vpop.f32.mrf.mxu3  ;;  %v15494_v0 = vld [vmem:[#allocation53_spill] sm:$0xff] }
 0x451   : > { %15487 = vst [vmem:[#allocation64_spill] sm:$0xff] %v14307_v24  ;;  %v7249_v54 = vmul.f32 %v7221_v34, %v14273_v36  ;;  %v7596_v32 = vmul.f32 %v7568_v29, %v14273_v36  ;;  %v7453_v24 = vunpack.c.h.bf16 %v14118_v28  ;;  %v7338_v14 = vunpack.c.h.bf16 %v15494_v0  ;;  %v15495_v35 = vld [vmem:[#allocation29_spill] sm:$0xff] }
 0x452   : > { %15490 = vst [vmem:[#allocation31_spill] sm:$0xff] %v14311_v8  ;;  %v14327_v8 = vadd.f32 %v14132_v7, %v7934_v6  ;;  %v14337_v17 = vadd.f32 %v7400_v62, %v15495_v35  ;;  %v7157_v13 = vmax.f32 %v7129_v57, 0.0  ;;  %v6903_v7 = vadd.f32 %v6902_v12, %v14237_v33  ;;  %v15496_v29 = vld [vmem:[#allocation57_spill] sm:$0xff]  ;;  %v6888_v0 = vpop.f32.mrf.mxu1  ;;  %v14354_v35 = vld [vmem:[#allocation10 + $0x17c] sm:$0xff] }
 0x453   : > { %15491 = vst [vmem:[#allocation20_spill] sm:$0xff] %v14315_v15  ;;  %v14333_v15 = vadd.f32 %v7515_v45, %v14138_v18  ;;  %v7286_v6 = vsel %vm7280_vm6, %v7249_v54, 0.0  ;;  %v7632_v34 = vsel %vm7280_vm6, %v7596_v32, 0.0  ;;  %v14349_v18 = vmul.f32 %v7453_v24, %v14273_v36  ;;  %v15498_v24 = vld [vmem:[#allocation34_spill] sm:$0xff] }
 0x454   : > { %15493 = vst [vmem:[#allocation27_spill] sm:$0xff] %v14327_v8  ;;  %v14343_v8 = vadd.f32 %v7286_v6, %v15496_v29  ;;  %v14346_v28 = vadd.f32 %v7632_v34, %v14151_v21  ;;  %v14352_v45 = vmul.f32 %v7338_v14, %v14273_v36  ;;  %v6922_v62 = vadd.f32 %v6921_v1, %v6903_v7  ;;  %v6869_v57 = vpop.f32.mrf.mxu0  ;;  %v14358_v34 = vld [vmem:[#allocation10 + $0x25c] sm:$0xff] }
 0x455   : > { %v7691_v12 = vmul.f32 %v7663_v5, %v7157_v13  ;;  %v7346_v33 = vmul.f32 %v7318_v23, %v7157_v13  ;;  %v7229_v54 = vmul.f32 %v7201_v2, %v7157_v13  ;;  %v14356_v32 = vadd.f32 %v6888_v0, %v6869_v57  ;;  %v14370_v23 = vld [vmem:[#allocation10 + $0x9c] sm:$0xff]  ;;  %v14372_v2 = vld [vmem:[#allocation10 + $0x2cc] sm:$0xff] }
 0x456   : > { %15497 = vst [vmem:[#allocation56_spill] sm:$0xff] %v14346_v28  ;;  %v8151_v6 = vmul.f32 %v8123_v46, %v7157_v13  ;;  %v7461_v29 = vmul.f32 %v7433_v63, %v7157_v13  ;;  %v7576_v21 = vmul.f32 %v7548_v55, %v7157_v13  ;;  %v7092_v28 = vadd.f32 %v6922_v62, %v15498_v24  ;;  %v14374_v46 = vld [vmem:[#allocation10 + $0x1ec] sm:$0xff]  ;;  %v14388_v0 = vld [vmem:[#allocation10 + $0x33c] sm:$0xff] }
 0x457   : > { %v14362_v14 = vadd.f32 %v14161_v26, %v7691_v12  ;;  %v14365_v1 = vadd.f32 %v14164_v39, %v7346_v33  ;;  %v14368_v5 = vadd.f32 %v14167_v60, %v7229_v54  ;;  %15499 = vst [vmem:[#allocation65_spill] sm:$0xff] %v14370_v23  ;;  %v7555_v39 = vunpack.c.l.bf16 %v14354_v35  ;;  %v14390_v12 = vld [vmem:[#allocation10 + $0x3ac] sm:$0xff] }
 0x458   : > { %15500 = vst [vmem:[#allocation60_spill] sm:$0xff] %v14372_v2  ;;  %v14377_v63 = vadd.f32 %v14170_v37, %v8151_v6  ;;  %v14380_v55 = vadd.f32 %v14173_v41, %v7461_v29  ;;  %v14383_v26 = vadd.f32 %v14176_v3, %v7576_v21  ;;  %v7136_v60 = vadd.f32 %v15492_v16, %v7092_v28  ;;  %v6905_v37 = vpop.f32.mrf.mxu2  ;;  %v6924_v33 = vpop.f32.mrf.mxu3 }
 0x459   : > { %15501 = vst [vmem:[#allocation21_spill] sm:$0xff] %v14374_v46  ;;  %v8266_v7 = vmul.f32 %v8238_v19, %v7157_v13  ;;  %v7806_v62 = vmul.f32 %v7778_v51, %v7157_v13  ;;  %v7785_v57 = vunpack.c.l.bf16 %v14358_v34  ;;  %v7325_v41 = vunpack.c.l.bf16 %v14370_v23 }
 0x45a   : > { %v7921_v54 = vmul.f32 %v7893_v56, %v7157_v13  ;;  %v7900_v3 = vunpack.c.l.bf16 %v14372_v2  ;;  %v7670_v6 = vunpack.c.l.bf16 %v14374_v46  ;;  %v14395_v29 = vmax.f32 %v7136_v60, 0.0  ;;  %v6957_v60 = vpop.f32.mrf.mxu1 }
 0x45b   : > { %v6906_v19 = vadd.f32 %v6905_v37, %v14298_v4  ;;  %v14399_v51 = vadd.f32 %v14185_v11, %v8266_v7  ;;  %v14402_v28 = vadd.f32 %v14188_v53, %v7806_v62  ;;  %v8036_v24 = vmul.f32 %v8008_v44, %v7157_v13  ;;  %v14419_v13 = vld [vmem:[#allocation10 + $0x2c] sm:$0xff]  ;;  %v14423_v37 = vld [vmem:[#allocation10 + $0x198] sm:$0xff] }
 0x45c   : > { %v14405_v21 = vadd.f32 %v14191_v49, %v7921_v54  ;;  %v8015_v56 = vunpack.c.l.bf16 %v14388_v0  ;;  %v8130_v36 = vunpack.c.l.bf16 %v14390_v12  ;;  %v6938_v46 = vpop.f32.mrf.mxu0  ;;  %v7583_v23 = vmul.f32 %v7555_v39, %v14395_v29  ;;  %15502 = vst [vmem:[#allocation67_spill] sm:$0xff] %v14419_v13  ;;  %v14421_v62 = vld [vmem:[#allocation10 + $0x48] sm:$0xff] }
 0x45d   : > { %v6925_v2 = vadd.f32 %v6924_v33, %v6906_v19  ;;  %v7813_v4 = vmul.f32 %v7785_v57, %v14395_v29  ;;  %v7353_v11 = vmul.f32 %v7325_v41, %v14395_v29  ;;  %v14412_v7 = vadd.f32 %v6957_v60, %v6938_v46  ;;  %15503 = vst [vmem:[#allocation28_spill] sm:$0xff] %v14421_v62  ;;  %v15505_v39 = vld [vmem:[#allocation35_spill] sm:$0xff]  ;;  %v14435_v54 = vld [vmem:[#allocation10 + $0x10c] sm:$0xff]  ;;  %v14453_v60 = vld [vmem:[#allocation10 + $0x41c] sm:$0xff] }
 0x45e   : > { %v7928_v53 = vmul.f32 %v7900_v3, %v14395_v29  ;;  %v7698_v49 = vmul.f32 %v7670_v6, %v14395_v29  ;;  %v14417_v44 = vadd.f32 %v14196_v48, %v8036_v24  ;;  %15504 = vst [vmem:[#allocation66_spill] sm:$0xff] %v14423_v37  ;;  %v14427_v57 = vadd.f32 %v14200_v50, %v7583_v23  ;;  %v14437_v48 = vld [vmem:[#allocation10 + $0x128] sm:$0xff] }
 0x45f   : > { %v7099_v33 = vadd.f32 %v6925_v2, %v15505_v39  ;;  %v14430_v46 = vadd.f32 %v14203_v38, %v7813_v4  ;;  %v14433_v41 = vadd.f32 %v14206_v20, %v7353_v11  ;;  %15506 = vst [vmem:[#allocation68_spill] sm:$0xff] %v14435_v54  ;;  %v8043_v2 = vmul.f32 %v8015_v56, %v14395_v29  ;;  %v14447_v23 = vld [vmem:[#allocation10 + $0x208] sm:$0xff] }
 0x460   : > { %v14440_v3 = vadd.f32 %v14209_v10, %v7928_v53  ;;  %v14443_v6 = vadd.f32 %v14212_v58, %v7698_v49  ;;  %v8158_v50 = vmul.f32 %v8130_v36, %v14395_v29  ;;  %v7208_v20 = vunpack.c.l.bf16 %v14419_v13  ;;  %15507 = vst [vmem:[#allocation32_spill] sm:$0xff] %v14453_v60  ;;  %v14455_v10 = vld [vmem:[#allocation10 + $0x358] sm:$0xff]  ;;  %v6907_v4 = vpop.f32.mrf.mxu2  ;;  %v6926_v56 = vpop.f32.mrf.mxu3 }
 0x461   : > { %v7143_v38 = vadd.f32 %v15492_v16, %v7099_v33  ;;  %v7215_v19 = vunpack.c.l.bf16 %v14421_v62  ;;  %v7562_v24 = vunpack.c.l.bf16 %v14423_v37  ;;  %15508 = vst [vmem:[#allocation72_spill] sm:$0xff] %v14455_v10  ;;  %v14457_v58 = vld [vmem:[#allocation10 + $0x278] sm:$0xff]  ;;  %v14460_v36 = vadd.f32 %v14219_v31, %v8043_v2 }
 0x462   : > { %15509 = vst [vmem:[#allocation74_spill] sm:$0xff] %v14457_v58  ;;  %v14463_v11 = vadd.f32 %v14222_v42, %v8158_v50  ;;  %v7440_v53 = vunpack.c.l.bf16 %v14435_v54  ;;  %v7447_v49 = vunpack.c.l.bf16 %v14437_v48  ;;  %v6908_v33 = vadd.f32 %v6907_v4, %v14356_v32 }
 0x463   : > { %v14467_v39 = vmax.f32 %v7143_v38, 0.0  ;;  %v7236_v37 = vmul.f32 %v7208_v20, %v14395_v29  ;;  %v7677_v62 = vunpack.c.l.bf16 %v14447_v23  ;;  %v8245_v31 = vunpack.c.l.bf16 %v14453_v60 }
 0x464   : > { %15510 = vst [vmem:[#allocation23_spill] sm:$0xff] %v14463_v11  ;;  %v7468_v13 = vmul.f32 %v7440_v53, %v14395_v29  ;;  %v8022_v2 = vunpack.c.l.bf16 %v14455_v10  ;;  %v7792_v42 = vunpack.c.l.bf16 %v14457_v58  ;;  %v6927_v50 = vadd.f32 %v6926_v56, %v6908_v33  ;;  %v6940_v54 = vpop.f32.mrf.mxu0  ;;  %v6959_v11 = vpop.f32.mrf.mxu1  ;;  %v14488_v58 = vld [vmem:[#allocation10 + $0xb8] sm:$0xff]  ;;  %v14490_v56 = vld [vmem:[#allocation10 + $0x3c8] sm:$0xff] }
 0x465   : > { %15511 = vst [vmem:[#allocation47_spill] sm:$0xff] %v14467_v39  ;;  %v14477_v38 = vadd.f32 %v14233_v47, %v7236_v37  ;;  %v7243_v32 = vmul.f32 %v7215_v19, %v14467_v39  ;;  %v7590_v20 = vmul.f32 %v7562_v24, %v14467_v39  ;;  %v14481_v4 = vadd.f32 %v6959_v11, %v6940_v54  ;;  %v15514_v33 = vld [vmem:[#allocation36_spill] sm:$0xff] }
 0x466   : > { %v14484_v53 = vadd.f32 %v14240_v40, %v7468_v13  ;;  %v7475_v60 = vmul.f32 %v7447_v49, %v14467_v39  ;;  %v7705_v10 = vmul.f32 %v7677_v62, %v14467_v39  ;;  %15512 = vst [vmem:[#allocation48_spill] sm:$0xff] %v14488_v58  ;;  %v7106_v47 = vadd.f32 %v6927_v50, %v15514_v33  ;;  %v14500_v40 = vld [vmem:[#allocation10 + $0x2e8] sm:$0xff]  ;;  %v14518_v50 = vld [vmem:[#allocation10 + $0x1b4] sm:$0x11] }
 0x467   : > { %15513 = vst [vmem:[#allocation70_spill] sm:$0xff] %v14490_v56  ;;  %v14494_v37 = vadd.f32 %v14246_v61, %v7243_v32  ;;  %v14497_v19 = vadd.f32 %v14249_v22, %v7590_v20  ;;  %v8273_v54 = vmul.f32 %v8245_v31, %v14395_v29  ;;  %v14502_v13 = vld [vmem:[#allocation10 + $0x64] sm:$0x11]  ;;  %v8050_v11 = vmul.f32 %v8022_v2, %v14467_v39 }
 0x468   : > { %15517 = vst [vmem:[#allocation76_spill] sm:$0xff] %v14500_v40  ;;  %v14505_v62 = vadd.f32 %v14252_v59, %v7475_v60  ;;  %v14508_v24 = vadd.f32 %v14255_v43, %v7705_v10  ;;  %v7820_v61 = vmul.f32 %v7792_v42, %v14467_v39  ;;  %v7150_v49 = vadd.f32 %v15492_v16, %v7106_v47  ;;  %v6976_v59 = vpop.f32.mrf.mxu2  ;;  %v6995_v60 = vpop.f32.mrf.mxu3 }
 0x469   : > { %15515 = vst [vmem:[#allocation71_spill] sm:$0xff] %v14494_v37  ;;  %v14514_v22 = vadd.f32 %v14261_v52, %v8273_v54  ;;  %v7332_v29 = vunpack.c.l.bf16 %v14488_v58  ;;  %v8137_v31 = vunpack.c.l.bf16 %v14490_v56  ;;  %v14521_v43 = vadd.f32 %v14266_v9, %v8050_v11 }
 0x46a   : > { %15516 = vst [vmem:[#allocation75_spill] sm:$0xff] %v14497_v19  ;;  %v14524_v10 = vadd.f32 %v14269_v27, %v7820_v61  ;;  %v7907_v2 = vunpack.c.l.bf16 %v14500_v40  ;;  %v7222_v16 = vunpack.c.l.bf16 %v14502_v13  ;;  %v14528_v52 = vmax.f32 %v7150_v49, 0.0  ;;  %v15526_v49 = vld [vmem:[#allocation25_spill] sm:$0xff]  ;;  %v15531_v40 = vld [vmem:[#allocation52_spill] sm:$0xff] }
 0x46b   : > { %15518 = vst [vmem:[#allocation22_spill] sm:$0xff] %v14502_v13  ;;  %v6977_v42 = vadd.f32 %v6976_v59, %v14412_v7  ;;  %v7360_v32 = vmul.f32 %v7332_v29, %v14467_v39  ;;  %v8165_v20 = vmul.f32 %v8137_v31, %v14467_v39  ;;  %v7569_v9 = vunpack.c.l.bf16 %v14518_v50  ;;  %v15527_v7 = vld [vmem:[#allocation62_spill] sm:$0xff]  ;;  %v15528_v29 = vld [vmem:[#allocation63_spill] sm:$0xff]  ;;  %v15529_v13 = vld [vmem:[#allocation24_spill] sm:$0xff] }
 0x46c   : > { %15519 = vst [vmem:[#allocation45_spill] sm:$0xff] %v14505_v62  ;;  %v7935_v33 = vmul.f32 %v7907_v2, %v14467_v39  ;;  %v7517_v27 = vsel %vm7280_vm6, %v14349_v18, 0.0  ;;  %v7402_v47 = vsel %vm7280_vm6, %v14352_v45, 0.0  ;;  %v6943_v11 = vpop.f32.mrf.mxu0  ;;  %v6962_v61 = vpop.f32.mrf.mxu1  ;;  %v7319_v59 = vunpack.c.h.bf16 %v15527_v7  ;;  %v15530_v39 = vld [vmem:[#allocation55_spill] sm:$0xff]  ;;  %v15532_v18 = vld [vmem:[#allocation37_spill] sm:$0xff] }
 0x46d   : > { %15520 = vst [vmem:[#allocation26_spill] sm:$0xff] %v14508_v24  ;;  %v6996_v54 = vadd.f32 %v6995_v60, %v6977_v42  ;;  %v6963_v31 = vadd.f32 %v6962_v61, %v6943_v11  ;;  %v8124_v2 = vunpack.c.h.bf16 %v15529_v13  ;;  %v7549_v56 = vunpack.c.h.bf16 %v15531_v40  ;;  %v15535_v60 = vld [vmem:[#allocation19_spill] sm:$0xff]  ;;  %v15536_v24 = vld [vmem:[#allocation30_spill] sm:$0xff]  ;;  %v14553_v7 = vld [vmem:[#allocation10 + $0xd4] sm:$0x11] }
 0x46e   : > { %15521 = vst [vmem:[#allocation33_spill] sm:$0xff] %v14514_v22  ;;  %v15533_v22 = vld [vmem:[#allocation46_spill] sm:$0xff]  ;;  %v8239_v42 = vunpack.c.h.bf16 %v15535_v60  ;;  %v14551_v62 = vld [vmem:[#allocation10 + $0x144] sm:$0x11]  ;;  %v15537_v11 = vld [vmem:[#allocation64_spill] sm:$0xff]  ;;  %v14561_v40 = vadd.f32 %v14323_v30, %v8165_v20  ;;  %v14575_v30 = vadd.f32 %v7402_v47, %v14337_v17 }
 0x46f   : > { %15522 = vst [vmem:[#allocation49_spill] sm:$0xff] %v14518_v50  ;;  %v7434_v50 = vunpack.c.h.bf16 %v15530_v39  ;;  %v7086_v58 = vadd.f32 %v6996_v54, %v15532_v18  ;;  %v14547_v45 = vperm.slane %v15533_v22, 6  ;;  %v7894_v61 = vunpack.c.h.bf16 %v15537_v11  ;;  %v15538_v13 = vld [vmem:[#allocation20_spill] sm:$0xff]  ;;  %v15539_v22 = vld [vmem:[#allocation31_spill] sm:$0xff] }
 0x470   : > { %15523 = vst [vmem:[#allocation53_spill] sm:$0xff] %v14521_v43  ;;  %v7202_v43 = vunpack.c.h.bf16 %v15528_v29  ;;  %v8009_v29 = vunpack.c.h.bf16 %v15538_v13  ;;  %v14558_v39 = vadd.f32 %v14320_v25, %v7360_v32  ;;  %v15540_v18 = vld [vmem:[#allocation27_spill] sm:$0xff]  ;;  %v6978_v19 = vpop.f32.mrf.mxu2  ;;  %v6997_v37 = vpop.f32.mrf.mxu3  ;;  %v7454_v11 = vunpack.c.l.bf16 %v14551_v62 }
 0x471   : > { %15524 = vst [vmem:[#allocation29_spill] sm:$0xff] %v14524_v10  ;;  %v7664_v10 = vunpack.c.h.bf16 %v15526_v49  ;;  %v7779_v49 = vunpack.c.h.bf16 %v15536_v24  ;;  %v7130_v54 = vadd.f32 %v15539_v22, %v7086_v58  ;;  %v14565_v60 = vadd.f32 %v15540_v18, %v7935_v33 }
 0x472   : > { %15525 = vst [vmem:[#allocation57_spill] sm:$0xff] %v14528_v52  ;;  %v7250_v24 = vmul.f32 %v7222_v16, %v14528_v52  ;;  %v14571_v13 = vadd.f32 %v7517_v27, %v14333_v15  ;;  %v7339_v25 = vunpack.c.l.bf16 %v14553_v7  ;;  %v6979_v32 = vadd.f32 %v6978_v19, %v14481_v4 }
 0x473   : > { %15534 = vst [vmem:[#allocation34_spill] sm:$0xff] %v14547_v45  ;;  %v7597_v45 = vmul.f32 %v7569_v9, %v14528_v52  ;;  %v7158_v58 = vmax.f32 %v7130_v54, 0.0  ;;  %v15544_v9 = vld [vmem:[#allocation56_spill] sm:$0xff]  ;;  %v14587_v15 = vmul.f32 %v7454_v11, %v14528_v52 }
 0x474   : > { %15541 = vst [vmem:[#allocation35_spill] sm:$0xff] %v14571_v13  ;;  %v7288_v20 = vsel %vm7280_vm6, %v7250_v24, 0.0  ;;  %v14590_v27 = vmul.f32 %v7339_v25, %v14528_v52  ;;  %v6998_v17 = vadd.f32 %v6997_v37, %v6979_v32  ;;  %v6945_v47 = vpop.f32.mrf.mxu0  ;;  %v6964_v54 = vpop.f32.mrf.mxu1  ;;  %v15548_v32 = vld [vmem:[#allocation65_spill] sm:$0xff] }
 0x475   : > { %15542 = vst [vmem:[#allocation36_spill] sm:$0xff] %v14575_v30  ;;  %v7634_v16 = vsel %vm7280_vm6, %v7597_v45, 0.0  ;;  %v14581_v33 = vadd.f32 %v7288_v20, %v14343_v8  ;;  %v7692_v4 = vmul.f32 %v7664_v10, %v7158_v58  ;;  %v7347_v19 = vmul.f32 %v7319_v59, %v7158_v58  ;;  %v15547_v20 = vld [vmem:[#allocation38_spill] sm:$0xff]  ;;  %v14728_v52 = vld [vmem:[#allocation10 + $0x2b8] sm:$0xf] }
 0x476   : > { %v14584_v18 = vadd.f32 %v7634_v16, %v15544_v9  ;;  %15546 = vst [vmem:[#allocation63_spill] sm:$0xff] %v14590_v27  ;;  %v7230_v24 = vmul.f32 %v7202_v43, %v7158_v58  ;;  %v6965_v30 = vadd.f32 %v6964_v54, %v6945_v47  ;;  %v8152_v45 = vmul.f32 %v8124_v2, %v7158_v58 }
 0x477   : > { %15543 = vst [vmem:[#allocation25_spill] sm:$0xff] %v14581_v33  ;;  %v7462_v13 = vmul.f32 %v7434_v50, %v7158_v58  ;;  %v7577_v8 = vmul.f32 %v7549_v56, %v7158_v58  ;;  %v7093_v33 = vadd.f32 %v6998_v17, %v15547_v20  ;;  %v14594_v16 = vadd.f32 %v14362_v14, %v7692_v4  ;;  %v15549_v17 = vld [vmem:[#allocation60_spill] sm:$0xff] }
 0x478   : > { %15545 = vst [vmem:[#allocation62_spill] sm:$0xff] %v14584_v18  ;;  %v14597_v11 = vadd.f32 %v14365_v1, %v7347_v19  ;;  %v14600_v25 = vadd.f32 %v14368_v5, %v7230_v24  ;;  %v14603_v37 = vadd.f32 %v14377_v63, %v8152_v45  ;;  %v7556_v56 = vunpack.c.h.bf16 %v14354_v35  ;;  %v6981_v2 = vpop.f32.mrf.mxu2  ;;  %v7000_v5 = vpop.f32.mrf.mxu3 }
 0x479   : > { %v14606_v43 = vadd.f32 %v14380_v55, %v7462_v13  ;;  %v14609_v50 = vadd.f32 %v14383_v26, %v7577_v8  ;;  %v7137_v14 = vadd.f32 %v15539_v22, %v7093_v33  ;;  %v8267_v10 = vmul.f32 %v8239_v42, %v7158_v58  ;;  %v15550_v55 = vld [vmem:[#allocation21_spill] sm:$0xff] }
 0x47a   : > { %v7807_v59 = vmul.f32 %v7779_v49, %v7158_v58  ;;  %v7786_v1 = vunpack.c.h.bf16 %v14358_v34  ;;  %v7326_v9 = vunpack.c.h.bf16 %v15548_v32  ;;  %v7922_v63 = vmul.f32 %v7894_v61, %v7158_v58 }
 0x47b   : > { %v7901_v47 = vunpack.c.h.bf16 %v15549_v17  ;;  %v7671_v13 = vunpack.c.h.bf16 %v15550_v55  ;;  %v7165_v54 = vmax.f32 %v7137_v14, 0.0  ;;  %v6982_v26 = vadd.f32 %v6981_v2, %v6963_v31  ;;  %v15552_v2 = vld [vmem:[#allocation67_spill] sm:$0xff] }
 0x47c   : > { %v14618_v4 = vadd.f32 %v14399_v51, %v8267_v10  ;;  %v14621_v35 = vadd.f32 %v14402_v28, %v7807_v59  ;;  %v14624_v42 = vadd.f32 %v14405_v21, %v7922_v63  ;;  %v8037_v34 = vmul.f32 %v8009_v29, %v7158_v58  ;;  %v7014_v19 = vpop.f32.mrf.mxu0  ;;  %v7033_v24 = vpop.f32.mrf.mxu1  ;;  %v15551_v10 = vld [vmem:[#allocation39_spill] sm:$0xff] }
 0x47d   : > { %v8016_v49 = vunpack.c.h.bf16 %v14388_v0  ;;  %v8131_v61 = vunpack.c.h.bf16 %v14390_v12  ;;  %v7001_v33 = vadd.f32 %v7000_v5, %v6982_v26  ;;  %v7584_v45 = vmul.f32 %v7556_v56, %v7165_v54 }
 0x47e   : > { %v7814_v8 = vmul.f32 %v7786_v1, %v7165_v54  ;;  %v7354_v31 = vmul.f32 %v7326_v9, %v7165_v54  ;;  %v7034_v20 = vadd.f32 %v7033_v24, %v7014_v19  ;;  %v7929_v51 = vmul.f32 %v7901_v47, %v7165_v54  ;;  %v15554_v9 = vld [vmem:[#allocation66_spill] sm:$0xff] }
 0x47f   : > { %v7699_v14 = vmul.f32 %v7671_v13, %v7165_v54  ;;  %v14629_v28 = vadd.f32 %v14417_v44, %v8037_v34  ;;  %v7100_v21 = vadd.f32 %v7001_v33, %v15551_v10  ;;  %v14633_v29 = vadd.f32 %v14427_v57, %v7584_v45  ;;  %v15553_v57 = vld [vmem:[#allocation28_spill] sm:$0xff]  ;;  %v14668_v45 = vld [vmem:[#allocation10 + $0x18] sm:$0xf] }
 0x480   : > { %v14636_v0 = vadd.f32 %v14430_v46, %v7814_v8  ;;  %v14639_v12 = vadd.f32 %v14433_v41, %v7354_v31  ;;  %v14642_v58 = vadd.f32 %v14440_v3, %v7929_v51  ;;  %v8044_v59 = vmul.f32 %v8016_v49, %v7165_v54  ;;  %v6983_v63 = vpop.f32.mrf.mxu2  ;;  %v7002_v17 = vpop.f32.mrf.mxu3  ;;  %v15555_v3 = vld [vmem:[#allocation23_spill] sm:$0xff]  ;;  %v14661_v49 = vld [vmem:[#allocation10 + $0x1d8] sm:$0xf]  ;;  %v15558_v31 = vld [vmem:[#allocation32_spill] sm:$0xff] }
 0x481   : > { %v14645_v56 = vadd.f32 %v14443_v6, %v7699_v14  ;;  %v8159_v44 = vmul.f32 %v8131_v61, %v7165_v54  ;;  %v7144_v1 = vadd.f32 %v15539_v22, %v7100_v21  ;;  %v7209_v5 = vunpack.c.h.bf16 %v15552_v2  ;;  %v15556_v6 = vld [vmem:[#allocation68_spill] sm:$0xff]  ;;  %v14663_v61 = vld [vmem:[#allocation10 + $0x88] sm:$0xf] }
 0x482   : > { %v7216_v32 = vunpack.c.h.bf16 %v15553_v57  ;;  %v7563_v46 = vunpack.c.h.bf16 %v15554_v9  ;;  %v14652_v41 = vadd.f32 %v14460_v36, %v8044_v59  ;;  %v7441_v55 = vunpack.c.h.bf16 %v15556_v6  ;;  %v15560_v9 = vld [vmem:[#allocation71_spill] sm:$0xff] }
 0x483   : > { %v14655_v47 = vadd.f32 %v15555_v3, %v8159_v44  ;;  %v7448_v13 = vunpack.c.h.bf16 %v14437_v48  ;;  %v14659_v26 = vmax.f32 %v7144_v1, 0.0  ;;  %v6984_v34 = vadd.f32 %v6983_v63, %v6965_v30  ;;  %v15561_v3 = vld [vmem:[#allocation75_spill] sm:$0xff] }
 0x484   : > { %v7237_v33 = vmul.f32 %v7209_v5, %v7165_v54  ;;  %v7678_v19 = vunpack.c.h.bf16 %v14447_v23  ;;  %v7469_v8 = vmul.f32 %v7441_v55, %v7165_v54  ;;  %v8246_v51 = vunpack.c.h.bf16 %v15558_v31  ;;  %v7016_v14 = vpop.f32.mrf.mxu0  ;;  %v7035_v10 = vpop.f32.mrf.mxu1  ;;  %v15559_v5 = vld [vmem:[#allocation40_spill] sm:$0xff]  ;;  %v14712_v30 = vld [vmem:[#allocation10 + $0x184] sm:$0xf] }
 0x485   : > { %15557 = vst [vmem:[#allocation24_spill] sm:$0xff] %v14659_v26  ;;  %v7003_v48 = vadd.f32 %v7002_v17, %v6984_v34  ;;  %v7244_v59 = vmul.f32 %v7216_v32, %v14659_v26  ;;  %v14676_v23 = vadd.f32 %v7035_v10, %v7016_v14  ;;  %v7591_v44 = vmul.f32 %v7563_v46, %v14659_v26  ;;  %v15562_v32 = vld [vmem:[#allocation45_spill] sm:$0xff]  ;;  %v15563_v46 = vld [vmem:[#allocation72_spill] sm:$0xff] }
 0x486   : > { %v14673_v21 = vadd.f32 %v14477_v38, %v7237_v33  ;;  %v14680_v1 = vadd.f32 %v14484_v53, %v7469_v8  ;;  %v7476_v2 = vmul.f32 %v7448_v13, %v14659_v26  ;;  %v7706_v17 = vmul.f32 %v7678_v19, %v14659_v26  ;;  %v15564_v53 = vld [vmem:[#allocation74_spill] sm:$0xff]  ;;  %v15567_v19 = vld [vmem:[#allocation48_spill] sm:$0xff] }
 0x487   : > { %v7107_v57 = vadd.f32 %v7003_v48, %v15559_v5  ;;  %v14685_v63 = vadd.f32 %v15560_v9, %v7244_v59  ;;  %v8274_v38 = vmul.f32 %v8246_v51, %v7165_v54  ;;  %v14689_v6 = vadd.f32 %v15561_v3, %v7591_v44  ;;  %v15565_v8 = vld [vmem:[#allocation26_spill] sm:$0xff]  ;;  %v15566_v48 = vld [vmem:[#allocation33_spill] sm:$0xff]  ;;  %v15569_v9 = vld [vmem:[#allocation76_spill] sm:$0xff] }
 0x488   : > { %v14692_v55 = vadd.f32 %v15562_v32, %v7476_v2  ;;  %v8023_v34 = vunpack.c.h.bf16 %v15563_v46  ;;  %v7793_v33 = vunpack.c.h.bf16 %v15564_v53  ;;  %v14698_v31 = vadd.f32 %v15565_v8, %v7706_v17  ;;  %v7052_v51 = vpop.f32.mrf.mxu2  ;;  %v7071_v10 = vpop.f32.mrf.mxu3  ;;  %v15568_v2 = vld [vmem:[#allocation70_spill] sm:$0xff]  ;;  %v7416_v17 = vld [vmem:[#allocation10 + $0xf8] sm:$0xf] }
 0x489   : > { %v7151_v13 = vadd.f32 %v15539_v22, %v7107_v57  ;;  %v14701_v14 = vadd.f32 %v15566_v48, %v8274_v38  ;;  %v7333_v54 = vunpack.c.h.bf16 %v15567_v19  ;;  %v8138_v5 = vunpack.c.h.bf16 %v15568_v2  ;;  %v8106_v57 = vld [vmem:[#allocation10 + $0x398] sm:$0xf]  ;;  %v15571_v46 = vld [vmem:[#allocation22_spill] sm:$0xff]  ;;  %v7531_v19 = vld [vmem:[#allocation10 + $0x168] sm:$0xf] }
 0x48a   : > { %v8051_v59 = vmul.f32 %v8023_v34, %v14659_v26  ;;  %v7821_v44 = vmul.f32 %v7793_v33, %v14659_v26  ;;  %v7908_v3 = vunpack.c.h.bf16 %v15569_v9  ;;  %v7053_v22 = vadd.f32 %v7052_v51, %v7034_v20  ;;  %v14714_v34 = vld [vmem:[#allocation10 + $0x408] sm:$0xf]  ;;  %v15572_v33 = vld [vmem:[#allocation53_spill] sm:$0xff] }
 0x48b   : > { %v14708_v32 = vmax.f32 %v7151_v13, 0.0  ;;  %v7361_v38 = vmul.f32 %v7333_v54, %v14659_v26  ;;  %v7223_v53 = vunpack.c.h.bf16 %v15571_v46  ;;  %v8125_v8 = vunpack.c.l.bf16 %v8106_v57  ;;  %v15574_v9 = vld [vmem:[#allocation29_spill] sm:$0xff]  ;;  %v14726_v46 = vld [vmem:[#allocation10 + $0x264] sm:$0xf] }
 0x48c   : > { %v7435_v48 = vunpack.c.l.bf16 %v7416_v17  ;;  %v14717_v2 = vadd.f32 %v15572_v33, %v8051_v59  ;;  %v14720_v13 = vadd.f32 %v15574_v9, %v7821_v44  ;;  %v7072_v20 = vadd.f32 %v7071_v10, %v7053_v22  ;;  %v7019_v51 = vpop.f32.mrf.mxu0  ;;  %v7038_v24 = vpop.f32.mrf.mxu1  ;;  %v14724_v17 = vld [vmem:[#allocation10 + $0x248] sm:$0xf]  ;;  %v15577_v59 = vld [vmem:[#allocation49_spill] sm:$0xff]  ;;  %v15578_v10 = vld [vmem:[#allocation34_spill] sm:$0xff] }
 0x48d   : > { %15570 = vst [vmem:[#allocation55_spill] sm:$0xff] %v14708_v32  ;;  %v7550_v36 = vunpack.c.l.bf16 %v7531_v19  ;;  %v14730_v27 = vadd.f32 %v7038_v24, %v7019_v51  ;;  %v14735_v22 = vld [vmem:[#allocation10 + $0x328] sm:$0xf]  ;;  %v15576_v19 = vld [vmem:[#allocation41_spill] sm:$0xff]  ;;  %v14740_v54 = vadd.f32 %v14558_v39, %v7361_v38  ;;  %v8166_v57 = vmul.f32 %v8138_v5, %v14659_v26 }
 0x48e   : > { %15573 = vst [vmem:[#allocation52_spill] sm:$0xff] %v14717_v2  ;;  %v7087_v33 = vadd.f32 %v7072_v20, %v15576_v19  ;;  %v7936_v24 = vmul.f32 %v7908_v3, %v14659_v26  ;;  %v7251_v51 = vmul.f32 %v7223_v53, %v14708_v32  ;;  %v7570_v18 = vunpack.c.h.bf16 %v15577_v59  ;;  %v14754_v19 = vld [vmem:[#allocation10 + $0xa4] sm:$0xf]  ;;  %v7880_v59 = vld [vmem:[#allocation10 + $0x2d4] sm:$0xf] }
 0x48f   : > { %15575 = vst [vmem:[#allocation37_spill] sm:$0xff] %v14720_v13  ;;  %v7455_v44 = vunpack.c.h.bf16 %v14551_v62  ;;  %v14749_v2 = vadd.f32 %v14561_v40, %v8166_v57  ;;  %v7519_v20 = vsel %vm7280_vm6, %v14587_v15, 0.0  ;;  %v7340_v39 = vunpack.c.h.bf16 %v14553_v7 }
 0x490   : > { %v7131_v13 = vadd.f32 %v15578_v10, %v7087_v33  ;;  %v7054_v38 = vpop.f32.mrf.mxu2  ;;  %v7073_v5 = vpop.f32.mrf.mxu3  ;;  %v14757_v3 = vadd.f32 %v14565_v60, %v7936_v24  ;;  %v7290_v53 = vsel %vm7280_vm6, %v7251_v51, 0.0  ;;  %v14761_v62 = vmul.f32 %v7570_v18, %v14708_v32  ;;  %v15580_v33 = vld [vmem:[#allocation25_spill] sm:$0xff]  ;;  %v15582_v60 = vld [vmem:[#allocation35_spill] sm:$0xff] }
 0x491   : > { %v14764_v40 = vmul.f32 %v7455_v44, %v14708_v32  ;;  %v7055_v15 = vadd.f32 %v7054_v38, %v14676_v23  ;;  %v7327_v7 = vunpack.c.l.bf16 %v14754_v19  ;;  %v14769_v9 = vadd.f32 %v7290_v53, %v15580_v33  ;;  %v14777_v18 = vld [vmem:[#allocation10 + $0x284] sm:$0x11] }
 0x492   : > { %v7159_v57 = vmax.f32 %v7131_v13, 0.0  ;;  %v7902_v26 = vunpack.c.l.bf16 %v7880_v59  ;;  %v14772_v24 = vadd.f32 %v7519_v20, %v15582_v60  ;;  %v14775_v51 = vmul.f32 %v7340_v39, %v14708_v32 }
 0x493   : > { %15579 = vst [vmem:[#allocation46_spill] sm:$0xff] %v14764_v40  ;;  %v7796_v44 = vunpack.c.h.bf16 %v14777_v18  ;;  %v7074_v13 = vadd.f32 %v7073_v5, %v7055_v15  ;;  %v15585_v38 = vunpack.c.l.bf16 %v14661_v49  ;;  %v15586_v53 = vunpack.c.l.bf16 %v14663_v61 }
 0x494   : > { %15581 = vst [vmem:[#allocation19_spill] sm:$0xff] %v14769_v9  ;;  %v7021_v40 = vpop.f32.mrf.mxu0  ;;  %v7040_v23 = vpop.f32.mrf.mxu1  ;;  %v15587_v59 = vunpack.c.l.bf16 %v14668_v45  ;;  %v8153_v39 = vmul.f32 %v8125_v8, %v7159_v57  ;;  %v7463_v32 = vmul.f32 %v7435_v48, %v7159_v57  ;;  %v15588_v9 = vld [vmem:[#allocation42_spill] sm:$0xff] }
 0x495   : > { %15583 = vst [vmem:[#allocation30_spill] sm:$0xff] %v14772_v24  ;;  %v7693_v19 = vmul.f32 %v15585_v38, %v7159_v57  ;;  %v7348_v33 = vmul.f32 %v15586_v53, %v7159_v57  ;;  %v14786_v60 = vadd.f32 %v7040_v23, %v7021_v40  ;;  %v7094_v24 = vadd.f32 %v7074_v13, %v15588_v9  ;;  %v7650_v38 = vld [vmem:[#allocation10 + $0x1f4] sm:$0xf]  ;;  %v7995_v13 = vld [vmem:[#allocation10 + $0x344] sm:$0xf] }
 0x496   : > { %15584 = vst [vmem:[#allocation64_spill] sm:$0xff] %v14775_v51  ;;  %v7231_v20 = vmul.f32 %v15587_v59, %v7159_v57  ;;  %v7578_v51 = vmul.f32 %v7550_v36, %v7159_v57  ;;  %v8180_v40 = vsel %vm3203_vm5, %v8153_v39, 0.0  ;;  %v7490_v48 = vsel %vm3203_vm5, %v7463_v32, 0.0  ;;  %v8110_v23 = vld [vmem:[#allocation10 + $0x3b4] sm:$0xf] }
 0x497   : > { %v7720_v5 = vsel %vm3203_vm5, %v7693_v19, 0.0  ;;  %v7375_v15 = vsel %vm3203_vm5, %v7348_v33, 0.0  ;;  %v7138_v8 = vadd.f32 %v15578_v10, %v7094_v24  ;;  %v8181_v36 = vadd.f32 %v8180_v40, %v14603_v37 }
 0x498   : > { %v7258_v49 = vsel %vm3203_vm5, %v7231_v20, 0.0  ;;  %v7721_v61 = vadd.f32 %v7720_v5, %v14594_v16  ;;  %v7376_v53 = vadd.f32 %v7375_v15, %v14597_v11  ;;  %v7605_v9 = vsel %vm3203_vm5, %v7578_v51, 0.0  ;;  %v7057_v19 = vpop.f32.mrf.mxu2  ;;  %v7076_v33 = vpop.f32.mrf.mxu3 }
 0x499   : > { %v7259_v45 = vadd.f32 %v7258_v49, %v14600_v25  ;;  %v7491_v16 = vadd.f32 %v7490_v48, %v14606_v43  ;;  %v7606_v11 = vadd.f32 %v7605_v9, %v14609_v50  ;;  %v15589_v25 = vunpack.c.l.bf16 %v14714_v34 }
 0x49a   : > { %7722 = vadd.xlane.f32.xlu1 %v7721_v61  ;;  %7377 = vadd.xlane.f32.xlu2 %v7376_v53  ;;  %v7672_v24 = vunpack.c.l.bf16 %v7650_v38  ;;  %v14804_v20 = vmax.f32 %v7138_v8, 0.0  ;;  %v7058_v37 = vadd.f32 %v7057_v19, %v14730_v27  ;;  %v15590_v32 = vunpack.c.l.bf16 %v14724_v17  ;;  %v15595_v8 = vld [vmem:[#allocation43_spill] sm:$0xff] }
 0x49b   : > { %v8268_v59 = vmul.f32 %v15589_v25, %v7159_v57  ;;  %7260 = vadd.xlane.f32.xlu0 %v7259_v45  ;;  %v15591_v39 = vunpack.c.l.bf16 %v14728_v52  ;;  %v15592_v43 = vunpack.c.l.bf16 %v14735_v22  ;;  %v8017_v49 = vunpack.c.l.bf16 %v7995_v13  ;;  %v7188_v25 = vld [vmem:[#allocation10 + $0x34] sm:$0xf] }
 0x49c   : > { %v7808_v51 = vmul.f32 %v15590_v32, %v7159_v57  ;;  %v8132_v34 = vunpack.c.l.bf16 %v8110_v23  ;;  %v7077_v61 = vadd.f32 %v7076_v33, %v7058_v37  ;;  %v15593_v38 = vunpack.c.l.bf16 %v14712_v30  ;;  %v7539_v32 = vld [vmem:[#allocation10 + $0x1a0] sm:$0xf] }
 0x49d   : > { %v7923_v5 = vmul.f32 %v15591_v39, %v7159_v57  ;;  %v8295_v15 = vsel %vm3203_vm5, %v8268_v59, 0.0  ;;  %v8038_v50 = vmul.f32 %v15592_v43, %v7159_v57  ;;  %v15594_v45 = vunpack.c.l.bf16 %v14726_v46 }
 0x49e   : > { %v7585_v53 = vmul.f32 %v15593_v38, %v14804_v20  ;;  %v14818_v27 = vadd.f32 %v8295_v15, %v14618_v4  ;;  %v7835_v17 = vsel %vm3203_vm5, %v7808_v51, 0.0  ;;  %v7355_v57 = vmul.f32 %v7327_v7, %v14804_v20  ;;  %v7420_v51 = vld [vmem:[#allocation10 + $0x114] sm:$0xf] }
 0x49f   : > { %v14822_v52 = vadd.f32 %v7835_v17, %v14621_v35  ;;  %v7815_v22 = vmul.f32 %v15594_v45, %v14804_v20  ;;  %v7950_v40 = vsel %vm3203_vm5, %v7923_v5, 0.0  ;;  %v7101_v48 = vadd.f32 %v7077_v61, %v15595_v8 }
 0x4a0   : > { %v7614_v30 = vsel %vm3203_vm5, %v7585_v53, 0.0  ;;  %v14832_v4 = vadd.f32 %v7950_v40, %v14624_v42  ;;  %v7930_v9 = vmul.f32 %v7902_v26, %v14804_v20  ;;  %v7384_v46 = vsel %vm3203_vm5, %v7355_v57, 0.0  ;;  %v7192_v26 = vld [vmem:[#allocation10 + $0x50] sm:$0xf]  ;;  %v7059_v59 = vpop.f32.mrf.mxu2 }
 0x4a1   : > { %v7615_v35 = vadd.f32 %v7614_v30, %v14633_v29  ;;  %v7844_v13 = vsel %vm3203_vm5, %v7815_v22, 0.0  ;;  %v7700_v23 = vmul.f32 %v7672_v24, %v14804_v20  ;;  %v7145_v7 = vadd.f32 %v15578_v10, %v7101_v48  ;;  %v7654_v53 = vld [vmem:[#allocation10 + $0x210] sm:$0xf] }
 0x4a2   : > { %v14841_v19 = vadd.f32 %v7844_v13, %v14636_v0  ;;  %v14844_v33 = vadd.f32 %v7384_v46, %v14639_v12  ;;  %v7959_v42 = vsel %vm3203_vm5, %v7930_v9, 0.0  ;;  %8182 = vadd.xlane.f32.xlu1 %v8181_v36  ;;  %7492 = vadd.xlane.f32.xlu2 %v7491_v16  ;;  %v8065_v37 = vsel %vm3203_vm5, %v8038_v50, 0.0  ;;  %v7078_v16 = vpop.f32.mrf.mxu3  ;;  %v15596_v22 = vld [vmem:[#allocation44_spill] sm:$0xff]  ;;  %v8225_v13 = vld [vmem:[#allocation10 + $0x424] sm:$0xf] }
 0x4a3   : > { %v14848_v29 = vadd.f32 %v7959_v42, %v14642_v58  ;;  %v7729_v24 = vsel %vm3203_vm5, %v7700_v23, 0.0  ;;  %v8045_v0 = vmul.f32 %v8017_v49, %v14804_v20  ;;  %v14853_v12 = vmax.f32 %v7145_v7, 0.0  ;;  %7607 = vadd.xlane.f32.xlu0 %v7606_v11  ;;  %v7424_v58 = vld [vmem:[#allocation10 + $0x130] sm:$0xf]  ;;  %v7999_v46 = vld [vmem:[#allocation10 + $0x360] sm:$0xf] }
 0x4a4   : > { %v7060_v39 = vadd.f32 %v7059_v59, %v14786_v60  ;;  %v14857_v5 = vadd.f32 %v7729_v24, %v14645_v56  ;;  %v14860_v36 = vadd.f32 %v8065_v37, %v14629_v28  ;;  %v8160_v43 = vmul.f32 %v8132_v34, %v14804_v20  ;;  %v8114_v37 = vld [vmem:[#allocation10 + $0x3d0] sm:$0xf] }
 0x4a5   : > { %v8074_v15 = vsel %vm3203_vm5, %v8045_v0, 0.0  ;;  %v7210_v50 = vunpack.c.l.bf16 %v7188_v25  ;;  %v7217_v49 = vunpack.c.l.bf16 %v7192_v26  ;;  %v7564_v60 = vunpack.c.l.bf16 %v7539_v32  ;;  %v7769_v25 = vld [vmem:[#allocation10 + $0x280] sm:$0xf]  ;;  %v7884_v0 = vld [vmem:[#allocation10 + $0x2f0] sm:$0xf] }
 0x4a6   : > { %v7079_v61 = vadd.f32 %v7078_v16, %v7060_v39  ;;  %v14865_v38 = vadd.f32 %v8074_v15, %v14652_v41  ;;  %v7442_v11 = vunpack.c.l.bf16 %v7420_v51  ;;  %v8189_v56 = vsel %vm3203_vm5, %v8160_v43, 0.0  ;;  %v7309_v26 = vld [vmem:[#allocation10 + $0xc0] sm:$0xf] }
 0x4a7   : > { %v7238_v28 = vmul.f32 %v7210_v50, %v14804_v20  ;;  %v7245_v17 = vmul.f32 %v7217_v49, %v14853_v12  ;;  %v7449_v45 = vunpack.c.l.bf16 %v7424_v58  ;;  %v14872_v34 = vadd.f32 %v8189_v56, %v14655_v47 }
 0x4a8   : > { %v7108_v57 = vadd.f32 %v7079_v61, %v15596_v22  ;;  %v7592_v40 = vmul.f32 %v7564_v60, %v14853_v12  ;;  %v7470_v41 = vmul.f32 %v7442_v11, %v14804_v20  ;;  %v7679_v9 = vunpack.c.l.bf16 %v7654_v53  ;;  %v15597_v22 = vld [vmem:[#allocation52_spill] sm:$0xff] }
 0x4a9   : > { %v7267_v8 = vsel %vm3203_vm5, %v7238_v28, 0.0  ;;  %v7276_v48 = vsel %vm3203_vm5, %v7245_v17, 0.0  ;;  %v7477_v30 = vmul.f32 %v7449_v45, %v14853_v12  ;;  %v8024_v39 = vunpack.c.l.bf16 %v7999_v46  ;;  %v7428_v45 = vld [vmem:[#allocation10 + $0x14c] sm:$0x1] }
 0x4aa   : > { %v7152_v23 = vadd.f32 %v15578_v10, %v7108_v57  ;;  %v14881_v7 = vadd.f32 %v7267_v8, %v14673_v21  ;;  %v14884_v47 = vadd.f32 %v7276_v48, %v14685_v63  ;;  %v7623_v42 = vsel %vm3203_vm5, %v7592_v40, 0.0  ;;  %7616 = vadd.xlane.f32.xlu1 %v7615_v35  ;;  %8297 = vadd.xlane.f32.xlu2 %v14818_v27  ;;  %v7196_v35 = vld [vmem:[#allocation10 + $0x6c] sm:$0x1]  ;;  %v15598_v40 = vld [vmem:[#allocation37_spill] sm:$0xff] }
 0x4ab   : > { %v14889_v59 = vadd.f32 %v7623_v42, %v14689_v6  ;;  %v7499_v24 = vsel %vm3203_vm5, %v7470_v41, 0.0  ;;  %v7508_v10 = vsel %vm3203_vm5, %v7477_v30, 0.0  ;;  %v7707_v21 = vmul.f32 %v7679_v9, %v14853_v12  ;;  %7837 = vadd.xlane.f32.xlu0 %v14822_v52 }
 0x4ac   : > { %v14894_v63 = vmax.f32 %v7152_v23, 0.0  ;;  %v14898_v32 = vadd.f32 %v7499_v24, %v14680_v1  ;;  %v14901_v27 = vadd.f32 %v7508_v10, %v14692_v55  ;;  %v8247_v6 = vunpack.c.l.bf16 %v8225_v13  ;;  %v15601_v24 = vld [vmem:[#allocation30_spill] sm:$0xff] }
 0x4ad   : > { %v7738_v51 = vsel %vm3203_vm5, %v7707_v21, 0.0  ;;  %v7794_v58 = vunpack.c.l.bf16 %v7769_v25  ;;  %v7334_v16 = vunpack.c.l.bf16 %v7309_v26  ;;  %v8139_v50 = vunpack.c.l.bf16 %v8114_v37  ;;  %v15600_v25 = vld [vmem:[#allocation62_spill] sm:$0xff]  ;;  %v15602_v21 = vld [vmem:[#allocation19_spill] sm:$0xff] }
 0x4ae   : > { %v14905_v15 = vadd.f32 %v7738_v51, %v14698_v31  ;;  %v8275_v43 = vmul.f32 %v8247_v6, %v14804_v20  ;;  %v7909_v52 = vunpack.c.l.bf16 %v7884_v0  ;;  %v8052_v1 = vmul.f32 %v8024_v39, %v14853_v12  ;;  %v7543_v31 = vld [vmem:[#allocation10 + $0x1bc] sm:$0x1]  ;;  %v15603_v37 = vld [vmem:[#allocation63_spill] sm:$0xff]  ;;  %v15604_v6 = vld [vmem:[#allocation36_spill] sm:$0xff] }
 0x4af   : > { %v7822_v49 = vmul.f32 %v7794_v58, %v14853_v12  ;;  %v7362_v55 = vmul.f32 %v7334_v16, %v14853_v12  ;;  %v7224_v61 = vunpack.c.l.bf16 %v7196_v35  ;;  %v8167_v11 = vmul.f32 %v8139_v50, %v14853_v12  ;;  %v15605_v51 = vld [vmem:[#allocation64_spill] sm:$0xff]  ;;  %v7655_v58 = vld [vmem:[#allocation10 + $0x214] sm:$0x11] }
 0x4b0   : > { %v8304_v60 = vsel %vm3203_vm5, %v8275_v43, 0.0  ;;  %v7937_v53 = vmul.f32 %v7909_v52, %v14853_v12  ;;  %v8083_v20 = vsel %vm3203_vm5, %v8052_v1, 0.0  ;;  %v7571_v13 = vunpack.c.l.bf16 %v7543_v31  ;;  %v7885_v16 = vld [vmem:[#allocation10 + $0x2f4] sm:$0x11]  ;;  %v8000_v52 = vld [vmem:[#allocation10 + $0x364] sm:$0x11] }
 0x4b1   : > { %v14915_v56 = vadd.f32 %v8304_v60, %v14701_v14  ;;  %v7853_v28 = vsel %vm3203_vm5, %v7822_v49, 0.0  ;;  %v7393_v17 = vsel %vm3203_vm5, %v7362_v55, 0.0  ;;  %v14921_v57 = vadd.f32 %v8083_v20, %v15597_v22  ;;  %v15606_v55 = vld [vmem:[#allocation69_spill] sm:$0xff] }
 0x4b2   : > { %v14924_v41 = vadd.f32 %v7853_v28, %v15598_v40  ;;  %v14927_v8 = vadd.f32 %v7393_v17, %v14740_v54  ;;  %v8198_v48 = vsel %vm3203_vm5, %v8167_v11, 0.0  ;;  %7846 = vadd.xlane.f32.xlu1 %v14841_v19  ;;  %7386 = vadd.xlane.f32.xlu2 %v14844_v33  ;;  %v7968_v30 = vsel %vm3203_vm5, %v7937_v53, 0.0  ;;  %v15599_v19 = vld [vmem:[#allocation46_spill] sm:$0xff]  ;;  %v15609_v53 = vld [vmem:[#allocation51_spill] sm:$0xff]  ;;  %v8115_v22 = vld [vmem:[#allocation10 + $0x3d4] sm:$0x11] }
 0x4b3   : > { %v14933_v14 = vadd.f32 %v8198_v48, %v14749_v2  ;;  %v7252_v9 = vmul.f32 %v7224_v61, %v14894_v63  ;;  %7952 = vadd.xlane.f32.xlu0 %v14832_v4  ;;  %v14939_v46 = vadd.f32 %v7968_v30, %v14757_v3  ;;  %v7636_v54 = vsel %vm7280_vm6, %v14761_v62, 0.0  ;;  %v15607_v61 = vld [vmem:[#allocation54_spill] sm:$0xff] }
 0x4b4   : > { %v7456_v23 = vunpack.c.l.bf16 %v7428_v45  ;;  %v7521_v33 = vsel %vm7280_vm6, %v15599_v19, 0.0  ;;  %v7599_v42 = vmul.f32 %v7571_v13, %v14894_v63  ;;  %v7637_v26 = vadd.f32 %v7636_v54, %v15600_v25  ;;  %v8226_v25 = vld [vmem:[#allocation10 + $0x428] sm:$0xff] }
 0x4b5   : > { %v7293_v2 = vsel %vm7292_vm7, %v7252_v9, 0.0  ;;  %v7522_v10 = vadd.f32 %v7521_v33, %v15601_v24  ;;  %v7404_v62 = vsel %vm7280_vm6, %v15603_v37, 0.0  ;;  %v7406_v39 = vsel %vm7280_vm6, %v15605_v51, 0.0 }
 0x4b6   : > { %v14950_v4 = vadd.f32 %v7293_v2, %v15602_v21  ;;  %v7484_v3 = vmul.f32 %v7456_v23, %v14894_v63  ;;  %v7638_v0 = vsel %vm7292_vm7, %v7599_v42, 0.0  ;;  %v7405_v35 = vadd.f32 %v7404_v62, %v15604_v6  ;;  %v8230_v6 = vld [vmem:[#allocation10 + $0x444] sm:$0x11] }
 0x4b7   : > { %v14959_v43 = vadd.f32 %v7638_v0, %v7637_v26  ;;  %v15608_v60 = vunpack.c.l.bf16 %v15607_v61  ;;  %v7824_v31 = vmul.f32 %v7796_v44, %v15609_v53  ;;  %v7680_v20 = vunpack.c.l.bf16 %v7655_v58 }
 0x4b8   : > { %v7523_v50 = vsel %vm7292_vm7, %v7484_v3, 0.0  ;;  %v14964_v49 = vadd.f32 %v7406_v39, %v7405_v35  ;;  %v7681_v28 = vunpack.c.h.bf16 %v7655_v58  ;;  %v7910_v17 = vunpack.c.l.bf16 %v7885_v16  ;;  %v7313_v35 = vld [vmem:[#allocation10 + $0xdc] sm:$0x1] }
 0x4b9   : > { %v14962_v1 = vadd.f32 %v7523_v50, %v7522_v10  ;;  %v7823_v11 = vmul.f32 %v15608_v60, %v15606_v55  ;;  %v7911_v45 = vunpack.c.h.bf16 %v7885_v16  ;;  %v7858_v48 = vsel %vm7280_vm6, %v7824_v31, 0.0  ;;  %v15611_v60 = vld [vmem:[#allocation50_spill] sm:$0xff] }
 0x4ba   : > { %7961 = vadd.xlane.f32.xlu1 %v14848_v29  ;;  %7731 = vadd.xlane.f32.xlu2 %v14857_v5  ;;  %v8025_v30 = vunpack.c.l.bf16 %v8000_v52  ;;  %v8026_v9 = vunpack.c.h.bf16 %v8000_v52  ;;  %v7708_v18 = vmul.f32 %v7680_v20, %v15606_v55  ;;  %v7709_v44 = vmul.f32 %v7681_v28, %v15609_v53  ;;  %v15610_v52 = vld [vmem:[#allocation61_spill] sm:$0xff]  ;;  %v7771_v28 = vld [vmem:[#allocation10 + $0x28c] sm:$0x11] }
 0x4bb   : > { %v7857_v40 = vsel %vm7280_vm6, %v7823_v11, 0.0  ;;  %8067 = vadd.xlane.f32.xlu0 %v14860_v36  ;;  %v7938_v54 = vmul.f32 %v7910_v17, %v15606_v55  ;;  %v7939_v23 = vmul.f32 %v7911_v45, %v15609_v53  ;;  %v8140_v19 = vunpack.c.l.bf16 %v8115_v22 }
 0x4bc   : > { %v7859_v13 = vadd.f32 %v7858_v48, %v7857_v40  ;;  %v8053_v29 = vmul.f32 %v8025_v30, %v15606_v55  ;;  %v8054_v5 = vmul.f32 %v8026_v9, %v15609_v53  ;;  %v7742_v33 = vsel %vm7280_vm6, %v7708_v18, 0.0  ;;  %v7772_v40 = vld [vmem:[#allocation10 + $0x294] sm:$0x11]  ;;  %v7773_v18 = vld [vmem:[#allocation10 + $0x29c] sm:$0x1] }
 0x4bd   : > { %v7743_v2 = vsel %vm7280_vm6, %v7709_v44, 0.0  ;;  %v7972_v36 = vsel %vm7280_vm6, %v7938_v54, 0.0  ;;  %v8141_v42 = vunpack.c.h.bf16 %v8115_v22  ;;  %v7973_v24 = vsel %vm7280_vm6, %v7939_v23, 0.0  ;;  %v15612_v54 = vld [vmem:[#allocation77_spill] sm:$0xff] }
 0x4be   : > { %v14986_v26 = vadd.f32 %v7743_v2, %v7742_v33  ;;  %v8087_v10 = vsel %vm7280_vm6, %v8053_v29, 0.0  ;;  %v8088_v21 = vsel %vm7280_vm6, %v8054_v5, 0.0  ;;  %v14991_v3 = vadd.f32 %v7973_v24, %v7972_v36  ;;  %v15615_v2 = vld [vmem:[#allocation55_spill] sm:$0xff] }
 0x4bf   : > { %v14993_v37 = vadd.f32 %v8088_v21, %v8087_v10  ;;  %v8168_v62 = vmul.f32 %v8140_v19, %v15606_v55  ;;  %v8169_v0 = vmul.f32 %v8141_v42, %v15609_v53  ;;  %v8248_v51 = vunpack.c.l.bf16 %v8226_v25 }
 0x4c0   : > { %v8249_v39 = vunpack.c.h.bf16 %v8226_v25  ;;  %v8255_v31 = vunpack.c.l.bf16 %v8230_v6  ;;  %v7341_v20 = vunpack.c.l.bf16 %v7313_v35  ;;  %v8256_v48 = vunpack.c.h.bf16 %v8230_v6  ;;  %v7656_v35 = vld [vmem:[#allocation10 + $0x21c] sm:$0x11] }
 0x4c1   : > { %v8202_v58 = vsel %vm7280_vm6, %v8168_v62, 0.0  ;;  %v8203_v16 = vsel %vm7280_vm6, %v8169_v0, 0.0  ;;  %v8276_v61 = vmul.f32 %v8248_v51, %v15610_v52  ;;  %v7800_v44 = vunpack.c.h.bf16 %v7772_v40  ;;  %v7657_v51 = vld [vmem:[#allocation10 + $0x224] sm:$0x11] }
 0x4c2   : > { %8076 = vadd.xlane.f32.xlu1 %v14865_v38  ;;  %8191 = vadd.xlane.f32.xlu2 %v14872_v34  ;;  %v15001_v50 = vadd.f32 %v8203_v16, %v8202_v58  ;;  %v8277_v11 = vmul.f32 %v8249_v39, %v15611_v60  ;;  %v8283_v45 = vmul.f32 %v8255_v31, %v15606_v55  ;;  %v7797_v38 = vunpack.c.l.bf16 %v7771_v28  ;;  %v7658_v39 = vld [vmem:[#allocation10 + $0x22c] sm:$0x1]  ;;  %v7887_v60 = vld [vmem:[#allocation10 + $0x304] sm:$0x11] }
 0x4c3   : > { %7269 = vadd.xlane.f32.xlu0 %v14881_v7  ;;  %v7369_v22 = vmul.f32 %v7341_v20, %v14894_v63  ;;  %v7798_v34 = vunpack.c.h.bf16 %v7771_v28  ;;  %v8284_v30 = vmul.f32 %v8256_v48, %v15609_v53  ;;  %v7799_v55 = vunpack.c.l.bf16 %v7772_v40  ;;  %v15614_v53 = vld [vmem:[#allocation57_spill] sm:$0xff]  ;;  %v7888_v20 = vld [vmem:[#allocation10 + $0x30c] sm:$0x1] }
 0x4c4   : > { %v15006_v17 = vadd.f32 %v8277_v11, %v8276_v61  ;;  %v8317_v7 = vsel %vm7280_vm6, %v8283_v45, 0.0  ;;  %v7825_v23 = vmul.f32 %v7797_v38, %v15612_v54  ;;  %v7801_v5 = vunpack.c.l.bf16 %v7773_v18  ;;  %v7886_v61 = vld [vmem:[#allocation10 + $0x2fc] sm:$0x11] }
 0x4c5   : > { %v7408_v9 = vsel %vm7292_vm7, %v7369_v22, 0.0  ;;  %v7827_v33 = vmul.f32 %v7799_v55, %v15614_v53  ;;  %v7828_v36 = vmul.f32 %v7800_v44, %v15615_v2  ;;  %v7682_v58 = vunpack.c.l.bf16 %v7656_v35 }
 0x4c6   : > { %v15018_v29 = vadd.f32 %v7408_v9, %v14964_v49  ;;  %v7829_v25 = vmul.f32 %v7801_v5, %v14894_v63  ;;  %v7683_v16 = vunpack.c.h.bf16 %v7656_v35  ;;  %v7684_v52 = vunpack.c.l.bf16 %v7657_v51 }
 0x4c7   : > { %v7864_v49 = vsel %vm7280_vm6, %v7827_v33, 0.0  ;;  %v7866_v62 = vsel %vm7280_vm6, %v7828_v36, 0.0  ;;  %v7685_v11 = vunpack.c.h.bf16 %v7657_v51  ;;  %v7686_v31 = vunpack.c.l.bf16 %v7658_v39  ;;  %v8002_v36 = vld [vmem:[#allocation10 + $0x374] sm:$0x11] }
 0x4c8   : > { %v7868_v6 = vsel %vm7292_vm7, %v7829_v25, 0.0  ;;  %v7913_v28 = vunpack.c.h.bf16 %v7886_v61  ;;  %v7710_v45 = vmul.f32 %v7682_v58, %v15612_v54  ;;  %v7712_v22 = vmul.f32 %v7684_v52, %v15614_v53 }
 0x4c9   : > { %v7713_v38 = vmul.f32 %v7685_v11, %v15615_v2  ;;  %v7714_v40 = vmul.f32 %v7686_v31, %v14894_v63  ;;  %v7915_v48 = vunpack.c.h.bf16 %v7887_v60  ;;  %v7916_v18 = vunpack.c.l.bf16 %v7888_v20 }
 0x4ca   : > { %7278 = vadd.xlane.f32.xlu1 %v14884_v47  ;;  %7625 = vadd.xlane.f32.xlu2 %v14889_v59  ;;  %v15613_v47 = vld [vmem:[#allocation59_spill] sm:$0xff]  ;;  %v8318_v59 = vsel %vm7280_vm6, %v8284_v30, 0.0  ;;  %v8001_v30 = vld [vmem:[#allocation10 + $0x36c] sm:$0x11]  ;;  %v7749_v44 = vsel %vm7280_vm6, %v7712_v22, 0.0  ;;  %v8030_v51 = vunpack.c.h.bf16 %v8002_v36 }
 0x4cb   : > { %7501 = vadd.xlane.f32.xlu0 %v14898_v32  ;;  %v7826_v19 = vmul.f32 %v7798_v34, %v15613_v47  ;;  %v7860_v32 = vsel %vm7280_vm6, %v7825_v23, 0.0  ;;  %v15025_v42 = vadd.f32 %v8318_v59, %v8317_v7  ;;  %v7914_v34 = vunpack.c.l.bf16 %v7887_v60  ;;  %v8117_v60 = vld [vmem:[#allocation10 + $0x3e4] sm:$0x11] }
 0x4cc   : > { %v7861_v24 = vadd.f32 %v7860_v32, %v7859_v13  ;;  %v7745_v7 = vsel %vm7280_vm6, %v7710_v45, 0.0  ;;  %v7751_v23 = vsel %vm7280_vm6, %v7713_v38, 0.0  ;;  %v7943_v33 = vmul.f32 %v7915_v48, %v15615_v2  ;;  %v8118_v45 = vld [vmem:[#allocation10 + $0x3ec] sm:$0x1] }
 0x4cd   : > { %v7862_v10 = vsel %vm7280_vm6, %v7826_v19, 0.0  ;;  %v7746_v55 = vadd.f32 %v7745_v7, %v14986_v26  ;;  %v7941_v19 = vmul.f32 %v7913_v28, %v15613_v47  ;;  %v7942_v59 = vmul.f32 %v7914_v34, %v15614_v53  ;;  %v8227_v34 = vld [vmem:[#allocation10 + $0x430] sm:$0xff] }
 0x4ce   : > { %v7863_v21 = vadd.f32 %v7862_v10, %v7861_v24  ;;  %v8027_v32 = vunpack.c.l.bf16 %v8001_v30  ;;  %v7753_v25 = vsel %vm7292_vm7, %v7714_v40, 0.0  ;;  %v8003_v10 = vld [vmem:[#allocation10 + $0x37c] sm:$0x1]  ;;  %v7981_v35 = vsel %vm7280_vm6, %v7943_v33, 0.0 }
 0x4d0   : > { %v7865_v0 = vadd.f32 %v7864_v49, %v7863_v21  ;;  %v8028_v49 = vunpack.c.h.bf16 %v8001_v30  ;;  %v7977_v21 = vsel %vm7280_vm6, %v7941_v19, 0.0  ;;  %v8055_v58 = vmul.f32 %v8027_v32, %v15612_v54 }
 0x4d2   : > { %7510 = vadd.xlane.f32.xlu1 %v14901_v27  ;;  %7740 = vadd.xlane.f32.xlu2 %v14905_v15  ;;  %v7867_v13 = vadd.f32 %v7866_v62, %v7865_v0  ;;  %v7912_v27 = vunpack.c.l.bf16 %v7886_v61  ;;  %v7979_v62 = vsel %vm7280_vm6, %v7942_v59, 0.0  ;;  %v8116_v0 = vld [vmem:[#allocation10 + $0x3dc] sm:$0x11]  ;;  %v8250_v59 = vunpack.c.l.bf16 %v8227_v34 }
 0x4d3   : > { %8306 = vadd.xlane.f32.xlu0 %v14915_v56  ;;  %v7711_v56 = vmul.f32 %v7683_v16, %v15613_v47  ;;  %v8056_v16 = vmul.f32 %v8028_v49, %v15613_v47  ;;  %v8142_v11 = vunpack.c.l.bf16 %v8116_v0  ;;  %v8143_v7 = vunpack.c.h.bf16 %v8116_v0  ;;  %v8231_v49 = vld [vmem:[#allocation10 + $0x44c] sm:$0x11] }
 0x4d4   : > { %v15035_v15 = vadd.f32 %v7868_v6, %v7867_v13  ;;  %v7940_v5 = vmul.f32 %v7912_v27, %v15612_v54  ;;  %v8031_v13 = vunpack.c.l.bf16 %v8003_v10  ;;  %v8090_v27 = vsel %vm7280_vm6, %v8055_v58, 0.0  ;;  %v15617_v58 = vld [vmem:[#allocation58_spill] sm:$0xff] }
 0x4d5   : > { %v7747_v9 = vsel %vm7280_vm6, %v7711_v56, 0.0  ;;  %v8092_v28 = vsel %vm7280_vm6, %v8056_v16, 0.0  ;;  %v8091_v38 = vadd.f32 %v8090_v27, %v14993_v37  ;;  %v8251_v10 = vunpack.c.h.bf16 %v8227_v34 }
 0x4d6   : > { %v7748_v26 = vadd.f32 %v7747_v9, %v7746_v55  ;;  %v7975_v24 = vsel %vm7280_vm6, %v7940_v5, 0.0  ;;  %v8059_v22 = vmul.f32 %v8031_v13, %v14894_v63  ;;  %v8144_v9 = vunpack.c.l.bf16 %v8117_v60 }
 0x4d7   : > { %v8145_v55 = vunpack.c.h.bf16 %v8117_v60  ;;  %v8171_v5 = vmul.f32 %v8143_v7, %v15613_v47  ;;  %v8279_v16 = vmul.f32 %v8251_v10, %v15617_v58  ;;  %v15618_v60 = vld [vmem:[#allocation47_spill] sm:$0xff] }
 0x4d8   : > { %v7750_v6 = vadd.f32 %v7749_v44, %v7748_v26  ;;  %v8146_v44 = vunpack.c.l.bf16 %v8118_v45  ;;  %v8172_v19 = vmul.f32 %v8144_v9, %v15614_v53  ;;  %v8098_v33 = vsel %vm7292_vm7, %v8059_v22, 0.0 }
 0x4da   : > { %8085 = vadd.xlane.f32.xlu1 %v14921_v57  ;;  %7855 = vadd.xlane.f32.xlu2 %v14924_v41  ;;  %v7944_v57 = vmul.f32 %v7916_v18, %v14894_v63  ;;  %v7976_v41 = vadd.f32 %v7975_v24, %v14991_v3  ;;  %v7752_v52 = vadd.f32 %v7751_v23, %v7750_v6  ;;  %v8207_v24 = vsel %vm7280_vm6, %v8171_v5, 0.0 }
 0x4db   : > { %7395 = vadd.xlane.f32.xlu0 %v14927_v8  ;;  %v8029_v8 = vunpack.c.l.bf16 %v8002_v36  ;;  %v8058_v3 = vmul.f32 %v8030_v51, %v15615_v2  ;;  %v8093_v18 = vadd.f32 %v8092_v28, %v8091_v38  ;;  %v8170_v23 = vmul.f32 %v8142_v11, %v15612_v54  ;;  %v8232_v51 = vld [vmem:[#allocation10 + $0x454] sm:$0x11] }
 0x4dc   : > { %v7978_v39 = vadd.f32 %v7977_v21, %v7976_v41  ;;  %v7983_v20 = vsel %vm7292_vm7, %v7944_v57, 0.0  ;;  %v15068_v56 = vadd.f32 %v7753_v25, %v7752_v52  ;;  %v8173_v36 = vmul.f32 %v8145_v55, %v15615_v2 }
 0x4dd   : > { %v8057_v61 = vmul.f32 %v8029_v8, %v15614_v53  ;;  %v8096_v30 = vsel %vm7280_vm6, %v8058_v3, 0.0  ;;  %v8205_v32 = vsel %vm7280_vm6, %v8170_v23, 0.0  ;;  %v8174_v26 = vmul.f32 %v8146_v44, %v14894_v63 }
 0x4de   : > { %v7980_v31 = vadd.f32 %v7979_v62, %v7978_v39  ;;  %v8206_v25 = vadd.f32 %v8205_v32, %v15001_v50  ;;  %v8209_v41 = vsel %vm7280_vm6, %v8172_v19, 0.0  ;;  %v8211_v0 = vsel %vm7280_vm6, %v8173_v36, 0.0  ;;  %v8233_v50 = vld [vmem:[#allocation10 + $0x45c] sm:$0x1] }
 0x4df   : > { %v8094_v40 = vsel %vm7280_vm6, %v8057_v61, 0.0  ;;  %v8257_v52 = vunpack.c.l.bf16 %v8231_v49  ;;  %v8213_v3 = vsel %vm7292_vm7, %v8174_v26, 0.0  ;;  %v8259_v28 = vunpack.c.l.bf16 %v8232_v51 }
 0x4e0   : > { %v7982_v48 = vadd.f32 %v7981_v35, %v7980_v31  ;;  %v8208_v62 = vadd.f32 %v8207_v24, %v8206_v25  ;;  %v15616_v35 = vld [vmem:[#allocation73_spill] sm:$0xff]  ;;  %v8258_v31 = vunpack.c.h.bf16 %v8231_v49  ;;  %v8260_v45 = vunpack.c.h.bf16 %v8232_v51 }
 0x4e1   : > { %v8278_v8 = vmul.f32 %v8250_v59, %v15616_v35  ;;  %v8261_v38 = vunpack.c.l.bf16 %v8233_v50 }
 0x4e2   : > { %8200 = vadd.xlane.f32.xlu2 %v14933_v14  ;;  %7295 = vadd.xlane.f32.xlu1 %v14950_v4  ;;  %v7984_v37 = vadd.f32 %v7983_v20, %v7982_v48  ;;  %v8228_v14 = vld [vmem:[#allocation10 + $0x438] sm:$0xff]  ;;  %v8095_v4 = vadd.f32 %v8094_v40, %v8093_v18  ;;  %v8210_v61 = vadd.f32 %v8209_v41, %v8208_v62  ;;  %v15619_v40 = vld [vmem:[#allocation24_spill] sm:$0xff] }
 0x4e3   : > { %7970 = vadd.xlane.f32.xlu0 %v14939_v46  ;;  %v8229_v46 = vld [vmem:[#allocation10 + $0x440] sm:$0xf]  ;;  %v8252_v21 = vunpack.c.l.bf16 %v8228_v14  ;;  %v8253_v13 = vunpack.c.h.bf16 %v8228_v14  ;;  %v8309_v27 = vadd.f32 %v15006_v17, %v8278_v8 }
 0x4e4   : > { %v8097_v57 = vadd.f32 %v8096_v30, %v8095_v4  ;;  %v8254_v6 = vunpack.c.l.bf16 %v8229_v46  ;;  %v8212_v22 = vadd.f32 %v8211_v0, %v8210_v61  ;;  %v8287_v30 = vmul.f32 %v8259_v28, %v15614_v53 }
 0x4e5   : > { %v8280_v11 = vmul.f32 %v8252_v21, %v15618_v60  ;;  %v8281_v34 = vmul.f32 %v8253_v13, %v15619_v40  ;;  %v8310_v48 = vadd.f32 %v8309_v27, %v8279_v16 }
 0x4e6   : > { %v8099_v39 = vadd.f32 %v8098_v33, %v8097_v57  ;;  %v8282_v20 = vmul.f32 %v8254_v6, %v14853_v12  ;;  %v8214_v7 = vadd.f32 %v8213_v3, %v8212_v22 }
 0x4e7   : > { %v8311_v9 = vadd.f32 %v8310_v48, %v8280_v11 }
 0x4e8   : > { %v8313_v55 = vsel %vm3203_vm5, %v8282_v20, 0.0 }
 0x4e9   : > { %v8312_v44 = vadd.f32 %v8311_v9, %v8281_v34 }
 0x4ea   : > { %7525 = vadd.xlane.f32.xlu2 %v14962_v1  ;;  %7410 = vadd.xlane.f32.xlu1 %v15018_v29  ;;  %v8285_v1 = vmul.f32 %v8257_v52, %v15612_v54  ;;  %v8286_v29 = vmul.f32 %v8258_v31, %v15613_v47  ;;  %v8289_v54 = vmul.f32 %v8261_v38, %v14894_v63  ;;  %v8324_v47 = vsel %vm7280_vm6, %v8287_v30, 0.0 }
 0x4eb   : > { %7640 = vadd.xlane.f32.xlu0 %v14959_v43  ;;  %v8288_v43 = vmul.f32 %v8260_v45, %v15615_v2  ;;  %v8314_v2 = vadd.f32 %v8313_v55, %v8312_v44 }
 0x4ec   : > { %v8320_v12 = vsel %vm7280_vm6, %v8285_v1, 0.0  ;;  %v8322_v17 = vsel %vm7280_vm6, %v8286_v29, 0.0  ;;  %v8328_v19 = vsel %vm7292_vm7, %v8289_v54, 0.0 }
 0x4ed   : > { %v8321_v18 = vadd.f32 %v8320_v12, %v15025_v42  ;;  %v8326_v53 = vsel %vm7280_vm6, %v8288_v43, 0.0 }
 0x4ef   : > { %v8323_v23 = vadd.f32 %v8322_v17, %v8321_v18 }
 0x4f1   : > { %v8325_v5 = vadd.f32 %v8324_v47, %v8323_v23 }
 0x4f2   : > { %7755 = vadd.xlane.f32.xlu2 %v15068_v56  ;;  %7985 = vadd.xlane.f32.xlu1 %v7984_v37 }
 0x4f3   : > { %7870 = vadd.xlane.f32.xlu0 %v15035_v15  ;;  %v8327_v42 = vadd.f32 %v8326_v53, %v8325_v5 }
 0x4f5   : > { %v8329_v14 = vadd.f32 %v8328_v19, %v8327_v42 }
 0x4fa   : > { %8215 = vadd.xlane.f32.xlu2 %v8214_v7  ;;  %8315 = vadd.xlane.f32.xlu1 %v8314_v2 }
 0x4fb   : > { %8100 = vadd.xlane.f32.xlu0 %v8099_v39 }
 0x503   : > { %8330 = vadd.xlane.f32.xlu0 %v8329_v14 }
 0x50d   : > { %v7723_v63 = vpop.xlane.xlu1 %7722  ;;  %v7378_v59 = vpop.xlane.xlu2 %7377 }
 0x50e   : > { %v7261_v4 = vpop.xlane.xlu0 %7260 }
 0x50f   : > { %v8333_v56 = vsel %vm8332_vm8, %v7261_v4, %v7378_v59 }
 0x515   : > { %v8183_v37 = vpop.xlane.xlu1 %8182  ;;  %v7493_v15 = vpop.xlane.xlu2 %7492 }
 0x516   : > { %v8338_v33 = vsel %vm8337_vm9, %v8333_v56, %v7493_v15  ;;  %v7608_v36 = vpop.xlane.xlu0 %7607 }
 0x517   : > { %v8343_v32 = vsel %vm8342_vm10, %v8338_v33, %v7608_v36 }
 0x518   : > { %v8348_v46 = vsel %vm8347_vm11, %v8343_v32, %v7723_v63 }
 0x51d   : > { %v7617_v26 = vpop.xlane.xlu1 %7616  ;;  %v8298_v25 = vpop.xlane.xlu2 %8297 }
 0x51e   : > { %v7838_v24 = vpop.xlane.xlu0 %7837 }
 0x51f   : > { %v8353_v10 = vsel %vm8352_vm12, %v8348_v46, %v7838_v24 }
 0x525   : > { %v7847_v49 = vpop.xlane.xlu1 %7846  ;;  %v7387_v57 = vpop.xlane.xlu2 %7386 }
 0x526   : > { %v7953_v41 = vpop.xlane.xlu0 %7952 }
 0x527   : > { %v8358_v21 = vsel %vm8357_vm13, %v8353_v10, %v7953_v41 }
 0x52d   : > { %v7962_v62 = vpop.xlane.xlu1 %7961  ;;  %v7732_v0 = vpop.xlane.xlu2 %7731 }
 0x52e   : > { %v8068_v6 = vpop.xlane.xlu0 %8067 }
 0x52f   : > { %v8363_v35 = vsel %vm8362_vm14, %v8358_v21, %v8068_v6 }
 0x530   : > { %v8368_v8 = vsel %vm8367_vm15, %v8363_v35, %v8183_v37 }
 0x531   : > { %v8373_v51 = vsel %vm8372_vm0, %v8368_v8, %v8298_v25 }
 0x532   : > { %v8378_v29 = vsel %vm8377_vm1, %v8373_v51, 0.0 }
 0x535   : > { %v8077_v39 = vpop.xlane.xlu1 %8076  ;;  %v8192_v13 = vpop.xlane.xlu2 %8191 }
 0x536   : > { %v7270_v58 = vpop.xlane.xlu0 %7269 }
 0x537   : > { %v8334_v52 = vsel %vm8332_vm8, %v7270_v58, %v7387_v57 }
 0x53d   : > { %v7279_v16 = vpop.xlane.xlu1 %7278  ;;  %v7626_v50 = vpop.xlane.xlu2 %7625 }
 0x53e   : > { %v7502_v61 = vpop.xlane.xlu0 %7501 }
 0x53f   : > { %v8339_v3 = vsel %vm8337_vm9, %v8334_v52, %v7502_v61 }
 0x540   : > { %v8344_v60 = vsel %vm8342_vm10, %v8339_v3, %v7617_v26 }
 0x541   : > { %v8349_v11 = vsel %vm8347_vm11, %v8344_v60, %v7732_v0 }
 0x542   : > { %v8354_v31 = vsel %vm8352_vm12, %v8349_v11, %v7847_v49 }
 0x543   : > { %v8359_v20 = vsel %vm8357_vm13, %v8354_v31, %v7962_v62 }
 0x544   : > { %v8364_v27 = vsel %vm8362_vm14, %v8359_v20, %v8077_v39  ;;  %v8392_v39 = vld [vmem:[#allocation11] sm:$0x1] }
 0x545   : > { %v7511_v28 = vpop.xlane.xlu1 %7510  ;;  %v7741_v45 = vpop.xlane.xlu2 %7740  ;;  %v8369_v22 = vsel %vm8367_vm15, %v8364_v27, %v8192_v13 }
 0x546   : > { %v8307_v38 = vpop.xlane.xlu0 %8306 }
 0x547   : > { %v8374_v1 = vsel %vm8372_vm0, %v8369_v22, %v8307_v38 }
 0x548   : > { %v8379_v40 = vsel %vm8377_vm1, %v8374_v1, 0.0 }
 0x549   : > { %v8380_v34 = vadd.f32 %v8379_v40, %v8378_v29 }
 0x54d   : > { %v8086_v48 = vpop.xlane.xlu1 %8085  ;;  %v7856_v30 = vpop.xlane.xlu2 %7855 }
 0x54e   : > { %v7396_v7 = vpop.xlane.xlu0 %7395 }
 0x54f   : > { %v8335_v9 = vsel %vm8332_vm8, %v7279_v16, %v7396_v7 }
 0x550   : > { %v8340_v47 = vsel %vm8337_vm9, %v8335_v9, %v7511_v28 }
 0x551   : > { %v8345_v44 = vsel %vm8342_vm10, %v8340_v47, %v7626_v50 }
 0x552   : > { %v8350_v2 = vsel %vm8347_vm11, %v8345_v44, %v7741_v45 }
 0x553   : > { %v8355_v42 = vsel %vm8352_vm12, %v8350_v2, %v7856_v30 }
 0x555   : > { %v8201_v43 = vpop.xlane.xlu2 %8200  ;;  %v7296_v12 = vpop.xlane.xlu1 %7295 }
 0x556   : > { %v7971_v17 = vpop.xlane.xlu0 %7970 }
 0x557   : > { %v8360_v63 = vsel %vm8357_vm13, %v8355_v42, %v7971_v17 }
 0x558   : > { %v8365_v56 = vsel %vm8362_vm14, %v8360_v63, %v8086_v48 }
 0x559   : > { %v8370_v36 = vsel %vm8367_vm15, %v8365_v56, %v8201_v43 }
 0x55d   : > { %v7411_v18 = vpop.xlane.xlu1 %7410  ;;  %v7526_v54 = vpop.xlane.xlu2 %7525 }
 0x55e   : > { %v7641_v55 = vpop.xlane.xlu0 %7640  ;;  %v8336_v23 = vsel %vm8332_vm8, %v7296_v12, %v7411_v18 }
 0x55f   : > { %v8341_v19 = vsel %vm8337_vm9, %v8336_v23, %v7526_v54 }
 0x560   : > { %v8346_v59 = vsel %vm8342_vm10, %v8341_v19, %v7641_v55 }
 0x565   : > { %v7986_v53 = vpop.xlane.xlu1 %7985  ;;  %v7756_v14 = vpop.xlane.xlu2 %7755 }
 0x566   : > { %v7871_v5 = vpop.xlane.xlu0 %7870  ;;  %v8351_v4 = vsel %vm8347_vm11, %v8346_v59, %v7756_v14 }
 0x567   : > { %v8356_v33 = vsel %vm8352_vm12, %v8351_v4, %v7871_v5 }
 0x568   : > { %v8361_v46 = vsel %vm8357_vm13, %v8356_v33, %v7986_v53 }
 0x56d   : > { %v8316_v15 = vpop.xlane.xlu1 %8315  ;;  %v8216_v25 = vpop.xlane.xlu2 %8215 }
 0x56e   : > { %v8101_v37 = vpop.xlane.xlu0 %8100  ;;  %v8375_v32 = vsel %vm8372_vm0, %v8370_v36, %v8316_v15 }
 0x56f   : > { %v8366_v26 = vsel %vm8362_vm14, %v8361_v46, %v8101_v37  ;;  %v8381_v24 = vsel %vm8377_vm1, %v8375_v32, 0.0 }
 0x570   : > { %v8371_v10 = vsel %vm8367_vm15, %v8366_v26, %v8216_v25  ;;  %v8382_v57 = vadd.f32 %v8381_v24, %v8380_v34 }
 0x576   : > { %v8331_v49 = vpop.xlane.xlu0 %8330 }
 0x577   : > { %v8376_v41 = vsel %vm8372_vm0, %v8371_v10, %v8331_v49 }
 0x578   : > { %v8384_v21 = vsel %vm8383_vm2, %v8376_v41, 0.0 }
 0x579   : > { %v8385_v62 = vadd.f32 %v8384_v21, %v8382_v57 }
 0x57b   : > { %v8386_v0 = vrot.slane %v8385_v62, 4 }
 0x57d   : > { %v8387_v6 = vadd.f32 %v8386_v0, %v8385_v62 }
 0x57f   : > { %v8388_v35 = vrot.slane %v8387_v6, 2 }
 0x581   : > { %v8389_v8 = vadd.f32 %v8388_v35, %v8387_v6 }
 0x583   : > { %v8390_v51 = vrot.slane %v8389_v8, 1 }
 0x585   : > { %v8391_v13 = vadd.f32 %v8390_v51, %v8389_v8 }
 0x587   : > { %v8393_v58 = vadd.f32 %v8392_v39, %v8391_v13 }
 0x589   : > { %8395 = vst.msk [vmem:[%s364_s9] sm:$0x1] %vm8394_vm3, %v8393_v58 }
 0x58a   : > { %12490 = shalt.err (!%p12487_p8)
}
 0x58b   : > { %12201 = dma.vmem_to_hbm [thread:$0]  (%p12631_p5), %s8408_s21, 16, %s8410_s14, %s8397_s15  }
 0x58c PF: > { %p12238_p9 = scmp.ge.s32.totalorder %s12541_s27, 2  ;;  %s8421_s2 = sand.u32 1, %s12529_s24  }
 0x58d   : > { %s8422_s3 = scalar_lea.sflag [#allocation4], %s8421_s2 }
 0x58e   : > { %p12223_p10 = pnand %p12238_p9, %p12635_p6 }
 0x590   : > { %p12224_p11 = pneg %p12223_p10 }
 0x592   : > { %12524 = dma.done.wait (%p12224_p11), %s8422_s3, 16  }
 0x593   : > { %12526 = vsyncadd (%p12224_p11), %s8422_s3, 4294967280  ;;  %p21_p12 = scmp.ge.s32.totalorder %s12618_s30, 4   ;;  %s15620_s24 = smov %s12533_s25 }
 0x594   : > { %s15621_s25 = smov %s12537_s26  ;;  %s15622_s26 = smov %s12629_s10 }
 0x595   : > { %s15623_s27 = smov %s12618_s30  ;;  %23 = sbr.rel (!%p21_p12) target bundleno = 12 (0xc), region = 123 }
 0x59a   :  { %8427 = vsyncpa [#allocation3], 1 }
 0x59b   :  { %8429 = vsyncpa [#allocation3 + $0x1], 1 }
 0x59c   :  { %8430 = vsyncpa [#allocation6], 1 }
 0x59d   :  { %8431 = vsyncpa [#allocation9], 1 }
 0x59e   :  { %8432 = vsyncpa [#allocation12], 1 }
 0x59f   :  { %8433 = vsyncpa [#allocation4], 1 }
 0x5a0   :  { %8435 = vsyncpa [#allocation4 + $0x1], 1 }

</bundles_post_ra>
